<compile_context>
chip_gen: v5e
topology: v5e:2x2
jax: 0.10.0
libtpu: 0.0.40
codegen_flags: <defaults>
</compile_context>

<pallas_src>
import functools

import jax
import jax.numpy as jnp
from jax import lax
from jax.experimental import pallas as pl
from jax.experimental.pallas import tpu as pltpu


# ------------------------------ Pallas kernel -------------------------------

def _orb_kernel(x_ref, w1_ref, w2_ref, wca1_ref, wca2_ref, wt_ref, o_ref, pbuf,
                *, num_cab, H, W, lpad, mm_dtype):
    """Fused ORB forward for one image.

    x_ref:    (1, C, HW)               input feature map (lane-dense, HW last)
    w1_ref:   (num_cab, C, 9*C)        CAB conv1 weights (mm_dtype)
    w2_ref:   (num_cab, C, 9*C)        CAB conv2 weights (mm_dtype)
    wca1_ref: (num_cab, Cr_pad, C)     CA 1x1 reduce weights (f32, zero-padded)
    wca2_ref: (num_cab, C, Cr_pad)     CA 1x1 expand weights (f32, zero-padded)
    wt_ref:   (C, 9*C)                 tail conv weights (mm_dtype)
    o_ref:    (1, C, HW)               output
    pbuf:     (C, lpad + HW + lpad)    VMEM scratch, lane-padded conv input
    """
    C = x_ref.shape[1]
    HW = H * W
    f32 = jnp.float32
    rpad = pbuf.shape[1] - lpad - HW

    # Zero the lane halos of the padded scratch.  Together with the flat
    # (row-major) shift trick below this gives SAME zero padding along H.
    pbuf[:, pl.ds(0, lpad)] = jnp.zeros((C, lpad), mm_dtype)
    pbuf[:, pl.ds(lpad + HW, rpad)] = jnp.zeros((C, rpad), mm_dtype)

    # Column-validity masks for the horizontal (dw = +-1) taps (W boundary).
    col = lax.broadcasted_iota(jnp.int32, (1, HW), 1) % W
    mask_l = jnp.where(col >= 1, 1.0, 0.0).astype(mm_dtype)       # dw = -1
    mask_r = jnp.where(col <= W - 2, 1.0, 0.0).astype(mm_dtype)   # dw = +1
    col_masks = {-1: mask_l, 0: None, 1: mask_r}

    def conv3x3(inp, w_mat):
        """inp: (C, HW) f32 value; w_mat: (C, 9*C) mm_dtype -> (C, HW) f32."""
        # Aligned store of the conv input into the padded scratch.
        pbuf[:, pl.ds(lpad, HW)] = inp.astype(mm_dtype)
        taps = []
        for kh in range(3):                       # taps generated in-kernel
            for kw in range(3):
                off = (kh - 1) * W + (kw - 1)     # flat row-major shift
                t = pbuf[:, pl.ds(lpad + off, HW)]       # static offset slice
                m = col_masks[kw - 1]
                if m is not None:
                    t = t * m                     # mask wrapped columns
                taps.append(t)
        patch = jnp.concatenate(taps, axis=0)     # (9*C, HW)  single K=9*C
        return jnp.dot(w_mat, patch, preferred_element_type=f32)

    x = x_ref[0].astype(f32)                      # (C, HW), stays in VMEM
    res = x
    for i in range(num_cab):                      # CAB chain, fully fused
        h = jnp.maximum(conv3x3(res, w1_ref[i]), 0.0)   # conv + ReLU
        r = conv3x3(h, w2_ref[i])                       # conv
        # CALayer: global avg pool -> 1x1 -> ReLU -> 1x1 -> sigmoid (all f32).
        p = jnp.mean(r, axis=1, keepdims=True)          # (C, 1)
        pb = jnp.broadcast_to(p, (C, 128))              # lane-friendly operand
        y = jnp.dot(wca1_ref[i], pb, preferred_element_type=f32)  # (Crp, 128)
        y = jnp.maximum(y, 0.0)
        y = jnp.dot(wca2_ref[i], y, preferred_element_type=f32)   # (C, 128)
        attn = jax.nn.sigmoid(y[:, 0:1])                # (C, 1)
        res = r * attn + res                            # CA gate + CAB skip
    out = conv3x3(res, wt_ref[...]) + x                 # tail conv + ORB skip
    o_ref[0] = out.astype(o_ref.dtype)


# ------------------------------ wrapper --------------------------------------

def orb_forward(x_nchw, params, mm_dtype=jnp.bfloat16):
    """ORB forward.  x_nchw: (N, C, H, W) float32, like PyTorch."""
    N, C, H, W = x_nchw.shape
    HW = H * W
    num_cab = len(params["cabs"])
    x_flat = x_nchw.reshape(N, C, HW)            # pure reshape, no transpose

    def wmat(w):  # HWIO (3,3,Cin,Cout) -> (Cout, 9*Cin); tap-major, Cin-minor
        cout = w.shape[3]
        return jnp.transpose(w, (3, 0, 1, 2)).reshape(cout, -1)

    w1 = jnp.stack([wmat(p["w_body1"]) for p in params["cabs"]]).astype(mm_dtype)
    w2 = jnp.stack([wmat(p["w_body2"]) for p in params["cabs"]]).astype(mm_dtype)
    wt = wmat(params["w_tail"]).astype(mm_dtype)

    # CA weights stay f32 (gate path in f32); pad Cr up to 8 for MXU tiles.
    cr = params["cabs"][0]["w_ca1"].shape[1]
    cr_pad = max(8, ((cr + 7) // 8) * 8)
    wca1 = jnp.stack([p["w_ca1"].T for p in params["cabs"]])     # (ncab, cr, C)
    wca1 = jnp.pad(wca1, ((0, 0), (0, cr_pad - cr), (0, 0)))
    wca2 = jnp.stack([p["w_ca2"].T for p in params["cabs"]])     # (ncab, C, cr)
    wca2 = jnp.pad(wca2, ((0, 0), (0, 0), (0, cr_pad - cr)))

    lpad = ((W + 1 + 127) // 128) * 128          # halo >= W+1, lane-aligned

    def _nbytes(a):
        return a.size * a.dtype.itemsize

    cost = pl.CostEstimate(
        flops=N * (2 * num_cab + 1) * 2 * C * (9 * C) * HW
              + N * num_cab * 2 * 2 * C * cr_pad * 128,
        transcendentals=N * num_cab * C,
        bytes_accessed=2 * _nbytes(x_flat) + _nbytes(w1) + _nbytes(w2)
                       + _nbytes(wt) + _nbytes(wca1) + _nbytes(wca2))

    kernel = functools.partial(_orb_kernel, num_cab=num_cab, H=H, W=W,
                               lpad=lpad, mm_dtype=mm_dtype)

    out_flat = pl.pallas_call(
        kernel,
        out_shape=jax.ShapeDtypeStruct((N, C, HW), x_nchw.dtype),
        grid=(N,),
        in_specs=[
            pl.BlockSpec((1, C, HW), lambda n: (n, 0, 0)),
            pl.BlockSpec(w1.shape, lambda n: (0, 0, 0)),
            pl.BlockSpec(w2.shape, lambda n: (0, 0, 0)),
            pl.BlockSpec(wca1.shape, lambda n: (0, 0, 0)),
            pl.BlockSpec(wca2.shape, lambda n: (0, 0, 0)),
            pl.BlockSpec(wt.shape, lambda n: (0, 0)),
        ],
        out_specs=pl.BlockSpec((1, C, HW), lambda n: (n, 0, 0)),
        scratch_shapes=[pltpu.VMEM((C, lpad + HW + lpad), mm_dtype)],
        compiler_params=pltpu.CompilerParams(
            dimension_semantics=("parallel",),
            vmem_limit_bytes=32 * 1024 * 1024),
        cost_estimate=cost,
    )(x_flat, w1, w2, wca1, wca2, wt)

    return out_flat.reshape(N, C, H, W)


# --------------------------- parameters / reference --------------------------

def init_orb_params(key, n_feat, kernel_size, reduction, num_cab):
    """Deterministic synthetic init (Conv2d-style uniform, bias=False)."""
    ks = kernel_size
    cr = n_feat // reduction

    def conv_w(k, cin, cout, kh, kw):
        fan_in = cin * kh * kw
        bound = 1.0 / (fan_in ** 0.5)
        return jax.random.uniform(k, (kh, kw, cin, cout), jnp.float32, -bound, bound)

    keys = jax.random.split(key, num_cab * 4 + 1)
    params = {"cabs": []}
    idx = 0
    for _ in range(num_cab):
        params["cabs"].append({
            "w_body1": conv_w(keys[idx + 0], n_feat, n_feat, ks, ks),
            "w_body2": conv_w(keys[idx + 1], n_feat, n_feat, ks, ks),
            "w_ca1": conv_w(keys[idx + 2], n_feat, cr, 1, 1).reshape(n_feat, cr),
            "w_ca2": conv_w(keys[idx + 3], cr, n_feat, 1, 1).reshape(cr, n_feat),
        })
        idx += 4
    params["w_tail"] = conv_w(keys[idx], n_feat, n_feat, ks, ks)
    return params


def orb_reference(x_nchw, params):
    """Pure-JAX f32 reference matching the PyTorch module."""
    x = jnp.transpose(x_nchw, (0, 2, 3, 1))

    def conv(v, w):
        return lax.conv_general_dilated(
            v, w, (1, 1), "SAME", dimension_numbers=("NHWC", "HWIO", "NHWC"))

    res = x
    for p in params["cabs"]:
        h = jax.nn.relu(conv(res, p["w_body1"]))
        r = conv(h, p["w_body2"])
        y = jnp.mean(r, axis=(1, 2), keepdims=True)
        y = jax.nn.relu(jnp.einsum("nhwc,cd->nhwd", y, p["w_ca1"]))
        y = jax.nn.sigmoid(jnp.einsum("nhwc,cd->nhwd", y, p["w_ca2"]))
        res = r * y + res
    res = conv(res, params["w_tail"]) + x
    return jnp.transpose(res, (0, 3, 1, 2))


# --------------------------------- main ---------------------------------------

if __name__ == "__main__":
    n_feat, kernel_size, reduction, num_cab = 32, 3, 16, 2
    N, H, W = 2, 16, 16

    key = jax.random.PRNGKey(0)
    kx, kp = jax.random.split(key)
    x = jax.random.normal(kx, (N, n_feat, H, W), jnp.float32)
    params = init_orb_params(kp, n_feat, kernel_size, reduction, num_cab)

    fwd_bf16 = jax.jit(functools.partial(orb_forward, mm_dtype=jnp.bfloat16))
    fwd_f32 = jax.jit(functools.partial(orb_forward, mm_dtype=jnp.float32))

    out_bf16 = jax.block_until_ready(fwd_bf16(x, params))   # fast MXU path
    out_f32 = jax.block_until_ready(fwd_f32(x, params))     # exact-math path
    ref = orb_reference(x, params)

    assert out_bf16.shape == x.shape and out_bf16.dtype == x.dtype
    assert out_f32.shape == x.shape and out_f32.dtype == x.dtype

    err_f32 = float(jnp.max(jnp.abs(out_f32 - ref)))
    err_bf16 = float(jnp.max(jnp.abs(out_bf16 - ref)))
    # f32 path must match tightly; bf16 MXU operands get a relaxed tolerance
    # (per the review's correctness note), accumulation stays f32.
    if err_f32 < 1e-3 and err_bf16 < 5e-2:
        print("KERNEL_OK")
    else:
        print(f"MISMATCH f32_err={err_f32} bf16_err={err_bf16}")
</pallas_src>

<mosaic_0001>
module attributes {stable_mosaic.version = 11 : i64} {
  func.func @_orb_kernel(%arg0: i32, %arg1: memref<1x32x256xf32, #tpu.memory_space<vmem>>, %arg2: memref<2x32x288xbf16, #tpu.memory_space<vmem>>, %arg3: memref<2x32x288xbf16, #tpu.memory_space<vmem>>, %arg4: memref<2x8x32xf32, #tpu.memory_space<vmem>>, %arg5: memref<2x32x8xf32, #tpu.memory_space<vmem>>, %arg6: memref<32x288xbf16, #tpu.memory_space<vmem>>, %arg7: memref<1x32x256xf32, #tpu.memory_space<vmem>>, %arg8: memref<32x512xbf16, #tpu.memory_space<vmem>>) attributes {dimension_semantics = [#tpu.dimension_semantics<parallel>], iteration_bounds = array<i64: 2>, scalar_prefetch = 0 : i64, scratch_operands = 1 : i64, tpu.core_type = #tpu.core_type<tc>, window_params = [{transform_indices = @transform_0, window_bounds = array<i64: 1, 32, 256>}, {pipeline_mode = #tpu.pipeline_mode<synchronous>, transform_indices = @transform_1, window_bounds = array<i64: 2, 32, 288>}, {pipeline_mode = #tpu.pipeline_mode<synchronous>, transform_indices = @transform_2, window_bounds = array<i64: 2, 32, 288>}, {pipeline_mode = #tpu.pipeline_mode<synchronous>, transform_indices = @transform_3, window_bounds = array<i64: 2, 8, 32>}, {pipeline_mode = #tpu.pipeline_mode<synchronous>, transform_indices = @transform_4, window_bounds = array<i64: 2, 32, 8>}, {pipeline_mode = #tpu.pipeline_mode<synchronous>, transform_indices = @transform_5, window_bounds = array<i64: 32, 288>}, {transform_indices = @transform_6, window_bounds = array<i64: 1, 32, 256>}]} {
    %cst = arith.constant 0.000000e+00 : bf16
    %0 = vector.broadcast %cst : bf16 to vector<32x128xbf16>
    %c0 = arith.constant 0 : index
    %c0_0 = arith.constant 0 : index
    %1 = vector.load %arg8[%c0, %c0_0] : memref<32x512xbf16, #tpu.memory_space<vmem>>, vector<32x128xbf16>
    tpu.vector_store %arg8[%c0, %c0_0], %0 {strides = array<i32>} : memref<32x512xbf16, #tpu.memory_space<vmem>>, vector<32x128xbf16>,
    %cst_1 = arith.constant 0.000000e+00 : bf16
    %2 = vector.broadcast %cst_1 : bf16 to vector<32x128xbf16>
    %c0_2 = arith.constant 0 : index
    %c384 = arith.constant 384 : index
    %3 = vector.load %arg8[%c0_2, %c384] : memref<32x512xbf16, #tpu.memory_space<vmem>>, vector<32x128xbf16>
    tpu.vector_store %arg8[%c0_2, %c384], %2 {strides = array<i32>} : memref<32x512xbf16, #tpu.memory_space<vmem>>, vector<32x128xbf16>,
    %4 = tpu.iota {dimensions = array<i32: 1>} : vector<1x256xi32>
    %c16_i32 = arith.constant 16 : i32
    %c0_i32 = arith.constant 0 : i32
    %5 = arith.cmpi eq, %c16_i32, %c0_i32 : i32
    %c1_i32 = arith.constant 1 : i32
    %6 = arith.select %5, %c1_i32, %c16_i32 : i32
    %7 = vector.broadcast %6 : i32 to vector<1x256xi32>
    %8 = arith.remsi %4, %7 : vector<1x256xi32>
    %c0_i32_3 = arith.constant 0 : i32
    %9 = vector.broadcast %c0_i32_3 : i32 to vector<1x256xi32>
    %10 = arith.cmpi ne, %8, %9 : vector<1x256xi32>
    %c0_i32_4 = arith.constant 0 : i32
    %11 = vector.broadcast %c0_i32_4 : i32 to vector<1x256xi32>
    %12 = arith.cmpi slt, %8, %11 : vector<1x256xi32>
    %c0_i32_5 = arith.constant 0 : i32
    %13 = arith.cmpi slt, %6, %c0_i32_5 : i32
    %14 = vector.broadcast %13 : i1 to vector<1x256xi1>
    %15 = vector.broadcast %14 : vector<1x256xi1> to vector<1x256xi1>
    %16 = arith.xori %12, %15 : vector<1x256xi1>
    %17 = arith.andi %16, %10 : vector<1x256xi1>
    %18 = vector.broadcast %6 : i32 to vector<1x256xi32>
    %19 = arith.addi %8, %18 : vector<1x256xi32>
    %20 = arith.select %17, %19, %8 : vector<1x256xi1>, vector<1x256xi32>
    %c1_i32_6 = arith.constant 1 : i32
    %21 = vector.broadcast %c1_i32_6 : i32 to vector<1x256xi32>
    %22 = arith.cmpi sge, %20, %21 : vector<1x256xi32>
    %cst_7 = arith.constant 1.000000e+00 : f32
    %cst_8 = arith.constant 0.000000e+00 : f32
    %23 = vector.broadcast %cst_7 : f32 to vector<1x256xf32>
    %24 = vector.broadcast %cst_8 : f32 to vector<1x256xf32>
    %25 = arith.select %22, %23, %24 : vector<1x256xi1>, vector<1x256xf32>
    %26 = arith.truncf %25 : vector<1x256xf32> to vector<1x256xbf16>
    %c14_i32 = arith.constant 14 : i32
    %27 = vector.broadcast %c14_i32 : i32 to vector<1x256xi32>
    %28 = arith.cmpi sle, %20, %27 : vector<1x256xi32>
    %cst_9 = arith.constant 1.000000e+00 : f32
    %cst_10 = arith.constant 0.000000e+00 : f32
    %29 = vector.broadcast %cst_9 : f32 to vector<1x256xf32>
    %30 = vector.broadcast %cst_10 : f32 to vector<1x256xf32>
    %31 = arith.select %28, %29, %30 : vector<1x256xi1>, vector<1x256xf32>
    %32 = arith.truncf %31 : vector<1x256xf32> to vector<1x256xbf16>
    %c0_11 = arith.constant 0 : index
    %c0_12 = arith.constant 0 : index
    %c0_13 = arith.constant 0 : index
    %33 = vector.load %arg1[%c0_11, %c0_12, %c0_13] : memref<1x32x256xf32, #tpu.memory_space<vmem>>, vector<1x32x256xf32>
    %34 = vector.shape_cast %33 : vector<1x32x256xf32> to vector<32x256xf32>
    %c0_14 = arith.constant 0 : index
    %c0_15 = arith.constant 0 : index
    %c0_16 = arith.constant 0 : index
    %35 = vector.load %arg2[%c0_14, %c0_15, %c0_16] : memref<2x32x288xbf16, #tpu.memory_space<vmem>>, vector<1x32x288xbf16>
    %36 = vector.shape_cast %35 : vector<1x32x288xbf16> to vector<32x288xbf16>
    %37 = arith.truncf %34 : vector<32x256xf32> to vector<32x256xbf16>
    %c0_17 = arith.constant 0 : index
    %c128 = arith.constant 128 : index
    %38 = vector.load %arg8[%c0_17, %c128] : memref<32x512xbf16, #tpu.memory_space<vmem>>, vector<32x256xbf16>
    tpu.vector_store %arg8[%c0_17, %c128], %37 {strides = array<i32>} : memref<32x512xbf16, #tpu.memory_space<vmem>>, vector<32x256xbf16>,
    %c0_18 = arith.constant 0 : index
    %c111 = arith.constant 111 : index
    %39 = vector.load %arg8[%c0_18, %c111] : memref<32x512xbf16, #tpu.memory_space<vmem>>, vector<32x256xbf16>
    %40 = vector.broadcast %26 : vector<1x256xbf16> to vector<32x256xbf16>
    %41 = arith.mulf %39, %40 : vector<32x256xbf16>
    %c0_19 = arith.constant 0 : index
    %c112 = arith.constant 112 : index
    %42 = vector.load %arg8[%c0_19, %c112] : memref<32x512xbf16, #tpu.memory_space<vmem>>, vector<32x256xbf16>
    %c0_20 = arith.constant 0 : index
    %c113 = arith.constant 113 : index
    %43 = vector.load %arg8[%c0_20, %c113] : memref<32x512xbf16, #tpu.memory_space<vmem>>, vector<32x256xbf16>
    %44 = vector.broadcast %32 : vector<1x256xbf16> to vector<32x256xbf16>
    %45 = arith.mulf %43, %44 : vector<32x256xbf16>
    %c0_21 = arith.constant 0 : index
    %c127 = arith.constant 127 : index
    %46 = vector.load %arg8[%c0_21, %c127] : memref<32x512xbf16, #tpu.memory_space<vmem>>, vector<32x256xbf16>
    %47 = vector.broadcast %26 : vector<1x256xbf16> to vector<32x256xbf16>
    %48 = arith.mulf %46, %47 : vector<32x256xbf16>
    %c0_22 = arith.constant 0 : index
    %c128_23 = arith.constant 128 : index
    %49 = vector.load %arg8[%c0_22, %c128_23] : memref<32x512xbf16, #tpu.memory_space<vmem>>, vector<32x256xbf16>
    %c0_24 = arith.constant 0 : index
    %c129 = arith.constant 129 : index
    %50 = vector.load %arg8[%c0_24, %c129] : memref<32x512xbf16, #tpu.memory_space<vmem>>, vector<32x256xbf16>
    %51 = vector.broadcast %32 : vector<1x256xbf16> to vector<32x256xbf16>
    %52 = arith.mulf %50, %51 : vector<32x256xbf16>
    %c0_25 = arith.constant 0 : index
    %c143 = arith.constant 143 : index
    %53 = vector.load %arg8[%c0_25, %c143] : memref<32x512xbf16, #tpu.memory_space<vmem>>, vector<32x256xbf16>
    %54 = vector.broadcast %26 : vector<1x256xbf16> to vector<32x256xbf16>
    %55 = arith.mulf %53, %54 : vector<32x256xbf16>
    %c0_26 = arith.constant 0 : index
    %c144 = arith.constant 144 : index
    %56 = vector.load %arg8[%c0_26, %c144] : memref<32x512xbf16, #tpu.memory_space<vmem>>, vector<32x256xbf16>
    %c0_27 = arith.constant 0 : index
    %c145 = arith.constant 145 : index
    %57 = vector.load %arg8[%c0_27, %c145] : memref<32x512xbf16, #tpu.memory_space<vmem>>, vector<32x256xbf16>
    %58 = vector.broadcast %32 : vector<1x256xbf16> to vector<32x256xbf16>
    %59 = arith.mulf %57, %58 : vector<32x256xbf16>
    %60 = tpu.concatenate %41, %42, %45, %48, %49, %52, %55, %56, %59 in 0 : vector<32x256xbf16>, vector<32x256xbf16>, vector<32x256xbf16>, vector<32x256xbf16>, vector<32x256xbf16>, vector<32x256xbf16>, vector<32x256xbf16>, vector<32x256xbf16>, vector<32x256xbf16> -> vector<288x256xbf16>
    %cst_28 = arith.constant dense<0.000000e+00> : vector<32x256xf32>
    %61 = tpu.matmul %36, %60, %cst_28 {dimension_numbers = #tpu.dot_dimension_numbers<[1], [0], [0], [1], [0, 0, 1, 1], [], []>} : vector<32x288xbf16>, vector<288x256xbf16>, vector<32x256xf32> -> vector<32x256xf32>
    %cst_29 = arith.constant 0.000000e+00 : f32
    %62 = vector.broadcast %cst_29 : f32 to vector<32x256xf32>
    %63 = arith.maximumf %61, %62 : vector<32x256xf32>
    %c0_30 = arith.constant 0 : index
    %c0_31 = arith.constant 0 : index
    %c0_32 = arith.constant 0 : index
    %64 = vector.load %arg3[%c0_30, %c0_31, %c0_32] : memref<2x32x288xbf16, #tpu.memory_space<vmem>>, vector<1x32x288xbf16>
    %65 = vector.shape_cast %64 : vector<1x32x288xbf16> to vector<32x288xbf16>
    %66 = arith.truncf %63 : vector<32x256xf32> to vector<32x256xbf16>
    %c0_33 = arith.constant 0 : index
    %c128_34 = arith.constant 128 : index
    %67 = vector.load %arg8[%c0_33, %c128_34] : memref<32x512xbf16, #tpu.memory_space<vmem>>, vector<32x256xbf16>
    tpu.vector_store %arg8[%c0_33, %c128_34], %66 {strides = array<i32>} : memref<32x512xbf16, #tpu.memory_space<vmem>>, vector<32x256xbf16>,
    %c0_35 = arith.constant 0 : index
    %c111_36 = arith.constant 111 : index
    %68 = vector.load %arg8[%c0_35, %c111_36] : memref<32x512xbf16, #tpu.memory_space<vmem>>, vector<32x256xbf16>
    %69 = vector.broadcast %26 : vector<1x256xbf16> to vector<32x256xbf16>
    %70 = arith.mulf %68, %69 : vector<32x256xbf16>
    %c0_37 = arith.constant 0 : index
    %c112_38 = arith.constant 112 : index
    %71 = vector.load %arg8[%c0_37, %c112_38] : memref<32x512xbf16, #tpu.memory_space<vmem>>, vector<32x256xbf16>
    %c0_39 = arith.constant 0 : index
    %c113_40 = arith.constant 113 : index
    %72 = vector.load %arg8[%c0_39, %c113_40] : memref<32x512xbf16, #tpu.memory_space<vmem>>, vector<32x256xbf16>
    %73 = vector.broadcast %32 : vector<1x256xbf16> to vector<32x256xbf16>
    %74 = arith.mulf %72, %73 : vector<32x256xbf16>
    %c0_41 = arith.constant 0 : index
    %c127_42 = arith.constant 127 : index
    %75 = vector.load %arg8[%c0_41, %c127_42] : memref<32x512xbf16, #tpu.memory_space<vmem>>, vector<32x256xbf16>
    %76 = vector.broadcast %26 : vector<1x256xbf16> to vector<32x256xbf16>
    %77 = arith.mulf %75, %76 : vector<32x256xbf16>
    %c0_43 = arith.constant 0 : index
    %c128_44 = arith.constant 128 : index
    %78 = vector.load %arg8[%c0_43, %c128_44] : memref<32x512xbf16, #tpu.memory_space<vmem>>, vector<32x256xbf16>
    %c0_45 = arith.constant 0 : index
    %c129_46 = arith.constant 129 : index
    %79 = vector.load %arg8[%c0_45, %c129_46] : memref<32x512xbf16, #tpu.memory_space<vmem>>, vector<32x256xbf16>
    %80 = vector.broadcast %32 : vector<1x256xbf16> to vector<32x256xbf16>
    %81 = arith.mulf %79, %80 : vector<32x256xbf16>
    %c0_47 = arith.constant 0 : index
    %c143_48 = arith.constant 143 : index
    %82 = vector.load %arg8[%c0_47, %c143_48] : memref<32x512xbf16, #tpu.memory_space<vmem>>, vector<32x256xbf16>
    %83 = vector.broadcast %26 : vector<1x256xbf16> to vector<32x256xbf16>
    %84 = arith.mulf %82, %83 : vector<32x256xbf16>
    %c0_49 = arith.constant 0 : index
    %c144_50 = arith.constant 144 : index
    %85 = vector.load %arg8[%c0_49, %c144_50] : memref<32x512xbf16, #tpu.memory_space<vmem>>, vector<32x256xbf16>
    %c0_51 = arith.constant 0 : index
    %c145_52 = arith.constant 145 : index
    %86 = vector.load %arg8[%c0_51, %c145_52] : memref<32x512xbf16, #tpu.memory_space<vmem>>, vector<32x256xbf16>
    %87 = vector.broadcast %32 : vector<1x256xbf16> to vector<32x256xbf16>
    %88 = arith.mulf %86, %87 : vector<32x256xbf16>
    %89 = tpu.concatenate %70, %71, %74, %77, %78, %81, %84, %85, %88 in 0 : vector<32x256xbf16>, vector<32x256xbf16>, vector<32x256xbf16>, vector<32x256xbf16>, vector<32x256xbf16>, vector<32x256xbf16>, vector<32x256xbf16>, vector<32x256xbf16>, vector<32x256xbf16> -> vector<288x256xbf16>
    %cst_53 = arith.constant dense<0.000000e+00> : vector<32x256xf32>
    %90 = tpu.matmul %65, %89, %cst_53 {dimension_numbers = #tpu.dot_dimension_numbers<[1], [0], [0], [1], [0, 0, 1, 1], [], []>} : vector<32x288xbf16>, vector<288x256xbf16>, vector<32x256xf32> -> vector<32x256xf32>
    %cst_54 = arith.constant dense<0.000000e+00> : vector<32xf32>
    %91 = vector.multi_reduction <add>, %90, %cst_54 [1] : vector<32x256xf32> to vector<32xf32>
    %92 = vector.shape_cast %91 : vector<32xf32> to vector<32x1xf32>
    %cst_55 = arith.constant 2.560000e+02 : f32
    %93 = vector.broadcast %cst_55 : f32 to vector<32x1xf32>
    %94 = arith.divf %92, %93 : vector<32x1xf32>
    %95 = vector.shape_cast %94 : vector<32x1xf32> to vector<32x1xf32>
    %96 = vector.broadcast %95 : vector<32x1xf32> to vector<32x128xf32>
    %c0_56 = arith.constant 0 : index
    %c0_57 = arith.constant 0 : index
    %c0_58 = arith.constant 0 : index
    %97 = vector.load %arg4[%c0_56, %c0_57, %c0_58] : memref<2x8x32xf32, #tpu.memory_space<vmem>>, vector<1x8x32xf32>
    %98 = vector.shape_cast %97 : vector<1x8x32xf32> to vector<8x32xf32>
    %cst_59 = arith.constant dense<0.000000e+00> : vector<8x128xf32>
    %99 = tpu.matmul %98, %96, %cst_59 {dimension_numbers = #tpu.dot_dimension_numbers<[1], [0], [0], [1], [0, 0, 1, 1], [], []>} : vector<8x32xf32>, vector<32x128xf32>, vector<8x128xf32> -> vector<8x128xf32>
    %cst_60 = arith.constant 0.000000e+00 : f32
    %100 = vector.broadcast %cst_60 : f32 to vector<8x128xf32>
    %101 = arith.maximumf %99, %100 : vector<8x128xf32>
    %c0_61 = arith.constant 0 : index
    %c0_62 = arith.constant 0 : index
    %c0_63 = arith.constant 0 : index
    %102 = vector.load %arg5[%c0_61, %c0_62, %c0_63] : memref<2x32x8xf32, #tpu.memory_space<vmem>>, vector<1x32x8xf32>
    %103 = vector.shape_cast %102 : vector<1x32x8xf32> to vector<32x8xf32>
    %cst_64 = arith.constant dense<0.000000e+00> : vector<32x128xf32>
    %104 = tpu.matmul %103, %101, %cst_64 {dimension_numbers = #tpu.dot_dimension_numbers<[1], [0], [0], [1], [0, 0, 1, 1], [], []>} : vector<32x8xf32>, vector<8x128xf32>, vector<32x128xf32> -> vector<32x128xf32>
    %105 = vector.extract_strided_slice %104 {offsets = [0, 0], sizes = [32, 1], strides = [1, 1]} : vector<32x128xf32> to vector<32x1xf32>
    %106 = arith.negf %105 : vector<32x1xf32>
    %107 = math.exp %106 : vector<32x1xf32>
    %cst_65 = arith.constant 1.000000e+00 : f32
    %108 = vector.broadcast %cst_65 : f32 to vector<32x1xf32>
    %109 = arith.addf %108, %107 : vector<32x1xf32>
    %110 = arith.divf %108, %109 : vector<32x1xf32>
    %111 = vector.broadcast %110 : vector<32x1xf32> to vector<32x256xf32>
    %112 = arith.mulf %90, %111 : vector<32x256xf32>
    %113 = arith.addf %112, %34 : vector<32x256xf32>
    %c1 = arith.constant 1 : index
    %c0_66 = arith.constant 0 : index
    %c0_67 = arith.constant 0 : index
    %114 = vector.load %arg2[%c1, %c0_66, %c0_67] : memref<2x32x288xbf16, #tpu.memory_space<vmem>>, vector<1x32x288xbf16>
    %115 = vector.shape_cast %114 : vector<1x32x288xbf16> to vector<32x288xbf16>
    %116 = arith.truncf %113 : vector<32x256xf32> to vector<32x256xbf16>
    %c0_68 = arith.constant 0 : index
    %c128_69 = arith.constant 128 : index
    %117 = vector.load %arg8[%c0_68, %c128_69] : memref<32x512xbf16, #tpu.memory_space<vmem>>, vector<32x256xbf16>
    tpu.vector_store %arg8[%c0_68, %c128_69], %116 {strides = array<i32>} : memref<32x512xbf16, #tpu.memory_space<vmem>>, vector<32x256xbf16>,
    %c0_70 = arith.constant 0 : index
    %c111_71 = arith.constant 111 : index
    %118 = vector.load %arg8[%c0_70, %c111_71] : memref<32x512xbf16, #tpu.memory_space<vmem>>, vector<32x256xbf16>
    %119 = vector.broadcast %26 : vector<1x256xbf16> to vector<32x256xbf16>
    %120 = arith.mulf %118, %119 : vector<32x256xbf16>
    %c0_72 = arith.constant 0 : index
    %c112_73 = arith.constant 112 : index
    %121 = vector.load %arg8[%c0_72, %c112_73] : memref<32x512xbf16, #tpu.memory_space<vmem>>, vector<32x256xbf16>
    %c0_74 = arith.constant 0 : index
    %c113_75 = arith.constant 113 : index
    %122 = vector.load %arg8[%c0_74, %c113_75] : memref<32x512xbf16, #tpu.memory_space<vmem>>, vector<32x256xbf16>
    %123 = vector.broadcast %32 : vector<1x256xbf16> to vector<32x256xbf16>
    %124 = arith.mulf %122, %123 : vector<32x256xbf16>
    %c0_76 = arith.constant 0 : index
    %c127_77 = arith.constant 127 : index
    %125 = vector.load %arg8[%c0_76, %c127_77] : memref<32x512xbf16, #tpu.memory_space<vmem>>, vector<32x256xbf16>
    %126 = vector.broadcast %26 : vector<1x256xbf16> to vector<32x256xbf16>
    %127 = arith.mulf %125, %126 : vector<32x256xbf16>
    %c0_78 = arith.constant 0 : index
    %c128_79 = arith.constant 128 : index
    %128 = vector.load %arg8[%c0_78, %c128_79] : memref<32x512xbf16, #tpu.memory_space<vmem>>, vector<32x256xbf16>
    %c0_80 = arith.constant 0 : index
    %c129_81 = arith.constant 129 : index
    %129 = vector.load %arg8[%c0_80, %c129_81] : memref<32x512xbf16, #tpu.memory_space<vmem>>, vector<32x256xbf16>
    %130 = vector.broadcast %32 : vector<1x256xbf16> to vector<32x256xbf16>
    %131 = arith.mulf %129, %130 : vector<32x256xbf16>
    %c0_82 = arith.constant 0 : index
    %c143_83 = arith.constant 143 : index
    %132 = vector.load %arg8[%c0_82, %c143_83] : memref<32x512xbf16, #tpu.memory_space<vmem>>, vector<32x256xbf16>
    %133 = vector.broadcast %26 : vector<1x256xbf16> to vector<32x256xbf16>
    %134 = arith.mulf %132, %133 : vector<32x256xbf16>
    %c0_84 = arith.constant 0 : index
    %c144_85 = arith.constant 144 : index
    %135 = vector.load %arg8[%c0_84, %c144_85] : memref<32x512xbf16, #tpu.memory_space<vmem>>, vector<32x256xbf16>
    %c0_86 = arith.constant 0 : index
    %c145_87 = arith.constant 145 : index
    %136 = vector.load %arg8[%c0_86, %c145_87] : memref<32x512xbf16, #tpu.memory_space<vmem>>, vector<32x256xbf16>
    %137 = vector.broadcast %32 : vector<1x256xbf16> to vector<32x256xbf16>
    %138 = arith.mulf %136, %137 : vector<32x256xbf16>
    %139 = tpu.concatenate %120, %121, %124, %127, %128, %131, %134, %135, %138 in 0 : vector<32x256xbf16>, vector<32x256xbf16>, vector<32x256xbf16>, vector<32x256xbf16>, vector<32x256xbf16>, vector<32x256xbf16>, vector<32x256xbf16>, vector<32x256xbf16>, vector<32x256xbf16> -> vector<288x256xbf16>
    %cst_88 = arith.constant dense<0.000000e+00> : vector<32x256xf32>
    %140 = tpu.matmul %115, %139, %cst_88 {dimension_numbers = #tpu.dot_dimension_numbers<[1], [0], [0], [1], [0, 0, 1, 1], [], []>} : vector<32x288xbf16>, vector<288x256xbf16>, vector<32x256xf32> -> vector<32x256xf32>
    %cst_89 = arith.constant 0.000000e+00 : f32
    %141 = vector.broadcast %cst_89 : f32 to vector<32x256xf32>
    %142 = arith.maximumf %140, %141 : vector<32x256xf32>
    %c1_90 = arith.constant 1 : index
    %c0_91 = arith.constant 0 : index
    %c0_92 = arith.constant 0 : index
    %143 = vector.load %arg3[%c1_90, %c0_91, %c0_92] : memref<2x32x288xbf16, #tpu.memory_space<vmem>>, vector<1x32x288xbf16>
    %144 = vector.shape_cast %143 : vector<1x32x288xbf16> to vector<32x288xbf16>
    %145 = arith.truncf %142 : vector<32x256xf32> to vector<32x256xbf16>
    %c0_93 = arith.constant 0 : index
    %c128_94 = arith.constant 128 : index
    %146 = vector.load %arg8[%c0_93, %c128_94] : memref<32x512xbf16, #tpu.memory_space<vmem>>, vector<32x256xbf16>
    tpu.vector_store %arg8[%c0_93, %c128_94], %145 {strides = array<i32>} : memref<32x512xbf16, #tpu.memory_space<vmem>>, vector<32x256xbf16>,
    %c0_95 = arith.constant 0 : index
    %c111_96 = arith.constant 111 : index
    %147 = vector.load %arg8[%c0_95, %c111_96] : memref<32x512xbf16, #tpu.memory_space<vmem>>, vector<32x256xbf16>
    %148 = vector.broadcast %26 : vector<1x256xbf16> to vector<32x256xbf16>
    %149 = arith.mulf %147, %148 : vector<32x256xbf16>
    %c0_97 = arith.constant 0 : index
    %c112_98 = arith.constant 112 : index
    %150 = vector.load %arg8[%c0_97, %c112_98] : memref<32x512xbf16, #tpu.memory_space<vmem>>, vector<32x256xbf16>
    %c0_99 = arith.constant 0 : index
    %c113_100 = arith.constant 113 : index
    %151 = vector.load %arg8[%c0_99, %c113_100] : memref<32x512xbf16, #tpu.memory_space<vmem>>, vector<32x256xbf16>
    %152 = vector.broadcast %32 : vector<1x256xbf16> to vector<32x256xbf16>
    %153 = arith.mulf %151, %152 : vector<32x256xbf16>
    %c0_101 = arith.constant 0 : index
    %c127_102 = arith.constant 127 : index
    %154 = vector.load %arg8[%c0_101, %c127_102] : memref<32x512xbf16, #tpu.memory_space<vmem>>, vector<32x256xbf16>
    %155 = vector.broadcast %26 : vector<1x256xbf16> to vector<32x256xbf16>
    %156 = arith.mulf %154, %155 : vector<32x256xbf16>
    %c0_103 = arith.constant 0 : index
    %c128_104 = arith.constant 128 : index
    %157 = vector.load %arg8[%c0_103, %c128_104] : memref<32x512xbf16, #tpu.memory_space<vmem>>, vector<32x256xbf16>
    %c0_105 = arith.constant 0 : index
    %c129_106 = arith.constant 129 : index
    %158 = vector.load %arg8[%c0_105, %c129_106] : memref<32x512xbf16, #tpu.memory_space<vmem>>, vector<32x256xbf16>
    %159 = vector.broadcast %32 : vector<1x256xbf16> to vector<32x256xbf16>
    %160 = arith.mulf %158, %159 : vector<32x256xbf16>
    %c0_107 = arith.constant 0 : index
    %c143_108 = arith.constant 143 : index
    %161 = vector.load %arg8[%c0_107, %c143_108] : memref<32x512xbf16, #tpu.memory_space<vmem>>, vector<32x256xbf16>
    %162 = vector.broadcast %26 : vector<1x256xbf16> to vector<32x256xbf16>
    %163 = arith.mulf %161, %162 : vector<32x256xbf16>
    %c0_109 = arith.constant 0 : index
    %c144_110 = arith.constant 144 : index
    %164 = vector.load %arg8[%c0_109, %c144_110] : memref<32x512xbf16, #tpu.memory_space<vmem>>, vector<32x256xbf16>
    %c0_111 = arith.constant 0 : index
    %c145_112 = arith.constant 145 : index
    %165 = vector.load %arg8[%c0_111, %c145_112] : memref<32x512xbf16, #tpu.memory_space<vmem>>, vector<32x256xbf16>
    %166 = vector.broadcast %32 : vector<1x256xbf16> to vector<32x256xbf16>
    %167 = arith.mulf %165, %166 : vector<32x256xbf16>
    %168 = tpu.concatenate %149, %150, %153, %156, %157, %160, %163, %164, %167 in 0 : vector<32x256xbf16>, vector<32x256xbf16>, vector<32x256xbf16>, vector<32x256xbf16>, vector<32x256xbf16>, vector<32x256xbf16>, vector<32x256xbf16>, vector<32x256xbf16>, vector<32x256xbf16> -> vector<288x256xbf16>
    %cst_113 = arith.constant dense<0.000000e+00> : vector<32x256xf32>
    %169 = tpu.matmul %144, %168, %cst_113 {dimension_numbers = #tpu.dot_dimension_numbers<[1], [0], [0], [1], [0, 0, 1, 1], [], []>} : vector<32x288xbf16>, vector<288x256xbf16>, vector<32x256xf32> -> vector<32x256xf32>
    %cst_114 = arith.constant dense<0.000000e+00> : vector<32xf32>
    %170 = vector.multi_reduction <add>, %169, %cst_114 [1] : vector<32x256xf32> to vector<32xf32>
    %171 = vector.shape_cast %170 : vector<32xf32> to vector<32x1xf32>
    %cst_115 = arith.constant 2.560000e+02 : f32
    %172 = vector.broadcast %cst_115 : f32 to vector<32x1xf32>
    %173 = arith.divf %171, %172 : vector<32x1xf32>
    %174 = vector.shape_cast %173 : vector<32x1xf32> to vector<32x1xf32>
    %175 = vector.broadcast %174 : vector<32x1xf32> to vector<32x128xf32>
    %c1_116 = arith.constant 1 : index
    %c0_117 = arith.constant 0 : index
    %c0_118 = arith.constant 0 : index
    %176 = vector.load %arg4[%c1_116, %c0_117, %c0_118] : memref<2x8x32xf32, #tpu.memory_space<vmem>>, vector<1x8x32xf32>
    %177 = vector.shape_cast %176 : vector<1x8x32xf32> to vector<8x32xf32>
    %cst_119 = arith.constant dense<0.000000e+00> : vector<8x128xf32>
    %178 = tpu.matmul %177, %175, %cst_119 {dimension_numbers = #tpu.dot_dimension_numbers<[1], [0], [0], [1], [0, 0, 1, 1], [], []>} : vector<8x32xf32>, vector<32x128xf32>, vector<8x128xf32> -> vector<8x128xf32>
    %cst_120 = arith.constant 0.000000e+00 : f32
    %179 = vector.broadcast %cst_120 : f32 to vector<8x128xf32>
    %180 = arith.maximumf %178, %179 : vector<8x128xf32>
    %c1_121 = arith.constant 1 : index
    %c0_122 = arith.constant 0 : index
    %c0_123 = arith.constant 0 : index
    %181 = vector.load %arg5[%c1_121, %c0_122, %c0_123] : memref<2x32x8xf32, #tpu.memory_space<vmem>>, vector<1x32x8xf32>
    %182 = vector.shape_cast %181 : vector<1x32x8xf32> to vector<32x8xf32>
    %cst_124 = arith.constant dense<0.000000e+00> : vector<32x128xf32>
    %183 = tpu.matmul %182, %180, %cst_124 {dimension_numbers = #tpu.dot_dimension_numbers<[1], [0], [0], [1], [0, 0, 1, 1], [], []>} : vector<32x8xf32>, vector<8x128xf32>, vector<32x128xf32> -> vector<32x128xf32>
    %184 = vector.extract_strided_slice %183 {offsets = [0, 0], sizes = [32, 1], strides = [1, 1]} : vector<32x128xf32> to vector<32x1xf32>
    %185 = arith.negf %184 : vector<32x1xf32>
    %186 = math.exp %185 : vector<32x1xf32>
    %cst_125 = arith.constant 1.000000e+00 : f32
    %187 = vector.broadcast %cst_125 : f32 to vector<32x1xf32>
    %188 = arith.addf %187, %186 : vector<32x1xf32>
    %189 = arith.divf %187, %188 : vector<32x1xf32>
    %190 = vector.broadcast %189 : vector<32x1xf32> to vector<32x256xf32>
    %191 = arith.mulf %169, %190 : vector<32x256xf32>
    %192 = arith.addf %191, %113 : vector<32x256xf32>
    %c0_126 = arith.constant 0 : index
    %c0_127 = arith.constant 0 : index
    %193 = vector.load %arg6[%c0_126, %c0_127] : memref<32x288xbf16, #tpu.memory_space<vmem>>, vector<32x288xbf16>
    %194 = arith.truncf %192 : vector<32x256xf32> to vector<32x256xbf16>
    %c0_128 = arith.constant 0 : index
    %c128_129 = arith.constant 128 : index
    %195 = vector.load %arg8[%c0_128, %c128_129] : memref<32x512xbf16, #tpu.memory_space<vmem>>, vector<32x256xbf16>
    tpu.vector_store %arg8[%c0_128, %c128_129], %194 {strides = array<i32>} : memref<32x512xbf16, #tpu.memory_space<vmem>>, vector<32x256xbf16>,
    %c0_130 = arith.constant 0 : index
    %c111_131 = arith.constant 111 : index
    %196 = vector.load %arg8[%c0_130, %c111_131] : memref<32x512xbf16, #tpu.memory_space<vmem>>, vector<32x256xbf16>
    %197 = vector.broadcast %26 : vector<1x256xbf16> to vector<32x256xbf16>
    %198 = arith.mulf %196, %197 : vector<32x256xbf16>
    %c0_132 = arith.constant 0 : index
    %c112_133 = arith.constant 112 : index
    %199 = vector.load %arg8[%c0_132, %c112_133] : memref<32x512xbf16, #tpu.memory_space<vmem>>, vector<32x256xbf16>
    %c0_134 = arith.constant 0 : index
    %c113_135 = arith.constant 113 : index
    %200 = vector.load %arg8[%c0_134, %c113_135] : memref<32x512xbf16, #tpu.memory_space<vmem>>, vector<32x256xbf16>
    %201 = vector.broadcast %32 : vector<1x256xbf16> to vector<32x256xbf16>
    %202 = arith.mulf %200, %201 : vector<32x256xbf16>
    %c0_136 = arith.constant 0 : index
    %c127_137 = arith.constant 127 : index
    %203 = vector.load %arg8[%c0_136, %c127_137] : memref<32x512xbf16, #tpu.memory_space<vmem>>, vector<32x256xbf16>
    %204 = vector.broadcast %26 : vector<1x256xbf16> to vector<32x256xbf16>
    %205 = arith.mulf %203, %204 : vector<32x256xbf16>
    %c0_138 = arith.constant 0 : index
    %c128_139 = arith.constant 128 : index
    %206 = vector.load %arg8[%c0_138, %c128_139] : memref<32x512xbf16, #tpu.memory_space<vmem>>, vector<32x256xbf16>
    %c0_140 = arith.constant 0 : index
    %c129_141 = arith.constant 129 : index
    %207 = vector.load %arg8[%c0_140, %c129_141] : memref<32x512xbf16, #tpu.memory_space<vmem>>, vector<32x256xbf16>
    %208 = vector.broadcast %32 : vector<1x256xbf16> to vector<32x256xbf16>
    %209 = arith.mulf %207, %208 : vector<32x256xbf16>
    %c0_142 = arith.constant 0 : index
    %c143_143 = arith.constant 143 : index
    %210 = vector.load %arg8[%c0_142, %c143_143] : memref<32x512xbf16, #tpu.memory_space<vmem>>, vector<32x256xbf16>
    %211 = vector.broadcast %26 : vector<1x256xbf16> to vector<32x256xbf16>
    %212 = arith.mulf %210, %211 : vector<32x256xbf16>
    %c0_144 = arith.constant 0 : index
    %c144_145 = arith.constant 144 : index
    %213 = vector.load %arg8[%c0_144, %c144_145] : memref<32x512xbf16, #tpu.memory_space<vmem>>, vector<32x256xbf16>
    %c0_146 = arith.constant 0 : index
    %c145_147 = arith.constant 145 : index
    %214 = vector.load %arg8[%c0_146, %c145_147] : memref<32x512xbf16, #tpu.memory_space<vmem>>, vector<32x256xbf16>
    %215 = vector.broadcast %32 : vector<1x256xbf16> to vector<32x256xbf16>
    %216 = arith.mulf %214, %215 : vector<32x256xbf16>
    %217 = tpu.concatenate %198, %199, %202, %205, %206, %209, %212, %213, %216 in 0 : vector<32x256xbf16>, vector<32x256xbf16>, vector<32x256xbf16>, vector<32x256xbf16>, vector<32x256xbf16>, vector<32x256xbf16>, vector<32x256xbf16>, vector<32x256xbf16>, vector<32x256xbf16> -> vector<288x256xbf16>
    %cst_148 = arith.constant dense<0.000000e+00> : vector<32x256xf32>
    %218 = tpu.matmul %193, %217, %cst_148 {dimension_numbers = #tpu.dot_dimension_numbers<[1], [0], [0], [1], [0, 0, 1, 1], [], []>} : vector<32x288xbf16>, vector<288x256xbf16>, vector<32x256xf32> -> vector<32x256xf32>
    %219 = arith.addf %218, %34 : vector<32x256xf32>
    %c0_149 = arith.constant 0 : index
    %c0_150 = arith.constant 0 : index
    %c0_151 = arith.constant 0 : index
    %220 = vector.load %arg7[%c0_149, %c0_150, %c0_151] : memref<1x32x256xf32, #tpu.memory_space<vmem>>, vector<1x32x256xf32>
    %221 = vector.shape_cast %220 : vector<1x32x256xf32> to vector<32x256xf32>
    %222 = vector.shape_cast %219 : vector<32x256xf32> to vector<1x32x256xf32>
    tpu.vector_store %arg7[%c0_149, %c0_150, %c0_151], %222 {strides = array<i32>} : memref<1x32x256xf32, #tpu.memory_space<vmem>>, vector<1x32x256xf32>,
    return
  }
  func.func @transform_0(%arg0: i32) -> (i32, i32, i32) {
    %c0_i32 = arith.constant 0 : i32
    %c0_i32_0 = arith.constant 0 : i32
    %c0_i32_1 = arith.constant 0 : i32
    return %arg0, %c0_i32, %c0_i32_0 : i32, i32, i32
  }
  func.func @transform_1(%arg0: i32) -> (i32, i32, i32) {
    %c0_i32 = arith.constant 0 : i32
    %c0_i32_0 = arith.constant 0 : i32
    %c0_i32_1 = arith.constant 0 : i32
    %c0_i32_2 = arith.constant 0 : i32
    return %c0_i32, %c0_i32_0, %c0_i32_1 : i32, i32, i32
  }
  func.func @transform_2(%arg0: i32) -> (i32, i32, i32) {
    %c0_i32 = arith.constant 0 : i32
    %c0_i32_0 = arith.constant 0 : i32
    %c0_i32_1 = arith.constant 0 : i32
    %c0_i32_2 = arith.constant 0 : i32
    return %c0_i32, %c0_i32_0, %c0_i32_1 : i32, i32, i32
  }
  func.func @transform_3(%arg0: i32) -> (i32, i32, i32) {
    %c0_i32 = arith.constant 0 : i32
    %c0_i32_0 = arith.constant 0 : i32
    %c0_i32_1 = arith.constant 0 : i32
    %c0_i32_2 = arith.constant 0 : i32
    return %c0_i32, %c0_i32_0, %c0_i32_1 : i32, i32, i32
  }
  func.func @transform_4(%arg0: i32) -> (i32, i32, i32) {
    %c0_i32 = arith.constant 0 : i32
    %c0_i32_0 = arith.constant 0 : i32
    %c0_i32_1 = arith.constant 0 : i32
    %c0_i32_2 = arith.constant 0 : i32
    return %c0_i32, %c0_i32_0, %c0_i32_1 : i32, i32, i32
  }
  func.func @transform_5(%arg0: i32) -> (i32, i32) {
    %c0_i32 = arith.constant 0 : i32
    %c0_i32_0 = arith.constant 0 : i32
    %c0_i32_1 = arith.constant 0 : i32
    return %c0_i32, %c0_i32_0 : i32, i32
  }
  func.func @transform_6(%arg0: i32) -> (i32, i32, i32) {
    %c0_i32 = arith.constant 0 : i32
    %c0_i32_0 = arith.constant 0 : i32
    %c0_i32_1 = arith.constant 0 : i32
    return %arg0, %c0_i32, %c0_i32_0 : i32, i32, i32
  }
}

</mosaic_0001>

<bundles_post_ra>
// kernel: orb_forward.1
= control target key start
LH: loop header
LB: loop body
LE: loop exit
PB: predicated region body
PF: predicated region fallthrough
CT: control target
= control target key end

     0   :  { %s5933_s21 = smov 0   ;;  %s9080_s0 = inlined_call_operand.vmem [shape: f32[2,32,256], index: 0, kind: input, shape index: {}]   ;;  %s9081_s1 = inlined_call_operand.vmem [shape: bf16[2,32,288], index: 1, kind: input, shape index: {}]   ;;  %s9082_s2 = inlined_call_operand.vmem [shape: bf16[2,32,288], index: 2, kind: input, shape index: {}]   ;;  %s9083_s3 = inlined_call_operand.vmem [shape: f32[2,8,32], index: 3, kind: input, shape index: {}]   ;;  %s9084_s4 = inlined_call_operand.vmem [shape: f32[2,32,8], index: 4, kind: input, shape index: {}]   ;;  %s9085_s5 = inlined_call_operand.vmem [shape: bf16[32,288], index: 5, kind: input, shape index: {}]   ;;  %s9086_s6 = inlined_call_operand.vmem [shape: f32[2,32,256], index: 6, kind: output, shape index: {}]  }
   0x1 LB: > { %s5145_s22 = sadd.s32 4294967295, %s5881_s21   ;;  %p5149_p0 = scmp.ge.s32.totalorder %s5881_s21, 1  ;;  %s5881_s21 = sphi %s5933_s21, %s16_s21  }
   0x2   : > { %p212_p1 = scmp.lt.s32.totalorder %s5881_s21, 3 }
   0x4   : > { %p213_p2 = pnand %p5149_p0, %p212_p1 }
   0x6   : > { %216 = sbr.rel (%p213_p2) target bundleno = 4017 (0xfb1), region = 44 }
   0xb   : > { %v261_v0 = vlaneseq  ;;  %v5883_v1 = vmov 0   ;;  %p242_p3 = scmp.lt.s32.totalorder %s5145_s22, 1  ;;  %v5884_v6 = vmov 0.0   ;;  %s5885_s27 = smov 17   ;;  %vm412_vm4 = vcmask 1039360  }
   0xc   : > { %255 = vst [vmem:[#allocation2 + $0x20] sm:$0xf] %v5883_v1  ;;  %5822 = vset.pattern.permute.xlu1 %v5883_v1  ;;  %5823 = vset.pattern.permute.xlu2 %v5883_v1  ;;  %s5886_s28 = smov 127   ;;  %s5887_s29 = smov 1   ;;  %vm383_vm5 = vcmask 924672   ;;  %vm9099_vm6 = vcmask 138240  }
   0xd   : > { %v262_v2 = vand.u32 127, %v261_v0  ;;  %256 = vst [vmem:[#allocation2 + $0x30] sm:$0xf] %v5883_v1  ;;  %5824 = vset.pattern.permute.xlu0 %v5883_v1  ;;  %s9264_s22 = smov (!%p242_p3, %s5145_s22), 1  ;;  %s5888_s30 = smov 15   ;;  %vm494_vm7 = vcmask 121856  }
   0xe   : > { %253 = vst [vmem:[#allocation2] sm:$0xf] %v5883_v1  ;;  %s5655_s23 = sshll.u32 %s9264_s22, 6  ;;  %s5889_s7 = smov 113   ;;  %vm465_vm8 = vcmask 7168   ;;  %vm350_vm9 = vcmask 908288  }
   0xf   : > { %v263_v3 = vadd.s32 128, %v262_v2  ;;  %v268_v4 = vand.u32 15, %v262_v2  ;;  %254 = vst [vmem:[#allocation2 + $0x10] sm:$0xf] %v5883_v1  ;;  %s5949_s26 = scalar_lea.vmem %s9080_s0, %s5655_s23  ;;  %s5890_s8 = smov 111   ;;  %vm854_vm10 = vcmask 777216  }
  0x10   : > { %257 = vst [vmem:[#allocation2 + $0xc] sm:$0xf] %v5883_v1  ;;  %v302_v11 = vld [vmem:[%s5949_s26 + $0x20] sm:$0xff]  ;;  %v303_v12 = vld [vmem:[%s5949_s26 + $0x28] sm:$0xff]  ;;  %v304_v15 = vld [vmem:[%s5949_s26 + $0x30] sm:$0xff]  ;;  %s5891_s9 = smov 95  }
  0x11   : > { %v275_v5 = vand.u32 15, %v263_v3  ;;  %vm293_vm0 = vcmp.le.s32.totalorder %v268_v4, 14  ;;  %vm288_vm1 = vcmp.ge.s32.totalorder %v268_v4, 1  ;;  %258 = vst [vmem:[#allocation2 + $0x1c] sm:$0xf] %v5883_v1  ;;  %v305_v16 = vld [vmem:[%s5949_s26 + $0x38] sm:$0xff]  ;;  %v5956_v18 = vpack.c.bf16 %v303_v12, %v302_v11 }
  0x12   : > { %v295_v7 = vsel %vm293_vm0, 1.0, %v5884_v6  ;;  %v290_v8 = vsel %vm288_vm1, 1.0, %v5884_v6  ;;  %259 = vst [vmem:[#allocation2 + $0x2c] sm:$0xf] %v5883_v1  ;;  %v298_v17 = vld [vmem:[%s5949_s26] sm:$0xff]  ;;  %v299_v19 = vld [vmem:[%s5949_s26 + $0x8] sm:$0xff]  ;;  %v5963_v22 = vpack.c.bf16 %v305_v16, %v304_v15 }
  0x13   : > { %vm294_vm2 = vcmp.le.s32.totalorder %v275_v5, 14  ;;  %vm289_vm3 = vcmp.ge.s32.totalorder %v275_v5, 1  ;;  %260 = vst [vmem:[#allocation2 + $0x3c] sm:$0xf] %v5883_v1  ;;  %v300_v20 = vld [vmem:[%s5949_s26 + $0x10] sm:$0xff]  ;;  %v301_v21 = vld [vmem:[%s5949_s26 + $0x18] sm:$0xff]  ;;  %v5965_v23 = vpack.c.bf16 %v299_v19, %v298_v17 }
  0x14   : > { %v296_v9 = vsel %vm294_vm2, 1.0, %v5884_v6  ;;  %v291_v10 = vsel %vm289_vm3, 1.0, %v5884_v6  ;;  %v5967_v24 = vpack.c.bf16 %v301_v21, %v300_v20  ;;  %320 = vst [vmem:[#allocation2 + $0x24] sm:$0xff] %v5956_v18  ;;  %v5168_v25 = vld [vmem:[#allocation2 + $0x20] sm:$0xf]  ;;  %s5892_s10 = smov 110  }
  0x15   : > { %v5802_v13 = vpack.i.bf16 %v296_v9, %v295_v7  ;;  %v5792_v14 = vpack.i.bf16 %v291_v10, %v290_v8  ;;  %321 = vst [vmem:[#allocation2 + $0x34] sm:$0xff] %v5963_v22  ;;  %v5667_v26 = vld [vmem:[#allocation2 + $0x2c] sm:$0xf0]  ;;  %v5156_v38 = vld [vmem:[#allocation2] sm:$0xf]  ;;  %s5893_s11 = smov 112  }
  0x16   : > { %318 = vst [vmem:[#allocation2 + $0x4] sm:$0xff] %v5965_v23  ;;  %v5169_v31 = vor.u32 %v5667_v26, %v5168_v25  ;;  %v5664_v39 = vld [vmem:[#allocation2 + $0xc] sm:$0xf0]  ;;  %s5894_s12 = smov 96   ;;  %s5895_s13 = smov 126   ;;  %vm698_vm11 = vcmask 916480  }
  0x17   : > { %5803 = vrot.lane.b32.xlu1 %v5802_v13, %s5885_s27  ;;  %5793 = vrot.lane.b32.xlu0 %v5792_v14, %s5886_s28  ;;  %319 = vst [vmem:[#allocation2 + $0x14] sm:$0xff] %v5967_v24  ;;  %v5157_v42 = vor.u32 %v5664_v39, %v5156_v38  ;;  %v5204_v61 = vld [vmem:[#allocation2 + $0xc] sm:$0xf]  ;;  %s5896_s14 = smov 94   ;;  %vm655_vm12 = vcmask 1031168   ;;  %vm811_vm13 = vcmask 785408  }
  0x18   : > { %5813 = vrot.lane.b32.xlu2 %v5802_v13, %s5887_s29  ;;  %v5675_v62 = vld [vmem:[#allocation2 + $0x18] sm:$0xf0]  ;;  %vm897_vm14 = vcmask 769024   ;;  %vm768_vm15 = vcmask 900096   ;;  %vm9098_vm0 = vcmask 261120   ;;  %vm9097_vm2 = vcmask 64512  }
  0x19   : > { %v5216_v45 = vld [vmem:[#allocation2 + $0x2c] sm:$0xf]  ;;  %v5205_v63 = vor.u32 %v5675_v62, %v5204_v61 }
  0x1a   : > { %v5678_v46 = vld [vmem:[#allocation2 + $0x38] sm:$0xf0] }
  0x1b   : > { %v5666_v27 = vld [vmem:[#allocation2 + $0x24] sm:$0xf]  ;;  %v5176_v29 = vld [vmem:[#allocation2 + $0x28] sm:$0xf]  ;;  %v5217_v50 = vor.u32 %v5678_v46, %v5216_v45 }
  0x1c   : > { %v5170_v28 = vld [vmem:[#allocation2 + $0x30] sm:$0xf0]  ;;  %v5668_v30 = vld [vmem:[#allocation2 + $0x34] sm:$0xf0]  ;;  %v5208_v43 = vld [vmem:[#allocation2 + $0x24] sm:$0xf] }
  0x1d   : > { %v5173_v32 = vor.u32 %v5666_v27, %v5170_v28  ;;  %v5177_v33 = vor.u32 %v5668_v30, %v5176_v29  ;;  %v5164_v34 = vld [vmem:[#allocation2 + $0x8] sm:$0xf]  ;;  %v5663_v36 = vld [vmem:[#allocation2 + $0x4] sm:$0xf]  ;;  %v5677_v44 = vld [vmem:[#allocation2 + $0x30] sm:$0xf0] }
  0x1e   : > { %v5665_v35 = vld [vmem:[#allocation2 + $0x14] sm:$0xf0]  ;;  %v5158_v37 = vld [vmem:[#allocation2 + $0x10] sm:$0xf0]  ;;  %v5676_v47 = vld [vmem:[#allocation2 + $0x28] sm:$0xf]  ;;  %v5209_v49 = vor.u32 %v5677_v44, %v5208_v43  ;;  %v6037_v44 = vunpack.c.l.bf16 %v5956_v18 }
  0x1f   : > { %5808 = vrot.lane.b32.xlu1 %v5792_v14, %s5888_s30  ;;  %5798 = vrot.lane.b32.xlu0 %v5802_v13, %s5889_s7  ;;  %v5165_v40 = vor.u32 %v5665_v35, %v5164_v34  ;;  %v5161_v41 = vor.u32 %v5663_v36, %v5158_v37  ;;  %v5210_v48 = vld [vmem:[#allocation2 + $0x34] sm:$0xf0]  ;;  %v5673_v52 = vld [vmem:[#allocation2 + $0x8] sm:$0xf]  ;;  %v5188_v55 = vld [vmem:[#allocation2 + $0x24] sm:$0xf] }
  0x20   : > { %5818 = vrot.lane.b32.xlu2 %v5792_v14, %s5890_s8  ;;  %v5213_v51 = vor.u32 %v5676_v47, %v5210_v48  ;;  %v5198_v53 = vld [vmem:[#allocation2 + $0x14] sm:$0xf0]  ;;  %v5672_v56 = vld [vmem:[#allocation2 + $0x30] sm:$0xf0]  ;;  %v5196_v57 = vld [vmem:[#allocation2 + $0x4] sm:$0xf] }
  0x21   : > { %v5201_v54 = vor.u32 %v5673_v52, %v5198_v53  ;;  %v5189_v58 = vor.u32 %v5672_v56, %v5188_v55  ;;  %v5674_v59 = vld [vmem:[#allocation2 + $0x10] sm:$0xf0]  ;;  %v442_v0 = vld [vmem:[#allocation2 + $0x8] sm:$0xff]   ;;  %v444_v1 = vld [vmem:[#allocation2 + $0x18] sm:$0xff]  }
  0x22   : > { %v5197_v60 = vor.u32 %v5674_v59, %v5196_v57  ;;  %v5987_v2 = vunpack.c.h.bf16 %v442_v0  ;;  %v5989_v3 = vunpack.c.h.bf16 %v444_v1  ;;  %v5671_v4 = vld [vmem:[#allocation2 + $0x28] sm:$0xf]  ;;  %v5190_v5 = vld [vmem:[#allocation2 + $0x34] sm:$0xf0]  ;;  %v326_v19 = vld [vmem:[#allocation2 + $0x20] sm:$0xff]  ;;  %v6020_v36 = vunpack.c.l.bf16 %v442_v0 }
  0x23   : > { %v5193_v7 = vor.u32 %v5671_v4, %v5190_v5  ;;  %v327_v16 = vld [vmem:[#allocation2 + $0x28] sm:$0xff]   ;;  %v329_v17 = vld [vmem:[#allocation2 + $0x38] sm:$0xff]   ;;  %v328_v20 = vld [vmem:[#allocation2 + $0x30] sm:$0xff]  ;;  %v6006_v27 = vunpack.c.l.bf16 %v326_v19  ;;  %v6008_v28 = vunpack.c.h.bf16 %v326_v19  ;;  %v6026_v39 = vunpack.c.l.bf16 %v444_v1 }
  0x24   : > { %v6002_v21 = vunpack.c.l.bf16 %v327_v16  ;;  %v6004_v25 = vunpack.c.l.bf16 %v329_v17  ;;  %v322_v26 = vld [vmem:[#allocation2] sm:$0xff]  ;;  %v6010_v29 = vunpack.c.h.bf16 %v327_v16  ;;  %v6012_v30 = vunpack.c.h.bf16 %v329_v17 }
  0x25   : > { %v6016_v34 = vunpack.c.l.bf16 %v328_v20  ;;  %v6018_v35 = vunpack.c.h.bf16 %v328_v20 }
  0x27   : > { %606 = vrot.lane.b32.xlu0 %v5169_v31, %s5886_s28  ;;  %608 = vrot.lane.b32.xlu1 %v5173_v32, %s5886_s28  ;;  %v324_v31 = vld [vmem:[#allocation2 + $0x10] sm:$0xff] }
  0x28   : > { %610 = vrot.lane.b32.xlu2 %v5177_v33, %s5886_s28  ;;  %v6034_v43 = vunpack.c.h.bf16 %v324_v31 }
  0x2f   : > { %604 = vrot.lane.b32.xlu1 %v5165_v40, %s5886_s28  ;;  %602 = vrot.lane.b32.xlu0 %v5161_v41, %s5886_s28  ;;  %v6028_v40 = vunpack.c.l.bf16 %v322_v26  ;;  %v6030_v41 = vunpack.c.h.bf16 %v322_v26 }
  0x30   : > { %600 = vrot.lane.b32.xlu2 %v5157_v42, %s5886_s28  ;;  %v6032_v42 = vunpack.c.l.bf16 %v324_v31 }
  0x37   : > { %848 = vrot.lane.b32.xlu1 %v5209_v49, %s5891_s9  ;;  %852 = vrot.lane.b32.xlu0 %v5217_v50, %s5891_s9 }
  0x38   : > { %850 = vrot.lane.b32.xlu2 %v5213_v51, %s5891_s9 }
  0x3f   : > { %842 = vrot.lane.b32.xlu1 %v5197_v60, %s5891_s9  ;;  %846 = vrot.lane.b32.xlu0 %v5205_v63, %s5891_s9 }
  0x40   : > { %844 = vrot.lane.b32.xlu2 %v5201_v54, %s5891_s9 }
  0x47   : > { %725 = vrot.lane.b32.xlu0 %v5193_v7, %s5890_s8 }
  0x48   : > { %723 = vrot.lane.b32.xlu2 %v5189_v58, %s5890_s8 }
  0x72   : > { %v5991_v6 = vpop.permute.xlu2 %5813 }
  0x73   : > { %v5994_v8 = vunpack.i.h.bf16 %v5991_v6 }
  0x75   : > { %9114 = vst [vmem:[#allocation3_spill] sm:$0xff] %v5994_v8  ;;  %v472_v9 = vmul.f32 %v5994_v8, %v5987_v2  ;;  %v475_v10 = vmul.f32 %v5994_v8, %v5989_v3 }
  0x77   : > { %v483_v11 = vpack.c.bf16 %v472_v9, %v472_v9  ;;  %v485_v12 = vpack.c.bf16 %v475_v10, %v475_v10 }
  0x79   : > { %v740_v13 = vunpack.c.l.b16 %v483_v11  ;;  %v743_v14 = vunpack.c.l.b16 %v485_v12 }
  0x7b   : > { %v752_v15 = vpack.c.b16 %v743_v14, %v740_v13 }
  0x7d   : > { %760 = vrot.lane.b32.xlu2 %v752_v15, %s5892_s10 }
  0x89   : > { %v6014_v32 = vpop.permute.xlu1 %5803  ;;  %v5794_v33 = vpop.permute.xlu0 %5793 }
  0x8a   : > { %v6022_v37 = vunpack.i.h.bf16 %v5794_v33  ;;  %v6024_v38 = vunpack.i.l.bf16 %v5794_v33 }
  0x8c   : > { %v425_v45 = vmul.f32 %v6022_v37, %v6002_v21  ;;  %v428_v46 = vmul.f32 %v6022_v37, %v6004_v25  ;;  %v6046_v47 = vsel %vm412_vm4, %v6024_v38, %v6022_v37  ;;  %v423_v48 = vmul.f32 %v6024_v38, %v6006_v27 }
  0x8d   : > { %v424_v49 = vmul.f32 %v6046_v47, %v6008_v28  ;;  %v426_v50 = vmul.f32 %v6024_v38, %v6016_v34  ;;  %v427_v51 = vmul.f32 %v6046_v47, %v6018_v35  ;;  %v419_v52 = vmul.f32 %v6022_v37, %v6020_v36 }
  0x8e   : > { %v434_v53 = vpack.c.bf16 %v425_v45, %v425_v45  ;;  %v436_v54 = vpack.c.bf16 %v428_v46, %v428_v46  ;;  %v422_v55 = vmul.f32 %v6022_v37, %v6026_v39  ;;  %v417_v56 = vmul.f32 %v6024_v38, %v6028_v40 }
  0x8f   : > { %v6062_v57 = vpack.c.bf16 %v424_v49, %v423_v48  ;;  %v6064_v58 = vpack.c.bf16 %v427_v51, %v426_v50  ;;  %v430_v59 = vpack.c.bf16 %v419_v52, %v419_v52  ;;  %v418_v60 = vmul.f32 %v6046_v47, %v6030_v41 }
  0x90   : > { %v676_v61 = vunpack.c.l.b16 %v434_v53  ;;  %v679_v62 = vunpack.c.l.b16 %v436_v54  ;;  %v432_v63 = vpack.c.bf16 %v422_v55, %v422_v55  ;;  %v420_v0 = vmul.f32 %v6024_v38, %v6032_v42 }
  0x91   : > { %v6070_v1 = vpop.permute.xlu1 %5808  ;;  %v674_v4 = vunpack.c.l.b16 %v6062_v57  ;;  %v677_v5 = vunpack.c.l.b16 %v6064_v58  ;;  %v5799_v7 = vpop.permute.xlu0 %5798  ;;  %v421_v9 = vmul.f32 %v6046_v47, %v6034_v43  ;;  %v670_v13 = vunpack.c.l.b16 %v430_v59 }
  0x92   : > { %v6077_v10 = vunpack.i.h.bf16 %v6070_v1  ;;  %v685_v11 = vpack.c.b16 %v679_v62, %v676_v61  ;;  %v6079_v12 = vunpack.i.h.bf16 %v5799_v7  ;;  %v6081_v15 = vunpack.i.l.bf16 %v5799_v7 }
  0x93   : > { %v683_v14 = vpack.c.b16 %v677_v5, %v674_v4  ;;  %v673_v16 = vunpack.c.l.b16 %v432_v63  ;;  %v6083_v17 = vpack.c.bf16 %v418_v60, %v417_v56  ;;  %v6090_v26 = vpack.c.bf16 %v421_v9, %v420_v0 }
  0x94   : > { %9115 = vst [vmem:[#allocation4_spill] sm:$0xff] %v6079_v12  ;;  %696 = vrot.lane.b32.xlu1 %v685_v11, %s5893_s11  ;;  %v507_v19 = vmul.f32 %v6077_v10, %v6010_v29  ;;  %v510_v20 = vmul.f32 %v6077_v10, %v6012_v30  ;;  %v396_v31 = vmul.f32 %v6079_v12, %v6002_v21  ;;  %v6101_v48 = vunpack.c.l.bf16 %v5963_v22 }
  0x95   : > { %9116 = vst [vmem:[#allocation5_spill] sm:$0xff] %v6081_v15  ;;  %692 = vrot.lane.b32.xlu2 %v683_v14, %s5893_s11  ;;  %v668_v33 = vunpack.c.l.b16 %v6083_v17  ;;  %v399_v45 = vmul.f32 %v6079_v12, %v6004_v25  ;;  %v501_v46 = vmul.f32 %v6077_v10, %v5987_v2  ;;  %v671_v51 = vunpack.c.l.b16 %v6090_v26 }
  0x96   : > { %v516_v49 = vpack.c.bf16 %v507_v19, %v507_v19  ;;  %v518_v50 = vpack.c.bf16 %v510_v20, %v510_v20  ;;  %v405_v52 = vpack.c.bf16 %v396_v31, %v396_v31  ;;  %v504_v53 = vmul.f32 %v6077_v10, %v5989_v3 }
  0x97   : > { %v6109_v54 = vsel %vm383_vm5, %v6081_v15, %v6079_v12  ;;  %v478_v55 = vmul.f32 %v5994_v8, %v6010_v29  ;;  %v682_v56 = vpack.c.b16 %v673_v16, %v670_v13  ;;  %v407_v61 = vpack.c.bf16 %v399_v45, %v399_v45 }
  0x98   : > { %9117 = vst [vmem:[#allocation6_spill] sm:$0xff] %v6109_v54  ;;  %v789_v59 = vunpack.c.l.b16 %v516_v49  ;;  %v792_v60 = vunpack.c.l.b16 %v518_v50  ;;  %v680_v62 = vpack.c.b16 %v671_v51, %v668_v33  ;;  %v512_v63 = vpack.c.bf16 %v501_v46, %v501_v46 }
  0x99   : > { %v514_v0 = vpack.c.bf16 %v504_v53, %v504_v53  ;;  %v394_v4 = vmul.f32 %v6081_v15, %v6006_v27  ;;  %v395_v7 = vmul.f32 %v6109_v54, %v6008_v28  ;;  %v397_v9 = vmul.f32 %v6081_v15, %v6016_v34 }
  0x9a   : > { %v798_v5 = vpack.c.b16 %v792_v60, %v789_v59  ;;  %v398_v11 = vmul.f32 %v6109_v54, %v6018_v35  ;;  %v6122_v13 = vunpack.i.h.bf16 %v6014_v32  ;;  %v633_v14 = vunpack.c.l.b16 %v405_v52 }
  0x9b   : > { %v390_v16 = vmul.f32 %v6079_v12, %v6020_v36  ;;  %v481_v19 = vmul.f32 %v5994_v8, %v6012_v30  ;;  %v636_v20 = vunpack.c.l.b16 %v407_v61  ;;  %v6130_v31 = vpack.c.bf16 %v395_v7, %v394_v4 }
  0x9c   : > { %9118 = vst [vmem:[#allocation7_spill] sm:$0xff] %v6122_v13  ;;  %690 = vrot.lane.b32.xlu1 %v682_v56, %s5893_s11  ;;  %809 = vrot.lane.b32.xlu0 %v798_v5, %s5894_s12  ;;  %v6132_v33 = vpack.c.bf16 %v398_v11, %v397_v9  ;;  %v393_v45 = vmul.f32 %v6079_v12, %v6026_v39  ;;  %v6137_v46 = vunpack.i.l.bf16 %v6014_v32  ;;  %v783_v49 = vunpack.c.l.b16 %v512_v63 }
  0x9d   : > { %686 = vrot.lane.b32.xlu2 %v680_v62, %s5893_s11  ;;  %v786_v50 = vunpack.c.l.b16 %v514_v0  ;;  %v388_v51 = vmul.f32 %v6081_v15, %v6028_v40  ;;  %v631_v52 = vunpack.c.l.b16 %v6130_v31  ;;  %v389_v56 = vmul.f32 %v6109_v54, %v6030_v41 }
  0x9e   : > { %9119 = vst [vmem:[#allocation8_spill] sm:$0xff] %v6137_v46  ;;  %v634_v53 = vunpack.c.l.b16 %v6132_v33  ;;  %v391_v59 = vmul.f32 %v6081_v15, %v6032_v42  ;;  %v487_v60 = vpack.c.bf16 %v478_v55, %v478_v55  ;;  %v489_v32 = vpack.c.bf16 %v481_v19, %v481_v19 }
  0x9f   : > { %v392_v61 = vmul.f32 %v6109_v54, %v6034_v43  ;;  %v6151_v62 = vunpack.c.h.bf16 %v5956_v18  ;;  %v642_v63 = vpack.c.b16 %v636_v20, %v633_v14  ;;  %v401_v0 = vpack.c.bf16 %v390_v16, %v390_v16  ;;  %v6205_v54 = vpop.permute.xlu2 %5818 }
  0xa0   : > { %v403_v4 = vpack.c.bf16 %v393_v45, %v393_v45  ;;  %v6154_v5 = vunpack.c.h.bf16 %v5963_v22  ;;  %v640_v7 = vpack.c.b16 %v634_v53, %v631_v52  ;;  %v6156_v9 = vpack.c.bf16 %v389_v56, %v388_v51 }
  0xa1   : > { %v6158_v11 = vpack.c.bf16 %v392_v61, %v391_v59  ;;  %v6163_v55 = vsel %vm9099_vm6, %v6137_v46, %v6122_v13  ;;  %v795_v19 = vpack.c.b16 %v786_v50, %v783_v49  ;;  %v6166_v18 = vunpack.c.l.bf16 %v5965_v23 }
  0xa2   : > { %9120 = vst [vmem:[#allocation9_spill] sm:$0xff] %v6163_v55  ;;  %v6169_v14 = vunpack.c.l.bf16 %v5967_v24  ;;  %v746_v16 = vunpack.c.l.b16 %v487_v60  ;;  %v749_v22 = vunpack.c.l.b16 %v489_v32  ;;  %v6172_v20 = vunpack.c.h.bf16 %v5965_v23 }
  0xa3   : > { %v6175_v45 = vunpack.c.h.bf16 %v5967_v24  ;;  %v627_v49 = vunpack.c.l.b16 %v401_v0  ;;  %v630_v50 = vunpack.c.l.b16 %v403_v4  ;;  %v534_v51 = vmul.f32 %v6137_v46, %v6037_v44 }
  0xa4   : > { %653 = vrot.lane.b32.xlu1 %v642_v63, %s5895_s13  ;;  %803 = vrot.lane.b32.xlu0 %v795_v19, %s5894_s12  ;;  %v535_v52 = vmul.f32 %v6163_v55, %v6151_v62  ;;  %v625_v23 = vunpack.c.l.b16 %v6156_v9  ;;  %v628_v24 = vunpack.c.l.b16 %v6158_v11  ;;  %v537_v53 = vmul.f32 %v6137_v46, %v6101_v48 }
  0xa5   : > { %649 = vrot.lane.b32.xlu2 %v640_v7, %s5895_s13  ;;  %v538_v56 = vmul.f32 %v6163_v55, %v6154_v5  ;;  %v6191_v59 = vunpack.i.l.bf16 %v6070_v1  ;;  %v528_v60 = vmul.f32 %v6137_v46, %v6166_v18  ;;  %v529_v32 = vmul.f32 %v6163_v55, %v6172_v20 }
  0xa6   : > { %v531_v61 = vmul.f32 %v6137_v46, %v6169_v14  ;;  %v532_v63 = vmul.f32 %v6163_v55, %v6175_v45  ;;  %v639_v0 = vpack.c.b16 %v630_v50, %v627_v49  ;;  %v755_v4 = vpack.c.b16 %v749_v22, %v746_v16 }
  0xa7   : > { %v637_v7 = vpack.c.b16 %v628_v24, %v625_v23  ;;  %v6201_v19 = vpack.c.bf16 %v535_v52, %v534_v51  ;;  %v6203_v1 = vpack.c.bf16 %v538_v56, %v537_v53  ;;  %v6207_v15 = vpack.c.bf16 %v529_v32, %v528_v60 }
  0xa8   : > { %v6209_v12 = vpack.c.bf16 %v532_v63, %v531_v61  ;;  %v6213_v46 = vsel %vm494_vm7, %v6191_v59, %v6077_v10  ;;  %v675_v49 = vunpack.c.h.b16 %v6062_v57  ;;  %v678_v50 = vunpack.c.h.b16 %v6064_v58 }
  0xa9   : > { %v874_v16 = vunpack.c.h.b16 %v6201_v19  ;;  %v877_v22 = vunpack.c.h.b16 %v6203_v1  ;;  %v505_v51 = vmul.f32 %v6191_v59, %v6037_v44  ;;  %v506_v52 = vmul.f32 %v6213_v46, %v6151_v62 }
  0xaa   : > { %v508_v23 = vmul.f32 %v6191_v59, %v6101_v48  ;;  %v509_v24 = vmul.f32 %v6213_v46, %v6154_v5  ;;  %v867_v53 = vunpack.c.l.b16 %v6207_v15  ;;  %v870_v56 = vunpack.c.l.b16 %v6209_v12 }
  0xab   : > { %v883_v60 = vpack.c.b16 %v877_v22, %v874_v16  ;;  %v684_v57 = vpack.c.b16 %v678_v50, %v675_v49  ;;  %v515_v32 = vpack.c.bf16 %v506_v52, %v505_v51  ;;  %v536_v61 = vmul.f32 %v6122_v13, %v6010_v29 }
  0xac   : > { %647 = vrot.lane.b32.xlu1 %v639_v0, %s5895_s13  ;;  %766 = vrot.lane.b32.xlu0 %v755_v4, %s5892_s10  ;;  %v517_v58 = vpack.c.bf16 %v509_v24, %v508_v23  ;;  %v539_v63 = vmul.f32 %v6122_v13, %v6012_v30  ;;  %v879_v0 = vpack.c.b16 %v870_v56, %v867_v53  ;;  %v6236_v4 = vpop.permute.xlu2 %610  ;;  %v672_v16 = vunpack.c.h.b16 %v6090_v26 }
  0xad   : > { %643 = vrot.lane.b32.xlu2 %v637_v7, %s5895_s13  ;;  %v669_v7 = vunpack.c.h.b16 %v6083_v17  ;;  %v545_v22 = vpack.c.bf16 %v536_v61, %v536_v61  ;;  %v499_v29 = vmul.f32 %v6191_v59, %v6166_v18  ;;  %v500_v30 = vmul.f32 %v6213_v46, %v6172_v20 }
  0xae   : > { %v502_v49 = vmul.f32 %v6191_v59, %v6169_v14  ;;  %v547_v50 = vpack.c.bf16 %v539_v63, %v539_v63  ;;  %v787_v51 = vunpack.c.l.b16 %v515_v32  ;;  %v790_v52 = vunpack.c.l.b16 %v517_v58 }
  0xaf   : > { %v503_v17 = vmul.f32 %v6213_v46, %v6175_v45  ;;  %v6251_v23 = vunpack.c.l.b16 %v545_v22  ;;  %v6254_v26 = vunpack.i.l.bf16 %v5991_v6  ;;  %v788_v24 = vunpack.c.h.b16 %v515_v32 }
  0xb0   : > { %v791_v53 = vunpack.c.h.b16 %v517_v58  ;;  %v6256_v56 = vunpack.c.l.b16 %v547_v50  ;;  %v796_v61 = vpack.c.b16 %v790_v52, %v787_v51  ;;  %v681_v63 = vpack.c.b16 %v672_v16, %v669_v7 }
  0xb1   : > { %v6262_v22 = vsel %vm465_vm8, %v6254_v26, %v5994_v8  ;;  %v632_v32 = vunpack.c.h.b16 %v6130_v31  ;;  %v635_v58 = vunpack.c.h.b16 %v6132_v33  ;;  %v476_v7 = vmul.f32 %v6254_v26, %v6037_v44 }
  0xb2   : > { %v797_v55 = vpack.c.b16 %v791_v53, %v788_v24  ;;  %v6280_v31 = vunpack.i.l.bf16 %v6205_v54  ;;  %v6283_v33 = vunpack.i.h.bf16 %v6205_v54  ;;  %v626_v54 = vunpack.c.h.b16 %v6156_v9 }
  0xb3   : > { %v641_v44 = vpack.c.b16 %v635_v58, %v632_v32 }
  0xb4   : > { %893 = vrot.lane.b32.xlu1 %v883_v60, %s5896_s14  ;;  %694 = vrot.lane.b32.xlu0 %v684_v57, %s5893_s11  ;;  %v511_v60 = vpack.c.bf16 %v500_v30, %v499_v29  ;;  %v884_v57 = vpack.c.b16 %v6256_v56, %v6251_v23  ;;  %v6269_v29 = vpop.permute.xlu2 %600  ;;  %v477_v30 = vmul.f32 %v6262_v22, %v6151_v62 }
  0xb5   : > { %885 = vrot.lane.b32.xlu2 %v879_v0, %s5896_s14  ;;  %v513_v0 = vpack.c.bf16 %v503_v17, %v502_v49  ;;  %v479_v49 = vmul.f32 %v6254_v26, %v6101_v48  ;;  %v361_v48 = vmul.f32 %v6280_v31, %v6006_v27  ;;  %v364_v62 = vmul.f32 %v6280_v31, %v6016_v34 }
  0xb6   : > { %v781_v6 = vunpack.c.l.b16 %v511_v60  ;;  %v782_v50 = vunpack.c.h.b16 %v511_v60  ;;  %v486_v17 = vpack.c.bf16 %v477_v30, %v476_v7  ;;  %v6297_v60 = vsel %vm350_vm9, %v6280_v31, %v6283_v33 }
  0xb7   : > { %v784_v16 = vunpack.c.l.b16 %v513_v0  ;;  %v785_v51 = vunpack.c.h.b16 %v513_v0  ;;  %v362_v0 = vmul.f32 %v6297_v60, %v6008_v28  ;;  %v365_v27 = vmul.f32 %v6297_v60, %v6018_v35  ;;  %v607_v28 = vpop.permute.xlu0 %606  ;;  %v6308_v35 = vpop.permute.xlu1 %608 }
  0xb8   : > { %v745_v34 = vunpack.c.h.b16 %v486_v17  ;;  %v356_v23 = vmul.f32 %v6297_v60, %v6030_v41  ;;  %v358_v56 = vmul.f32 %v6280_v31, %v6032_v42 }
  0xb9   : > { %v793_v52 = vpack.c.b16 %v784_v16, %v781_v6  ;;  %v794_v53 = vpack.c.b16 %v785_v51, %v782_v50  ;;  %v371_v9 = vpack.c.bf16 %v362_v0, %v361_v48  ;;  %v373_v58 = vpack.c.bf16 %v365_v27, %v364_v62  ;;  %v5669_v50 = vld [vmem:[#allocation2 + $0x8] sm:$0xf]  ;;  %v5182_v51 = vld [vmem:[#allocation2 + $0x14] sm:$0xf0] }
  0xba   : > { %v615_v48 = vsel %vm412_vm4, %v607_v28, %v6308_v35  ;;  %v868_v62 = vunpack.c.h.b16 %v6207_v15  ;;  %v355_v28 = vmul.f32 %v6280_v31, %v6028_v40 }
  0xbb   : > { %v562_v16 = vunpack.c.l.b16 %v371_v9  ;;  %v565_v30 = vunpack.c.l.b16 %v373_v58 }
  0xbc   : > { %805 = vrot.lane.b32.xlu1 %v796_v61, %s5894_s12  ;;  %688 = vrot.lane.b32.xlu0 %v681_v63, %s5893_s11  ;;  %v744_v61 = vunpack.c.l.b16 %v486_v17  ;;  %v6303_v32 = vpop.permute.xlu2 %850  ;;  %v5185_v17 = vor.u32 %v5669_v50, %v5182_v51  ;;  %v5670_v50 = vld [vmem:[#allocation2 + $0x10] sm:$0xf0] }
  0xbd   : > { %807 = vrot.lane.b32.xlu2 %v797_v55, %s5894_s12  ;;  %v480_v55 = vmul.f32 %v6262_v22, %v6154_v5  ;;  %v629_v5 = vunpack.c.h.b16 %v6158_v11 }
  0xbf   : > { %v488_v24 = vpack.c.bf16 %v480_v55, %v479_v49  ;;  %v638_v7 = vpack.c.b16 %v629_v5, %v626_v54  ;;  %v571_v55 = vpack.c.b16 %v565_v30, %v562_v16  ;;  %v871_v54 = vunpack.c.h.b16 %v6209_v12  ;;  %v603_v0 = vpop.permute.xlu0 %602 }
  0xc0   : > { %v473_v5 = vmul.f32 %v6254_v26, %v6169_v14  ;;  %v613_v41 = vsel %vm412_vm4, %v6269_v29, %v603_v0  ;;  %v533_v29 = vmul.f32 %v6122_v13, %v5989_v3 }
  0xc1   : > { %v747_v63 = vunpack.c.l.b16 %v488_v24  ;;  %v748_v6 = vunpack.c.h.b16 %v488_v24  ;;  %v880_v27 = vpack.c.b16 %v871_v54, %v868_v62  ;;  %v530_v62 = vmul.f32 %v6122_v13, %v5987_v2 }
  0xc3   : > { %v753_v11 = vpack.c.b16 %v747_v63, %v744_v61  ;;  %v754_v49 = vpack.c.b16 %v748_v6, %v745_v34  ;;  %v474_v61 = vmul.f32 %v6262_v22, %v6175_v45  ;;  %v6329_v63 = vpop.permute.xlu1 %604 }
  0xc4   : > { %799 = vrot.lane.b32.xlu1 %v793_v52, %s5894_s12  ;;  %651 = vrot.lane.b32.xlu0 %v641_v44, %s5895_s13  ;;  %v873_v52 = vunpack.c.l.b16 %v6201_v19  ;;  %v876_v44 = vunpack.c.l.b16 %v6203_v1  ;;  %v6312_v24 = vpop.permute.xlu2 %844  ;;  %v470_v19 = vmul.f32 %v6254_v26, %v6166_v18  ;;  %v471_v1 = vmul.f32 %v6262_v22, %v6172_v20 }
  0xc5   : > { %801 = vrot.lane.b32.xlu2 %v794_v53, %s5894_s12  ;;  %v614_v15 = vsel %vm412_vm4, %v603_v0, %v6329_v63  ;;  %v484_v34 = vpack.c.bf16 %v474_v61, %v473_v5  ;;  %v541_v61 = vpack.c.bf16 %v530_v62, %v530_v62  ;;  %v543_v0 = vpack.c.bf16 %v533_v29, %v533_v29 }
  0xc6   : > { %v882_v53 = vpack.c.b16 %v876_v44, %v873_v52  ;;  %v482_v12 = vpack.c.bf16 %v471_v1, %v470_v19  ;;  %v367_v52 = vpack.c.bf16 %v356_v23, %v355_v28  ;;  %v616_v1 = vsel %vm412_vm4, %v6308_v35, %v6236_v4 }
  0xc7   : > { %v742_v14 = vunpack.c.h.b16 %v484_v34  ;;  %v741_v45 = vunpack.c.l.b16 %v484_v34  ;;  %v363_v34 = vmul.f32 %v6283_v33, %v6002_v21  ;;  %v366_v35 = vmul.f32 %v6283_v33, %v6004_v25 }
  0xc8   : > { %v739_v18 = vunpack.c.h.b16 %v482_v12  ;;  %v738_v20 = vunpack.c.l.b16 %v482_v12 }
  0xca   : > { %v751_v30 = vpack.c.b16 %v742_v14, %v739_v18 }
  0xcb   : > { %v849_v40 = vpop.permute.xlu1 %848 }
  0xcc   : > { %762 = vrot.lane.b32.xlu1 %v753_v11, %s5892_s10  ;;  %645 = vrot.lane.b32.xlu0 %v638_v7, %s5895_s13  ;;  %v6333_v6 = vpop.permute.xlu2 %723  ;;  %v563_v11 = vunpack.c.h.b16 %v371_v9  ;;  %v566_v7 = vunpack.c.h.b16 %v373_v58  ;;  %v5180_v58 = vld [vmem:[#allocation2 + $0x4] sm:$0xf]  ;;  %v857_v42 = vsel %vm854_vm10, %v849_v40, %v6303_v32 }
  0xcd   : > { %764 = vrot.lane.b32.xlu2 %v754_v49, %s5892_s10  ;;  %v750_v49 = vpack.c.b16 %v741_v45, %v738_v20  ;;  %v5181_v51 = vor.u32 %v5670_v50, %v5180_v58  ;;  %v372_v45 = vpack.c.bf16 %v363_v34, %v363_v34 }
  0xce   : > { %v572_v16 = vpack.c.b16 %v566_v7, %v563_v11  ;;  %v374_v11 = vpack.c.bf16 %v366_v35, %v366_v35 }
  0xcf   : > { %v564_v21 = vunpack.c.l.b16 %v372_v45 }
  0xd3   : > { %v843_v2 = vpop.permute.xlu1 %842 }
  0xd4   : > { %721 = vrot.lane.b32.xlu1 %v5185_v17, %s5890_s8  ;;  %891 = vrot.lane.b32.xlu0 %v882_v53, %s5896_s14  ;;  %v853_v17 = vpop.permute.xlu0 %852  ;;  %v557_v53 = vunpack.c.h.b16 %v367_v52  ;;  %v855_v18 = vsel %vm854_vm10, %v843_v2, %v6312_v24 }
  0xd5   : > { %950 = vrot.lane.b32.xlu2 %v615_v48, %s5885_s27  ;;  %v858_v23 = vsel %vm854_vm10, %v6303_v32, %v853_v17 }
  0xd7   : > { %v6352_v9 = vpop.permute.xlu2 %760 }
  0xdc   : > { %895 = vrot.lane.b32.xlu1 %v884_v57, %s5896_s14  ;;  %887 = vrot.lane.b32.xlu0 %v880_v27, %s5896_s14  ;;  %v359_v57 = vmul.f32 %v6297_v60, %v6034_v43  ;;  %v556_v43 = vunpack.c.l.b16 %v367_v52  ;;  %v869_v27 = vunpack.c.l.b16 %v541_v61  ;;  %v847_v12 = vpop.permute.xlu0 %846 }
  0xdd   : > { %946 = vrot.lane.b32.xlu2 %v614_v15, %s5885_s27  ;;  %v872_v15 = vunpack.c.l.b16 %v543_v0  ;;  %v856_v20 = vsel %vm854_vm10, %v6312_v24, %v847_v12 }
  0xde   : > { %v369_v44 = vpack.c.bf16 %v359_v57, %v358_v56 }
  0xdf   : > { %v881_v14 = vpack.c.b16 %v872_v15, %v869_v27 }
  0xe0   : > { %v560_v48 = vunpack.c.h.b16 %v369_v44 }
  0xe2   : > { %v569_v5 = vpack.c.b16 %v560_v48, %v557_v53 }
  0xe4   : > { %758 = vrot.lane.b32.xlu1 %v751_v30, %s5892_s10  ;;  %756 = vrot.lane.b32.xlu0 %v750_v49, %s5892_s10  ;;  %v567_v30 = vunpack.c.l.b16 %v374_v11  ;;  %v6388_v49 = vpop.permute.xlu0 %725 }
  0xe5   : > { %938 = vrot.lane.b32.xlu2 %v571_v55, %s5885_s27  ;;  %v559_v55 = vunpack.c.l.b16 %v369_v44 }
  0xe6   : > { %v573_v25 = vpack.c.b16 %v567_v30, %v564_v21 }
  0xe7   : > { %v568_v19 = vpack.c.b16 %v559_v55, %v556_v43 }
  0xec   : > { %944 = vrot.lane.b32.xlu1 %v613_v41, %s5885_s27  ;;  %719 = vrot.lane.b32.xlu0 %v5181_v51, %s5890_s8 }
  0xed   : > { %1024 = vrot.lane.b32.xlu2 %v857_v42, %s5885_s27 }
  0xef   : > { %v6365_v54 = vpop.permute.xlu2 %692 }
  0xf4   : > { %952 = vrot.lane.b32.xlu0 %v616_v1, %s5885_s27  ;;  %932 = vrot.lane.b32.xlu1 %v568_v19, %s5885_s27 }
  0xf5   : > { %934 = vrot.lane.b32.xlu2 %v569_v5, %s5885_s27 }
  0xf7   : > { %v687_v3 = vpop.permute.xlu2 %686 }
  0xfc   : > { %889 = vrot.lane.b32.xlu0 %v881_v14, %s5896_s14  ;;  %1018 = vrot.lane.b32.xlu1 %v855_v18, %s5885_s27 }
  0xfd   : > { %1020 = vrot.lane.b32.xlu2 %v856_v20, %s5885_s27 }
  0xff   : > { %v6384_v7 = vpop.permute.xlu2 %649 }
 0x104   : > { %940 = vrot.lane.b32.xlu0 %v572_v16, %s5885_s27  ;;  %1016 = vrot.lane.b32.xlu1 %v843_v2, %s5885_s27 }
 0x105   : > { %942 = vrot.lane.b32.xlu2 %v573_v25, %s5885_s27 }
 0x106   : > { %v697_v24 = vpop.permute.xlu1 %696 }
 0x107   : > { %v644_v28 = vpop.permute.xlu2 %643 }
 0x10c   : > { %1026 = vrot.lane.b32.xlu0 %v858_v23, %s5885_s27  ;;  %948 = vrot.lane.b32.xlu1 %v6329_v63, %s5885_s27 }
 0x10e   : > { %v6396_v56 = vpop.permute.xlu1 %690  ;;  %v810_v57 = vpop.permute.xlu0 %809 }
 0x10f   : > { %v6398_v16 = vpop.permute.xlu2 %885 }
 0x114   : > { %1022 = vrot.lane.b32.xlu0 %v849_v40, %s5885_s27  ;;  %978 = vrot.lane.b32.xlu1 %v697_v24, %s5885_s27 }
 0x116   : > { %v654_v58 = vpop.permute.xlu1 %653  ;;  %v6402_v50 = vpop.permute.xlu0 %803 }
 0x117   : > { %v808_v32 = vpop.permute.xlu2 %807 }
 0x11c   : > { %954 = vrot.lane.b32.xlu0 %v6236_v4, %s5885_s27  ;;  %966 = vrot.lane.b32.xlu1 %v654_v58, %s5885_s27 }
 0x11e   : > { %v648_v51 = vpop.permute.xlu1 %647  ;;  %v767_v63 = vpop.permute.xlu0 %766 }
 0x11f   : > { %960 = vrot.lane.b32.xlu2 %v648_v51, %s5885_s27  ;;  %v6412_v44 = vpop.permute.xlu2 %801 }
 0x124   : > { %972 = vrot.lane.b32.xlu0 %v6396_v56, %s5885_s27 }
 0x126   : > { %v6410_v52 = vpop.permute.xlu1 %893  ;;  %v695_v40 = vpop.permute.xlu0 %694 }
 0x127   : > { %v6417_v42 = vpop.permute.xlu2 %764  ;;  %v702_v17 = vsel %vm698_vm11, %v695_v40, %v697_v24  ;;  %v701_v45 = vsel %vm698_vm11, %v6365_v54, %v695_v40 }
 0x128   : > { %v772_v25 = vsel %vm768_vm15, %v6417_v42, %v767_v63 }
 0x12c   : > { %1028 = vrot.lane.b32.xlu0 %v6398_v16, %s5885_s27 }
 0x12e   : > { %v806_v41 = vpop.permute.xlu1 %805  ;;  %v689_v4 = vpop.permute.xlu0 %688 }
 0x12f   : > { %1010 = vrot.lane.b32.xlu2 %v806_v41, %s5885_s27  ;;  %v6422_v53 = vpop.permute.xlu2 %950  ;;  %v699_v29 = vsel %vm698_vm11, %v687_v3, %v689_v4  ;;  %v815_v3 = vsel %vm811_vm13, %v808_v32, %v810_v57  ;;  %v814_v14 = vsel %vm811_vm13, %v806_v41, %v808_v32  ;;  %v700_v54 = vsel %vm698_vm11, %v689_v4, %v6396_v56 }
 0x130   : > { %v729_v56 = vsel %vm350_vm9, %v6333_v6, %v6388_v49 }
 0x136   : > { %v800_v43 = vpop.permute.xlu1 %799  ;;  %v652_v55 = vpop.permute.xlu0 %651 }
 0x137   : > { %1004 = vrot.lane.b32.xlu0 %v800_v43, %s5885_s27  ;;  %976 = vrot.lane.b32.xlu2 %v702_v17, %s5885_s27  ;;  %v659_v19 = vsel %vm655_vm12, %v652_v55, %v654_v58  ;;  %v6430_v1 = vpop.permute.xlu2 %946  ;;  %v812_v18 = vsel %vm811_vm13, %v800_v43, %v6412_v44 }
 0x13e   : > { %v6424_v48 = vpop.permute.xlu1 %762  ;;  %v646_v62 = vpop.permute.xlu0 %645 }
 0x13f   : > { %968 = vrot.lane.b32.xlu0 %v699_v29, %s5885_s27  ;;  %964 = vrot.lane.b32.xlu2 %v659_v19, %s5885_s27  ;;  %v657_v0 = vsel %vm655_vm12, %v646_v62, %v648_v51  ;;  %v656_v2 = vsel %vm655_vm12, %v644_v28, %v646_v62  ;;  %v6444_v34 = vpop.permute.xlu2 %938  ;;  %v357_v28 = vmul.f32 %v6283_v33, %v6020_v36  ;;  %v1349_v19 = vld [vmem:[#allocation2 + $0x3c] sm:$0xf] }
 0x140   : > { %v658_v36 = vsel %vm655_vm12, %v6384_v7, %v652_v55  ;;  %v813_v29 = vsel %vm811_vm13, %v6412_v44, %v6402_v50  ;;  %v5296_v44 = vld [vmem:[#allocation2 + $0xc] sm:$0xf] }
 0x141   : > { %v368_v57 = vpack.c.bf16 %v357_v28, %v357_v28 }
 0x146   : > { %v6432_v5 = vpop.permute.xlu1 %721  ;;  %v892_v61 = vpop.permute.xlu0 %891 }
 0x147   : > { %958 = vrot.lane.b32.xlu0 %v657_v0, %s5885_s27  ;;  %956 = vrot.lane.b32.xlu2 %v656_v2, %s5885_s27  ;;  %v900_v12 = vsel %vm897_vm14, %v892_v61, %v6410_v52  ;;  %v6458_v11 = vpop.permute.xlu2 %1024 }
 0x148   : > { %1034 = vrot.lane.b32.xlu1 %v892_v61, %s5885_s27 }
 0x14e   : > { %v6439_v27 = vpop.permute.xlu1 %895  ;;  %v888_v15 = vpop.permute.xlu0 %887 }
 0x14f   : > { %1014 = vrot.lane.b32.xlu0 %v815_v3, %s5885_s27  ;;  %1036 = vrot.lane.b32.xlu2 %v900_v12, %s5885_s27  ;;  %v6477_v23 = vpop.permute.xlu2 %934  ;;  %v898_v17 = vsel %vm897_vm14, %v6398_v16, %v888_v15  ;;  %v1347_v16 = vld [vmem:[#allocation2 + $0x2c] sm:$0xf]  ;;  %v6526_v12 = vunpack.c.l.bf16 %v1349_v19 }
 0x150   : > { %998 = vrot.lane.b32.xlu1 %v6424_v48, %s5885_s27  ;;  %v6516_v2 = vunpack.c.l.bf16 %v1347_v16 }
 0x156   : > { %v757_v35 = vpop.permute.xlu0 %756  ;;  %v759_v20 = vpop.permute.xlu1 %758 }
 0x157   : > { %1006 = vrot.lane.b32.xlu0 %v812_v18, %s5885_s27  ;;  %1012 = vrot.lane.b32.xlu2 %v814_v14, %s5885_s27  ;;  %v770_v30 = vsel %vm768_vm15, %v759_v20, %v6352_v9  ;;  %v360_v9 = vmul.f32 %v6283_v33, %v6026_v39  ;;  %v769_v51 = vsel %vm768_vm15, %v757_v35, %v759_v20  ;;  %v558_v39 = vunpack.c.l.b16 %v368_v57  ;;  %v6492_v41 = vpop.permute.xlu2 %1020  ;;  %v5689_v18 = vld [vmem:[#allocation2 + $0x2c] sm:$0xf0] }
 0x158   : > { %974 = vrot.lane.b32.xlu1 %v701_v45, %s5885_s27  ;;  %v1390_v14 = vmul.f32 %v6077_v10, %v6516_v2  ;;  %v1393_v20 = vmul.f32 %v6077_v10, %v6526_v12 }
 0x159   : > { %v370_v58 = vpack.c.bf16 %v360_v9, %v360_v9 }
 0x15b   : > { %v561_v63 = vunpack.c.l.b16 %v370_v58 }
 0x15d   : > { %v570_v4 = vpack.c.b16 %v561_v63, %v558_v39 }
 0x15e   : > { %v6460_v21 = vpop.permute.xlu0 %719  ;;  %v6471_v24 = vpop.permute.xlu1 %944 }
 0x15f   : > { %996 = vrot.lane.b32.xlu0 %v770_v30, %s5885_s27  ;;  %1002 = vrot.lane.b32.xlu2 %v772_v25, %s5885_s27  ;;  %v6503_v62 = vpop.permute.xlu2 %942  ;;  %v1343_v25 = vld [vmem:[#allocation2 + $0xc] sm:$0xf] }
 0x160   : > { %970 = vrot.lane.b32.xlu1 %v700_v54, %s5885_s27  ;;  %v1401_v54 = vpack.c.bf16 %v1393_v20, %v1393_v20  ;;  %v6533_v9 = vunpack.c.l.bf16 %v1343_v25  ;;  %v1413_v20 = vmul.f32 %v6122_v13, %v6526_v12 }
 0x162   : > { %v1364_v39 = vmul.f32 %v5994_v8, %v6533_v9 }
 0x166   : > { %v6479_v32 = vpop.permute.xlu0 %952  ;;  %v6490_v40 = vpop.permute.xlu1 %932 }
 0x167   : > { %988 = vrot.lane.b32.xlu0 %v729_v56, %s5885_s27  ;;  %994 = vrot.lane.b32.xlu2 %v769_v51, %s5885_s27  ;;  %v5308_v51 = vld [vmem:[#allocation2 + $0x2c] sm:$0xf] }
 0x168   : > { %962 = vrot.lane.b32.xlu1 %v658_v36, %s5885_s27  ;;  %v5700_v36 = vld [vmem:[#allocation2 + $0x38] sm:$0xf0] }
 0x169   : > { %v5309_v19 = vor.u32 %v5700_v36, %v5308_v51  ;;  %v901_v36 = vsel %vm897_vm14, %v6410_v52, %v6439_v27 }
 0x16e   : > { %v890_v43 = vpop.permute.xlu0 %889  ;;  %v6499_v7 = vpop.permute.xlu1 %1018 }
 0x16f   : > { %936 = vrot.lane.b32.xlu0 %v570_v4, %s5885_s27  ;;  %992 = vrot.lane.b32.xlu2 %v757_v35, %s5885_s27  ;;  %v899_v0 = vsel %vm897_vm14, %v888_v15, %v890_v43  ;;  %v5697_v15 = vld [vmem:[#allocation2 + $0x18] sm:$0xf0]  ;;  %v5260_v35 = vld [vmem:[#allocation2 + $0x20] sm:$0xf]  ;;  %v1661_v43 = vunpack.c.l.b16 %v1401_v54 }
 0x170   : > { %1030 = vrot.lane.b32.xlu1 %v898_v17, %s5885_s27  ;;  %v5297_v45 = vor.u32 %v5697_v15, %v5296_v44  ;;  %v5261_v30 = vor.u32 %v5689_v18, %v5260_v35 }
 0x176   : > { %v6501_v55 = vpop.permute.xlu0 %940  ;;  %v1017_v3 = vpop.permute.xlu1 %1016 }
 0x177   : > { %986 = vrot.lane.b32.xlu0 %v6333_v6, %s5885_s27  ;;  %984 = vrot.lane.b32.xlu2 %v6432_v5, %s5885_s27  ;;  %v771_v6 = vsel %vm768_vm15, %v6424_v48, %v6417_v42  ;;  %v1399_v42 = vpack.c.bf16 %v1390_v14, %v1390_v14  ;;  %v1345_v48 = vld [vmem:[#allocation2 + $0x1c] sm:$0xf]  ;;  %v1069_v16 = vsel %vm9099_vm6, %v1017_v3, %v6499_v7 }
 0x178   : > { %1008 = vrot.lane.b32.xlu1 %v813_v29, %s5885_s27  ;;  %v6539_v58 = vunpack.c.l.bf16 %v1345_v48  ;;  %v1384_v29 = vmul.f32 %v6077_v10, %v6533_v9  ;;  %v728_v14 = vsel %vm350_vm9, %v6460_v21, %v6432_v5  ;;  %v1410_v3 = vmul.f32 %v6122_v13, %v6516_v2 }
 0x179   : > { %v6524_v50 = vpop.permute.xlu2 %960  ;;  %v1658_v56 = vunpack.c.l.b16 %v1399_v42 }
 0x17a   : > { %v1367_v17 = vmul.f32 %v5994_v8, %v6539_v58  ;;  %v1395_v15 = vpack.c.bf16 %v1384_v29, %v1384_v29  ;;  %v1419_v5 = vpack.c.bf16 %v1410_v3, %v1410_v3  ;;  %v5248_v29 = vld [vmem:[#allocation2] sm:$0xf]  ;;  %v1404_v3 = vmul.f32 %v6122_v13, %v6533_v9 }
 0x17c   : > { %v1377_v44 = vpack.c.bf16 %v1367_v17, %v1367_v17  ;;  %v1652_v48 = vunpack.c.l.b16 %v1395_v15 }
 0x17e   : > { %v6513_v61 = vpop.permute.xlu0 %1026  ;;  %v6545_v63 = vpop.permute.xlu1 %948  ;;  %v1613_v42 = vunpack.c.l.b16 %v1377_v44 }
 0x17f   : > { %1032 = vrot.lane.b32.xlu0 %v899_v0, %s5885_s27  ;;  %980 = vrot.lane.b32.xlu2 %v6460_v21, %s5885_s27  ;;  %v1375_v0 = vpack.c.bf16 %v1364_v39, %v1364_v39  ;;  %v1421_v21 = vpack.c.bf16 %v1413_v20, %v1413_v20 }
 0x180   : > { %1000 = vrot.lane.b32.xlu1 %v771_v6, %s5885_s27  ;;  %v1667_v6 = vpack.c.b16 %v1661_v43, %v1658_v56  ;;  %v1742_v43 = vunpack.c.l.b16 %v1419_v5 }
 0x181   : > { %v1610_v25 = vunpack.c.l.b16 %v1375_v0  ;;  %v1745_v17 = vunpack.c.l.b16 %v1421_v21 }
 0x186   : > { %v1023_v28 = vpop.permute.xlu0 %1022 }
 0x187   : > { %1714 = vrot.lane.b32.xlu0 %v5297_v45, %s5891_s9  ;;  %1480 = vrot.lane.b32.xlu2 %v5261_v30, %s5886_s28  ;;  %v1071_v57 = vsel %vm9099_vm6, %v1023_v28, %v6458_v11  ;;  %v979_v45 = vpop.permute.xlu1 %978 }
 0x188   : > { %990 = vrot.lane.b32.xlu1 %v6388_v49, %s5885_s27  ;;  %1139 = vmatpush.bf16.msra.mxu1 %v1071_v57  ;;  %v1387_v49 = vmul.f32 %v6077_v10, %v6539_v58  ;;  %v1622_v57 = vpack.c.b16 %v1613_v42, %v1610_v25 }
 0x189   : > { %v6547_v4 = vpop.permute.xlu2 %1010 }
 0x18a   : > { %v1397_v35 = vpack.c.bf16 %v1387_v49, %v1387_v49  ;;  %v5686_v49 = vld [vmem:[#allocation2 + $0xc] sm:$0xf0] }
 0x18b   : > { %v5249_v0 = vor.u32 %v5686_v49, %v5248_v29 }
 0x18c   : > { %1140 = vmatpush.bf16.msra.mxu1 %v1069_v16  ;;  %v1655_v54 = vunpack.c.l.b16 %v1397_v35  ;;  %v1370_v16 = vmul.f32 %v5994_v8, %v6516_v2  ;;  %v1407_v2 = vmul.f32 %v6122_v13, %v6539_v58 }
 0x18e   : > { %v6557_v18 = vpop.permute.xlu0 %954  ;;  %v1664_v56 = vpack.c.b16 %v1655_v54, %v1652_v48  ;;  %v1379_v44 = vpack.c.bf16 %v1370_v16, %v1370_v16 }
 0x18f   : > { %1678 = vrot.lane.b32.xlu0 %v1667_v6, %s5894_s12  ;;  %1720 = vrot.lane.b32.xlu2 %v5309_v19, %s5891_s9  ;;  %v1373_v19 = vmul.f32 %v5994_v8, %v6526_v12  ;;  %v1751_v6 = vpack.c.b16 %v1745_v17, %v1742_v43  ;;  %v1415_v12 = vpack.c.bf16 %v1404_v3, %v1404_v3  ;;  %v967_v9 = vpop.permute.xlu1 %966 }
 0x190   : > { %982 = vrot.lane.b32.xlu1 %v728_v14, %s5885_s27  ;;  %v1616_v35 = vunpack.c.l.b16 %v1379_v44 }
 0x191   : > { %v977_v30 = vpop.permute.xlu2 %976  ;;  %v1381_v15 = vpack.c.bf16 %v1373_v19, %v1373_v19  ;;  %v1736_v48 = vunpack.c.l.b16 %v1415_v12  ;;  %v5228_v12 = vld [vmem:[%s9081_s1 + $0x8] sm:$0xf] }
 0x192   : > { %v1056_v28 = vsel %vm9099_vm6, %v977_v30, %v979_v45  ;;  %v1417_v45 = vpack.c.bf16 %v1407_v2, %v1407_v2 }
 0x193   : > { %1177 = vmatpush.bf16.msra.mxu3 %v1056_v28  ;;  %v1619_v14 = vunpack.c.l.b16 %v1381_v15 }
 0x194   : > { %v1739_v54 = vunpack.c.l.b16 %v1417_v45 }
 0x195   : > { %v1625_v20 = vpack.c.b16 %v1619_v14, %v1616_v35 }
 0x196   : > { %v973_v51 = vpop.permute.xlu0 %972  ;;  %v1748_v28 = vpack.c.b16 %v1739_v54, %v1736_v48  ;;  %v1046_v48 = vsel %vm9099_vm6, %v6430_v1, %v6545_v63  ;;  %v1072_v54 = vsel %vm9099_vm6, %v6458_v11, %v6513_v61  ;;  %v1070_v63 = vsel %vm9099_vm6, %v6499_v7, %v6492_v41 }
 0x197   : > { %1630 = vrot.lane.b32.xlu0 %v1622_v57, %s5892_s10  ;;  %1672 = vrot.lane.b32.xlu2 %v1664_v56, %s5894_s12 }
 0x198   : > { %1038 = vrot.lane.b32.xlu1 %v901_v36, %s5885_s27 }
 0x199   : > { %v965_v39 = vpop.permute.xlu2 %964 }
 0x19a   : > { %v1052_v15 = vsel %vm9099_vm6, %v965_v39, %v967_v9  ;;  %v5662_v9 = vld [vmem:[%s9081_s1 + $0x28] sm:$0xf0] }
 0x19e   : > { %v1029_v52 = vpop.permute.xlu0 %1028 }
 0x19f   : > { %1762 = vrot.lane.b32.xlu0 %v1751_v6, %s5896_s14 }
 0x1a0   : > { %1474 = vrot.lane.b32.xlu1 %v5249_v0, %s5886_s28 }
 0x1a1   : > { %v957_v27 = vpop.permute.xlu2 %956 }
 0x1a8   : > { %1636 = vrot.lane.b32.xlu1 %v1625_v20, %s5892_s10 }
 0x1a9   : > { %v1005_v25 = vpop.permute.xlu0 %1004  ;;  %v6587_v42 = vpop.permute.xlu2 %1036 }
 0x1b0   : > { %1756 = vrot.lane.b32.xlu1 %v1748_v28, %s5896_s14 }
 0x1b1   : > { %v969_v57 = vpop.permute.xlu0 %968  ;;  %v6590_v56 = vpop.permute.xlu2 %1012 }
 0x1b2   : > { %v1067_v58 = vsel %vm9099_vm6, %v6547_v4, %v6590_v56 }
 0x1b3   : > { %1141 = vmatpush.bf16.msra.mxu1 %v1067_v58 }
 0x1b9   : > { %v959_v5 = vpop.permute.xlu0 %958  ;;  %v1003_v35 = vpop.permute.xlu2 %1002 }
 0x1ba   : > { %v1035_v21 = vpop.permute.xlu1 %1034  ;;  %v1049_v20 = vsel %vm9099_vm6, %v957_v27, %v959_v5  ;;  %v1047_v27 = vsel %vm9099_vm6, %v6422_v53, %v6479_v32  ;;  %v1045_v53 = vsel %vm9099_vm6, %v6471_v24, %v6430_v1  ;;  %v5220_v1 = vld [vmem:[%s9081_s1] sm:$0xf]  ;;  %v5658_v24 = vld [vmem:[%s9081_s1 + $0x8] sm:$0xf0] }
 0x1bb   : > { %v1075_v36 = vsel %vm9099_vm6, %v1035_v21, %v6587_v42  ;;  %v5221_v28 = vor.u32 %v5658_v24, %v5220_v1 }
 0x1bc   : > { %1164 = vmatpush.bf16.msra.mxu2 %v1075_v36 }
 0x1c1   : > { %v1015_v43 = vpop.permute.xlu0 %1014 }
 0x1c2   : > { %v6597_v17 = vpop.permute.xlu1 %998  ;;  %v1068_v7 = vsel %vm9099_vm6, %v6590_v56, %v1015_v43 }
 0x1c9   : > { %v1007_v29 = vpop.permute.xlu0 %1006 }
 0x1ca   : > { %v975_v49 = vpop.permute.xlu1 %974  ;;  %v1065_v16 = vsel %vm9099_vm6, %v1005_v25, %v1007_v29  ;;  %v995_v25 = vpop.permute.xlu2 %994 }
 0x1cb   : > { %v1055_v19 = vsel %vm9099_vm6, %v975_v49, %v977_v30  ;;  %1142 = vmatpush.bf16.msra.mxu1 %v1065_v16  ;;  %v1050_v30 = vsel %vm9099_vm6, %v959_v5, %v6524_v50  ;;  %v5232_v16 = vld [vmem:[%s9081_s1 + $0x18] sm:$0xf] }
 0x1cc   : > { %1120 = vmatpush.bf16.msra.mxu0 %v1055_v19  ;;  %v5661_v19 = vld [vmem:[%s9081_s1 + $0x20] sm:$0xf0] }
 0x1d1   : > { %v6603_v44 = vpop.permute.xlu0 %996 }
 0x1d2   : > { %v971_v0 = vpop.permute.xlu1 %970  ;;  %v1062_v43 = vsel %vm9099_vm6, %v995_v25, %v6603_v44 }
 0x1d3   : > { %v1053_v4 = vsel %vm9099_vm6, %v969_v57, %v971_v0  ;;  %v1054_v6 = vsel %vm9099_vm6, %v971_v0, %v973_v51  ;;  %v1048_v51 = vsel %vm9099_vm6, %v6479_v32, %v6557_v18  ;;  %v1044_v32 = vsel %vm9099_vm6, %v6501_v55, %v6503_v62  ;;  %v993_v62 = vpop.permute.xlu2 %992  ;;  %v5240_v57 = vld [vmem:[%s9081_s1 + $0x20] sm:$0xf] }
 0x1d4   : > { %1121 = vmatpush.bf16.msra.mxu0 %v1053_v4  ;;  %1178 = vmatpush.bf16.msra.mxu3 %v1054_v6  ;;  %v1061_v5 = vsel %vm9099_vm6, %v993_v62, %v995_v25  ;;  %v5233_v0 = vor.u32 %v5661_v19, %v5232_v16  ;;  %v5657_v4 = vld [vmem:[%s9081_s1 + $0x4] sm:$0xf]  ;;  %v5222_v6 = vld [vmem:[%s9081_s1 + $0xc] sm:$0xf0] }
 0x1d8   : > { %1179 = vmatpush.bf16.msra.mxu3 %v1052_v15 }
 0x1d9   : > { %v989_v2 = vpop.permute.xlu0 %988 }
 0x1da   : > { %v963_v14 = vpop.permute.xlu1 %962 }
 0x1db   : > { %v1051_v3 = vsel %vm9099_vm6, %v963_v14, %v965_v39  ;;  %v5659_v39 = vld [vmem:[%s9081_s1 + $0x10] sm:$0xf0]  ;;  %v985_v21 = vpop.permute.xlu2 %984 }
 0x1dc   : > { %1122 = vmatpush.bf16.msra.mxu0 %v1051_v3  ;;  %1180 = vmatpush.bf16.msra.mxu3 %v1050_v30  ;;  %v6626_v18 = vor.u32 %v5659_v39, %v5228_v12  ;;  %v5225_v3 = vor.u32 %v5657_v4, %v5222_v6  ;;  %v5660_v12 = vld [vmem:[%s9081_s1 + $0x1c] sm:$0xf]  ;;  %v5234_v39 = vld [vmem:[%s9081_s1 + $0x24] sm:$0xf0] }
 0x1e0   : > { %1123 = vmatpush.bf16.msra.mxu0 %v1049_v20  ;;  %1181 = vmatpush.bf16.msra.mxu3 %v1048_v51 }
 0x1e1   : > { %v937_v11 = vpop.permute.xlu0 %936 }
 0x1e2   : > { %v6619_v50 = vpop.permute.xlu1 %1030  ;;  %v1042_v41 = vsel %vm9099_vm6, %v6477_v23, %v937_v11 }
 0x1e3   : > { %v1073_v45 = vsel %vm9099_vm6, %v1029_v52, %v6619_v50  ;;  %v1043_v52 = vsel %vm9099_vm6, %v6444_v34, %v6501_v55  ;;  %v1041_v34 = vsel %vm9099_vm6, %v6490_v40, %v6477_v23  ;;  %v5241_v40 = vor.u32 %v5662_v9, %v5240_v57  ;;  %v981_v44 = vpop.permute.xlu2 %980 }
 0x1e4   : > { %1124 = vmatpush.bf16.msra.mxu0 %v1047_v27  ;;  %1165 = vmatpush.bf16.msra.mxu2 %v1073_v45  ;;  %v5237_v27 = vor.u32 %v5660_v12, %v5234_v39 }
 0x1e5   : > { %1182 = vmatpush.bf16.msra.mxu3 %v1046_v48 }
 0x1e7   : > { %5242 = vmatmul.msk.bf16.vlgmr.msra.gmra.mxu2 %vm9098_vm0, %v6626_v18 }
 0x1e8   : > { %1196 = vmatpush.bf16.msrb.mxu2 %v1072_v54  ;;  %1125 = vmatpush.bf16.msra.mxu0 %v1045_v53 }
 0x1e9   : > { %1183 = vmatpush.bf16.msra.mxu3 %v1044_v32  ;;  %v987_v36 = vpop.permute.xlu0 %986 }
 0x1ea   : > { %v1009_v61 = vpop.permute.xlu1 %1008  ;;  %v1059_v49 = vsel %vm9099_vm6, %v987_v36, %v989_v2 }
 0x1eb   : > { %v1066_v55 = vsel %vm9099_vm6, %v1007_v29, %v1009_v61 }
 0x1ec   : > { %1197 = vmatpush.bf16.msrb.mxu2 %v1070_v63  ;;  %1126 = vmatpush.bf16.msra.mxu0 %v1043_v52 }
 0x1ed   : > { %1184 = vmatpush.bf16.msra.mxu3 %v1042_v41 }
 0x1f0   : > { %1198 = vmatpush.bf16.msrb.mxu2 %v1068_v7  ;;  %1127 = vmatpush.bf16.msra.mxu0 %v1041_v34 }
 0x1f1   : > { %1185 = vmatmul.bf16.vlgmr.msra.gmra.mxu3 %v5221_v28  ;;  %v1033_v20 = vpop.permute.xlu0 %1032 }
 0x1f2   : > { %v1001_v56 = vpop.permute.xlu1 %1000  ;;  %v1074_v51 = vsel %vm9099_vm6, %v6619_v50, %v1033_v20 }
 0x1f3   : > { %1128 = vmatmul.bf16.vlgmr.msra.gmra.mxu0 %v5221_v28  ;;  %v1063_v58 = vsel %vm9099_vm6, %v6597_v17, %v1001_v56  ;;  %v1064_v23 = vsel %vm9099_vm6, %v1001_v56, %v1003_v35 }
 0x1f4   : > { %1199 = vmatpush.bf16.msrb.mxu2 %v1066_v55  ;;  %1143 = vmatpush.bf16.msra.mxu1 %v1063_v58 }
 0x1f7   : > { %5243 = vmatmul.msk.bf16.gmra.mxu2 %vm9098_vm0, %v5241_v40 }
 0x1f8   : > { %1200 = vmatpush.bf16.msrb.mxu2 %v1064_v23  ;;  %1144 = vmatpush.bf16.msra.mxu1 %v1061_v5 }
 0x1fa   : > { %v991_v29 = vpop.permute.xlu1 %990 }
 0x1fb   : > { %v1060_v17 = vsel %vm9099_vm6, %v989_v2, %v991_v29 }
 0x1fc   : > { %1201 = vmatpush.bf16.msrb.mxu2 %v1062_v43  ;;  %1145 = vmatpush.bf16.msra.mxu1 %v1059_v49 }
 0x200   : > { %1202 = vmatpush.bf16.msrb.mxu2 %v1060_v17 }
 0x201   : > { %1190 = vmatmul.bf16.gmra.mxu3 %v5233_v0 }
 0x202   : > { %v983_v15 = vpop.permute.xlu1 %982 }
 0x203   : > { %1133 = vmatmul.bf16.gmra.mxu0 %v5233_v0  ;;  %v1057_v35 = vsel %vm9099_vm6, %v981_v44, %v983_v15  ;;  %v1058_v14 = vsel %vm9099_vm6, %v983_v15, %v985_v21 }
 0x204   : > { %1146 = vmatpush.bf16.msra.mxu1 %v1057_v35  ;;  %1203 = vmatpush.bf16.msrb.mxu2 %v1058_v14 }
 0x207   : > { %1147 = vmatmul.bf16.vlgmr.msra.gmra.mxu1 %v5225_v3  ;;  %1204 = vmatmul.bf16.vlgmr.msrb.gmra.mxu2 %v5225_v3 }
 0x20a   : > { %v1039_v30 = vpop.permute.xlu1 %1038 }
 0x20b   : > { %v1076_v2 = vsel %vm9099_vm6, %v6587_v42, %v1039_v30 }
 0x20c   : > { %1221 = vmatpush.bf16.msrb.mxu0 %v1076_v2 }
 0x210   : > { %1222 = vmatpush.bf16.msrb.mxu0 %v1074_v51 }
 0x213   : > { %5244 = vmatmul.msk.bf16.vlgmr.msrb.gmra.mxu0 %vm9098_vm0, %v6626_v18 }
 0x217   : > { %1152 = vmatmul.bf16.gmra.mxu1 %v5237_v27  ;;  %1209 = vmatmul.bf16.gmra.mxu2 %v5237_v27 }
 0x223   : > { %5245 = vmatmul.msk.bf16.gmra.mxu0 %vm9098_vm0, %v5241_v40 }
 0x26a   : > { %v1167_v42 = vpop.f32.mrf.mxu2 }
 0x270   : > { %v1129_v45 = vpop.f32.mrf.mxu0 }
 0x272   : > { %v1169_v50 = vpop.f32.mrf.mxu2 }
 0x274   : > { %v1186_v63 = vpop.f32.mrf.mxu3 }
 0x278   : > { %v1131_v25 = vpop.f32.mrf.mxu0 }
 0x27a   : > { %v1172_v48 = vpop.f32.mrf.mxu2 }
 0x27c   : > { %v1188_v41 = vpop.f32.mrf.mxu3 }
 0x280   : > { %v1134_v54 = vpop.f32.mrf.mxu0 }
 0x282   : > { %v1174_v53 = vpop.f32.mrf.mxu2 }
 0x284   : > { %v1148_v32 = vpop.f32.mrf.mxu1  ;;  %v1191_v5 = vpop.f32.mrf.mxu3 }
 0x285   : > { %v1149_v52 = vadd.f32 %v1148_v32, %v1129_v45 }
 0x287   : > { %v1168_v18 = vadd.f32 %v1167_v42, %v1149_v52 }
 0x288   : > { %v1136_v11 = vpop.f32.mrf.mxu0 }
 0x289   : > { %v1234_v34 = vmax.f32 %v1168_v18, 0.0 }
 0x28a   : > { %v1205_v61 = vpop.f32.mrf.mxu2 }
 0x28b   : > { %v1206_v24 = vadd.f32 %v1205_v61, %v1186_v63 }
 0x28c   : > { %v1150_v1 = vpop.f32.mrf.mxu1  ;;  %v1193_v15 = vpop.f32.mrf.mxu3 }
 0x28d   : > { %v1151_v55 = vadd.f32 %v1150_v1, %v1131_v25 }
 0x28f   : > { %v1170_v58 = vadd.f32 %v1169_v50, %v1151_v55 }
 0x290   : > { %v1224_v7 = vpop.f32.mrf.mxu0 }
 0x291   : > { %v1225_v62 = vadd.f32 %v1224_v7, %v1206_v24  ;;  %v1236_v43 = vmax.f32 %v1170_v58, 0.0 }
 0x292   : > { %v1207_v28 = vpop.f32.mrf.mxu2 }
 0x293   : > { %v1235_v57 = vmax.f32 %v1225_v62, 0.0  ;;  %v1208_v23 = vadd.f32 %v1207_v28, %v1188_v41 }
 0x294   : > { %v1153_v56 = vpop.f32.mrf.mxu1 }
 0x295   : > { %v1250_v9 = vpack.c.bf16 %v1235_v57, %v1234_v34  ;;  %v1154_v29 = vadd.f32 %v1153_v56, %v1134_v54 }
 0x297   : > { %1254 = vst [vmem:[#allocation2 + $0x4] sm:$0xff] %v1250_v9  ;;  %v1173_v19 = vadd.f32 %v1172_v48, %v1154_v29  ;;  %v6729_v57 = vunpack.c.l.bf16 %v1250_v9 }
 0x298   : > { %v1226_v40 = vpop.f32.mrf.mxu0 }
 0x299   : > { %v1227_v21 = vadd.f32 %v1226_v40, %v1208_v23  ;;  %v1238_v30 = vmax.f32 %v1173_v19, 0.0  ;;  %v6736_v40 = vunpack.c.h.bf16 %v1250_v9 }
 0x29a   : > { %v1210_v36 = vpop.f32.mrf.mxu2 }
 0x29b   : > { %v1237_v49 = vmax.f32 %v1227_v21, 0.0  ;;  %v1211_v16 = vadd.f32 %v1210_v36, %v1191_v5 }
 0x29c   : > { %v1155_v4 = vpop.f32.mrf.mxu1 }
 0x29d   : > { %v1251_v17 = vpack.c.bf16 %v1237_v49, %v1236_v43  ;;  %v1156_v2 = vadd.f32 %v1155_v4, %v1136_v11 }
 0x29e   : > { %v1258_v0 = vld [vmem:[#allocation2] sm:$0xff]  ;;  %v5695_v27 = vld [vmem:[#allocation2 + $0x8] sm:$0xf] }
 0x29f   : > { %1255 = vst [vmem:[#allocation2 + $0x14] sm:$0xff] %v1251_v17  ;;  %v6704_v14 = vunpack.c.l.bf16 %v1258_v0  ;;  %v6706_v3 = vunpack.c.h.bf16 %v1258_v0  ;;  %v5288_v51 = vld [vmem:[#allocation2 + $0x4] sm:$0xf]  ;;  %v1259_v45 = vld [vmem:[#allocation2 + $0x8] sm:$0xf]  ;;  %v1175_v63 = vadd.f32 %v1174_v53, %v1156_v2  ;;  %v6719_v62 = vunpack.c.l.bf16 %v1251_v17 }
 0x2a0   : > { %v1229_v6 = vpop.f32.mrf.mxu0  ;;  %v5685_v42 = vld [vmem:[#allocation2 + $0x4] sm:$0xf]  ;;  %v6721_v28 = vunpack.c.h.bf16 %v1251_v17  ;;  %v6725_v53 = vunpack.c.l.bf16 %v1259_v45  ;;  %v5691_v0 = vld [vmem:[#allocation2 + $0x8] sm:$0xf] }
 0x2a1   : > { %v1230_v44 = vadd.f32 %v1229_v6, %v1211_v16  ;;  %v1318_v54 = vmul.f32 %v6024_v38, %v6704_v14  ;;  %v1319_v32 = vmul.f32 %v6706_v3, %v6046_v47  ;;  %v1240_v5 = vmax.f32 %v1175_v63, 0.0  ;;  %v5256_v4 = vld [vmem:[#allocation2 + $0x8] sm:$0xf]  ;;  %v5272_v63 = vld [vmem:[#allocation2 + $0x4] sm:$0xf] }
 0x2a2   : > { %v1212_v35 = vpop.f32.mrf.mxu2  ;;  %v1385_v17 = vmul.f32 %v6191_v59, %v6719_v62  ;;  %v1386_v16 = vmul.f32 %v6721_v28, %v6213_v46  ;;  %v1320_v9 = vmul.f32 %v6022_v37, %v6725_v53 }
 0x2a3   : > { %v1239_v20 = vmax.f32 %v1230_v44, 0.0  ;;  %v1213_v39 = vadd.f32 %v1212_v35, %v1193_v15  ;;  %v1330_v23 = vpack.c.bf16 %v1319_v32, %v1318_v54  ;;  %v1382_v15 = vmul.f32 %v6191_v59, %v6729_v57 }
 0x2a4   : > { %v1383_v35 = vmul.f32 %v6736_v40, %v6213_v46 }
 0x2a5   : > { %v6708_v12 = vpack.c.bf16 %v1239_v20, %v1238_v30  ;;  %v1540_v6 = vunpack.c.l.b16 %v1330_v23 }
 0x2a6   : > { %v5696_v50 = vld [vmem:[#allocation2 + $0x10] sm:$0xf0]  ;;  %v5290_v25 = vld [vmem:[#allocation2 + $0x14] sm:$0xf0] }
 0x2a7   : > { %v5250_v48 = vld [vmem:[#allocation2 + $0x10] sm:$0xf0]  ;;  %1256 = vst [vmem:[#allocation2 + $0x24] sm:$0xff] %v6708_v12  ;;  %v5289_v11 = vor.u32 %v5696_v50, %v5288_v51  ;;  %v5293_v61 = vor.u32 %v5695_v27, %v5290_v25  ;;  %v1261_v7 = vld [vmem:[#allocation2 + $0x18] sm:$0xf]  ;;  %v1331_v27 = vpack.c.bf16 %v1320_v9, %v1320_v9 }
 0x2a8   : > { %v5253_v52 = vor.u32 %v5685_v42, %v5250_v48  ;;  %v1260_v1 = vld [vmem:[#allocation2 + $0x10] sm:$0xff]  ;;  %v1231_v24 = vpop.f32.mrf.mxu0  ;;  %v6727_v55 = vunpack.c.l.bf16 %v1261_v7  ;;  %v5274_v43 = vld [vmem:[#allocation2 + $0x14] sm:$0xf0]  ;;  %v1394_v42 = vpack.c.bf16 %v1383_v35, %v1382_v15  ;;  %v9121_v48 = vld [vmem:[#allocation4_spill] sm:$0xff]  ;;  %v1363_v15 = vmul.f32 %v6736_v40, %v6262_v22 }
 0x2a9   : > { %v6715_v18 = vunpack.c.l.bf16 %v1260_v1  ;;  %v6717_v41 = vunpack.c.h.bf16 %v1260_v1  ;;  %v1232_v34 = vadd.f32 %v1231_v24, %v1213_v39  ;;  %1710 = vrot.lane.b32.xlu0 %v5289_v11, %s5891_s9  ;;  %1712 = vrot.lane.b32.xlu1 %v5293_v61, %s5891_s9  ;;  %v5687_v29 = vld [vmem:[#allocation2 + $0x14] sm:$0xf0]  ;;  %v5277_v30 = vor.u32 %v5691_v0, %v5274_v43  ;;  %v5692_v50 = vld [vmem:[#allocation2 + $0x10] sm:$0xf0] }
 0x2aa   : > { %1476 = vrot.lane.b32.xlu2 %v5253_v52, %s5886_s28  ;;  %v1323_v36 = vmul.f32 %v6022_v37, %v6727_v55  ;;  %v5257_v2 = vor.u32 %v5687_v29, %v5256_v4  ;;  %v1396_v39 = vpack.c.bf16 %v1386_v16, %v1385_v17  ;;  %v1303_v54 = vmul.f32 %v9121_v48, %v6727_v55 }
 0x2ab   : > { %v1321_v56 = vmul.f32 %v6024_v38, %v6715_v18  ;;  %v1322_v58 = vmul.f32 %v6717_v41, %v6046_v47  ;;  %v1241_v21 = vmax.f32 %v1232_v34, 0.0  ;;  %v1542_v32 = vunpack.c.l.b16 %v1331_v27  ;;  %v9124_v27 = vld [vmem:[#allocation8_spill] sm:$0xff] }
 0x2ac   : > { %v1333_v20 = vpack.c.bf16 %v1323_v36, %v1323_v36  ;;  %v1654_v25 = vunpack.c.h.b16 %v1396_v39  ;;  %v1651_v11 = vunpack.c.h.b16 %v1394_v42  ;;  %v1300_v61 = vmul.f32 %v9121_v48, %v6725_v53  ;;  %v9123_v36 = vld [vmem:[#allocation6_spill] sm:$0xff] }
 0x2ad   : > { %v1332_v49 = vpack.c.bf16 %v1322_v58, %v1321_v56  ;;  %v6744_v19 = vpack.c.bf16 %v1241_v21, %v1240_v5  ;;  %v5273_v52 = vor.u32 %v5692_v50, %v5272_v63  ;;  %v1313_v7 = vpack.c.bf16 %v1303_v54, %v1303_v54  ;;  %v9122_v5 = vld [vmem:[#allocation5_spill] sm:$0xff] }
 0x2ae   : > { %v1545_v45 = vunpack.c.l.b16 %v1333_v20  ;;  %v1663_v24 = vpack.c.b16 %v1654_v25, %v1651_v11  ;;  %v1311_v34 = vpack.c.bf16 %v1300_v61, %v1300_v61  ;;  %v1653_v56 = vunpack.c.l.b16 %v1396_v39 }
 0x2af   : > { %v1543_v44 = vunpack.c.l.b16 %v1332_v49  ;;  %1257 = vst [vmem:[#allocation2 + $0x34] sm:$0xff] %v6744_v19  ;;  %v1544_v58 = vunpack.c.h.b16 %v1332_v49  ;;  %v1301_v21 = vmul.f32 %v9122_v5, %v6715_v18  ;;  %v1302_v43 = vmul.f32 %v6717_v41, %v9123_v36 }
 0x2b0   : > { %v1554_v1 = vpack.c.b16 %v1545_v45, %v1542_v32  ;;  %v1503_v29 = vunpack.c.l.b16 %v1313_v7  ;;  %v1365_v17 = vmul.f32 %v6254_v26, %v6719_v62  ;;  %v1366_v16 = vmul.f32 %v6721_v28, %v6262_v22  ;;  %v9125_v45 = vld [vmem:[#allocation9_spill] sm:$0xff] }
 0x2b1   : > { %v1552_v51 = vpack.c.b16 %v1543_v44, %v1540_v6  ;;  %1592 = vrot.lane.b32.xlu1 %v5277_v30, %s5890_s8  ;;  %1478 = vrot.lane.b32.xlu0 %v5257_v2, %s5886_s28  ;;  %v1650_v9 = vunpack.c.l.b16 %v1394_v42  ;;  %v1541_v0 = vunpack.c.h.b16 %v1330_v23  ;;  %v1298_v4 = vmul.f32 %v9122_v5, %v6704_v14 }
 0x2b2   : > { %v1299_v49 = vmul.f32 %v6706_v3, %v9123_v36  ;;  %v1500_v6 = vunpack.c.l.b16 %v1311_v34  ;;  %v1362_v44 = vmul.f32 %v6254_v26, %v6729_v57  ;;  %v1312_v2 = vpack.c.bf16 %v1302_v43, %v1301_v21 }
 0x2b3   : > { %1558 = vrot.lane.b32.xlu2 %v1552_v51, %s5893_s11  ;;  %v1662_v35 = vpack.c.b16 %v1653_v56, %v1650_v9  ;;  %v1553_v30 = vpack.c.b16 %v1544_v58, %v1541_v0  ;;  %v1376_v51 = vpack.c.bf16 %v1366_v16, %v1365_v17  ;;  %v1405_v42 = vmul.f32 %v9124_v27, %v6719_v62 }
 0x2b4   : > { %v1512_v20 = vpack.c.b16 %v1503_v29, %v1500_v6  ;;  %v1310_v23 = vpack.c.bf16 %v1299_v49, %v1298_v4  ;;  %v1374_v39 = vpack.c.bf16 %v1363_v15, %v1362_v44  ;;  %v1406_v50 = vmul.f32 %v6721_v28, %v9125_v45 }
 0x2b5   : > { %v1502_v25 = vunpack.c.h.b16 %v1312_v2  ;;  %v1501_v54 = vunpack.c.l.b16 %v1312_v2  ;;  %v1356_v32 = vunpack.c.l.bf16 %v6708_v12  ;;  %v1357_v63 = vunpack.c.h.bf16 %v6708_v12 }
 0x2b6   : > { %v1611_v11 = vunpack.c.l.b16 %v1376_v51  ;;  %v1402_v61 = vmul.f32 %v9124_v27, %v6729_v57  ;;  %v1608_v7 = vunpack.c.l.b16 %v1374_v39  ;;  %v6792_v62 = vpack.c.bf16 %v1406_v50, %v1405_v42  ;;  %v5699_v6 = vld [vmem:[#allocation2 + $0x30] sm:$0xf0] }
 0x2b7   : > { %v1368_v56 = vmul.f32 %v6254_v26, %v1356_v32  ;;  %v1369_v58 = vmul.f32 %v1357_v63, %v6262_v22  ;;  %v1281_v43 = vmul.f32 %v6280_v31, %v6715_v18  ;;  %v1282_v57 = vmul.f32 %v6717_v41, %v6297_v60 }
 0x2b8   : > { %v1620_v21 = vpack.c.b16 %v1611_v11, %v1608_v7  ;;  %v1360_v29 = vunpack.c.h.bf16 %v6744_v19  ;;  %v1388_v17 = vmul.f32 %v6191_v59, %v1356_v32  ;;  %v1389_v16 = vmul.f32 %v1357_v63, %v6213_v46 }
 0x2b9   : > { %1590 = vrot.lane.b32.xlu0 %v5273_v52, %s5890_s8  ;;  %1562 = vrot.lane.b32.xlu1 %v1554_v1, %s5893_s11  ;;  %v1403_v52 = vmul.f32 %v6736_v40, %v9125_v45  ;;  %v1499_v1 = vunpack.c.h.b16 %v1310_v23  ;;  %v1359_v40 = vunpack.c.l.bf16 %v6744_v19  ;;  %v1737_v9 = vunpack.c.l.b16 %v6792_v62 }
 0x2ba   : > { %v1609_v18 = vunpack.c.h.b16 %v1374_v39  ;;  %v1612_v0 = vunpack.c.h.b16 %v1376_v51  ;;  %v1278_v41 = vmul.f32 %v6280_v31, %v6704_v14  ;;  %v1279_v4 = vmul.f32 %v6706_v3, %v6297_v60  ;;  %v5300_v3 = vld [vmem:[#allocation2 + $0x24] sm:$0xf] }
 0x2bb   : > { %1670 = vrot.lane.b32.xlu2 %v1663_v24, %s5894_s12  ;;  %v1498_v24 = vunpack.c.l.b16 %v1310_v23  ;;  %v1511_v34 = vpack.c.b16 %v1502_v25, %v1499_v1  ;;  %v1414_v12 = vpack.c.bf16 %v1403_v52, %v1402_v61  ;;  %v6812_v49 = vpack.c.bf16 %v1369_v58, %v1368_v56 }
 0x2bc   : > { %v1408_v19 = vmul.f32 %v9124_v27, %v1356_v32  ;;  %v1371_v44 = vmul.f32 %v6254_v26, %v1359_v40  ;;  %v1372_v15 = vmul.f32 %v1360_v29, %v6262_v22  ;;  %v1392_v14 = vmul.f32 %v1360_v29, %v6213_v46 }
 0x2bd   : > { %v1510_v28 = vpack.c.b16 %v1501_v54, %v1498_v24  ;;  %v1734_v2 = vunpack.c.l.b16 %v1414_v12  ;;  %v1398_v51 = vpack.c.bf16 %v1389_v16, %v1388_v17  ;;  %v1621_v23 = vpack.c.b16 %v1612_v0, %v1609_v18  ;;  %v5268_v17 = vld [vmem:[#allocation2 + $0x28] sm:$0xf] }
 0x2be   : > { %v1380_v39 = vpack.c.bf16 %v1372_v15, %v1371_v44  ;;  %v1411_v42 = vmul.f32 %v9124_v27, %v1359_v40  ;;  %v5301_v25 = vor.u32 %v5699_v6, %v5300_v3  ;;  %v6823_v54 = vpack.c.bf16 %v1279_v4, %v1278_v41  ;;  %v1263_v16 = vld [vmem:[#allocation2 + $0x28] sm:$0xf]  ;;  %v1262_v44 = vld [vmem:[#allocation2 + $0x20] sm:$0xff] }
 0x2bf   : > { %v1746_v50 = vpack.c.b16 %v1737_v9, %v1734_v2  ;;  %v1615_v32 = vunpack.c.h.b16 %v6812_v49  ;;  %v1738_v1 = vunpack.c.h.b16 %v6792_v62  ;;  %v1657_v7 = vunpack.c.h.b16 %v1398_v51  ;;  %v1265_v9 = vld [vmem:[#allocation2 + $0x38] sm:$0xf] }
 0x2c0   : > { %v1618_v11 = vunpack.c.h.b16 %v1380_v39  ;;  %v6847_v2 = vunpack.c.l.bf16 %v1263_v16  ;;  %v1614_v3 = vunpack.c.l.b16 %v6812_v49  ;;  %v5698_v16 = vld [vmem:[#allocation2 + $0x28] sm:$0xf] }
 0x2c1   : > { %1668 = vrot.lane.b32.xlu1 %v1662_v35, %s5894_s12  ;;  %1560 = vrot.lane.b32.xlu0 %v1553_v30, %s5893_s11  ;;  %v1391_v35 = vmul.f32 %v6191_v59, %v1359_v40  ;;  %v1409_v30 = vmul.f32 %v1357_v63, %v9125_v45  ;;  %v1412_v63 = vmul.f32 %v1360_v29, %v9125_v45  ;;  %v1430_v40 = vunpack.c.l.b16 %v6823_v54  ;;  %v1264_v29 = vld [vmem:[#allocation2 + $0x30] sm:$0xff] }
 0x2c2   : > { %v6832_v56 = vpack.c.b16 %v1618_v11, %v1615_v32  ;;  %v6839_v15 = vunpack.c.l.bf16 %v1264_v29 }
 0x2c3   : > { %1520 = vrot.lane.b32.xlu2 %v1512_v20, %s5895_s13  ;;  %v6819_v20 = vpack.c.bf16 %v1282_v57, %v1281_v43  ;;  %v1400_v61 = vpack.c.bf16 %v1392_v14, %v1391_v35  ;;  %v1418_v52 = vpack.c.bf16 %v1409_v30, %v1408_v19  ;;  %v1420_v43 = vpack.c.bf16 %v1412_v63, %v1411_v42 }
 0x2c4   : > { %v1735_v57 = vunpack.c.h.b16 %v1414_v12  ;;  %v1280_v12 = vmul.f32 %v6283_v33, %v6725_v53  ;;  %v6845_v30 = vunpack.c.h.bf16 %v1264_v29  ;;  %v6849_v14 = vunpack.c.l.bf16 %v1265_v9 }
 0x2c5   : > { %v1433_v24 = vunpack.c.l.b16 %v6819_v20  ;;  %v1660_v58 = vunpack.c.h.b16 %v1400_v61  ;;  %v1740_v0 = vunpack.c.l.b16 %v1418_v52  ;;  %v1743_v41 = vunpack.c.l.b16 %v1420_v43 }
 0x2c6   : > { %v1747_v19 = vpack.c.b16 %v1738_v1, %v1735_v57  ;;  %v1744_v42 = vunpack.c.h.b16 %v1420_v43  ;;  %v6858_v53 = vunpack.c.h.bf16 %v1262_v44  ;;  %v1434_v32 = vunpack.c.h.b16 %v6819_v20 }
 0x2c7   : > { %v6835_v62 = vpack.c.b16 %v1660_v58, %v1657_v7  ;;  %v1442_v6 = vpack.c.b16 %v1433_v24, %v1430_v40  ;;  %v6841_v35 = vpack.c.b16 %v1743_v41, %v1740_v0  ;;  %v1291_v11 = vpack.c.bf16 %v1280_v12, %v1280_v12  ;;  %v5280_v7 = vld [vmem:[#allocation2 + $0x24] sm:$0xf] }
 0x2c8   : > { %v1328_v63 = vmul.f32 %v6845_v30, %v6046_v47  ;;  %v1289_v1 = vmul.f32 %v6283_v33, %v6849_v14  ;;  %v1431_v20 = vunpack.c.h.b16 %v6823_v54  ;;  %v1325_v58 = vmul.f32 %v6858_v53, %v6046_v47 }
 0x2c9   : > { %1518 = vrot.lane.b32.xlu1 %v1511_v34, %s5895_s13  ;;  %1516 = vrot.lane.b32.xlu0 %v1510_v28, %s5895_s13  ;;  %v1656_v34 = vunpack.c.l.b16 %v1398_v51  ;;  %v5690_v28 = vld [vmem:[#allocation2 + $0x34] sm:$0xf0]  ;;  %v1617_v51 = vunpack.c.l.b16 %v1380_v39  ;;  %v6879_v40 = vunpack.c.l.b16 %v1291_v11  ;;  %v1307_v12 = vmul.f32 %v9122_v5, %v6839_v15 }
 0x2ca   : > { %v5269_v4 = vor.u32 %v5690_v28, %v5268_v17  ;;  %v1297_v43 = vpack.c.bf16 %v1289_v1, %v1289_v1  ;;  %v1443_v17 = vpack.c.b16 %v1434_v32, %v1431_v20  ;;  %v1305_v11 = vmul.f32 %v6858_v53, %v9123_v36  ;;  %v5693_v1 = vld [vmem:[#allocation2 + $0x28] sm:$0xf] }
 0x2cb   : > { %1626 = vrot.lane.b32.xlu2 %v1620_v21, %s5892_s10  ;;  %v1659_v21 = vunpack.c.l.b16 %v1400_v61  ;;  %v6862_v39 = vpack.c.b16 %v1617_v51, %v1614_v3  ;;  %v5694_v61 = vld [vmem:[#allocation2 + $0x30] sm:$0xf0]  ;;  %v1308_v51 = vmul.f32 %v6845_v30, %v9123_v36 }
 0x2cc   : > { %v5281_v57 = vor.u32 %v5694_v61, %v5280_v7  ;;  %v6885_v0 = vunpack.c.l.b16 %v1297_v43  ;;  %v5262_v3 = vld [vmem:[#allocation2 + $0x30] sm:$0xf0]  ;;  %v5688_v61 = vld [vmem:[#allocation2 + $0x24] sm:$0xf] }
 0x2cd   : > { %v6837_v18 = vpack.c.b16 %v1659_v21, %v1656_v34  ;;  %v5302_v34 = vld [vmem:[#allocation2 + $0x34] sm:$0xf0]  ;;  %v1316_v20 = vpack.c.bf16 %v1308_v51, %v1307_v12 }
 0x2ce   : > { %v5305_v41 = vor.u32 %v5698_v16, %v5302_v34 }
 0x2d1   : > { %1716 = vrot.lane.b32.xlu1 %v5301_v25, %s5891_s9  ;;  %1628 = vrot.lane.b32.xlu0 %v1621_v23, %s5892_s10  ;;  %v1741_v23 = vunpack.c.h.b16 %v1418_v52  ;;  %v6856_v25 = vunpack.c.l.bf16 %v1262_v44  ;;  %v1286_v52 = vmul.f32 %v6283_v33, %v6847_v2 }
 0x2d3   : > { %1752 = vrot.lane.b32.xlu2 %v1746_v50, %s5896_s14  ;;  %v1283_v50 = vmul.f32 %v6283_v33, %v6727_v55  ;;  %v6864_v49 = vpack.c.b16 %v1744_v42, %v1741_v23  ;;  %v1327_v55 = vmul.f32 %v6024_v38, %v6839_v15  ;;  %v1324_v28 = vmul.f32 %v6024_v38, %v6856_v25 }
 0x2d4   : > { %v1295_v21 = vpack.c.bf16 %v1286_v52, %v1286_v52  ;;  %v1329_v23 = vmul.f32 %v6022_v37, %v6849_v14  ;;  %v1304_v32 = vmul.f32 %v9122_v5, %v6856_v25  ;;  %v5265_v52 = vor.u32 %v5688_v61, %v5262_v3 }
 0x2d5   : > { %v1293_v24 = vpack.c.bf16 %v1283_v50, %v1283_v50  ;;  %v1336_v9 = vpack.c.bf16 %v1328_v63, %v1327_v55  ;;  %v5282_v50 = vld [vmem:[#allocation2 + $0x34] sm:$0xf0]  ;;  %v1326_v55 = vmul.f32 %v6022_v37, %v6847_v2 }
 0x2d6   : > { %v6883_v54 = vunpack.c.l.b16 %v1295_v21  ;;  %v5285_v7 = vor.u32 %v5693_v1, %v5282_v50  ;;  %v1337_v34 = vpack.c.bf16 %v1329_v23, %v1329_v23  ;;  %v1507_v21 = vunpack.c.l.b16 %v1316_v20 }
 0x2d7   : > { %v6881_v29 = vunpack.c.l.b16 %v1293_v24  ;;  %v1550_v44 = vunpack.c.h.b16 %v1336_v9  ;;  %v6906_v24 = vpop.permute.xlu2 %1480  ;;  %v1549_v43 = vunpack.c.l.b16 %v1336_v9  ;;  %v1309_v23 = vmul.f32 %v9121_v48, %v6849_v14 }
 0x2d8   : > { %v1306_v9 = vmul.f32 %v9121_v48, %v6847_v2  ;;  %v1287_v14 = vmul.f32 %v6280_v31, %v6839_v15  ;;  %v1508_v2 = vunpack.c.h.b16 %v1316_v20 }
 0x2d9   : > { %1484 = vrot.lane.b32.xlu1 %v5269_v4, %s5886_s28  ;;  %1754 = vrot.lane.b32.xlu0 %v1747_v19, %s5896_s14  ;;  %v1444_v4 = vpack.c.b16 %v6881_v29, %v6879_v40  ;;  %v1334_v19 = vpack.c.bf16 %v1325_v58, %v1324_v28  ;;  %v1314_v28 = vpack.c.bf16 %v1305_v11, %v1304_v32 }
 0x2da   : > { %v1335_v58 = vpack.c.bf16 %v1326_v55, %v1326_v55  ;;  %v1315_v50 = vpack.c.bf16 %v1306_v9, %v1306_v9  ;;  %v1288_v11 = vmul.f32 %v6845_v30, %v6297_v60 }
 0x2db   : > { %1798 = vrot.lane.b32.xlu2 %v1442_v6, %s5885_s27  ;;  %v1447_v6 = vpack.c.b16 %v6885_v0, %v6883_v54  ;;  %v1547_v42 = vunpack.c.h.b16 %v1334_v19  ;;  %v1546_v16 = vunpack.c.l.b16 %v1334_v19  ;;  %v1317_v19 = vpack.c.bf16 %v1309_v23, %v1309_v23 }
 0x2dc   : > { %v1506_v55 = vunpack.c.l.b16 %v1315_v50 }
 0x2dd   : > { %v1556_v63 = vpack.c.b16 %v1550_v44, %v1547_v42  ;;  %v1555_v12 = vpack.c.b16 %v1549_v43, %v1546_v16  ;;  %v6918_v42 = vpop.permute.xlu0 %1714  ;;  %v1509_v32 = vunpack.c.l.b16 %v1317_v19 }
 0x2df   : > { %v6913_v3 = vpop.permute.xlu2 %1720  ;;  %v1515_v1 = vpack.c.b16 %v1509_v32, %v1506_v55 }
 0x2e1   : > { %1594 = vrot.lane.b32.xlu1 %v5281_v57, %s5890_s8  ;;  %1800 = vrot.lane.b32.xlu0 %v1443_v17, %s5885_s27  ;;  %v1551_v57 = vunpack.c.l.b16 %v1337_v34  ;;  %v1504_v17 = vunpack.c.l.b16 %v1314_v28 }
 0x2e3   : > { %1718 = vrot.lane.b32.xlu2 %v5305_v41, %s5891_s9  ;;  %v1548_v41 = vunpack.c.l.b16 %v1335_v58  ;;  %v1513_v44 = vpack.c.b16 %v1507_v21, %v1504_v17 }
 0x2e5   : > { %v1557_v51 = vpack.c.b16 %v1551_v57, %v1548_v41 }
 0x2e7   : > { %v6932_v61 = vpop.permute.xlu2 %1672 }
 0x2e9   : > { %1566 = vrot.lane.b32.xlu1 %v1556_v63, %s5893_s11  ;;  %1482 = vrot.lane.b32.xlu0 %v5265_v52, %s5886_s28  ;;  %v1505_v63 = vunpack.c.h.b16 %v1314_v28  ;;  %v6938_v52 = vpop.permute.xlu0 %1678 }
 0x2eb   : > { %1596 = vrot.lane.b32.xlu2 %v5285_v7, %s5890_s8  ;;  %v1296_v7 = vpack.c.bf16 %v1288_v11, %v1287_v14  ;;  %v1514_v15 = vpack.c.b16 %v1508_v2, %v1505_v63 }
 0x2ed   : > { %v1439_v20 = vunpack.c.l.b16 %v1296_v7  ;;  %v1440_v21 = vunpack.c.h.b16 %v1296_v7 }
 0x2f1   : > { %1522 = vrot.lane.b32.xlu1 %v1513_v44, %s5895_s13  ;;  %1564 = vrot.lane.b32.xlu0 %v1555_v12, %s5893_s11 }
 0x2f3   : > { %1568 = vrot.lane.b32.xlu2 %v1557_v51, %s5893_s11 }
 0x2f9   : > { %1634 = vrot.lane.b32.xlu1 %v6832_v56, %s5892_s10  ;;  %1676 = vrot.lane.b32.xlu0 %v6835_v62, %s5894_s12  ;;  %v1284_v56 = vmul.f32 %v6280_v31, %v6856_v25  ;;  %v1285_v62 = vmul.f32 %v6858_v53, %v6297_v60  ;;  %v6944_v53 = vpop.permute.xlu0 %1630 }
 0x2fb   : > { %1674 = vrot.lane.b32.xlu2 %v6837_v18, %s5894_s12  ;;  %v1475_v18 = vpop.permute.xlu1 %1474  ;;  %v1294_v30 = vpack.c.bf16 %v1285_v62, %v1284_v56 }
 0x2fd   : > { %v1436_v34 = vunpack.c.l.b16 %v1294_v30  ;;  %v1437_v43 = vunpack.c.h.b16 %v1294_v30 }
 0x2ff   : > { %v1445_v58 = vpack.c.b16 %v1439_v20, %v1436_v34  ;;  %v1446_v57 = vpack.c.b16 %v1440_v21, %v1437_v43 }
 0x301   : > { %1758 = vrot.lane.b32.xlu1 %v6841_v35, %s5896_s14  ;;  %1526 = vrot.lane.b32.xlu0 %v1515_v1, %s5895_s13  ;;  %v6954_v17 = vpop.permute.xlu0 %1762 }
 0x303   : > { %1524 = vrot.lane.b32.xlu2 %v1514_v15, %s5895_s13  ;;  %v6946_v28 = vpop.permute.xlu1 %1636 }
 0x304   : > { %v1477_v25 = vpop.permute.xlu2 %1476 }
 0x305   : > { %v1486_v55 = vsel %vm412_vm4, %v1475_v18, %v1477_v25 }
 0x309   : > { %1804 = vrot.lane.b32.xlu1 %v1445_v58, %s5885_s27  ;;  %1632 = vrot.lane.b32.xlu0 %v6862_v39, %s5892_s10 }
 0x30b   : > { %1760 = vrot.lane.b32.xlu2 %v6864_v49, %s5896_s14  ;;  %v6956_v16 = vpop.permute.xlu1 %1756 }
 0x30d   : > { %v1559_v35 = vpop.permute.xlu2 %1558 }
 0x313   : > { %1806 = vrot.lane.b32.xlu2 %v1446_v57, %s5885_s27 }
 0x315   : > { %v6958_v41 = vpop.permute.xlu2 %1670 }
 0x31b   : > { %v1711_v44 = vpop.permute.xlu0 %1710  ;;  %v6960_v12 = vpop.permute.xlu1 %1712 }
 0x31c   : > { %1882 = vrot.lane.b32.xlu0 %v1711_v44, %s5885_s27  ;;  %v1722_v39 = vsel %vm854_vm10, %v1711_v44, %v6960_v12 }
 0x31d   : > { %1884 = vrot.lane.b32.xlu1 %v1722_v39, %s5885_s27  ;;  %v6966_v49 = vpop.permute.xlu2 %1520 }
 0x323   : > { %v6968_v51 = vpop.permute.xlu0 %1478  ;;  %v6970_v23 = vpop.permute.xlu1 %1592 }
 0x324   : > { %v1487_v9 = vsel %vm412_vm4, %v1477_v25, %v6968_v51 }
 0x325   : > { %1812 = vrot.lane.b32.xlu1 %v1487_v9, %s5885_s27  ;;  %v1627_v19 = vpop.permute.xlu2 %1626 }
 0x32b   : > { %v1591_v50 = vpop.permute.xlu0 %1590  ;;  %v6975_v32 = vpop.permute.xlu1 %1562 }
 0x32c   : > { %1846 = vrot.lane.b32.xlu0 %v1591_v50, %s5885_s27  ;;  %v1598_v14 = vsel %vm350_vm9, %v1591_v50, %v6970_v23 }
 0x32d   : > { %1848 = vrot.lane.b32.xlu1 %v1598_v14, %s5885_s27  ;;  %v6982_v56 = vpop.permute.xlu2 %1752 }
 0x333   : > { %v1561_v11 = vpop.permute.xlu0 %1560  ;;  %v1669_v2 = vpop.permute.xlu1 %1668 }
 0x334   : > { %1810 = vrot.lane.b32.xlu0 %v1486_v55, %s5885_s27  ;;  %v1680_v62 = vsel %vm811_vm13, %v1669_v2, %v6958_v41  ;;  %v1570_v7 = vsel %vm698_vm11, %v1559_v35, %v1561_v11  ;;  %v1571_v25 = vsel %vm698_vm11, %v1561_v11, %v6975_v32 }
 0x335   : > { %1872 = vrot.lane.b32.xlu2 %v1680_v62, %s5885_s27  ;;  %1870 = vrot.lane.b32.xlu1 %v1669_v2, %s5885_s27  ;;  %v6995_v15 = vpop.permute.xlu2 %1798 }
 0x33b   : > { %v1517_v63 = vpop.permute.xlu0 %1516  ;;  %v1519_v1 = vpop.permute.xlu1 %1518 }
 0x33c   : > { %1834 = vrot.lane.b32.xlu0 %v1570_v7, %s5885_s27  ;;  %v1529_v18 = vsel %vm655_vm12, %v1519_v1, %v6966_v49  ;;  %v1528_v43 = vsel %vm655_vm12, %v1517_v63, %v1519_v1 }
 0x33d   : > { %1858 = vrot.lane.b32.xlu1 %v1627_v19, %s5885_s27  ;;  %1824 = vrot.lane.b32.xlu2 %v1529_v18, %s5885_s27  ;;  %v1719_v58 = vpop.permute.xlu2 %1718 }
 0x33e   : > { %v1725_v18 = vsel %vm854_vm10, %v1719_v58, %v6913_v3 }
 0x343   : > { %v6997_v30 = vpop.permute.xlu0 %1628  ;;  %v1717_v20 = vpop.permute.xlu1 %1716 }
 0x344   : > { %v1638_v34 = vsel %vm768_vm15, %v1627_v19, %v6997_v30  ;;  %v1724_v19 = vsel %vm854_vm10, %v1717_v20, %v1719_v58  ;;  %v1639_v54 = vsel %vm768_vm15, %v6997_v30, %v6944_v53 }
 0x345   : > { %1836 = vrot.lane.b32.xlu1 %v1571_v25, %s5885_s27  ;;  %1860 = vrot.lane.b32.xlu2 %v1638_v34, %s5885_s27  ;;  %v7009_v57 = vpop.permute.xlu2 %1596 }
 0x34b   : > { %v7005_v35 = vpop.permute.xlu0 %1754  ;;  %v1485_v21 = vpop.permute.xlu1 %1484 }
 0x34c   : > { %v1764_v0 = vsel %vm897_vm14, %v6982_v56, %v7005_v35 }
 0x34d   : > { %1822 = vrot.lane.b32.xlu1 %v1528_v43, %s5885_s27  ;;  %v1569_v50 = vpop.permute.xlu2 %1568 }
 0x353   : > { %v7011_v44 = vpop.permute.xlu0 %1800  ;;  %v1595_v39 = vpop.permute.xlu1 %1594 }
 0x354   : > { %1852 = vrot.lane.b32.xlu2 %v1595_v39, %s5885_s27  ;;  %v1599_v63 = vsel %vm350_vm9, %v1595_v39, %v7009_v57 }
 0x355   : > { %1888 = vrot.lane.b32.xlu1 %v1717_v20, %s5885_s27  ;;  %v1675_v20 = vpop.permute.xlu2 %1674 }
 0x35b   : > { %v1483_v9 = vpop.permute.xlu0 %1482  ;;  %v1567_v11 = vpop.permute.xlu1 %1566 }
 0x35c   : > { %1890 = vrot.lane.b32.xlu2 %v1724_v19, %s5885_s27  ;;  %v1489_v14 = vsel %vm412_vm4, %v1483_v9, %v1485_v21  ;;  %v1488_v55 = vsel %vm412_vm4, %v6906_v24, %v1483_v9  ;;  %v1723_v24 = vsel %vm854_vm10, %v6960_v12, %v6918_v42  ;;  %v1573_v9 = vsel %vm698_vm11, %v1567_v11, %v1569_v50 }
 0x35d   : > { %1844 = vrot.lane.b32.xlu1 %v1569_v50, %s5885_s27  ;;  %1818 = vrot.lane.b32.xlu0 %v1489_v14, %s5885_s27  ;;  %v1525_v43 = vpop.permute.xlu2 %1524 }
 0x363   : > { %v1565_v2 = vpop.permute.xlu0 %1564  ;;  %v1523_v1 = vpop.permute.xlu1 %1522 }
 0x364   : > { %v1572_v62 = vsel %vm698_vm11, %v1565_v2, %v1567_v11  ;;  %1816 = vrot.lane.b32.xlu2 %v1488_v55, %s5885_s27  ;;  %v1530_v12 = vsel %vm655_vm12, %v1523_v1, %v1525_v43 }
 0x365   : > { %1854 = vrot.lane.b32.xlu0 %v1599_v63, %s5885_s27  ;;  %1840 = vrot.lane.b32.xlu1 %v1572_v62, %s5885_s27  ;;  %v1761_v42 = vpop.permute.xlu2 %1760 }
 0x36b   : > { %v1677_v7 = vpop.permute.xlu0 %1676  ;;  %v1635_v25 = vpop.permute.xlu1 %1634 }
 0x36c   : > { %1892 = vrot.lane.b32.xlu2 %v1725_v18, %s5885_s27  ;;  %v1682_v19 = vsel %vm811_vm13, %v1675_v20, %v1677_v7 }
 0x36d   : > { %1886 = vrot.lane.b32.xlu1 %v1723_v24, %s5885_s27  ;;  %v7049_v14 = vpop.permute.xlu2 %1806 }
 0x373   : > { %v1527_v34 = vpop.permute.xlu0 %1526  ;;  %v1759_v58 = vpop.permute.xlu1 %1758 }
 0x374   : > { %1876 = vrot.lane.b32.xlu2 %v1675_v20, %s5885_s27  ;;  %v1531_v11 = vsel %vm655_vm12, %v1525_v43, %v1527_v34 }
 0x37b   : > { %v1633_v39 = vpop.permute.xlu0 %1632  ;;  %v7047_v50 = vpop.permute.xlu1 %1804 }
 0x37c   : > { %1864 = vrot.lane.b32.xlu0 %v1633_v39, %s5885_s27  ;;  %1842 = vrot.lane.b32.xlu2 %v1573_v9, %s5885_s27  ;;  %v1640_v3 = vsel %vm768_vm15, %v1633_v39, %v1635_v25 }
 0x37d   : > { %1866 = vrot.lane.b32.xlu1 %v1640_v3, %s5885_s27 }
 0x384   : > { %1878 = vrot.lane.b32.xlu0 %v1682_v19, %s5885_s27  ;;  %1828 = vrot.lane.b32.xlu2 %v1530_v12, %s5885_s27 }
 0x385   : > { %1826 = vrot.lane.b32.xlu1 %v6966_v49, %s5885_s27  ;;  %v1681_v49 = vsel %vm811_vm13, %v6958_v41, %v6932_v61  ;;  %v1641_v61 = vsel %vm768_vm15, %v1635_v25, %v6946_v28 }
 0x38c   : > { %1830 = vrot.lane.b32.xlu0 %v1531_v11, %s5885_s27  ;;  %1832 = vrot.lane.b32.xlu2 %v1527_v34, %s5885_s27 }
 0x38d   : > { %1900 = vrot.lane.b32.xlu1 %v1759_v58, %s5885_s27 }
 0x38e   : > { %v1883_v1 = vpop.permute.xlu0 %1882 }
 0x38f   : > { %v7055_v2 = vpop.permute.xlu1 %1884  ;;  %v7057_v55 = vpop.permute.xlu2 %1872 }
 0x394   : > { %1838 = vrot.lane.b32.xlu0 %v6975_v32, %s5885_s27  ;;  %1874 = vrot.lane.b32.xlu2 %v1681_v49, %s5885_s27  ;;  %v1766_v32 = vsel %vm897_vm14, %v1759_v58, %v1761_v42 }
 0x395   : > { %1808 = vrot.lane.b32.xlu1 %v1447_v6, %s5885_s27 }
 0x397   : > { %v7069_v62 = vpop.permute.xlu1 %1812  ;;  %v7071_v63 = vpop.permute.xlu2 %1824 }
 0x39c   : > { %1820 = vrot.lane.b32.xlu0 %v1485_v21, %s5885_s27  ;;  %1814 = vrot.lane.b32.xlu2 %v6968_v51, %s5885_s27  ;;  %v1683_v51 = vsel %vm811_vm13, %v1677_v7, %v6938_v52  ;;  %v1765_v21 = vsel %vm897_vm14, %v7005_v35, %v6956_v16  ;;  %v1767_v7 = vsel %vm897_vm14, %v1761_v42, %v6954_v17 }
 0x39d   : > { %1868 = vrot.lane.b32.xlu1 %v1641_v61, %s5885_s27  ;;  %v1934_v17 = vsel %vm9099_vm6, %v1883_v1, %v7055_v2 }
 0x39e   : > { %v1847_v20 = vpop.permute.xlu0 %1846 }
 0x39f   : > { %v7079_v41 = vpop.permute.xlu1 %1848  ;;  %v7091_v6 = vpop.permute.xlu2 %1860 }
 0x3a4   : > { %1862 = vrot.lane.b32.xlu0 %v1639_v54, %s5885_s27  ;;  %1856 = vrot.lane.b32.xlu2 %v7009_v57, %s5885_s27 }
 0x3a5   : > { %1896 = vrot.lane.b32.xlu1 %v1764_v0, %s5885_s27 }
 0x3a6   : > { %v1811_v24 = vpop.permute.xlu0 %1810 }
 0x3a7   : > { %v1871_v28 = vpop.permute.xlu1 %1870 }
 0x3ac   : > { %1880 = vrot.lane.b32.xlu0 %v1683_v51, %s5885_s27  ;;  %1902 = vrot.lane.b32.xlu2 %v1766_v32, %s5885_s27 }
 0x3ad   : > { %1850 = vrot.lane.b32.xlu1 %v6970_v23, %s5885_s27 }
 0x3ae   : > { %v1853_v53 = vpop.permute.xlu2 %1852  ;;  %v1835_v43 = vpop.permute.xlu0 %1834 }
 0x3af   : > { %v1859_v30 = vpop.permute.xlu1 %1858 }
 0x3b4   : > { %1894 = vrot.lane.b32.xlu0 %v6982_v56, %s5885_s27  ;;  %1898 = vrot.lane.b32.xlu2 %v1765_v21, %s5885_s27  ;;  %v1930_v21 = vsel %vm9099_vm6, %v1871_v28, %v7057_v55 }
 0x3b6   : > { %v7106_v52 = vpop.permute.xlu2 %1890 }
 0x3b7   : > { %v1837_v57 = vpop.permute.xlu1 %1836 }
 0x3b8   : > { %v1918_v3 = vsel %vm9099_vm6, %v1835_v43, %v1837_v57 }
 0x3bc   : > { %1904 = vrot.lane.b32.xlu0 %v1767_v7, %s5885_s27 }
 0x3be   : > { %v1817_v23 = vpop.permute.xlu2 %1816 }
 0x3bf   : > { %v1823_v18 = vpop.permute.xlu1 %1822 }
 0x3c4   : > { %1802 = vrot.lane.b32.xlu0 %v1444_v4, %s5885_s27 }
 0x3c6   : > { %v7115_v16 = vpop.permute.xlu2 %1892 }
 0x3c7   : > { %v1889_v56 = vpop.permute.xlu1 %1888 }
 0x3c8   : > { %v1936_v35 = vsel %vm9099_vm6, %v1889_v56, %v7106_v52 }
 0x3c9   : > { %2003 = vmatpush.bf16.msrb.mxu3 %v1936_v35 }
 0x3cd   : > { %2004 = vmatpush.bf16.msrb.mxu3 %v1934_v17  ;;  %v1914_v17 = vsel %vm9099_vm6, %v1823_v18, %v7071_v63  ;;  %v5314_v18 = vld [vmem:[%s9082_s2 + $0xc] sm:$0xf0] }
 0x3ce   : > { %v1877_v25 = vpop.permute.xlu2 %1876 }
 0x3cf   : > { %v1845_v34 = vpop.permute.xlu1 %1844  ;;  %v1819_v4 = vpop.permute.xlu0 %1818 }
 0x3d6   : > { %v1843_v39 = vpop.permute.xlu2 %1842 }
 0x3d7   : > { %v1841_v9 = vpop.permute.xlu1 %1840  ;;  %v1921_v40 = vsel %vm9099_vm6, %v1843_v39, %v1845_v34  ;;  %v7124_v42 = vpop.permute.xlu0 %1854 }
 0x3d8   : > { %2041 = vmatpush.bf16.msra.mxu0 %v1921_v40  ;;  %v1920_v29 = vsel %vm9099_vm6, %v1841_v9, %v1843_v39  ;;  %v1912_v39 = vsel %vm9099_vm6, %v1817_v23, %v1819_v4  ;;  %v1924_v9 = vsel %vm9099_vm6, %v1853_v53, %v7124_v42  ;;  %v1910_v53 = vsel %vm9099_vm6, %v1811_v24, %v7069_v62 }
 0x3d9   : > { %1984 = vmatpush.bf16.msrb.mxu1 %v1920_v29  ;;  %v1922_v23 = vsel %vm9099_vm6, %v1847_v20, %v7079_v41  ;;  %v5312_v20 = vld [vmem:[%s9082_s2] sm:$0xf] }
 0x3dd   : > { %1985 = vmatpush.bf16.msrb.mxu1 %v1918_v3 }
 0x3de   : > { %v1829_v58 = vpop.permute.xlu2 %1828 }
 0x3df   : > { %v1887_v19 = vpop.permute.xlu1 %1886 }
 0x3e6   : > { %v1833_v12 = vpop.permute.xlu2 %1832 }
 0x3ee   : > { %v1865_v11 = vpop.permute.xlu0 %1864  ;;  %v7126_v49 = vpop.permute.xlu2 %1874 }
 0x3ef   : > { %v7128_v61 = vpop.permute.xlu1 %1866 }
 0x3f0   : > { %v1928_v35 = vsel %vm9099_vm6, %v1865_v11, %v7128_v61  ;;  %v1908_v11 = vsel %vm9099_vm6, %v7047_v50, %v7049_v14  ;;  %v1937_v50 = vsel %vm9099_vm6, %v7106_v52, %v7115_v16  ;;  %v5326_v52 = vld [vmem:[%s9082_s2 + $0x24] sm:$0xf0] }
 0x3f6   : > { %v7130_v54 = vpop.permute.xlu0 %1878  ;;  %v1815_v0 = vpop.permute.xlu2 %1814 }
 0x3f7   : > { %v1932_v51 = vsel %vm9099_vm6, %v1877_v25, %v7130_v54  ;;  %v1827_v32 = vpop.permute.xlu1 %1826  ;;  %v1926_v25 = vsel %vm9099_vm6, %v1859_v30, %v7091_v6  ;;  %v5679_v30 = vld [vmem:[%s9082_s2 + $0x4] sm:$0xf] }
 0x3f8   : > { %2005 = vmatpush.bf16.msrb.mxu3 %v1932_v51  ;;  %v7163_v3 = vor.u32 %v5679_v30, %v5314_v18  ;;  %v1915_v24 = vsel %vm9099_vm6, %v7071_v63, %v1827_v32 }
 0x3fc   : > { %2006 = vmatpush.bf16.msrb.mxu3 %v1930_v21  ;;  %v1906_v21 = vsel %vm9099_vm6, %v6995_v15, %v7011_v44  ;;  %v5682_v15 = vld [vmem:[%s9082_s2 + $0x1c] sm:$0xf] }
 0x3fd   : > { %v5329_v16 = vor.u32 %v5682_v15, %v5326_v52 }
 0x3fe   : > { %v1831_v1 = vpop.permute.xlu0 %1830  ;;  %v7136_v7 = vpop.permute.xlu2 %1856 }
 0x3ff   : > { %v1916_v56 = vsel %vm9099_vm6, %v1829_v58, %v1831_v1  ;;  %v1901_v28 = vpop.permute.xlu1 %1900  ;;  %v1925_v18 = vsel %vm9099_vm6, %v7124_v42, %v7136_v7 }
 0x400   : > { %1986 = vmatpush.bf16.msrb.mxu1 %v1916_v56  ;;  %2007 = vmatpush.bf16.msrb.mxu3 %v1928_v35  ;;  %v1911_v56 = vsel %vm9099_vm6, %v7069_v62, %v1815_v0  ;;  %v1935_v35 = vsel %vm9099_vm6, %v7055_v2, %v1887_v19  ;;  %v5324_v19 = vld [vmem:[%s9082_s2 + $0x18] sm:$0xf]  ;;  %v5683_v0 = vld [vmem:[%s9082_s2 + $0x20] sm:$0xf0] }
 0x404   : > { %1987 = vmatpush.bf16.msrb.mxu1 %v1914_v17  ;;  %2008 = vmatpush.bf16.msrb.mxu3 %v1926_v25  ;;  %v1931_v25 = vsel %vm9099_vm6, %v7057_v55, %v7126_v49 }
 0x406   : > { %v1839_v34 = vpop.permute.xlu0 %1838  ;;  %v7145_v43 = vpop.permute.xlu2 %1902 }
 0x407   : > { %v1940_v40 = vsel %vm9099_vm6, %v1901_v28, %v7145_v43  ;;  %v1919_v29 = vsel %vm9099_vm6, %v1837_v57, %v1839_v34  ;;  %v1917_v57 = vsel %vm9099_vm6, %v1831_v1, %v1833_v12  ;;  %v5680_v12 = vld [vmem:[%s9082_s2 + $0x8] sm:$0xf0]  ;;  %v1809_v51 = vpop.permute.xlu1 %1808  ;;  %v5320_v28 = vld [vmem:[%s9082_s2 + $0x8] sm:$0xf] }
 0x408   : > { %1988 = vmatpush.bf16.msrb.mxu1 %v1912_v39  ;;  %2009 = vmatpush.bf16.msrb.mxu3 %v1924_v9  ;;  %v5313_v1 = vor.u32 %v5680_v12, %v5312_v20  ;;  %v1909_v17 = vsel %vm9099_vm6, %v7049_v14, %v1809_v51  ;;  %v5325_v14 = vor.u32 %v5683_v0, %v5324_v19 }
 0x409   : > { %2028 = vmatpush.bf16.msra.mxu2 %v1940_v40  ;;  %2042 = vmatpush.bf16.msra.mxu0 %v1919_v29 }
 0x40c   : > { %1989 = vmatpush.bf16.msrb.mxu1 %v1910_v53  ;;  %2010 = vmatpush.bf16.msrb.mxu3 %v1922_v23 }
 0x40d   : > { %2043 = vmatpush.bf16.msra.mxu0 %v1917_v57 }
 0x40e   : > { %v1821_v58 = vpop.permute.xlu0 %1820 }
 0x40f   : > { %2011 = vmatmul.bf16.vlgmr.msrb.gmra.mxu3 %v7163_v3  ;;  %v1913_v63 = vsel %vm9099_vm6, %v1819_v4, %v1821_v58  ;;  %v1869_v4 = vpop.permute.xlu1 %1868 }
 0x410   : > { %1990 = vmatpush.bf16.msrb.mxu1 %v1908_v11  ;;  %v1929_v40 = vsel %vm9099_vm6, %v7128_v61, %v1869_v4  ;;  %v1899_v61 = vpop.permute.xlu2 %1898 }
 0x411   : > { %2044 = vmatpush.bf16.msra.mxu0 %v1915_v24 }
 0x414   : > { %1991 = vmatpush.bf16.msrb.mxu1 %v1906_v21 }
 0x415   : > { %2045 = vmatpush.bf16.msra.mxu0 %v1913_v63 }
 0x416   : > { %v1863_v32 = vpop.permute.xlu0 %1862 }
 0x417   : > { %1992 = vmatmul.bf16.vlgmr.msrb.gmra.mxu1 %v5313_v1  ;;  %v1897_v34 = vpop.permute.xlu1 %1896  ;;  %v1927_v55 = vsel %vm9099_vm6, %v7091_v6, %v1863_v32  ;;  %v5332_v6 = vld [vmem:[%s9082_s2 + $0x20] sm:$0xf] }
 0x418   : > { %2060 = vmatpush.bf16.msra.mxu1 %v1937_v50  ;;  %v1939_v57 = vsel %vm9099_vm6, %v1897_v34, %v1899_v61 }
 0x419   : > { %2046 = vmatpush.bf16.msra.mxu0 %v1911_v56 }
 0x41c   : > { %2061 = vmatpush.bf16.msra.mxu1 %v1935_v35 }
 0x41d   : > { %2047 = vmatpush.bf16.msra.mxu0 %v1909_v17 }
 0x41e   : > { %v1881_v62 = vpop.permute.xlu0 %1880 }
 0x41f   : > { %2016 = vmatmul.bf16.gmra.mxu3 %v5329_v16  ;;  %v1933_v2 = vsel %vm9099_vm6, %v7130_v54, %v1881_v62  ;;  %v5681_v54 = vld [vmem:[%s9082_s2 + $0x10] sm:$0xf0]  ;;  %v1851_v53 = vpop.permute.xlu1 %1850 }
 0x420   : > { %2062 = vmatpush.bf16.msra.mxu1 %v1933_v2  ;;  %v5321_v29 = vor.u32 %v5681_v54, %v5320_v28  ;;  %v1923_v23 = vsel %vm9099_vm6, %v7079_v41, %v1851_v53 }
 0x424   : > { %2063 = vmatpush.bf16.msra.mxu1 %v1931_v25 }
 0x426   : > { %v1895_v39 = vpop.permute.xlu0 %1894 }
 0x427   : > { %1997 = vmatmul.bf16.gmra.mxu1 %v5325_v14  ;;  %v1938_v9 = vsel %vm9099_vm6, %v1895_v39, %v1897_v34 }
 0x428   : > { %2029 = vmatpush.bf16.msra.mxu2 %v1938_v9  ;;  %2064 = vmatpush.bf16.msra.mxu1 %v1929_v40 }
 0x42b   : > { %5334 = vmatmul.msk.bf16.vlgmr.msra.gmra.mxu2 %vm9098_vm0, %v5321_v29 }
 0x42c   : > { %2065 = vmatpush.bf16.msra.mxu1 %v1927_v55 }
 0x42e   : > { %v1905_v49 = vpop.permute.xlu0 %1904 }
 0x42f   : > { %v1941_v30 = vsel %vm9099_vm6, %v7145_v43, %v1905_v49  ;;  %v5684_v43 = vld [vmem:[%s9082_s2 + $0x28] sm:$0xf0] }
 0x430   : > { %2066 = vmatpush.bf16.msra.mxu1 %v1925_v18  ;;  %2085 = vmatpush.bf16.msra.mxu3 %v1941_v30  ;;  %v5333_v7 = vor.u32 %v5684_v43, %v5332_v6  ;;  %v5369_v43 = vld [vmem:[#allocation2 + $0x20] sm:$0xf] }
 0x434   : > { %2067 = vmatpush.bf16.msra.mxu1 %v1923_v23  ;;  %2086 = vmatpush.bf16.msra.mxu3 %v1939_v57 }
 0x436   : > { %v1803_v42 = vpop.permute.xlu0 %1802 }
 0x437   : > { %2068 = vmatmul.bf16.vlgmr.msra.gmra.mxu1 %v7163_v3  ;;  %5336 = vmatmul.msk.bf16.vlgmr.msra.gmra.mxu3 %vm9098_vm0, %v5321_v29  ;;  %v1907_v41 = vsel %vm9099_vm6, %v7011_v44, %v1803_v42  ;;  %v5711_v42 = vld [vmem:[#allocation2 + $0x2c] sm:$0xf0] }
 0x438   : > { %2048 = vmatpush.bf16.msra.mxu0 %v1907_v41 }
 0x43b   : > { %5335 = vmatmul.msk.bf16.gmra.mxu2 %vm9098_vm0, %v5333_v7  ;;  %2049 = vmatmul.bf16.vlgmr.msra.gmra.mxu0 %v5313_v1 }
 0x447   : > { %2073 = vmatmul.bf16.gmra.mxu1 %v5329_v16  ;;  %5337 = vmatmul.msk.bf16.gmra.mxu3 %vm9098_vm0, %v5333_v7  ;;  %v5370_v7 = vor.u32 %v5711_v42, %v5369_v43 }
 0x44b   : > { %2054 = vmatmul.bf16.gmra.mxu0 %v5325_v14 }
 0x492   : > { %v2012_v58 = vpop.f32.mrf.mxu3 }
 0x494   : > { %v1993_v11 = vpop.f32.mrf.mxu1 }
 0x495   : > { %v2013_v57 = vadd.f32 %v2012_v58, %v1993_v11  ;;  %v2410_v11 = vld [vmem:[#allocation2 + $0x2c] sm:$0xf] }
 0x49a   : > { %v2014_v20 = vpop.f32.mrf.mxu3 }
 0x49c   : > { %v1995_v24 = vpop.f32.mrf.mxu1 }
 0x49d   : > { %v2015_v1 = vadd.f32 %v2014_v20, %v1995_v24  ;;  %v5357_v24 = vld [vmem:[#allocation2] sm:$0xf]  ;;  %v5708_v20 = vld [vmem:[#allocation2 + $0xc] sm:$0xf0] }
 0x4a2   : > { %v2017_v3 = vpop.f32.mrf.mxu3 }
 0x4a4   : > { %v1998_v12 = vpop.f32.mrf.mxu1 }
 0x4a5   : > { %v2018_v25 = vadd.f32 %v2017_v3, %v1998_v12  ;;  %v2406_v3 = vld [vmem:[#allocation2 + $0xc] sm:$0xf] }
 0x4aa   : > { %v2019_v50 = vpop.f32.mrf.mxu3 }
 0x4ac   : > { %v2000_v51 = vpop.f32.mrf.mxu1 }
 0x4ad   : > { %v2020_v55 = vadd.f32 %v2019_v50, %v2000_v51  ;;  %v2408_v51 = vld [vmem:[#allocation2 + $0x1c] sm:$0xf]  ;;  %v5358_v50 = vor.u32 %v5708_v20, %v5357_v24 }
 0x4ae   : > { %v2031_v21 = vpop.f32.mrf.mxu2  ;;  %v2418_v58 = vunpack.c.l.bf16 %v2408_v51 }
 0x4af   : > { %v7260_v41 = vadd.f32 %v2031_v21, %v2013_v57 }
 0x4b4   : > { %v2069_v63 = vpop.f32.mrf.mxu1 }
 0x4b6   : > { %v2033_v56 = vpop.f32.mrf.mxu2 }
 0x4b7   : > { %v7240_v4 = vadd.f32 %v2033_v56, %v2015_v1  ;;  %v5719_v56 = vld [vmem:[#allocation2 + $0x18] sm:$0xf0] }
 0x4b8   : > { %v2050_v44 = vpop.f32.mrf.mxu0 }
 0x4b9   : > { %v2070_v61 = vadd.f32 %v2069_v63, %v2050_v44  ;;  %v2415_v63 = vunpack.c.l.bf16 %v2406_v3  ;;  %v2412_v44 = vld [vmem:[#allocation2 + $0x3c] sm:$0xf] }
 0x4ba   : > { %v2088_v32 = vpop.f32.mrf.mxu3  ;;  %v2424_v1 = vunpack.c.l.bf16 %v2412_v44 }
 0x4bb   : > { %v7258_v6 = vadd.f32 %v2088_v32, %v2070_v61  ;;  %v5405_v32 = vld [vmem:[#allocation2 + $0xc] sm:$0xf]  ;;  %v2447_v21 = vmul.f32 %v6077_v10, %v2415_v63  ;;  %v2467_v42 = vmul.f32 %v6122_v13, %v2415_v63 }
 0x4bc   : > { %v2071_v35 = vpop.f32.mrf.mxu1 }
 0x4bd   : > { %v2098_v12 = vadd.f32 %v7258_v6, %v7260_v41  ;;  %v2478_v44 = vpack.c.bf16 %v2467_v42, %v2467_v42 }
 0x4be   : > { %v2036_v62 = vpop.f32.mrf.mxu2 }
 0x4bf   : > { %v7246_v54 = vadd.f32 %v2036_v62, %v2018_v25  ;;  %v5722_v62 = vld [vmem:[#allocation2 + $0x38] sm:$0xf0] }
 0x4c0   : > { %v2052_v15 = vpop.f32.mrf.mxu0 }
 0x4c1   : > { %v2072_v52 = vadd.f32 %v2071_v35, %v2052_v15  ;;  %v2450_v35 = vmul.f32 %v6077_v10, %v2418_v58  ;;  %v2421_v15 = vunpack.c.l.bf16 %v2410_v11 }
 0x4c2   : > { %v2090_v16 = vpop.f32.mrf.mxu3 }
 0x4c3   : > { %v7242_v17 = vadd.f32 %v2090_v16, %v2072_v52  ;;  %v5406_v52 = vor.u32 %v5719_v56, %v5405_v32  ;;  %v5417_v16 = vld [vmem:[#allocation2 + $0x2c] sm:$0xf]  ;;  %v2460_v25 = vpack.c.bf16 %v2450_v35, %v2450_v35  ;;  %v2430_v56 = vmul.f32 %v5994_v8, %v2418_v58 }
 0x4c4   : > { %v2074_v19 = vpop.f32.mrf.mxu1 }
 0x4c5   : > { %v2101_v2 = vadd.f32 %v7242_v17, %v7240_v4 }
 0x4c6   : > { %v2038_v9 = vpop.f32.mrf.mxu2 }
 0x4c7   : > { %2102 = vadd.xlane.f32.xlu1 %v2101_v2  ;;  %v7252_v18 = vadd.f32 %v2038_v9, %v2020_v55  ;;  %v2433_v2 = vmul.f32 %v5994_v8, %v2421_v15  ;;  %v2718_v55 = vunpack.c.l.b16 %v2460_v25  ;;  %v5897_v25 = vmov 256.0  }
 0x4c8   : > { %v2055_v0 = vpop.f32.mrf.mxu0  ;;  %5825 = vrcp.f32 %v5897_v25 }
 0x4c9   : > { %v2075_v14 = vadd.f32 %v2074_v19, %v2055_v0  ;;  %v2436_v19 = vmul.f32 %v5994_v8, %v2424_v1  ;;  %v2458_v0 = vpack.c.bf16 %v2447_v21, %v2447_v21  ;;  %v2442_v9 = vpack.c.bf16 %v2433_v2, %v2433_v2 }
 0x4ca   : > { %v2093_v28 = vpop.f32.mrf.mxu3 }
 0x4cb   : > { %v7248_v34 = vadd.f32 %v2093_v28, %v2075_v14  ;;  %v5418_v14 = vor.u32 %v5722_v62, %v5417_v16  ;;  %v2453_v28 = vmul.f32 %v6077_v10, %v2421_v15  ;;  %v2679_v57 = vunpack.c.l.b16 %v2442_v9 }
 0x4cc   : > { %v2076_v40 = vpop.f32.mrf.mxu1  ;;  %v2440_v62 = vpack.c.bf16 %v2430_v56, %v2430_v56 }
 0x4cd   : > { %v2104_v39 = vadd.f32 %v7248_v34, %v7246_v54  ;;  %v2462_v61 = vpack.c.bf16 %v2453_v28, %v2453_v28 }
 0x4cf   : > { %2105 = vadd.xlane.f32.xlu0 %v2104_v39  ;;  %v2456_v39 = vmul.f32 %v6077_v10, %v2424_v1  ;;  %v2721_v3 = vunpack.c.l.b16 %v2462_v61 }
 0x4d0   : > { %v2057_v29 = vpop.f32.mrf.mxu0 }
 0x4d1   : > { %v2077_v49 = vadd.f32 %v2076_v40, %v2057_v29  ;;  %v2444_v40 = vpack.c.bf16 %v2436_v19, %v2436_v19  ;;  %v2715_v29 = vunpack.c.l.b16 %v2458_v0  ;;  %v2676_v0 = vunpack.c.l.b16 %v2440_v62 }
 0x4d2   : > { %v2095_v30 = vpop.f32.mrf.mxu3 }
 0x4d3   : > { %v7254_v53 = vadd.f32 %v2095_v30, %v2077_v49  ;;  %v2473_v49 = vmul.f32 %v6122_v13, %v2421_v15  ;;  %v2476_v30 = vmul.f32 %v6122_v13, %v2424_v1  ;;  %v2682_v43 = vunpack.c.l.b16 %v2444_v40 }
 0x4d4   : > { %v2727_v24 = vpack.c.b16 %v2718_v55, %v2715_v29  ;;  %v2799_v1 = vunpack.c.l.b16 %v2478_v44 }
 0x4d5   : > { %v2107_v23 = vadd.f32 %v7254_v53, %v7252_v18  ;;  %v2482_v20 = vpack.c.bf16 %v2473_v49, %v2473_v49  ;;  %v2688_v11 = vpack.c.b16 %v2682_v43, %v2679_v57 }
 0x4d7   : > { %2108 = vadd.xlane.f32.xlu2 %v2107_v23  ;;  %v2464_v23 = vpack.c.bf16 %v2456_v39, %v2456_v39  ;;  %v2805_v21 = vunpack.c.l.b16 %v2482_v20 }
 0x4d9   : > { %v2724_v51 = vunpack.c.l.b16 %v2464_v23 }
 0x4db   : > { %v2730_v15 = vpack.c.b16 %v2724_v51, %v2721_v3  ;;  %v2147_v3 = vld [vmem:[%s9084_s4 + $0x8] sm:$0xff]  ;;  %v2148_v51 = vld [vmem:[%s9084_s4 + $0x10] sm:$0xff] }
 0x4df   : > { %2099 = vadd.xlane.f32.xlu2 %v2098_v12  ;;  %v2484_v12 = vpack.c.bf16 %v2476_v30, %v2476_v30 }
 0x4e0   : > { %2543 = vrot.lane.b32.xlu1 %v5370_v7, %s5886_s28  ;;  %v2470_v7 = vmul.f32 %v6122_v13, %v2418_v58 }
 0x4e1   : > { %v2808_v35 = vunpack.c.l.b16 %v2484_v12  ;;  %v2146_v12 = vld [vmem:[%s9084_s4] sm:$0xff] }
 0x4e2   : > { %v2480_v32 = vpack.c.bf16 %v2470_v7, %v2470_v7  ;;  %v2121_v7 = vld [vmem:[%s9083_s3] sm:$0xff] }
 0x4e3   : > { %2537 = vrot.lane.b32.xlu0 %v5358_v50, %s5886_s28  ;;  %v2427_v50 = vmul.f32 %v5994_v8, %v2415_v63  ;;  %v2814_v2 = vpack.c.b16 %v2808_v35, %v2805_v21 }
 0x4e5   : > { %v2438_v16 = vpack.c.bf16 %v2427_v50, %v2427_v50  ;;  %v2149_v50 = vld [vmem:[%s9084_s4 + $0x18] sm:$0xff] }
 0x4e7   : > { %v2673_v19 = vunpack.c.l.b16 %v2438_v16 }
 0x4e8   : > { %2777 = vrot.lane.b32.xlu1 %v5406_v52, %s5891_s9  ;;  %v2802_v52 = vunpack.c.l.b16 %v2480_v32 }
 0x4e9   : > { %v2685_v58 = vpack.c.b16 %v2676_v0, %v2673_v19 }
 0x4ea   : > { %v2811_v63 = vpack.c.b16 %v2802_v52, %v2799_v1 }
 0x4eb   : > { %2783 = vrot.lane.b32.xlu0 %v5418_v14, %s5891_s9  ;;  %v5826_v14 = vpop.eup %5825 }
 0x4ec   : > { %v2111_v28 = vmul.f32 256.0, %v5826_v14  ;;  %vm2115_vm1 = vweird.f32 %v5826_v14 }
 0x4ee   : > { %v2112_v39 = vsub.f32 1.0, %v2111_v28 }
 0x4f0   : > { %2735 = vrot.lane.b32.xlu1 %v2727_v24, %s5894_s12  ;;  %v2113_v9 = vmul.f32 %v5826_v14, %v2112_v39 }
 0x4f2   : > { %v2114_v40 = vadd.f32 %v5826_v14, %v2113_v9 }
 0x4f3   : > { %2699 = vrot.lane.b32.xlu0 %v2688_v11, %s5892_s10 }
 0x4f4   : > { %v7286_v29 = vsel %vm2115_vm1, %v5826_v14, %v2114_v40 }
 0x4f5   : > { %9126 = vst [vmem:[#allocation4_spill] sm:$0xff] %v7286_v29 }
 0x4f7   : > { %2741 = vrot.lane.b32.xlu2 %v2730_v15, %s5894_s12 }
 0x4f8   : > { %2825 = vrot.lane.b32.xlu1 %v2814_v2, %s5896_s14 }
 0x4fb   : > { %2819 = vrot.lane.b32.xlu0 %v2811_v63, %s5896_s14 }
 0x4ff   : > { %2693 = vrot.lane.b32.xlu2 %v2685_v58, %s5892_s10 }
 0x53a   : > { %v2103_v61 = vpop.xlane.xlu1 %2102 }
 0x53b   : > { %v2118_v57 = vmul.f32 %v7286_v29, %v2103_v61 }
 0x542   : > { %v2106_v55 = vpop.xlane.xlu0 %2105 }
 0x543   : > { %v2119_v23 = vmul.f32 %v7286_v29, %v2106_v55 }
 0x54a   : > { %v2109_v49 = vpop.xlane.xlu2 %2108 }
 0x54b   : > { %v2120_v30 = vmul.f32 %v7286_v29, %v2109_v49 }
 0x54d   : > { %2137 = vmatpush.msrb.mxu2 %v2120_v30 }
 0x54f   : > { %2138 = vmatpush.msrb.mxu2 %v2119_v23 }
 0x551   : > { %2139 = vmatpush.msrb.mxu2 %v2118_v57 }
 0x552   : > { %v2100_v43 = vpop.xlane.xlu2 %2099 }
 0x553   : > { %v2117_v42 = vmul.f32 %v7286_v29, %v2100_v43 }
 0x555   : > { %2140 = vmatpush.msrb.mxu2 %v2117_v42 }
 0x556   : > { %5338 = vmatmul.msk.f32.vlgmr.msrb.gmra.mxu2 %vm9098_vm0, %v2121_v7 }
 0x5d9   : > { %v2142_v24 = vpop.f32.mrf.mxu2 }
 0x5da   : > { %v2145_v20 = vmax.f32 %v2142_v24, 0.0 }
 0x5dc   : > { %2178 = vmatpush.msra.mxu2 %v2145_v20 }
 0x5dd   : > { %5339 = vmatmul.msk.f32.vlgmr.msra.gmra.mxu2 %vm9097_vm2, %v2146_v12 }
 0x5e5   : > { %5340 = vmatmul.msk.f32.gmra.mxu2 %vm9097_vm2, %v2147_v3 }
 0x5ed   : > { %5341 = vmatmul.msk.f32.gmra.mxu2 %vm9097_vm2, %v2148_v51 }
 0x5f5   : > { %5342 = vmatmul.msk.f32.gmra.mxu2 %vm9097_vm2, %v2149_v50 }
 0x660   : > { %v2180_v11 = vpop.f32.mrf.mxu2 }
 0x661   : > { %v5343_v44 = vmul.f32 -1.442695, %v2180_v11 }
 0x663   : > { %5827 = vpow2.f32 %v5343_v44 }
 0x668   : > { %v2183_v32 = vpop.f32.mrf.mxu2 }
 0x669   : > { %v5828_v56 = vpop.eup %5827  ;;  %v5344_v21 = vmul.f32 -1.442695, %v2183_v32 }
 0x66a   : > { %v2204_v35 = vadd.f32 1.0, %v5828_v56 }
 0x66b   : > { %5829 = vpow2.f32 %v5344_v21 }
 0x66c   : > { %5831 = vrcp.f32 %v2204_v35  ;;  %v2219_v19 = vand.u32 2147483648, %v2204_v35  ;;  %v2217_v58 = vand.u32 2147483647, %v2204_v35  ;;  %vm2213_vm5 = vweird.f32 %v2204_v35 }
 0x66e   : > { %v2220_v55 = vor.u32 1.1754944e-38, %v2219_v19  ;;  %vm2218_vm8 = vcmp.eq.f32.partialorder %v2217_v58, 8.507059e+37 }
 0x670   : > { %v2186_v15 = vpop.f32.mrf.mxu2 }
 0x671   : > { %v5830_v1 = vpop.eup %5829  ;;  %v5345_v52 = vmul.f32 -1.442695, %v2186_v15 }
 0x672   : > { %v5832_v16 = vpop.eup %5831  ;;  %v2205_v62 = vadd.f32 1.0, %v5830_v1 }
 0x673   : > { %5833 = vpow2.f32 %v5345_v52  ;;  %v2209_v2 = vmul.f32 %v5832_v16, %v2204_v35  ;;  %vm2214_vm3 = vweird.f32 %v5832_v16 }
 0x674   : > { %5835 = vrcp.f32 %v2205_v62  ;;  %vm2215_vm7 = vmor %vm2213_vm5, %vm2214_vm3  ;;  %v2234_v23 = vand.u32 2147483648, %v2205_v62  ;;  %vm2228_vm1 = vweird.f32 %v2205_v62  ;;  %v2232_v43 = vand.u32 2147483647, %v2205_v62 }
 0x675   : > { %v2210_v63 = vsub.f32 1.0, %v2209_v2 }
 0x676   : > { %v2235_v7 = vor.u32 1.1754944e-38, %v2234_v23  ;;  %vm2233_vm6 = vcmp.eq.f32.partialorder %v2232_v43, 8.507059e+37  ;;  %v5859_v43 = vld [vmem:[%s5949_s26 + $0x10] sm:$0xff] }
 0x677   : > { %v2211_v0 = vmul.f32 %v5832_v16, %v2210_v63 }
 0x678   : > { %v2189_v25 = vpop.f32.mrf.mxu2 }
 0x679   : > { %v5834_v14 = vpop.eup %5833  ;;  %v5346_v28 = vmul.f32 -1.442695, %v2189_v25  ;;  %v2212_v39 = vadd.f32 %v5832_v16, %v2211_v0 }
 0x67a   : > { %v5836_v9 = vpop.eup %5835  ;;  %v2206_v40 = vadd.f32 1.0, %v5834_v14 }
 0x67b   : > { %5837 = vpow2.f32 %v5346_v28  ;;  %v2216_v49 = vsel %vm2215_vm7, %v5832_v16, %v2212_v39  ;;  %v2224_v30 = vmul.f32 %v5836_v9, %v2205_v62  ;;  %vm2229_vm2 = vweird.f32 %v5836_v9  ;;  %v7312_v39 = vpop.permute.xlu1 %2543 }
 0x67c   : > { %5839 = vrcp.f32 %v2206_v40  ;;  %v2221_v61 = vsel %vm2218_vm8, %v2220_v55, %v2216_v49  ;;  %vm2230_vm0 = vmor %vm2228_vm1, %vm2229_vm2  ;;  %v2249_v44 = vand.u32 2147483648, %v2206_v40  ;;  %vm2243_vm3 = vweird.f32 %v2206_v40 }
 0x67d   : > { %2270 = vperm.xlu1 %5822, %v2221_v61   ;;  %v2225_v57 = vsub.f32 1.0, %v2224_v30  ;;  %v2247_v56 = vand.u32 2147483647, %v2206_v40 }
 0x67e   : > { %v2250_v35 = vor.u32 1.1754944e-38, %v2249_v44 }
 0x67f   : > { %v2226_v42 = vmul.f32 %v5836_v9, %v2225_v57  ;;  %vm2248_vm2 = vcmp.eq.f32.partialorder %v2247_v56, 8.507059e+37  ;;  %v7324_v57 = vpop.permute.xlu0 %2537 }
 0x681   : > { %v5838_v24 = vpop.eup %5837  ;;  %v2227_v20 = vadd.f32 %v5836_v9, %v2226_v42 }
 0x682   : > { %v5840_v12 = vpop.eup %5839  ;;  %v2207_v3 = vadd.f32 1.0, %v5838_v24 }
 0x683   : > { %v2231_v51 = vsel %vm2230_vm0, %v5836_v9, %v2227_v20  ;;  %v2239_v50 = vmul.f32 %v5840_v12, %v2206_v40  ;;  %vm2244_vm5 = vweird.f32 %v5840_v12  ;;  %v7314_v9 = vpop.permute.xlu2 %2741  ;;  %v7316_v40 = vpop.permute.xlu1 %2777 }
 0x684   : > { %5841 = vrcp.f32 %v2207_v3  ;;  %v2236_v11 = vsel %vm2233_vm6, %v2235_v7, %v2231_v51  ;;  %vm2245_vm7 = vmor %vm2243_vm3, %vm2244_vm5  ;;  %v2264_v2 = vand.u32 2147483648, %v2207_v3  ;;  %vm2258_vm0 = vweird.f32 %v2207_v3  ;;  %v5860_v7 = vld [vmem:[%s5949_s26 + $0x18] sm:$0xff]  ;;  %v5861_v51 = vld [vmem:[%s5949_s26 + $0x20] sm:$0xff] }
 0x685   : > { %2275 = vperm.xlu2 %5823, %v2236_v11   ;;  %v2240_v32 = vsub.f32 1.0, %v2239_v50  ;;  %v2262_v19 = vand.u32 2147483647, %v2207_v3  ;;  %v5862_v11 = vld [vmem:[%s5949_s26 + $0x28] sm:$0xff]  ;;  %vm9140_vm3 = vcmask 138240  }
 0x686   : > { %v2265_v58 = vor.u32 1.1754944e-38, %v2264_v2  ;;  %vm9141_vm5 = vmmov %vm9140_vm3 }
 0x687   : > { %v2241_v21 = vmul.f32 %v5840_v12, %v2240_v32  ;;  %vm2263_vm1 = vcmp.eq.f32.partialorder %v2262_v19, 8.507059e+37  ;;  %v7347_v32 = vpop.permute.xlu0 %2783 }
 0x689   : > { %v2242_v15 = vadd.f32 %v5840_v12, %v2241_v21 }
 0x68a   : > { %v5842_v1 = vpop.eup %5841 }
 0x68b   : > { %v2246_v52 = vsel %vm2245_vm7, %v5840_v12, %v2242_v15  ;;  %v2254_v16 = vmul.f32 %v5842_v1, %v2207_v3  ;;  %vm2259_vm6 = vweird.f32 %v5842_v1  ;;  %v7318_v55 = vpop.permute.xlu2 %2693  ;;  %v7320_v49 = vpop.permute.xlu1 %2735  ;;  %vm9142_vm7 = vmmov %vm9140_vm3 }
 0x68c   : > { %v2251_v62 = vsel %vm2248_vm2, %v2250_v35, %v2246_v52  ;;  %vm2260_vm8 = vmor %vm2258_vm0, %vm2259_vm6 }
 0x68d   : > { %2280 = vperm.xlu2 %5823, %v2251_v62   ;;  %v2255_v63 = vsub.f32 1.0, %v2254_v16  ;;  %vm9143_vm2 = vmmov %vm9140_vm3 }
 0x68e   : > { %vm9144_vm0 = vmmov %vm9143_vm2 }
 0x68f   : > { %v2256_v0 = vmul.f32 %v5842_v1, %v2255_v63  ;;  %v7364_v62 = vpop.permute.xlu0 %2699  ;;  %vm9145_vm6 = vmmov %vm9144_vm0 }
 0x691   : > { %v2257_v25 = vadd.f32 %v5842_v1, %v2256_v0 }
 0x693   : > { %v2261_v14 = vsel %vm2260_vm8, %v5842_v1, %v2257_v25  ;;  %v7337_v12 = vpop.permute.xlu1 %2825  ;;  %v5864_v1 = vld [vmem:[%s5949_s26 + $0x8] sm:$0xff]  ;;  %vm9146_vm8 = vmmov %vm9144_vm0 }
 0x694   : > { %v2266_v28 = vsel %vm2263_vm1, %v2265_v58, %v2261_v14  ;;  %9129 = vst [vmem:[#allocation8_spill] sm:$0xff] %v7337_v12  ;;  %vm9147_vm1 = vmmov %vm9144_vm0 }
 0x695   : > { %2285 = vperm.xlu0 %5824, %v2266_v28  }
 0x6df   : > { %v2276_v30 = vpop.permute.xlu2 %2275 }
 0x6e0   : > { %v2290_v61 = vmul.f32 %v2276_v30, %v7240_v4  ;;  %v2291_v23 = vmul.f32 %v2276_v30, %v7242_v17 }
 0x6e2   : > { %v7327_v42 = vadd.f32 %v5859_v43, %v2290_v61  ;;  %v7330_v24 = vadd.f32 %v5860_v7, %v2291_v23  ;;  %v7370_v61 = vpop.permute.xlu0 %2819 }
 0x6e4   : > { %9127 = vst [vmem:[#allocation5_spill] sm:$0xff] %v7327_v42  ;;  %v7334_v20 = vpack.c.bf16 %v7330_v24, %v7327_v42 }
 0x6e5   : > { %9128 = vst [vmem:[#allocation6_spill] sm:$0xff] %v7330_v24 }
 0x6e6   : > { %2318 = vst [vmem:[#allocation2 + $0x14] sm:$0xff] %v7334_v20 }
 0x6e7   : > { %v2281_v4 = vpop.permute.xlu2 %2280 }
 0x6e8   : > { %v2292_v17 = vmul.f32 %v2281_v4, %v7246_v54  ;;  %v2293_v3 = vmul.f32 %v2281_v4, %v7248_v34  ;;  %v5863_v34 = vld [vmem:[%s5949_s26] sm:$0xff] }
 0x6ea   : > { %v7342_v50 = vadd.f32 %v5861_v51, %v2292_v17  ;;  %v7345_v44 = vadd.f32 %v5862_v11, %v2293_v3 }
 0x6ec   : > { %9130 = vst [vmem:[#allocation9_spill] sm:$0xff] %v7342_v50  ;;  %v7351_v56 = vpack.c.bf16 %v7345_v44, %v7342_v50 }
 0x6ed   : > { %9131 = vst [vmem:[#allocation10_spill] sm:$0xff] %v7345_v44  ;;  %v2324_v2 = vld [vmem:[#allocation2 + $0x18] sm:$0xf]  ;;  %v5718_v19 = vld [vmem:[#allocation2 + $0x10] sm:$0xf0] }
 0x6ee   : > { %2319 = vst [vmem:[#allocation2 + $0x24] sm:$0xff] %v7351_v56  ;;  %v7366_v63 = vunpack.c.l.bf16 %v2324_v2  ;;  %v5399_v58 = vld [vmem:[#allocation2 + $0x14] sm:$0xf0]  ;;  %v2323_v30 = vld [vmem:[#allocation2 + $0x10] sm:$0xff] }
 0x6ef   : > { %v2271_v21 = vpop.permute.xlu1 %2270  ;;  %v7382_v51 = vunpack.c.l.bf16 %v2323_v30  ;;  %v7384_v11 = vunpack.c.h.bf16 %v2323_v30  ;;  %v5709_v2 = vld [vmem:[#allocation2 + $0x14] sm:$0xf0] }
 0x6f0   : > { %v2288_v35 = vmul.f32 %v2271_v21, %v7260_v41  ;;  %v2289_v54 = vmul.f32 %v2271_v21, %v7258_v6  ;;  %v2386_v6 = vmul.f32 %v6022_v37, %v7366_v63 }
 0x6f2   : > { %v7357_v15 = vadd.f32 %v5863_v34, %v2288_v35  ;;  %v7360_v52 = vadd.f32 %v5864_v1, %v2289_v54  ;;  %v2396_v3 = vpack.c.bf16 %v2386_v6, %v2386_v6  ;;  %v2365_v6 = vmul.f32 %v7384_v11, %v9123_v36 }
 0x6f4   : > { %9132 = vst [vmem:[#allocation11_spill] sm:$0xff] %v7357_v15  ;;  %v2313_v16 = vpack.c.bf16 %v7360_v52, %v7357_v15 }
 0x6f5   : > { %9133 = vst [vmem:[#allocation12_spill] sm:$0xff] %v7360_v52 }
 0x6f6   : > { %2317 = vst [vmem:[#allocation2 + $0x4] sm:$0xff] %v2313_v16  ;;  %v7398_v24 = vunpack.c.h.bf16 %v2313_v16 }
 0x6fd   : > { %v5397_v0 = vld [vmem:[#allocation2 + $0x4] sm:$0xf]  ;;  %v5717_v41 = vld [vmem:[#allocation2 + $0x8] sm:$0xf] }
 0x6fe   : > { %v5398_v25 = vor.u32 %v5718_v19, %v5397_v0  ;;  %v5402_v14 = vor.u32 %v5717_v41, %v5399_v58  ;;  %v2322_v28 = vld [vmem:[#allocation2 + $0x8] sm:$0xf]  ;;  %v2321_v43 = vld [vmem:[#allocation2] sm:$0xff]  ;;  %v2608_v0 = vunpack.c.l.b16 %v2396_v3  ;;  %v5359_v41 = vld [vmem:[#allocation2 + $0x10] sm:$0xf0]  ;;  %v2364_v58 = vmul.f32 %v9122_v5, %v7382_v51 }
 0x6ff   : > { %v7372_v23 = vunpack.c.l.bf16 %v2322_v28  ;;  %v7376_v7 = vunpack.c.l.bf16 %v2321_v43  ;;  %v7378_v4 = vunpack.c.h.bf16 %v2321_v43  ;;  %v5365_v21 = vld [vmem:[#allocation2 + $0x8] sm:$0xf]  ;;  %v5707_v54 = vld [vmem:[#allocation2 + $0x4] sm:$0xf] }
 0x700   : > { %2773 = vrot.lane.b32.xlu1 %v5398_v25, %s5891_s9  ;;  %2775 = vrot.lane.b32.xlu2 %v5402_v14, %s5891_s9  ;;  %v5366_v25 = vor.u32 %v5709_v2, %v5365_v21  ;;  %v5362_v14 = vor.u32 %v5707_v54, %v5359_v41  ;;  %v7405_v21 = vpack.c.bf16 %v2365_v6, %v2364_v58  ;;  %v2416_v54 = vunpack.c.l.bf16 %v7334_v20  ;;  %v5381_v41 = vld [vmem:[#allocation2 + $0x4] sm:$0xf] }
 0x701   : > { %v2383_v17 = vmul.f32 %v6022_v37, %v7372_v23  ;;  %v2361_v34 = vmul.f32 %v9122_v5, %v7376_v7  ;;  %v2362_v1 = vmul.f32 %v7378_v4, %v9123_v36  ;;  %v2363_v8 = vmul.f32 %v9121_v48, %v7372_v23 }
 0x703   : > { %v2394_v35 = vpack.c.bf16 %v2383_v17, %v2383_v17  ;;  %v7394_v43 = vpack.c.bf16 %v2362_v1, %v2361_v34  ;;  %v7396_v17 = vunpack.c.l.bf16 %v2313_v16  ;;  %v2417_v34 = vunpack.c.h.bf16 %v7334_v20  ;;  %v5865_v1 = vld [vmem:[%s5949_s26 + $0x30] sm:$0xff]  ;;  %v5866_v16 = vld [vmem:[%s5949_s26 + $0x38] sm:$0xff] }
 0x704   : > { %v2446_v20 = vmul.f32 %v7398_v24, %v6213_v46 }
 0x705   : > { %v2605_v19 = vunpack.c.l.b16 %v2394_v35  ;;  %v2562_v58 = vunpack.c.h.b16 %v7394_v43  ;;  %v2445_v6 = vmul.f32 %v6191_v59, %v7396_v17 }
 0x707   : > { %v2286_v28 = vpop.permute.xlu0 %2285  ;;  %v2617_v30 = vpack.c.b16 %v2608_v0, %v2605_v19  ;;  %v5713_v0 = vld [vmem:[#allocation2 + $0x8] sm:$0xf]  ;;  %v2457_v15 = vpack.c.bf16 %v2446_v20, %v2445_v6  ;;  %v2374_v20 = vpack.c.bf16 %v2363_v8, %v2363_v8  ;;  %v2466_v8 = vmul.f32 %v7398_v24, %v9125_v45 }
 0x708   : > { %v2294_v3 = vmul.f32 %v2286_v28, %v7252_v18  ;;  %v2295_v35 = vmul.f32 %v2286_v28, %v7254_v53  ;;  %2541 = vrot.lane.b32.xlu2 %v5366_v25, %s5886_s28  ;;  %2539 = vrot.lane.b32.xlu1 %v5362_v14, %s5886_s28  ;;  %v2381_v18 = vmul.f32 %v6024_v38, %v7376_v7 }
 0x709   : > { %2625 = vrot.lane.b32.xlu0 %v2617_v30, %s5893_s11  ;;  %v2382_v53 = vmul.f32 %v7378_v4, %v6046_v47  ;;  %v2384_v14 = vmul.f32 %v6024_v38, %v7382_v51  ;;  %v2385_v28 = vmul.f32 %v7384_v11, %v6046_v47  ;;  %v5383_v30 = vld [vmem:[#allocation2 + $0x14] sm:$0xf0]  ;;  %v2714_v12 = vunpack.c.h.b16 %v2457_v15 }
 0x70a   : > { %v7410_v2 = vadd.f32 %v5865_v1, %v2294_v3  ;;  %v7413_v19 = vadd.f32 %v5866_v16, %v2295_v35  ;;  %v5714_v3 = vld [vmem:[#allocation2 + $0x10] sm:$0xf0]  ;;  %v2565_v35 = vunpack.c.h.b16 %v7405_v21  ;;  %v2448_v1 = vmul.f32 %v6191_v59, %v2416_v54 }
 0x70b   : > { %v2449_v16 = vmul.f32 %v2417_v34, %v6213_v46  ;;  %v5386_v42 = vor.u32 %v5713_v0, %v5383_v30  ;;  %v5382_v52 = vor.u32 %v5714_v3, %v5381_v41  ;;  %v2395_v44 = vpack.c.bf16 %v2385_v28, %v2384_v14 }
 0x70c   : > { %9134 = vst [vmem:[#allocation13_spill] sm:$0xff] %v7410_v2  ;;  %v7426_v25 = vpack.c.bf16 %v7413_v19, %v7410_v2  ;;  %v2574_v2 = vpack.c.b16 %v2565_v35, %v2562_v58  ;;  %v2425_v0 = vmul.f32 %v6254_v26, %v7396_v17  ;;  %v2563_v3 = vunpack.c.l.b16 %v2374_v20 }
 0x70d   : > { %9135 = vst [vmem:[#allocation14_spill] sm:$0xff] %v7413_v19  ;;  %v2393_v19 = vpack.c.bf16 %v2382_v53, %v2381_v18  ;;  %v2459_v50 = vpack.c.bf16 %v2449_v16, %v2448_v1  ;;  %v2426_v18 = vmul.f32 %v7398_v24, %v6262_v22  ;;  %v2607_v53 = vunpack.c.h.b16 %v2395_v44 }
 0x70e   : > { %2320 = vst [vmem:[#allocation2 + $0x34] sm:$0xff] %v7426_v25  ;;  %v2561_v35 = vunpack.c.l.b16 %v7394_v43  ;;  %v2465_v16 = vmul.f32 %v9124_v27, %v7396_v17  ;;  %v2713_v17 = vunpack.c.l.b16 %v2457_v15  ;;  %v2344_v20 = vmul.f32 %v6280_v31, %v7382_v51 }
 0x70f   : > { %v2604_v29 = vunpack.c.h.b16 %v2393_v19  ;;  %v2603_v13 = vunpack.c.l.b16 %v2393_v19  ;;  %v2717_v41 = vunpack.c.h.b16 %v2459_v50  ;;  %v2429_v19 = vmul.f32 %v2417_v34, %v6262_v22 }
 0x710   : > { %2655 = vrot.lane.b32.xlu2 %v5386_v42, %s5890_s8  ;;  %2653 = vrot.lane.b32.xlu1 %v5382_v52, %s5890_s8  ;;  %v2606_v42 = vunpack.c.l.b16 %v2395_v44  ;;  %v2366_v52 = vmul.f32 %v9121_v48, %v7366_v63  ;;  %v2437_v28 = vpack.c.bf16 %v2426_v18, %v2425_v0  ;;  %v2468_v0 = vmul.f32 %v9124_v27, %v2416_v54 }
 0x711   : > { %2581 = vrot.lane.b32.xlu0 %v2574_v2, %s5895_s13  ;;  %v2428_v2 = vmul.f32 %v6254_v26, %v2416_v54  ;;  %v2616_v58 = vpack.c.b16 %v2607_v53, %v2604_v29  ;;  %v2726_v14 = vpack.c.b16 %v2717_v41, %v2714_v12  ;;  %v2564_v29 = vunpack.c.l.b16 %v7405_v21 }
 0x712   : > { %v2615_v6 = vpack.c.b16 %v2606_v42, %v2603_v13  ;;  %v2376_v30 = vpack.c.bf16 %v2366_v52, %v2366_v52  ;;  %v2671_v1 = vunpack.c.l.b16 %v2437_v28  ;;  %v2469_v18 = vmul.f32 %v2417_v34, %v9125_v45 }
 0x713   : > { %v2439_v44 = vpack.c.bf16 %v2429_v19, %v2428_v2  ;;  %v2573_v42 = vpack.c.b16 %v2564_v29, %v2561_v35  ;;  %v2477_v41 = vpack.c.bf16 %v2466_v8, %v2465_v16  ;;  %v2672_v43 = vunpack.c.h.b16 %v2437_v28 }
 0x714   : > { %v2566_v13 = vunpack.c.l.b16 %v2376_v30  ;;  %v2479_v24 = vpack.c.bf16 %v2469_v18, %v2468_v0  ;;  %v2341_v21 = vmul.f32 %v6280_v31, %v7376_v7  ;;  %v2342_v54 = vmul.f32 %v7378_v4, %v6297_v60  ;;  %v2325_v30 = vld [vmem:[#allocation2 + $0x20] sm:$0xff] }
 0x715   : > { %v2674_v12 = vunpack.c.l.b16 %v2439_v44  ;;  %v2675_v34 = vunpack.c.h.b16 %v2439_v44  ;;  %v2797_v2 = vunpack.c.l.b16 %v2477_v41  ;;  %v2327_v19 = vld [vmem:[#allocation2 + $0x30] sm:$0xff]  ;;  %v2798_v8 = vunpack.c.h.b16 %v2477_v41  ;;  %v2328_v0 = vld [vmem:[#allocation2 + $0x38] sm:$0xf] }
 0x716   : > { %v2575_v53 = vpack.c.b16 %v2566_v13, %v2563_v3  ;;  %v2800_v28 = vunpack.c.l.b16 %v2479_v24  ;;  %v2353_v3 = vpack.c.bf16 %v2342_v54, %v2341_v21  ;;  %v7473_v35 = vunpack.c.l.bf16 %v2327_v19  ;;  %v2326_v21 = vld [vmem:[#allocation2 + $0x28] sm:$0xf] }
 0x717   : > { %v2683_v52 = vpack.c.b16 %v2674_v12, %v2671_v1  ;;  %v2684_v15 = vpack.c.b16 %v2675_v34, %v2672_v43  ;;  %v7475_v4 = vunpack.c.h.bf16 %v2327_v19  ;;  %v7483_v1 = vunpack.c.h.bf16 %v2325_v30 }
 0x718   : > { %2623 = vrot.lane.b32.xlu2 %v2616_v58, %s5893_s11  ;;  %2621 = vrot.lane.b32.xlu1 %v2615_v6, %s5893_s11  ;;  %v2346_v58 = vmul.f32 %v6283_v33, %v7366_v63  ;;  %v2716_v6 = vunpack.c.l.b16 %v2459_v50  ;;  %v2809_v44 = vpack.c.b16 %v2800_v28, %v2797_v2  ;;  %v2343_v63 = vmul.f32 %v6283_v33, %v7372_v23  ;;  %v5721_v28 = vld [vmem:[#allocation2 + $0x30] sm:$0xf0] }
 0x719   : > { %2733 = vrot.lane.b32.xlu0 %v2726_v14, %s5894_s12  ;;  %v2345_v14 = vmul.f32 %v7384_v11, %v6297_v60  ;;  %v7481_v11 = vunpack.c.l.bf16 %v2325_v30  ;;  %v2493_v13 = vunpack.c.l.b16 %v2353_v3  ;;  %v2390_v29 = vmul.f32 %v6024_v38, %v7473_v35  ;;  %v5411_v30 = vld [vmem:[#allocation2 + $0x34] sm:$0xf0] }
 0x71a   : > { %v2725_v7 = vpack.c.b16 %v2716_v6, %v2713_v17  ;;  %v2356_v50 = vpack.c.bf16 %v2346_v58, %v2346_v58  ;;  %v2354_v16 = vpack.c.bf16 %v2343_v63, %v2343_v63  ;;  %v2391_v23 = vmul.f32 %v7475_v4, %v6046_v47 }
 0x71b   : > { %v2355_v51 = vpack.c.bf16 %v2345_v14, %v2344_v20  ;;  %v2494_v12 = vunpack.c.h.b16 %v2353_v3  ;;  %v2387_v43 = vmul.f32 %v6024_v38, %v7481_v11  ;;  %v2388_v41 = vmul.f32 %v7483_v1, %v6046_v47 }
 0x71c   : > { %v7490_v18 = vunpack.c.l.b16 %v2354_v16  ;;  %v7500_v19 = vpack.c.bf16 %v2391_v23, %v2390_v29  ;;  %v7502_v58 = vunpack.c.l.bf16 %v2328_v0  ;;  %v7508_v20 = vunpack.c.l.bf16 %v2326_v21  ;;  %v5371_v29 = vld [vmem:[#allocation2 + $0x30] sm:$0xf0] }
 0x71d   : > { %v2497_v17 = vunpack.c.h.b16 %v2355_v51  ;;  %v2371_v0 = vmul.f32 %v7475_v4, %v9123_v36  ;;  %v2368_v21 = vmul.f32 %v7483_v1, %v9123_v36 }
 0x71e   : > { %v2612_v14 = vunpack.c.l.b16 %v7500_v19  ;;  %v2389_v3 = vmul.f32 %v6022_v37, %v7508_v20 }
 0x71f   : > { %v2506_v6 = vpack.c.b16 %v2497_v17, %v2494_v12  ;;  %v2370_v12 = vmul.f32 %v9122_v5, %v7473_v35  ;;  %v2367_v17 = vmul.f32 %v9122_v5, %v7481_v11 }
 0x720   : > { %2583 = vrot.lane.b32.xlu1 %v2575_v53, %s5895_s13  ;;  %2579 = vrot.lane.b32.xlu2 %v2573_v42, %s5895_s13  ;;  %v7492_v53 = vunpack.c.l.b16 %v2356_v50  ;;  %v2801_v42 = vunpack.c.h.b16 %v2479_v24  ;;  %v7506_v24 = vpack.c.bf16 %v2388_v41, %v2387_v43  ;;  %v5720_v50 = vld [vmem:[#allocation2 + $0x28] sm:$0xf]  ;;  %v5710_v43 = vld [vmem:[#allocation2 + $0x24] sm:$0xf] }
 0x721   : > { %2689 = vrot.lane.b32.xlu0 %v2683_v52, %s5892_s10  ;;  %v2496_v52 = vunpack.c.l.b16 %v2355_v51 }
 0x722   : > { %v2810_v34 = vpack.c.b16 %v2801_v42, %v2798_v8  ;;  %v5414_v8 = vor.u32 %v5720_v50, %v5411_v30  ;;  %v2349_v42 = vmul.f32 %v6283_v33, %v7508_v20  ;;  %v2420_v50 = vunpack.c.h.bf16 %v7351_v56 }
 0x723   : > { %v2505_v2 = vpack.c.b16 %v2496_v52, %v2493_v13  ;;  %v2398_v13 = vpack.c.bf16 %v2389_v3, %v2389_v3  ;;  %v5712_v52 = vld [vmem:[#allocation2 + $0x34] sm:$0xf0] }
 0x724   : > { %v2358_v3 = vpack.c.bf16 %v2349_v42, %v2349_v42 }
 0x725   : > { %v2611_v41 = vunpack.c.l.b16 %v2398_v13  ;;  %v5716_v13 = vld [vmem:[#allocation2 + $0x30] sm:$0xf0] }
 0x728   : > { %2691 = vrot.lane.b32.xlu1 %v2684_v15, %s5892_s10  ;;  %2731 = vrot.lane.b32.xlu2 %v2725_v7, %s5894_s12  ;;  %v2392_v15 = vmul.f32 %v6022_v37, %v7502_v58  ;;  %v2609_v7 = vunpack.c.l.b16 %v7506_v24 }
 0x729   : > { %2815 = vrot.lane.b32.xlu0 %v2809_v44, %s5896_s14  ;;  %v5409_v44 = vld [vmem:[#allocation2 + $0x24] sm:$0xf] }
 0x72a   : > { %v5410_v63 = vor.u32 %v5721_v28, %v5409_v44  ;;  %v2618_v51 = vpack.c.b16 %v2612_v14, %v2609_v7  ;;  %v2400_v16 = vpack.c.bf16 %v2392_v15, %v2392_v15  ;;  %v2379_v14 = vpack.c.bf16 %v2371_v0, %v2370_v12  ;;  %v5391_v12 = vld [vmem:[#allocation2 + $0x34] sm:$0xf0] }
 0x72b   : > { %v2422_v15 = vunpack.c.l.bf16 %v7426_v25  ;;  %v2423_v28 = vunpack.c.h.bf16 %v7426_v25  ;;  %v2352_v7 = vmul.f32 %v6283_v33, %v7502_v58  ;;  %v2377_v44 = vpack.c.bf16 %v2368_v21, %v2367_v17 }
 0x72c   : > { %v2614_v23 = vunpack.c.l.b16 %v2400_v16  ;;  %v2571_v16 = vunpack.c.h.b16 %v2379_v14 }
 0x72d   : > { %v2454_v25 = vmul.f32 %v6191_v59, %v2422_v15  ;;  %v2568_v0 = vunpack.c.h.b16 %v2377_v44  ;;  %v2475_v54 = vmul.f32 %v2423_v28, %v9125_v45 }
 0x72f   : > { %v2577_v21 = vpack.c.b16 %v2571_v16, %v2568_v0  ;;  %v2570_v16 = vunpack.c.l.b16 %v2379_v14  ;;  %v2369_v0 = vmul.f32 %v9121_v48, %v7508_v20  ;;  %v2474_v20 = vmul.f32 %v9124_v27, %v2422_v15 }
 0x730   : > { %2817 = vrot.lane.b32.xlu1 %v2810_v34, %s5896_s14  ;;  %2861 = vrot.lane.b32.xlu2 %v2505_v2, %s5885_s27  ;;  %v5374_v34 = vor.u32 %v5710_v43, %v5371_v29  ;;  %v5377_v2 = vld [vmem:[#allocation2 + $0x28] sm:$0xf]  ;;  %v7541_v29 = vunpack.c.l.b16 %v2358_v3  ;;  %v2372_v3 = vmul.f32 %v9121_v48, %v7502_v58 }
 0x731   : > { %2863 = vrot.lane.b32.xlu0 %v2506_v6, %s5885_s27  ;;  %v2620_v6 = vpack.c.b16 %v2614_v23, %v2611_v41  ;;  %v5378_v30 = vor.u32 %v5712_v52, %v5377_v2  ;;  %v2452_v52 = vmul.f32 %v2420_v50, %v6213_v46  ;;  %v5715_v41 = vld [vmem:[#allocation2 + $0x28] sm:$0xf]  ;;  %v2378_v14 = vpack.c.bf16 %v2369_v0, %v2369_v0 }
 0x732   : > { %v5394_v2 = vor.u32 %v5715_v41, %v5391_v12  ;;  %v2380_v41 = vpack.c.bf16 %v2372_v3, %v2372_v3 }
 0x738   : > { %2779 = vrot.lane.b32.xlu2 %v5410_v63, %s5891_s9  ;;  %2627 = vrot.lane.b32.xlu1 %v2618_v51, %s5893_s11  ;;  %v2419_v63 = vunpack.c.l.bf16 %v7351_v56  ;;  %v2360_v51 = vpack.c.bf16 %v2352_v7, %v2352_v7  ;;  %v5389_v56 = vld [vmem:[#allocation2 + $0x24] sm:$0xf] }
 0x739   : > { %2781 = vrot.lane.b32.xlu0 %v5414_v8, %s5891_s9  ;;  %v2455_v8 = vmul.f32 %v2423_v28, %v6213_v46  ;;  %v5390_v17 = vor.u32 %v5716_v13, %v5389_v56  ;;  %v2435_v13 = vmul.f32 %v2423_v28, %v6262_v22 }
 0x73a   : > { %v7543_v23 = vunpack.c.l.b16 %v2360_v51  ;;  %v2451_v42 = vmul.f32 %v6191_v59, %v2419_v63  ;;  %v2434_v51 = vmul.f32 %v6254_v26, %v2422_v15  ;;  %v2471_v3 = vmul.f32 %v9124_v27, %v2419_v63 }
 0x73c   : > { %v2510_v43 = vpack.c.b16 %v7543_v23, %v7541_v29  ;;  %v2443_v58 = vpack.c.bf16 %v2435_v13, %v2434_v51  ;;  %v2472_v51 = vmul.f32 %v2420_v50, %v9125_v45  ;;  %v9136_v23 = vpack.c.b16 %v7492_v53, %v7490_v18 }
 0x73e   : > { %v2481_v0 = vpack.c.bf16 %v2472_v51, %v2471_v3  ;;  %v2681_v28 = vunpack.c.h.b16 %v2443_v58 }
 0x740   : > { %2545 = vrot.lane.b32.xlu2 %v5374_v34, %s5886_s28  ;;  %2631 = vrot.lane.b32.xlu1 %v2620_v6, %s5893_s11  ;;  %v2463_v34 = vpack.c.bf16 %v2455_v8, %v2454_v25  ;;  %v2461_v6 = vpack.c.bf16 %v2452_v52, %v2451_v42  ;;  %v2431_v25 = vmul.f32 %v6254_v26, %v2419_v63  ;;  %v2610_v8 = vunpack.c.h.b16 %v7506_v24 }
 0x741   : > { %2547 = vrot.lane.b32.xlu0 %v5378_v30, %s5886_s28  ;;  %v2613_v30 = vunpack.c.h.b16 %v7500_v19  ;;  %v2432_v42 = vmul.f32 %v2420_v50, %v6262_v22  ;;  %v2567_v19 = vunpack.c.l.b16 %v2377_v44  ;;  %v2572_v24 = vunpack.c.l.b16 %v2380_v41 }
 0x742   : > { %v2723_v7 = vunpack.c.h.b16 %v2463_v34  ;;  %v2720_v12 = vunpack.c.h.b16 %v2461_v6  ;;  %v2722_v44 = vunpack.c.l.b16 %v2463_v34  ;;  %v2719_v13 = vunpack.c.l.b16 %v2461_v6 }
 0x743   : > { %v2619_v52 = vpack.c.b16 %v2613_v30, %v2610_v8  ;;  %v2569_v30 = vunpack.c.l.b16 %v2378_v14  ;;  %v2350_v63 = vmul.f32 %v6280_v31, %v7473_v35  ;;  %v2351_v50 = vmul.f32 %v7475_v4, %v6297_v60 }
 0x744   : > { %v2729_v56 = vpack.c.b16 %v2723_v7, %v2720_v12  ;;  %v2483_v12 = vpack.c.bf16 %v2475_v54, %v2474_v20 }
 0x746   : > { %v2807_v34 = vunpack.c.h.b16 %v2483_v12  ;;  %v2806_v6 = vunpack.c.l.b16 %v2483_v12 }
 0x748   : > { %2657 = vrot.lane.b32.xlu2 %v5390_v17, %s5890_s8  ;;  %2587 = vrot.lane.b32.xlu1 %v2577_v21, %s5895_s13  ;;  %v2576_v17 = vpack.c.b16 %v2570_v16, %v2567_v19  ;;  %v2441_v21 = vpack.c.bf16 %v2432_v42, %v2431_v25  ;;  %v2578_v16 = vpack.c.b16 %v2572_v24, %v2569_v30  ;;  %v2804_v42 = vunpack.c.h.b16 %v2481_v0 }
 0x749   : > { %2659 = vrot.lane.b32.xlu0 %v5394_v2, %s5890_s8  ;;  %v2680_v2 = vunpack.c.l.b16 %v2443_v58  ;;  %v2728_v25 = vpack.c.b16 %v2722_v44, %v2719_v13  ;;  %v2347_v19 = vmul.f32 %v6280_v31, %v7481_v11  ;;  %v2359_v58 = vpack.c.bf16 %v2351_v50, %v2350_v63 }
 0x74a   : > { %v2677_v7 = vunpack.c.l.b16 %v2441_v21  ;;  %v2678_v54 = vunpack.c.h.b16 %v2441_v21 }
 0x74b   : > { %v2503_v21 = vunpack.c.h.b16 %v2359_v58  ;;  %v2502_v24 = vunpack.c.l.b16 %v2359_v58 }
 0x74c   : > { %v2686_v8 = vpack.c.b16 %v2680_v2, %v2677_v7  ;;  %v2687_v41 = vpack.c.b16 %v2681_v28, %v2678_v54 }
 0x750   : > { %2629 = vrot.lane.b32.xlu2 %v2619_v52, %s5893_s11  ;;  %2739 = vrot.lane.b32.xlu1 %v2729_v56, %s5894_s12  ;;  %v2348_v52 = vmul.f32 %v7483_v1, %v6297_v60  ;;  %v2803_v56 = vunpack.c.l.b16 %v2481_v0 }
 0x751   : > { %2585 = vrot.lane.b32.xlu0 %v2576_v17, %s5895_s13  ;;  %v2813_v17 = vpack.c.b16 %v2807_v34, %v2804_v42 }
 0x752   : > { %v2812_v14 = vpack.c.b16 %v2806_v6, %v2803_v56  ;;  %v2357_v35 = vpack.c.bf16 %v2348_v52, %v2347_v19 }
 0x754   : > { %v2500_v11 = vunpack.c.h.b16 %v2357_v35  ;;  %v2499_v2 = vunpack.c.l.b16 %v2357_v35 }
 0x756   : > { %v2509_v20 = vpack.c.b16 %v2503_v21, %v2500_v11  ;;  %v2508_v1 = vpack.c.b16 %v2502_v24, %v2499_v2 }
 0x758   : > { %2589 = vrot.lane.b32.xlu2 %v2578_v16, %s5895_s13  ;;  %2695 = vrot.lane.b32.xlu1 %v2686_v8, %s5892_s10 }
 0x759   : > { %2737 = vrot.lane.b32.xlu0 %v2728_v25, %s5894_s12 }
 0x75a   : > { %v7572_v15 = vpop.permute.xlu2 %2775 }
 0x760   : > { %2697 = vrot.lane.b32.xlu2 %v2687_v41, %s5892_s10  ;;  %2823 = vrot.lane.b32.xlu1 %v2813_v17, %s5896_s14 }
 0x761   : > { %2821 = vrot.lane.b32.xlu0 %v2812_v14, %s5896_s14 }
 0x762   : > { %v7585_v4 = vpop.permute.xlu2 %2541 }
 0x768   : > { %2869 = vrot.lane.b32.xlu1 %v2509_v20, %s5885_s27 }
 0x769   : > { %2867 = vrot.lane.b32.xlu0 %v2508_v1, %s5885_s27 }
 0x76a   : > { %v7589_v44 = vpop.permute.xlu2 %2655 }
 0x772   : > { %v2774_v30 = vpop.permute.xlu1 %2773  ;;  %v2624_v7 = vpop.permute.xlu2 %2623 }
 0x773   : > { %2945 = vrot.lane.b32.xlu1 %v2774_v30, %s5885_s27 }
 0x77a   : > { %v2540_v3 = vpop.permute.xlu1 %2539  ;;  %v2580_v51 = vpop.permute.xlu2 %2579 }
 0x77b   : > { %v2626_v13 = vpop.permute.xlu0 %2625  ;;  %v2549_v16 = vsel %vm412_vm4, %v7324_v57, %v2540_v3  ;;  %v2785_v57 = vsel %vm854_vm10, %v2774_v30, %v7572_v15  ;;  %v2550_v54 = vsel %vm412_vm4, %v2540_v3, %v7585_v4 }
 0x77c   : > { %2873 = vrot.lane.b32.xlu1 %v2549_v16, %s5885_s27  ;;  %v2634_v8 = vsel %vm698_vm11, %v2624_v7, %v2626_v13 }
 0x77d   : > { %2899 = vrot.lane.b32.xlu0 %v2634_v8, %s5885_s27 }
 0x782   : > { %v7597_v12 = vpop.permute.xlu1 %2653  ;;  %v2732_v25 = vpop.permute.xlu2 %2731 }
 0x783   : > { %v2582_v0 = vpop.permute.xlu0 %2581  ;;  %2909 = vrot.lane.b32.xlu2 %v7597_v12, %s5885_s27 }
 0x784   : > { %2933 = vrot.lane.b32.xlu1 %v2732_v25, %s5885_s27  ;;  %v2591_v35 = vsel %vm655_vm12, %v2580_v51, %v2582_v0 }
 0x78a   : > { %v2622_v28 = vpop.permute.xlu1 %2621  ;;  %v7602_v34 = vpop.permute.xlu2 %2861 }
 0x78b   : > { %v7606_v63 = vpop.permute.xlu0 %2733  ;;  %2947 = vrot.lane.b32.xlu2 %v2785_v57, %s5885_s27  ;;  %v2633_v52 = vsel %vm698_vm11, %v2622_v28, %v2624_v7 }
 0x78c   : > { %v2743_v11 = vsel %vm811_vm13, %v2732_v25, %v7606_v63 }
 0x792   : > { %v7609_v50 = vpop.permute.xlu1 %2583  ;;  %v2780_v6 = vpop.permute.xlu2 %2779 }
 0x793   : > { %v2690_v42 = vpop.permute.xlu0 %2689  ;;  %2875 = vrot.lane.b32.xlu2 %v2550_v54, %s5885_s27  ;;  %v2592_v19 = vsel %vm655_vm12, %v2582_v0, %v7609_v50 }
 0x794   : > { %2921 = vrot.lane.b32.xlu1 %v2690_v42, %s5885_s27  ;;  %2887 = vrot.lane.b32.xlu0 %v2592_v19, %s5885_s27 }
 0x79a   : > { %v7619_v56 = vpop.permute.xlu1 %2691  ;;  %v2546_v41 = vpop.permute.xlu2 %2545 }
 0x79b   : > { %v7621_v17 = vpop.permute.xlu0 %2815  ;;  %2897 = vrot.lane.b32.xlu2 %v2633_v52, %s5885_s27  ;;  %v2701_v30 = vsel %vm768_vm15, %v2690_v42, %v7619_v56  ;;  %v2551_v0 = vsel %vm412_vm4, %v7312_v39, %v2546_v41 }
 0x79c   : > { %2901 = vrot.lane.b32.xlu1 %v2626_v13, %s5885_s27 }
 0x7a2   : > { %v7625_v58 = vpop.permute.xlu1 %2817  ;;  %v2658_v14 = vpop.permute.xlu2 %2657 }
 0x7a3   : > { %v7628_v21 = vpop.permute.xlu0 %2863  ;;  %2885 = vrot.lane.b32.xlu2 %v2591_v35, %s5885_s27  ;;  %2915 = vrot.lane.b32.xlu0 %v2658_v14, %s5885_s27  ;;  %v2661_v35 = vsel %vm350_vm9, %v7597_v12, %v7589_v44  ;;  %v2827_v18 = vsel %vm897_vm14, %v7621_v17, %v7625_v58 }
 0x7aa   : > { %v2628_v24 = vpop.permute.xlu1 %2627  ;;  %v2630_v8 = vpop.permute.xlu2 %2629 }
 0x7ab   : > { %v2782_v2 = vpop.permute.xlu0 %2781  ;;  %2935 = vrot.lane.b32.xlu2 %v2743_v11, %s5885_s27  ;;  %v2635_v39 = vsel %vm698_vm11, %v2628_v24, %v2630_v8 }
 0x7ac   : > { %v2787_v20 = vsel %vm854_vm10, %v2780_v6, %v2782_v2  ;;  %v2788_v24 = vsel %vm854_vm10, %v2782_v2, %v7347_v32 }
 0x7ad   : > { %2953 = vrot.lane.b32.xlu0 %v2787_v20, %s5885_s27  ;;  %v2786_v20 = vsel %vm854_vm10, %v7572_v15, %v7316_v40  ;;  %v2744_v40 = vsel %vm811_vm13, %v7606_v63, %v7320_v49 }
 0x7b2   : > { %v2632_v1 = vpop.permute.xlu1 %2631  ;;  %v2590_v42 = vpop.permute.xlu2 %2589 }
 0x7b3   : > { %v2548_v7 = vpop.permute.xlu0 %2547  ;;  %2923 = vrot.lane.b32.xlu2 %v2701_v30, %s5885_s27  ;;  %v2636_v57 = vsel %vm698_vm11, %v2630_v8, %v2632_v1 }
 0x7b4   : > { %v2552_v3 = vsel %vm412_vm4, %v2546_v41, %v2548_v7 }
 0x7b5   : > { %2881 = vrot.lane.b32.xlu0 %v2552_v3, %s5885_s27  ;;  %v3271_v3 = vld [vmem:[#allocation2 + $0xc] sm:$0xf] }
 0x7ba   : > { %v2588_v51 = vpop.permute.xlu1 %2587  ;;  %v2698_v41 = vpop.permute.xlu2 %2697 }
 0x7bb   : > { %v7642_v13 = vpop.permute.xlu0 %2659  ;;  %2951 = vrot.lane.b32.xlu2 %v2780_v6, %s5885_s27 }
 0x7bc   : > { %v2662_v16 = vsel %vm350_vm9, %v2658_v14, %v7642_v13  ;;  %v2594_v14 = vsel %vm655_vm12, %v2588_v51, %v2590_v42 }
 0x7bd   : > { %2917 = vrot.lane.b32.xlu1 %v2662_v16, %s5885_s27 }
 0x7c2   : > { %v2740_v25 = vpop.permute.xlu1 %2739 }
 0x7c3   : > { %v2586_v28 = vpop.permute.xlu0 %2585  ;;  %2879 = vrot.lane.b32.xlu2 %v2551_v0, %s5885_s27  ;;  %v2746_v63 = vsel %vm811_vm13, %v2740_v25, %v7314_v9  ;;  %v2704_v9 = vsel %vm768_vm15, %v2698_v41, %v7364_v62  ;;  %v7738_v62 = vunpack.c.l.bf16 %v3271_v3  ;;  %v5469_v0 = vld [vmem:[#allocation2 + $0x20] sm:$0xf] }
 0x7c4   : > { %v2593_v19 = vsel %vm655_vm12, %v2586_v28, %v2588_v51  ;;  %v3273_v51 = vld [vmem:[#allocation2 + $0x1c] sm:$0xf]  ;;  %v5733_v28 = vld [vmem:[#allocation2 + $0x2c] sm:$0xf0] }
 0x7c5   : > { %2905 = vrot.lane.b32.xlu1 %v2636_v57, %s5885_s27  ;;  %v7740_v53 = vunpack.c.l.bf16 %v3273_v51 }
 0x7c7   : > { %v3315_v57 = vmul.f32 %v6077_v10, %v7740_v53 }
 0x7ca   : > { %v2696_v54 = vpop.permute.xlu1 %2695 }
 0x7cb   : > { %v2738_v6 = vpop.permute.xlu0 %2737  ;;  %2927 = vrot.lane.b32.xlu2 %v2696_v54, %s5885_s27  ;;  %v2703_v32 = vsel %vm768_vm15, %v2696_v54, %v2698_v41  ;;  %v2828_v54 = vsel %vm897_vm14, %v7625_v58, %v7370_v61 }
 0x7cc   : > { %2939 = vrot.lane.b32.xlu0 %v2738_v6, %s5885_s27  ;;  %v2745_v52 = vsel %vm811_vm13, %v2738_v6, %v2740_v25  ;;  %v3325_v6 = vpack.c.bf16 %v3315_v57, %v3315_v57 }
 0x7cd   : > { %2891 = vrot.lane.b32.xlu1 %v2593_v19, %s5885_s27  ;;  %v3275_v19 = vld [vmem:[#allocation2 + $0x2c] sm:$0xf] }
 0x7ce   : > { %v3286_v58 = vunpack.c.l.bf16 %v3275_v19 }
 0x7d0   : > { %v3318_v19 = vmul.f32 %v6077_v10, %v3286_v58 }
 0x7d2   : > { %v2824_v2 = vpop.permute.xlu1 %2823 }
 0x7d3   : > { %2907 = vrot.lane.b32.xlu2 %v2632_v1, %s5885_s27  ;;  %v2822_v1 = vpop.permute.xlu0 %2821 }
 0x7d4   : > { %2903 = vrot.lane.b32.xlu0 %v2635_v39, %s5885_s27  ;;  %v3277_v39 = vld [vmem:[#allocation2 + $0x3c] sm:$0xf] }
 0x7d5   : > { %2941 = vrot.lane.b32.xlu1 %v2745_v52, %s5885_s27 }
 0x7db   : > { %2893 = vrot.lane.b32.xlu2 %v2594_v14, %s5885_s27  ;;  %v5517_v14 = vld [vmem:[#allocation2 + $0x2c] sm:$0xf] }
 0x7dc   : > { %2911 = vrot.lane.b32.xlu0 %v2661_v35, %s5885_s27  ;;  %v5744_v35 = vld [vmem:[#allocation2 + $0x38] sm:$0xf0] }
 0x7dd   : > { %2955 = vrot.lane.b32.xlu1 %v2788_v24, %s5885_s27  ;;  %v7671_v11 = vpop.permute.xlu2 %2909 }
 0x7e3   : > { %2895 = vrot.lane.b32.xlu2 %v2590_v42, %s5885_s27 }
 0x7e4   : > { %2949 = vrot.lane.b32.xlu0 %v2786_v20, %s5885_s27  ;;  %v3289_v20 = vunpack.c.l.bf16 %v3277_v39 }
 0x7e5   : > { %2889 = vrot.lane.b32.xlu1 %v7609_v50, %s5885_s27  ;;  %v7680_v12 = vpop.permute.xlu2 %2947  ;;  %v2702_v50 = vsel %vm768_vm15, %v7619_v56, %v7318_v55  ;;  %v7709_v55 = vpop.permute.xlu0 %2867 }
 0x7e6   : > { %v3321_v39 = vmul.f32 %v6077_v10, %v3289_v20 }
 0x7eb   : > { %2877 = vrot.lane.b32.xlu2 %v7585_v4, %s5885_s27  ;;  %v7703_v4 = vpop.permute.xlu1 %2869 }
 0x7ec   : > { %2929 = vrot.lane.b32.xlu0 %v2703_v32, %s5885_s27 }
 0x7ed   : > { %2937 = vrot.lane.b32.xlu1 %v2744_v40, %s5885_s27  ;;  %v7690_v15 = vpop.permute.xlu2 %2875  ;;  %v3583_v40 = vunpack.c.l.b16 %v3325_v6 }
 0x7ef   : > { %v7725_v30 = vpop.permute.xlu0 %2899 }
 0x7f3   : > { %2925 = vrot.lane.b32.xlu2 %v2702_v50, %s5885_s27  ;;  %v7715_v29 = vpop.permute.xlu1 %2945  ;;  %v5457_v50 = vld [vmem:[#allocation2] sm:$0xf] }
 0x7f4   : > { %2883 = vrot.lane.b32.xlu0 %v2548_v7, %s5885_s27 }
 0x7f5   : > { %2871 = vrot.lane.b32.xlu1 %v2510_v43, %s5885_s27  ;;  %v7701_v49 = vpop.permute.xlu2 %2897  ;;  %v2829_v43 = vsel %vm897_vm14, %v2822_v1, %v2824_v2 }
 0x7fb   : > { %2943 = vrot.lane.b32.xlu2 %v2746_v63, %s5885_s27  ;;  %v7730_v16 = vpop.permute.xlu1 %2873  ;;  %v9138_v63 = vld [vmem:[#allocation3_spill] sm:$0xff] }
 0x7fc   : > { %2963 = vrot.lane.b32.xlu0 %v2822_v1, %s5885_s27  ;;  %v5730_v1 = vld [vmem:[#allocation2 + $0xc] sm:$0xf0]  ;;  %v3301_v3 = vmul.f32 %v9138_v63, %v3289_v20 }
 0x7fd   : > { %2957 = vrot.lane.b32.xlu1 %v7621_v17, %s5885_s27  ;;  %v7713_v56 = vpop.permute.xlu2 %2885  ;;  %v3312_v17 = vmul.f32 %v6077_v10, %v7738_v62  ;;  %v5458_v51 = vor.u32 %v5730_v1, %v5457_v50 }
 0x7fe   : > { %v3309_v57 = vpack.c.bf16 %v3301_v3, %v3301_v3 }
 0x7ff   : > { %v3323_v42 = vpack.c.bf16 %v3312_v17, %v3312_v17 }
 0x800   : > { %v3547_v1 = vunpack.c.l.b16 %v3309_v57 }
 0x801   : > { %v3580_v32 = vunpack.c.l.b16 %v3323_v42 }
 0x803   : > { %2865 = vrot.lane.b32.xlu2 %v9136_v23, %s5885_s27  ;;  %v7758_v41 = vpop.permute.xlu1 %2933  ;;  %v3295_v23 = vmul.f32 %v9138_v63, %v7740_v53 }
 0x804   : > { %2931 = vrot.lane.b32.xlu0 %v2704_v9, %s5885_s27  ;;  %v5518_v9 = vor.u32 %v5744_v35, %v5517_v14  ;;  %v9139_v14 = vld [vmem:[#allocation7_spill] sm:$0xff] }
 0x805   : > { %2965 = vrot.lane.b32.xlu1 %v2829_v43, %s5885_s27  ;;  %v7728_v7 = vpop.permute.xlu2 %2935  ;;  %v3298_v43 = vmul.f32 %v9138_v63, %v3286_v58  ;;  %v3338_v35 = vmul.f32 %v9139_v14, %v3286_v58  ;;  %v2997_v58 = vsel %vm9141_vm5, %v7715_v29, %v7680_v12  ;;  %vm9149_vm5 = vmmov %vm9144_vm0 }
 0x806   : > { %v7742_v8 = vpop.permute.xlu0 %2887 }
 0x807   : > { %v3307_v17 = vpack.c.bf16 %v3298_v43, %v3298_v43  ;;  %v3329_v43 = vpack.c.bf16 %v3321_v39, %v3321_v39 }
 0x809   : > { %v3544_v50 = vunpack.c.l.b16 %v3307_v17 }
 0x80b   : > { %2959 = vrot.lane.b32.xlu2 %v2827_v18, %s5885_s27  ;;  %v3592_v18 = vpack.c.b16 %v3583_v40, %v3580_v32  ;;  %v7772_v42 = vpop.permute.xlu1 %2921 }
 0x80c   : > { %2919 = vrot.lane.b32.xlu0 %v7642_v13, %s5885_s27  ;;  %v5470_v13 = vor.u32 %v5733_v28, %v5469_v0  ;;  %v3305_v28 = vpack.c.bf16 %v3295_v23, %v3295_v23 }
 0x80d   : > { %2913 = vrot.lane.b32.xlu1 %v7589_v44, %s5885_s27  ;;  %v7746_v25 = vpop.permute.xlu2 %2923  ;;  %v9137_v44 = vld [vmem:[#allocation8_spill] sm:$0xff] }
 0x80e   : > { %v2830_v52 = vsel %vm897_vm14, %v2824_v2, %v9137_v44  ;;  %v3292_v2 = vmul.f32 %v9138_v63, %v7738_v62 }
 0x810   : > { %v3303_v0 = vpack.c.bf16 %v3292_v2, %v3292_v2  ;;  %v3341_v2 = vmul.f32 %v9139_v14, %v3289_v20 }
 0x812   : > { %v3538_v44 = vunpack.c.l.b16 %v3303_v0  ;;  %v3349_v0 = vpack.c.bf16 %v3341_v2, %v3341_v2 }
 0x813   : > { %2961 = vrot.lane.b32.xlu2 %v2828_v54, %s5885_s27  ;;  %v5741_v54 = vld [vmem:[#allocation2 + $0x18] sm:$0xf0]  ;;  %v2902_v17 = vpop.permute.xlu1 %2901 }
 0x814   : > { %2967 = vrot.lane.b32.xlu0 %v2830_v52, %s5885_s27  ;;  %v3541_v52 = vunpack.c.l.b16 %v3305_v28  ;;  %v3589_v28 = vunpack.c.l.b16 %v3329_v43  ;;  %v2982_v43 = vsel %vm9143_vm2, %v7725_v30, %v2902_v17  ;;  %vm9151_vm2 = vmmov %vm9144_vm0 }
 0x815   : > { %3408 = vrot.lane.b32.xlu1 %v5470_v13, %s5886_s28  ;;  %v7762_v24 = vpop.permute.xlu0 %2915  ;;  %v2952_v61 = vpop.permute.xlu2 %2951  ;;  %v5505_v13 = vld [vmem:[#allocation2 + $0xc] sm:$0xf] }
 0x816   : > { %v5506_v40 = vor.u32 %v5741_v54, %v5505_v13  ;;  %v3550_v3 = vpack.c.b16 %v3541_v52, %v3538_v44  ;;  %v3673_v13 = vunpack.c.l.b16 %v3349_v0  ;;  %v3332_v54 = vmul.f32 %v9139_v14, %v7738_v62 }
 0x818   : > { %v3343_v29 = vpack.c.bf16 %v3332_v54, %v3332_v54 }
 0x81b   : > { %3648 = vrot.lane.b32.xlu2 %v5518_v9, %s5891_s9  ;;  %v3327_v9 = vpack.c.bf16 %v3318_v19, %v3318_v19  ;;  %v3335_v19 = vmul.f32 %v9139_v14, %v7740_v53 }
 0x81c   : > { %3600 = vrot.lane.b32.xlu0 %v3592_v18, %s5894_s12  ;;  %v3347_v18 = vpack.c.bf16 %v3338_v35, %v3338_v35 }
 0x81d   : > { %3402 = vrot.lane.b32.xlu1 %v5458_v51, %s5886_s28  ;;  %v7775_v6 = vpop.permute.xlu2 %2879  ;;  %v3553_v51 = vpack.c.b16 %v3547_v1, %v3544_v50  ;;  %v3345_v52 = vpack.c.bf16 %v3335_v19, %v3335_v19  ;;  %v3664_v50 = vunpack.c.l.b16 %v3343_v29 }
 0x81e   : > { %v3670_v57 = vunpack.c.l.b16 %v3347_v18 }
 0x81f   : > { %v7780_v32 = vpop.permute.xlu0 %2953  ;;  %v3667_v1 = vunpack.c.l.b16 %v3345_v52 }
 0x820   : > { %v2999_v23 = vsel %vm9140_vm3, %v2952_v61, %v7780_v32  ;;  %v3586_v61 = vunpack.c.l.b16 %v3327_v9  ;;  %v3679_v44 = vpack.c.b16 %v3673_v13, %v3670_v57  ;;  %v2981_v13 = vsel %vm9147_vm1, %v7701_v49, %v7725_v30  ;;  %vm9148_vm3 = vmmov %vm9144_vm0 }
 0x821   : > { %3066 = vmatpush.bf16.msrb.mxu1 %v2999_v23  ;;  %v3676_v2 = vpack.c.b16 %v3667_v1, %v3664_v50  ;;  %v2993_v17 = vsel %vm9148_vm3, %v7758_v41, %v7728_v7  ;;  %vm9154_vm1 = vmmov %vm9144_vm0 }
 0x822   : > { %v3595_v39 = vpack.c.b16 %v3589_v28, %v3586_v61  ;;  %vm9155_vm3 = vmmov %vm9144_vm0 }
 0x823   : > { %3642 = vrot.lane.b32.xlu2 %v5506_v40, %s5891_s9 }
 0x824   : > { %3558 = vrot.lane.b32.xlu0 %v3550_v3, %s5892_s10 }
 0x825   : > { %3564 = vrot.lane.b32.xlu1 %v3553_v51, %s5892_s10  ;;  %3067 = vmatpush.bf16.msrb.mxu1 %v2997_v58  ;;  %v2928_v20 = vpop.permute.xlu2 %2927 }
 0x827   : > { %v2882_v23 = vpop.permute.xlu0 %2881 }
 0x828   : > { %v2975_v30 = vsel %vm9151_vm2, %v7775_v6, %v2882_v23  ;;  %vm9158_vm2 = vmmov %vm9144_vm0 }
 0x82b   : > { %3606 = vrot.lane.b32.xlu2 %v3595_v39, %s5894_s12 }
 0x82d   : > { %3690 = vrot.lane.b32.xlu1 %v3679_v44, %s5896_s14  ;;  %v2908_v35 = vpop.permute.xlu2 %2907 }
 0x82f   : > { %v7797_v40 = vpop.permute.xlu1 %2917 }
 0x835   : > { %3684 = vrot.lane.b32.xlu1 %v3676_v2, %s5896_s14  ;;  %v2894_v62 = vpop.permute.xlu2 %2893 }
 0x837   : > { %v2906_v9 = vpop.permute.xlu1 %2905 }
 0x838   : > { %v2984_v53 = vsel %vm9142_vm7, %v2906_v9, %v2908_v35  ;;  %vm9150_vm7 = vmmov %vm9144_vm0 }
 0x839   : > { %3104 = vmatpush.bf16.msrb.mxu2 %v2984_v53  ;;  %v2977_v29 = vsel %vm9150_vm7, %v7713_v56, %v7742_v8  ;;  %vm9157_vm7 = vmmov %vm9144_vm0 }
 0x83d   : > { %3105 = vmatpush.bf16.msrb.mxu2 %v2982_v43  ;;  %v2896_v3 = vpop.permute.xlu2 %2895 }
 0x83e   : > { %v2940_v51 = vpop.permute.xlu0 %2939  ;;  %v2980_v18 = vsel %vm9144_vm0, %v2894_v62, %v2896_v3 }
 0x83f   : > { %v2892_v0 = vpop.permute.xlu1 %2891 }
 0x840   : > { %v2979_v39 = vsel %vm9149_vm5, %v2892_v0, %v2894_v62  ;;  %v2969_v62 = vsel %vm9155_vm3, %v7602_v34, %v7628_v21  ;;  %vm9156_vm5 = vmmov %vm9144_vm0 }
 0x841   : > { %3106 = vmatpush.bf16.msrb.mxu2 %v2980_v18  ;;  %v5423_v18 = vld [vmem:[%s9081_s1 + $0x3c] sm:$0xf0]  ;;  %vm9162_vm3 = vmmov %vm9144_vm0 }
 0x845   : > { %v2878_v44 = vpop.permute.xlu2 %2877 }
 0x846   : > { %v2904_v58 = vpop.permute.xlu0 %2903 }
 0x847   : > { %v2983_v61 = vsel %vm9145_vm6, %v2904_v58, %v2906_v9  ;;  %v2942_v28 = vpop.permute.xlu1 %2941  ;;  %vm9152_vm6 = vmmov %vm9144_vm0 }
 0x848   : > { %3047 = vmatpush.bf16.msrb.mxu0 %v2983_v61  ;;  %v2995_v57 = vsel %vm9146_vm8, %v2940_v51, %v2942_v28  ;;  %v2973_v35 = vsel %vm9152_vm6, %v7730_v16, %v7690_v15  ;;  %vm9153_vm8 = vmmov %vm9144_vm0  ;;  %v5702_v16 = vld [vmem:[%s9081_s1 + $0x38] sm:$0xf0]  ;;  %v2987_v51 = vsel %vm9158_vm2, %v7762_v24, %v7797_v40 }
 0x849   : > { %3068 = vmatpush.bf16.msrb.mxu1 %v2995_v57  ;;  %v2971_v2 = vsel %vm9153_vm8, %v7709_v55, %v7703_v4  ;;  %v2989_v55 = vsel %vm9156_vm5, %v7772_v42, %v7746_v25  ;;  %vm9159_vm6 = vmmov %vm9144_vm0 }
 0x84a   : > { %vm9160_vm8 = vmmov %vm9144_vm0 }
 0x84b   : > { %vm9163_vm5 = vmmov %vm9144_vm0 }
 0x84c   : > { %3048 = vmatpush.bf16.msrb.mxu0 %v2981_v13  ;;  %vm9165_vm2 = vmmov %vm9144_vm0 }
 0x84d   : > { %3069 = vmatpush.bf16.msrb.mxu1 %v2993_v17  ;;  %v7825_v50 = vpop.permute.xlu2 %2925 }
 0x84e   : > { %v7812_v54 = vpop.permute.xlu0 %2911 }
 0x84f   : > { %v2956_v19 = vpop.permute.xlu1 %2955  ;;  %v2985_v24 = vsel %vm9160_vm8, %v7671_v11, %v7812_v54  ;;  %vm9167_vm8 = vmmov %vm9144_vm0 }
 0x850   : > { %3049 = vmatpush.bf16.msrb.mxu0 %v2979_v39 }
 0x854   : > { %3050 = vmatpush.bf16.msrb.mxu0 %v2977_v29  ;;  %v5704_v29 = vld [vmem:[%s9081_s1 + $0x4c] sm:$0xf] }
 0x855   : > { %v2944_v53 = vpop.permute.xlu2 %2943 }
 0x856   : > { %v2950_v52 = vpop.permute.xlu0 %2949 }
 0x857   : > { %v2890_v49 = vpop.permute.xlu1 %2889  ;;  %v2998_v42 = vsel %vm9159_vm6, %v7680_v12, %v2950_v52  ;;  %v2996_v12 = vsel %vm9162_vm3, %v2942_v28, %v2944_v53  ;;  %v5705_v28 = vld [vmem:[%s9081_s1 + $0x50] sm:$0xf0]  ;;  %vm9166_vm6 = vmmov %vm9144_vm0  ;;  %v5435_v52 = vld [vmem:[%s9081_s1 + $0x54] sm:$0xf0] }
 0x858   : > { %3051 = vmatpush.bf16.msrb.mxu0 %v2975_v30  ;;  %v2978_v41 = vsel %vm9144_vm0, %v7742_v8, %v2890_v49  ;;  %v5421_v8 = vld [vmem:[%s9081_s1 + $0x30] sm:$0xf]  ;;  %v5703_v49 = vld [vmem:[%s9081_s1 + $0x40] sm:$0xf0]  ;;  %vm9169_vm3 = vmmov %vm9144_vm0 }
 0x859   : > { %3107 = vmatpush.bf16.msrb.mxu2 %v2978_v41  ;;  %v5422_v9 = vor.u32 %v5702_v16, %v5421_v8  ;;  %v2990_v41 = vsel %vm9167_vm8, %v7746_v25, %v7825_v50 }
 0x85c   : > { %3052 = vmatpush.bf16.msrb.mxu0 %v2973_v35  ;;  %v5438_v35 = vor.u32 %v5704_v29, %v5435_v52 }
 0x85d   : > { %v2866_v13 = vpop.permute.xlu2 %2865 }
 0x85e   : > { %v2930_v1 = vpop.permute.xlu0 %2929  ;;  %v2970_v17 = vsel %vm9165_vm2, %v7628_v21, %v2866_v13  ;;  %v5429_v21 = vld [vmem:[%s9081_s1 + $0x38] sm:$0xf]  ;;  %vm9172_vm2 = vmmov %vm9144_vm0 }
 0x85f   : > { %v2938_v56 = vpop.permute.xlu1 %2937  ;;  %v2991_v6 = vsel %vm9154_vm1, %v2928_v20, %v2930_v1  ;;  %v3000_v20 = vsel %vm9157_vm7, %v7780_v32, %v2956_v19  ;;  %v5701_v32 = vld [vmem:[%s9081_s1 + $0x34] sm:$0xf]  ;;  %vm9161_vm1 = vmmov %vm9144_vm0 }
 0x860   : > { %3053 = vmatpush.bf16.msrb.mxu0 %v2971_v2  ;;  %3070 = vmatpush.bf16.msrb.mxu1 %v2991_v6  ;;  %v5426_v0 = vor.u32 %v5701_v32, %v5423_v18  ;;  %vm9164_vm7 = vmmov %vm9144_vm0 }
 0x861   : > { %v2994_v11 = vsel %vm9164_vm7, %v7728_v7, %v2938_v56  ;;  %v5430_v56 = vor.u32 %v5703_v49, %v5429_v21  ;;  %vm9171_vm7 = vmmov %vm9144_vm0 }
 0x864   : > { %3054 = vmatpush.bf16.msrb.mxu0 %v2969_v62  ;;  %3071 = vmatpush.bf16.msrb.mxu1 %v2989_v55  ;;  %v5441_v55 = vld [vmem:[%s9081_s1 + $0x50] sm:$0xf] }
 0x865   : > { %v2960_v30 = vpop.permute.xlu2 %2959 }
 0x866   : > { %v2884_v43 = vpop.permute.xlu0 %2883 }
 0x867   : > { %v2872_v3 = vpop.permute.xlu1 %2871  ;;  %3055 = vmatmul.bf16.vlgmr.msrb.gmra.mxu0 %v5422_v9  ;;  %v2976_v34 = vsel %vm9144_vm0, %v2882_v23, %v2884_v43  ;;  %v2974_v23 = vsel %vm9161_vm1, %v7690_v15, %v2878_v44  ;;  %v5433_v15 = vld [vmem:[%s9081_s1 + $0x48] sm:$0xf]  ;;  %vm9168_vm1 = vmmov %vm9144_vm0 }
 0x868   : > { %3123 = vmatpush.bf16.msra.mxu0 %v3000_v20  ;;  %3072 = vmatpush.bf16.msrb.mxu1 %v2987_v51  ;;  %v2972_v57 = vsel %vm9163_vm5, %v7703_v4, %v2872_v3  ;;  %v5434_v19 = vor.u32 %v5705_v28, %v5433_v15  ;;  %vm9170_vm5 = vcmask 261120  }
 0x869   : > { %3108 = vmatpush.bf16.msrb.mxu2 %v2976_v34  ;;  %vm9174_vm8 = vmmov %vm9170_vm5 }
 0x86c   : > { %3124 = vmatpush.bf16.msra.mxu0 %v2998_v42  ;;  %3073 = vmatpush.bf16.msrb.mxu1 %v2985_v24 }
 0x86d   : > { %3109 = vmatpush.bf16.msrb.mxu2 %v2974_v23  ;;  %v2962_v62 = vpop.permute.xlu2 %2961 }
 0x86e   : > { %v2964_v58 = vpop.permute.xlu0 %2963 }
 0x86f   : > { %v2958_v61 = vpop.permute.xlu1 %2957  ;;  %3074 = vmatmul.bf16.vlgmr.msrb.gmra.mxu1 %v5426_v0 }
 0x870   : > { %3125 = vmatpush.bf16.msra.mxu0 %v2996_v12 }
 0x871   : > { %3110 = vmatpush.bf16.msrb.mxu2 %v2972_v57 }
 0x874   : > { %3126 = vmatpush.bf16.msra.mxu0 %v2994_v11 }
 0x875   : > { %3111 = vmatpush.bf16.msrb.mxu2 %v2970_v17 }
 0x876   : > { %v2932_v4 = vpop.permute.xlu0 %2931 }
 0x877   : > { %v2966_v39 = vpop.permute.xlu1 %2965  ;;  %3060 = vmatmul.bf16.gmra.mxu0 %v5434_v19  ;;  %v2992_v44 = vsel %vm9144_vm0, %v2930_v1, %v2932_v4  ;;  %v3001_v1 = vsel %vm9168_vm1, %v2958_v61, %v2960_v30  ;;  %vm9175_vm1 = vmmov %vm9170_vm5 }
 0x878   : > { %3112 = vmatmul.bf16.vlgmr.msrb.gmra.mxu2 %v5422_v9  ;;  %3127 = vmatpush.bf16.msra.mxu0 %v2992_v44  ;;  %v3003_v7 = vsel %vm9166_vm6, %v2964_v58, %v2966_v39  ;;  %v3002_v9 = vsel %vm9144_vm0, %v2960_v30, %v2962_v62  ;;  %vm9173_vm6 = vmmov %vm9170_vm5 }
 0x879   : > { %3091 = vmatpush.bf16.msrb.mxu3 %v3003_v7 }
 0x87c   : > { %3128 = vmatpush.bf16.msra.mxu0 %v2990_v41 }
 0x87d   : > { %3092 = vmatpush.bf16.msrb.mxu3 %v3001_v1 }
 0x87e   : > { %v2920_v2 = vpop.permute.xlu0 %2919 }
 0x87f   : > { %3079 = vmatmul.bf16.gmra.mxu1 %v5438_v35  ;;  %v2988_v6 = vsel %vm9169_vm3, %v7797_v40, %v2920_v2  ;;  %v2914_v8 = vpop.permute.xlu1 %2913  ;;  %v5706_v40 = vld [vmem:[%s9081_s1 + $0x58] sm:$0xf0]  ;;  %vm9176_vm3 = vmmov %vm9144_vm0 }
 0x880   : > { %5443 = vmatmul.msk.bf16.vlgmr.msrb.gmra.mxu3 %vm9170_vm5, %v5430_v56  ;;  %3129 = vmatpush.bf16.msra.mxu0 %v2988_v6  ;;  %v2986_v16 = vsel %vm9171_vm7, %v7812_v54, %v2914_v8  ;;  %v5442_v54 = vor.u32 %v5706_v40, %v5441_v55  ;;  %vm9177_vm5 = vmmov %vm9144_vm0 }
 0x881   : > { %vm9178_vm7 = vmmov %vm9144_vm0 }
 0x884   : > { %3130 = vmatpush.bf16.msra.mxu0 %v2986_v16 }
 0x886   : > { %v2968_v25 = vpop.permute.xlu0 %2967 }
 0x887   : > { %v3004_v50 = vsel %vm9172_vm2, %v2966_v39, %v2968_v25  ;;  %3131 = vmatmul.bf16.vlgmr.msra.gmra.mxu0 %v5426_v0  ;;  %vm9179_vm2 = vmmov %vm9144_vm0 }
 0x888   : > { %3117 = vmatmul.bf16.gmra.mxu2 %v5434_v19  ;;  %3148 = vmatpush.bf16.msra.mxu1 %v3004_v50 }
 0x88c   : > { %3149 = vmatpush.bf16.msra.mxu1 %v3002_v9 }
 0x88f   : > { %5445 = vmatmul.msk.bf16.vlgmr.msra.gmra.mxu1 %vm9173_vm6, %v5430_v56  ;;  %vm9180_vm6 = vmmov %vm9144_vm0 }
 0x890   : > { %5444 = vmatmul.msk.bf16.gmra.mxu3 %vm9174_vm8, %v5442_v54  ;;  %vm9181_vm8 = vmmov %vm9144_vm0 }
 0x897   : > { %3136 = vmatmul.bf16.gmra.mxu0 %v5438_v35 }
 0x89f   : > { %5446 = vmatmul.msk.bf16.gmra.mxu1 %vm9175_vm1, %v5442_v54  ;;  %vm9182_vm1 = vmmov %vm9144_vm0 }
 0x8e4   : > { %v3056_v20 = vpop.f32.mrf.mxu0 }
 0x8ec   : > { %v3058_v53 = vpop.f32.mrf.mxu0  ;;  %v3075_v43 = vpop.f32.mrf.mxu1 }
 0x8ed   : > { %v3076_v0 = vadd.f32 %v3075_v43, %v3056_v20 }
 0x8f4   : > { %v3061_v3 = vpop.f32.mrf.mxu0  ;;  %v3077_v51 = vpop.f32.mrf.mxu1 }
 0x8f5   : > { %v3078_v19 = vadd.f32 %v3077_v51, %v3058_v53 }
 0x8fb   : > { %v3113_v32 = vpop.f32.mrf.mxu2 }
 0x8fc   : > { %v3063_v34 = vpop.f32.mrf.mxu0  ;;  %v3080_v42 = vpop.f32.mrf.mxu1 }
 0x8fd   : > { %v3081_v56 = vadd.f32 %v3080_v42, %v3061_v3 }
 0x903   : > { %v3094_v18 = vpop.f32.mrf.mxu3  ;;  %v3115_v61 = vpop.f32.mrf.mxu2 }
 0x904   : > { %v3082_v24 = vpop.f32.mrf.mxu1  ;;  %v3132_v23 = vpop.f32.mrf.mxu0  ;;  %v3095_v58 = vadd.f32 %v3094_v18, %v3076_v0 }
 0x905   : > { %v3133_v12 = vadd.f32 %v3132_v23, %v3113_v32  ;;  %v3083_v0 = vadd.f32 %v3082_v24, %v3063_v34 }
 0x906   : > { %v3161_v28 = vmax.f32 %v3095_v58, 0.0 }
 0x90b   : > { %v3096_v57 = vpop.f32.mrf.mxu3  ;;  %v3118_v7 = vpop.f32.mrf.mxu2 }
 0x90c   : > { %v3134_v13 = vpop.f32.mrf.mxu0  ;;  %v3151_v11 = vpop.f32.mrf.mxu1  ;;  %v3097_v39 = vadd.f32 %v3096_v57, %v3078_v19 }
 0x90d   : > { %v3152_v15 = vadd.f32 %v3151_v11, %v3133_v12  ;;  %v3135_v44 = vadd.f32 %v3134_v13, %v3115_v61 }
 0x90e   : > { %v3163_v35 = vmax.f32 %v3097_v39, 0.0 }
 0x90f   : > { %v3162_v17 = vmax.f32 %v3152_v15, 0.0 }
 0x911   : > { %v3178_v4 = vpack.c.bf16 %v3162_v17, %v3161_v28 }
 0x913   : > { %3182 = vst [vmem:[#allocation2 + $0x4] sm:$0xff] %v3178_v4  ;;  %v7909_v49 = vunpack.c.l.bf16 %v3178_v4  ;;  %v7911_v30 = vunpack.c.h.bf16 %v3178_v4  ;;  %v3099_v41 = vpop.f32.mrf.mxu3  ;;  %v3120_v43 = vpop.f32.mrf.mxu2 }
 0x914   : > { %v3153_v29 = vpop.f32.mrf.mxu1  ;;  %v3137_v52 = vpop.f32.mrf.mxu0  ;;  %v3100_v25 = vadd.f32 %v3099_v41, %v3081_v56 }
 0x915   : > { %v3154_v21 = vadd.f32 %v3153_v29, %v3135_v44  ;;  %v3138_v6 = vadd.f32 %v3137_v52, %v3118_v7  ;;  %v3310_v8 = vmul.f32 %v6191_v59, %v7909_v49  ;;  %v3311_v16 = vmul.f32 %v7911_v30, %v6213_v46 }
 0x916   : > { %v3165_v32 = vmax.f32 %v3100_v25, 0.0 }
 0x917   : > { %v3164_v1 = vmax.f32 %v3154_v21, 0.0  ;;  %v7925_v53 = vpack.c.bf16 %v3311_v16, %v3310_v8 }
 0x919   : > { %v3179_v2 = vpack.c.bf16 %v3164_v1, %v3163_v35  ;;  %v3579_v13 = vunpack.c.h.b16 %v7925_v53 }
 0x91a   : > { %v3186_v55 = vld [vmem:[#allocation2] sm:$0xff]  ;;  %v5739_v28 = vld [vmem:[#allocation2 + $0x8] sm:$0xf] }
 0x91b   : > { %3183 = vst [vmem:[#allocation2 + $0x14] sm:$0xff] %v3179_v2  ;;  %v7917_v50 = vunpack.c.l.bf16 %v3179_v2  ;;  %v7919_v62 = vunpack.c.h.bf16 %v3179_v2  ;;  %v7927_v51 = vunpack.c.l.bf16 %v3186_v55  ;;  %v7929_v42 = vunpack.c.h.bf16 %v3186_v55  ;;  %v3101_v12 = vpop.f32.mrf.mxu3  ;;  %v5497_v57 = vld [vmem:[#allocation2 + $0x4] sm:$0xf] }
 0x91c   : > { %v3156_v40 = vpop.f32.mrf.mxu1  ;;  %v3139_v3 = vpop.f32.mrf.mxu0  ;;  %v3102_v39 = vadd.f32 %v3101_v12, %v3083_v0  ;;  %v3291_v0 = vmul.f32 %v7911_v30, %v6262_v22 }
 0x91d   : > { %v3157_v9 = vadd.f32 %v3156_v40, %v3138_v6  ;;  %v3313_v54 = vmul.f32 %v6191_v59, %v7917_v50  ;;  %v3314_v20 = vmul.f32 %v7919_v62, %v6213_v46  ;;  %v3140_v61 = vadd.f32 %v3139_v3, %v3120_v43  ;;  %v5735_v43 = vld [vmem:[#allocation2 + $0x8] sm:$0xf] }
 0x91e   : > { %v3246_v19 = vmul.f32 %v6024_v38, %v7927_v51  ;;  %v3247_v4 = vmul.f32 %v7929_v42, %v6046_v47  ;;  %v3167_v2 = vmax.f32 %v3102_v39, 0.0  ;;  %v3293_v55 = vmul.f32 %v6254_v26, %v7917_v50 }
 0x91f   : > { %v3166_v18 = vmax.f32 %v3157_v9, 0.0  ;;  %v7931_v23 = vpack.c.bf16 %v3314_v20, %v3313_v54  ;;  %v3294_v40 = vmul.f32 %v7919_v62, %v6262_v22  ;;  %v5481_v20 = vld [vmem:[#allocation2 + $0x4] sm:$0xf] }
 0x920   : > { %v3258_v56 = vpack.c.bf16 %v3247_v4, %v3246_v19 }
 0x921   : > { %v7933_v58 = vpack.c.bf16 %v3166_v18, %v3165_v32  ;;  %v3582_v11 = vunpack.c.h.b16 %v7931_v23  ;;  %v3290_v18 = vmul.f32 %v6254_v26, %v7909_v49 }
 0x922   : > { %v5740_v15 = vld [vmem:[#allocation2 + $0x10] sm:$0xf0]  ;;  %v5499_v17 = vld [vmem:[#allocation2 + $0x14] sm:$0xf0]  ;;  %v3468_v3 = vunpack.c.l.b16 %v3258_v56 }
 0x923   : > { %3184 = vst [vmem:[#allocation2 + $0x24] sm:$0xff] %v7933_v58  ;;  %v5498_v34 = vor.u32 %v5740_v15, %v5497_v57  ;;  %v5502_v24 = vor.u32 %v5739_v28, %v5499_v17  ;;  %v3591_v44 = vpack.c.b16 %v3582_v11, %v3579_v13  ;;  %v3188_v7 = vld [vmem:[#allocation2 + $0x10] sm:$0xff]  ;;  %v5483_v16 = vld [vmem:[#allocation2 + $0x14] sm:$0xf0]  ;;  %v3187_v57 = vld [vmem:[#allocation2 + $0x8] sm:$0xf]  ;;  %v3304_v11 = vpack.c.bf16 %v3294_v40, %v3293_v55 }
 0x924   : > { %v3158_v29 = vpop.f32.mrf.mxu1  ;;  %v7942_v52 = vunpack.c.l.bf16 %v3188_v7  ;;  %v7944_v21 = vunpack.c.h.bf16 %v3188_v7  ;;  %v5736_v8 = vld [vmem:[#allocation2 + $0x10] sm:$0xf0]  ;;  %v3189_v54 = vld [vmem:[#allocation2 + $0x18] sm:$0xf]  ;;  %v3302_v28 = vpack.c.bf16 %v3291_v0, %v3290_v18  ;;  %v7969_v17 = vunpack.c.l.bf16 %v3187_v57 }
 0x925   : > { %v3159_v41 = vadd.f32 %v3158_v29, %v3140_v61  ;;  %3638 = vrot.lane.b32.xlu2 %v5498_v34, %s5891_s9  ;;  %3640 = vrot.lane.b32.xlu0 %v5502_v24, %s5891_s9  ;;  %v5482_v12 = vor.u32 %v5736_v8, %v5481_v20  ;;  %v5486_v61 = vor.u32 %v5735_v43, %v5483_v16  ;;  %v7964_v15 = vunpack.c.l.bf16 %v3189_v54  ;;  %v5731_v19 = vld [vmem:[#allocation2 + $0x14] sm:$0xf0]  ;;  %v5459_v4 = vld [vmem:[#allocation2 + $0x10] sm:$0xf0]  ;;  %v5465_v24 = vld [vmem:[#allocation2 + $0x8] sm:$0xf] }
 0x926   : > { %3598 = vrot.lane.b32.xlu1 %v3591_v44, %s5894_s12  ;;  %v3249_v35 = vmul.f32 %v6024_v38, %v7942_v52  ;;  %v3250_v1 = vmul.f32 %v7944_v21, %v6046_v47  ;;  %v3539_v39 = vunpack.c.l.b16 %v3304_v11  ;;  %v5729_v44 = vld [vmem:[#allocation2 + $0x4] sm:$0xf]  ;;  %v3536_v7 = vunpack.c.l.b16 %v3302_v28 }
 0x927   : > { %v3168_v6 = vmax.f32 %v3159_v41, 0.0  ;;  %v3231_v34 = vmul.f32 %v9121_v48, %v7964_v15  ;;  %v3228_v29 = vmul.f32 %v9121_v48, %v7969_v17  ;;  %v5466_v41 = vor.u32 %v5731_v19, %v5465_v24 }
 0x928   : > { %v3260_v25 = vpack.c.bf16 %v3250_v1, %v3249_v35  ;;  %v5462_v35 = vor.u32 %v5729_v44, %v5459_v4  ;;  %v3548_v1 = vpack.c.b16 %v3539_v39, %v3536_v7  ;;  %v3581_v8 = vunpack.c.l.b16 %v7931_v23 }
 0x929   : > { %v7957_v9 = vpack.c.bf16 %v3168_v6, %v3167_v2  ;;  %v3241_v2 = vpack.c.bf16 %v3231_v34, %v3231_v34  ;;  %v3239_v6 = vpack.c.bf16 %v3228_v29, %v3228_v29  ;;  %v3251_v55 = vmul.f32 %v6022_v37, %v7964_v15 }
 0x92a   : > { %v3471_v32 = vunpack.c.l.b16 %v3260_v25  ;;  %v3472_v16 = vunpack.c.h.b16 %v3260_v25  ;;  %v3333_v54 = vmul.f32 %v9124_v27, %v7917_v50  ;;  %v3334_v20 = vmul.f32 %v7919_v62, %v9125_v45 }
 0x92b   : > { %3185 = vst [vmem:[#allocation2 + $0x34] sm:$0xff] %v7957_v9  ;;  %v3431_v40 = vunpack.c.l.b16 %v3241_v2  ;;  %v3578_v43 = vunpack.c.l.b16 %v7925_v53  ;;  %v3428_v18 = vunpack.c.l.b16 %v3239_v6  ;;  %v3330_v23 = vmul.f32 %v9124_v27, %v7909_v49 }
 0x92c   : > { %v3480_v13 = vpack.c.b16 %v3471_v32, %v3468_v3  ;;  %v3469_v3 = vunpack.c.h.b16 %v3258_v56  ;;  %v3248_v32 = vmul.f32 %v6022_v37, %v7969_v17  ;;  %v3331_v25 = vmul.f32 %v7911_v30, %v9125_v45 }
 0x92d   : > { %3518 = vrot.lane.b32.xlu2 %v5482_v12, %s5890_s8  ;;  %3520 = vrot.lane.b32.xlu0 %v5486_v61, %s5890_s8  ;;  %v3590_v0 = vpack.c.b16 %v3581_v8, %v3578_v43  ;;  %v3261_v61 = vpack.c.bf16 %v3251_v55, %v3251_v55  ;;  %v3440_v50 = vpack.c.b16 %v3431_v40, %v3428_v18  ;;  %v3537_v39 = vunpack.c.h.b16 %v3302_v28  ;;  %v5742_v40 = vld [vmem:[#allocation2 + $0x28] sm:$0xf] }
 0x92e   : > { %3486 = vrot.lane.b32.xlu1 %v3480_v13, %s5893_s11  ;;  %v3481_v12 = vpack.c.b16 %v3472_v16, %v3469_v3  ;;  %v3344_v57 = vpack.c.bf16 %v3334_v20, %v3333_v54  ;;  %v3259_v62 = vpack.c.bf16 %v3248_v32, %v3248_v32  ;;  %v3342_v53 = vpack.c.bf16 %v3331_v25, %v3330_v23 }
 0x92f   : > { %v3473_v56 = vunpack.c.l.b16 %v3261_v61  ;;  %v3540_v13 = vunpack.c.h.b16 %v3304_v11  ;;  %v3229_v49 = vmul.f32 %v9122_v5, %v7942_v52  ;;  %v3230_v30 = vmul.f32 %v7944_v21, %v9123_v36 }
 0x930   : > { %v3666_v19 = vunpack.c.h.b16 %v3344_v57  ;;  %v3470_v4 = vunpack.c.l.b16 %v3259_v62  ;;  %v3226_v34 = vmul.f32 %v9122_v5, %v7927_v51  ;;  %v3227_v24 = vmul.f32 %v7929_v42, %v9123_v36 }
 0x931   : > { %v3663_v44 = vunpack.c.h.b16 %v3342_v53  ;;  %v3549_v29 = vpack.c.b16 %v3540_v13, %v3537_v39  ;;  %v8007_v54 = vunpack.c.l.bf16 %v7957_v9  ;;  %v8010_v20 = vunpack.c.h.bf16 %v7957_v9 }
 0x932   : > { %v3482_v7 = vpack.c.b16 %v3473_v56, %v3470_v4  ;;  %v5511_v8 = vld [vmem:[#allocation2 + $0x34] sm:$0xf0]  ;;  %v8013_v3 = vunpack.c.l.bf16 %v7933_v58  ;;  %v8016_v32 = vunpack.c.h.bf16 %v7933_v58  ;;  %v3192_v18 = vld [vmem:[#allocation2 + $0x30] sm:$0xff]  ;;  %v3665_v25 = vunpack.c.l.b16 %v3344_v57  ;;  %v3190_v56 = vld [vmem:[#allocation2 + $0x20] sm:$0xff] }
 0x933   : > { %v3675_v11 = vpack.c.b16 %v3666_v19, %v3663_v44  ;;  %v5514_v43 = vor.u32 %v5742_v40, %v5511_v8  ;;  %v3193_v23 = vld [vmem:[#allocation2 + $0x38] sm:$0xf]  ;;  %v3319_v9 = vmul.f32 %v6191_v59, %v8007_v54  ;;  %v8029_v13 = vunpack.c.l.bf16 %v3192_v18  ;;  %v3191_v19 = vld [vmem:[#allocation2 + $0x28] sm:$0xf]  ;;  %v5743_v8 = vld [vmem:[#allocation2 + $0x30] sm:$0xf0] }
 0x934   : > { %v3316_v58 = vmul.f32 %v6191_v59, %v8013_v3  ;;  %v3317_v61 = vmul.f32 %v8016_v32, %v6213_v46  ;;  %v5491_v62 = vld [vmem:[#allocation2 + $0x34] sm:$0xf0]  ;;  %v8033_v57 = vunpack.c.l.bf16 %v3193_v23  ;;  %v3206_v4 = vmul.f32 %v6280_v31, %v7927_v51 }
 0x935   : > { %3406 = vrot.lane.b32.xlu0 %v5466_v41, %s5886_s28  ;;  %3404 = vrot.lane.b32.xlu2 %v5462_v35, %s5886_s28  ;;  %v3240_v41 = vpack.c.bf16 %v3230_v30, %v3229_v49  ;;  %v3238_v35 = vpack.c.bf16 %v3227_v24, %v3226_v34  ;;  %v8031_v49 = vunpack.c.h.bf16 %v3192_v18  ;;  %v5732_v30 = vld [vmem:[#allocation2 + $0x24] sm:$0xf]  ;;  %v5737_v24 = vld [vmem:[#allocation2 + $0x28] sm:$0xf]  ;;  %v3255_v51 = vmul.f32 %v6024_v38, %v8029_v13 }
 0x936   : > { %3554 = vrot.lane.b32.xlu1 %v3548_v1, %s5892_s10 }
 0x937   : > { %v3430_v1 = vunpack.c.h.b16 %v3240_v41  ;;  %v3429_v28 = vunpack.c.l.b16 %v3240_v41  ;;  %v3427_v2 = vunpack.c.h.b16 %v3238_v35  ;;  %v3426_v6 = vunpack.c.l.b16 %v3238_v35 }
 0x938   : > { %v8039_v41 = vunpack.c.l.bf16 %v3190_v56  ;;  %v3256_v35 = vmul.f32 %v8031_v49, %v6046_v47 }
 0x939   : > { %v3439_v16 = vpack.c.b16 %v3430_v1, %v3427_v2  ;;  %v3438_v55 = vpack.c.b16 %v3429_v28, %v3426_v6  ;;  %v8049_v1 = vunpack.c.l.bf16 %v3191_v19  ;;  %v3208_v6 = vmul.f32 %v6283_v33, %v7969_v17 }
 0x93a   : > { %v8060_v18 = vpack.c.bf16 %v3256_v35, %v3255_v51  ;;  %v3209_v17 = vmul.f32 %v6280_v31, %v7942_v52  ;;  %v5738_v35 = vld [vmem:[#allocation2 + $0x30] sm:$0xf0] }
 0x93b   : > { %v3254_v23 = vmul.f32 %v6022_v37, %v8049_v1 }
 0x93d   : > { %3596 = vrot.lane.b32.xlu0 %v3590_v0, %s5894_s12  ;;  %3488 = vrot.lane.b32.xlu2 %v3481_v12, %s5893_s11  ;;  %v3320_v0 = vmul.f32 %v8010_v20, %v6213_v46  ;;  %v5471_v12 = vld [vmem:[#allocation2 + $0x30] sm:$0xf0]  ;;  %v3263_v52 = vpack.c.bf16 %v3254_v23, %v3254_v23 }
 0x93e   : > { %3448 = vrot.lane.b32.xlu1 %v3440_v50, %s5895_s13  ;;  %v3662_v50 = vunpack.c.l.b16 %v3342_v53  ;;  %v5474_v34 = vor.u32 %v5732_v30, %v5471_v12  ;;  %v3207_v53 = vmul.f32 %v7929_v42, %v6297_v60  ;;  %v3257_v42 = vmul.f32 %v6022_v37, %v8033_v57 }
 0x93f   : > { %v3328_v44 = vpack.c.bf16 %v3320_v0, %v3319_v9  ;;  %v5509_v9 = vld [vmem:[#allocation2 + $0x24] sm:$0xf]  ;;  %v3210_v12 = vmul.f32 %v7944_v21, %v6297_v60  ;;  %v3476_v23 = vunpack.c.l.b16 %v3263_v52 }
 0x940   : > { %v3674_v39 = vpack.c.b16 %v3665_v25, %v3662_v50  ;;  %v3218_v28 = vpack.c.bf16 %v3207_v53, %v3206_v4  ;;  %v3265_v25 = vpack.c.bf16 %v3257_v42, %v3257_v42  ;;  %v3211_v50 = vmul.f32 %v6283_v33, %v7964_v15 }
 0x941   : > { %v3588_v2 = vunpack.c.h.b16 %v3328_v44  ;;  %v3220_v19 = vpack.c.bf16 %v3210_v12, %v3209_v17  ;;  %v3477_v4 = vunpack.c.l.b16 %v8060_v18  ;;  %v3299_v53 = vmul.f32 %v6254_v26, %v8007_v54 }
 0x942   : > { %v3359_v21 = vunpack.c.h.b16 %v3218_v28  ;;  %v3235_v42 = vmul.f32 %v9122_v5, %v8029_v13 }
 0x943   : > { %v3361_v15 = vunpack.c.l.b16 %v3220_v19 }
 0x945   : > { %3490 = vrot.lane.b32.xlu0 %v3482_v7, %s5893_s11  ;;  %3556 = vrot.lane.b32.xlu2 %v3549_v29, %s5892_s10  ;;  %v5494_v7 = vor.u32 %v5737_v24, %v5491_v62  ;;  %v3326_v29 = vpack.c.bf16 %v3317_v61, %v3316_v58  ;;  %v5510_v58 = vor.u32 %v5743_v8, %v5509_v9  ;;  %v3362_v24 = vunpack.c.h.b16 %v3220_v19 }
 0x946   : > { %3682 = vrot.lane.b32.xlu1 %v3675_v11, %s5896_s14  ;;  %v8041_v11 = vunpack.c.h.bf16 %v3190_v56  ;;  %v3219_v62 = vpack.c.bf16 %v3208_v6, %v3208_v6  ;;  %v3214_v19 = vmul.f32 %v6283_v33, %v8049_v1 }
 0x947   : > { %v3584_v0 = vunpack.c.l.b16 %v3326_v29  ;;  %v8088_v6 = vpack.c.b16 %v3362_v24, %v3359_v21 }
 0x948   : > { %v3253_v40 = vmul.f32 %v8041_v11, %v6046_v47  ;;  %v3233_v9 = vmul.f32 %v8041_v11, %v9123_v36 }
 0x94d   : > { %3446 = vrot.lane.b32.xlu0 %v3439_v16, %s5895_s13  ;;  %3444 = vrot.lane.b32.xlu2 %v3438_v55, %s5895_s13  ;;  %v3587_v16 = vunpack.c.l.b16 %v3328_v44  ;;  %v3252_v55 = vmul.f32 %v6024_v38, %v8039_v41  ;;  %v3358_v44 = vunpack.c.l.b16 %v3218_v28 }
 0x94e   : > { %3646 = vrot.lane.b32.xlu1 %v5514_v43, %s5891_s9  ;;  %v3585_v43 = vunpack.c.h.b16 %v3326_v29  ;;  %v8080_v29 = vunpack.c.l.b16 %v3219_v62 }
 0x94f   : > { %v3593_v56 = vpack.c.b16 %v3587_v16, %v3584_v0  ;;  %v8070_v30 = vpack.c.bf16 %v3253_v40, %v3252_v55  ;;  %v8090_v28 = vpack.c.b16 %v3361_v15, %v3358_v44  ;;  %v3296_v16 = vmul.f32 %v6254_v26, %v8013_v3  ;;  %v8103_v0 = vpop.permute.xlu2 %3648  ;;  %v5477_v15 = vld [vmem:[#allocation2 + $0x28] sm:$0xf] }
 0x950   : > { %v3594_v61 = vpack.c.b16 %v3588_v2, %v3585_v43  ;;  %v3236_v2 = vmul.f32 %v8031_v49, %v9123_v36  ;;  %v3297_v55 = vmul.f32 %v8016_v32, %v6262_v22  ;;  %v5489_v43 = vld [vmem:[#allocation2 + $0x24] sm:$0xf]  ;;  %v3234_v44 = vmul.f32 %v9121_v48, %v8049_v1 }
 0x951   : > { %v3474_v8 = vunpack.c.l.b16 %v8070_v30  ;;  %v5490_v17 = vor.u32 %v5738_v35, %v5489_v43  ;;  %v3223_v35 = vpack.c.bf16 %v3214_v19, %v3214_v19  ;;  %v3475_v19 = vunpack.c.h.b16 %v8070_v30 }
 0x952   : > { %v3306_v62 = vpack.c.bf16 %v3297_v55, %v3296_v16 }
 0x953   : > { %v3483_v12 = vpack.c.b16 %v3477_v4, %v3474_v8  ;;  %v3237_v4 = vmul.f32 %v9121_v48, %v8033_v57  ;;  %v8129_v1 = vunpack.c.l.b16 %v3223_v35  ;;  %v3212_v35 = vmul.f32 %v6280_v31, %v8039_v41 }
 0x954   : > { %v3542_v24 = vunpack.c.l.b16 %v3306_v62 }
 0x955   : > { %3680 = vrot.lane.b32.xlu0 %v3674_v39, %s5896_s14  ;;  %3410 = vrot.lane.b32.xlu2 %v5474_v34, %s5886_s28  ;;  %v3479_v39 = vunpack.c.l.b16 %v3265_v25  ;;  %v3221_v34 = vpack.c.bf16 %v3211_v50, %v3211_v50  ;;  %v3232_v25 = vmul.f32 %v9122_v5, %v8039_v41  ;;  %v8105_v50 = vpack.c.bf16 %v3236_v2, %v3235_v42 }
 0x956   : > { %3524 = vrot.lane.b32.xlu1 %v5494_v7, %s5890_s8  ;;  %v3300_v7 = vmul.f32 %v8010_v20, %v6262_v22  ;;  %v3245_v8 = vpack.c.bf16 %v3237_v4, %v3237_v4  ;;  %v3336_v4 = vmul.f32 %v9124_v27, %v8013_v3  ;;  %v3216_v3 = vmul.f32 %v8031_v49, %v6297_v60 }
 0x957   : > { %v8082_v51 = vunpack.c.l.b16 %v3221_v34  ;;  %v8116_v34 = vpop.permute.xlu1 %3408  ;;  %v3436_v21 = vunpack.c.h.b16 %v8105_v50  ;;  %v8124_v43 = vpop.permute.xlu2 %3642  ;;  %v3435_v49 = vunpack.c.l.b16 %v8105_v50 }
 0x959   : > { %v3372_v40 = vpack.c.b16 %v8082_v51, %v8080_v29 }
 0x95d   : > { %3644 = vrot.lane.b32.xlu0 %v5510_v58, %s5891_s9  ;;  %3604 = vrot.lane.b32.xlu2 %v3594_v61, %s5894_s12  ;;  %v3308_v58 = vpack.c.bf16 %v3300_v7, %v3299_v53  ;;  %v3485_v61 = vpack.c.b16 %v3479_v39, %v3476_v23  ;;  %v5734_v39 = vld [vmem:[#allocation2 + $0x34] sm:$0xf0]  ;;  %v3217_v7 = vmul.f32 %v6283_v33, %v8033_v57  ;;  %v3478_v57 = vunpack.c.h.b16 %v8060_v18 }
 0x95e   : > { %3602 = vrot.lane.b32.xlu1 %v3593_v56, %s5894_s12  ;;  %v8110_v56 = vpack.c.bf16 %v3233_v9, %v3232_v25  ;;  %v5478_v42 = vor.u32 %v5734_v39, %v5477_v15  ;;  %v3243_v23 = vpack.c.bf16 %v3234_v44, %v3234_v44  ;;  %v3437_v9 = vunpack.c.l.b16 %v3245_v8 }
 0x95f   : > { %v3545_v52 = vunpack.c.l.b16 %v3308_v58  ;;  %v3225_v55 = vpack.c.bf16 %v3217_v7, %v3217_v7  ;;  %v3337_v39 = vmul.f32 %v8016_v32, %v9125_v45  ;;  %v3403_v18 = vpop.permute.xlu1 %3402  ;;  %v3546_v15 = vunpack.c.h.b16 %v3308_v58 }
 0x960   : > { %v3433_v53 = vunpack.c.h.b16 %v8110_v56  ;;  %v3543_v32 = vunpack.c.h.b16 %v3306_v62 }
 0x961   : > { %v3551_v2 = vpack.c.b16 %v3545_v52, %v3542_v24  ;;  %v8131_v25 = vunpack.c.l.b16 %v3225_v55  ;;  %v3434_v52 = vunpack.c.l.b16 %v3243_v23  ;;  %v3432_v23 = vunpack.c.l.b16 %v8110_v56 }
 0x962   : > { %v3442_v16 = vpack.c.b16 %v3436_v21, %v3433_v53  ;;  %v3484_v21 = vpack.c.b16 %v3478_v57, %v3475_v19  ;;  %v3215_v53 = vmul.f32 %v6280_v31, %v8029_v13 }
 0x963   : > { %v3443_v24 = vpack.c.b16 %v3437_v9, %v3434_v52  ;;  %v3441_v57 = vpack.c.b16 %v3435_v49, %v3432_v23 }
 0x965   : > { %3522 = vrot.lane.b32.xlu0 %v5490_v17, %s5890_s8  ;;  %3492 = vrot.lane.b32.xlu2 %v3483_v12, %s5893_s11  ;;  %v3339_v17 = vmul.f32 %v9124_v27, %v8007_v54  ;;  %v3340_v12 = vmul.f32 %v8010_v20, %v9125_v45  ;;  %v3346_v54 = vpack.c.bf16 %v3337_v39, %v3336_v4  ;;  %v8147_v20 = vpop.permute.xlu2 %3606 }
 0x966   : > { %3496 = vrot.lane.b32.xlu1 %v3485_v61, %s5893_s11  ;;  %v3375_v61 = vpack.c.b16 %v8131_v25, %v8129_v1 }
 0x967   : > { %v3348_v44 = vpack.c.bf16 %v3340_v12, %v3339_v17  ;;  %v3668_v7 = vunpack.c.l.b16 %v3346_v54  ;;  %v8157_v55 = vpop.permute.xlu1 %3564  ;;  %v3669_v52 = vunpack.c.h.b16 %v3346_v54 }
 0x969   : > { %v3671_v30 = vunpack.c.l.b16 %v3348_v44  ;;  %v3672_v19 = vunpack.c.h.b16 %v3348_v44 }
 0x96b   : > { %v3677_v8 = vpack.c.b16 %v3671_v30, %v3668_v7  ;;  %v3678_v4 = vpack.c.b16 %v3672_v19, %v3669_v52 }
 0x96d   : > { %3412 = vrot.lane.b32.xlu0 %v5478_v42, %s5886_s28  ;;  %3560 = vrot.lane.b32.xlu2 %v3551_v2, %s5892_s10  ;;  %v3213_v42 = vmul.f32 %v8041_v11, %v6297_v60  ;;  %v3552_v2 = vpack.c.b16 %v3546_v15, %v3543_v32  ;;  %v8163_v11 = vpop.permute.xlu0 %3600 }
 0x96e   : > { %3452 = vrot.lane.b32.xlu1 %v3442_v16, %s5895_s13  ;;  %v3224_v16 = vpack.c.bf16 %v3216_v3, %v3215_v53 }
 0x96f   : > { %v3222_v13 = vpack.c.bf16 %v3213_v42, %v3212_v35  ;;  %v8167_v17 = vpop.permute.xlu1 %3690 }
 0x970   : > { %v3367_v62 = vunpack.c.l.b16 %v3224_v16  ;;  %v3368_v39 = vunpack.c.h.b16 %v3224_v16 }
 0x971   : > { %v3364_v41 = vunpack.c.l.b16 %v3222_v13  ;;  %v3365_v15 = vunpack.c.h.b16 %v3222_v13 }
 0x973   : > { %v3373_v9 = vpack.c.b16 %v3367_v62, %v3364_v41  ;;  %v3374_v30 = vpack.c.b16 %v3368_v39, %v3365_v15 }
 0x975   : > { %3494 = vrot.lane.b32.xlu0 %v3484_v21, %s5893_s11  ;;  %3454 = vrot.lane.b32.xlu2 %v3443_v24, %s5895_s13  ;;  %v8170_v50 = vpop.permute.xlu0 %3558 }
 0x977   : > { %v8172_v21 = vpop.permute.xlu1 %3684 }
 0x97d   : > { %3562 = vrot.lane.b32.xlu0 %v3552_v2, %s5892_s10  ;;  %3686 = vrot.lane.b32.xlu2 %v3677_v8, %s5896_s14 }
 0x97f   : > { %v3639_v58 = vpop.permute.xlu2 %3638 }
 0x985   : > { %3450 = vrot.lane.b32.xlu0 %v3441_v57, %s5895_s13  ;;  %3732 = vrot.lane.b32.xlu2 %v3373_v9, %s5885_s27 }
 0x987   : > { %v3519_v12 = vpop.permute.xlu2 %3518 }
 0x98d   : > { %3688 = vrot.lane.b32.xlu0 %v3678_v4, %s5896_s14 }
 0x98f   : > { %v3405_v56 = vpop.permute.xlu2 %3404 }
 0x990   : > { %v3414_v24 = vsel %vm412_vm4, %v3403_v18, %v3405_v56 }
 0x991   : > { %3738 = vrot.lane.b32.xlu2 %v3414_v24, %s5885_s27 }
 0x995   : > { %3734 = vrot.lane.b32.xlu0 %v3374_v30, %s5885_s27 }
 0x997   : > { %v8177_v53 = vpop.permute.xlu0 %3640  ;;  %v3489_v7 = vpop.permute.xlu2 %3488 }
 0x998   : > { %v3650_v44 = vsel %vm854_vm10, %v3639_v58, %v8177_v53  ;;  %v8181_v54 = vpop.permute.xlu1 %3598 }
 0x999   : > { %3812 = vrot.lane.b32.xlu1 %v3650_v44, %s5885_s27 }
 0x99d   : > { %3810 = vrot.lane.b32.xlu0 %v3639_v58, %s5885_s27 }
 0x99f   : > { %v8185_v3 = vpop.permute.xlu0 %3520  ;;  %v8196_v8 = vpop.permute.xlu2 %3556 }
 0x9a0   : > { %v3526_v18 = vsel %vm350_vm9, %v3519_v12, %v8185_v3  ;;  %v3487_v32 = vpop.permute.xlu1 %3486 }
 0x9a1   : > { %3776 = vrot.lane.b32.xlu1 %v3526_v18, %s5885_s27  ;;  %v3498_v62 = vsel %vm698_vm11, %v3487_v32, %v3489_v7 }
 0x9a5   : > { %3774 = vrot.lane.b32.xlu0 %v3519_v12, %s5885_s27 }
 0x9a7   : > { %v8191_v35 = vpop.permute.xlu0 %3406  ;;  %v3445_v58 = vpop.permute.xlu2 %3444 }
 0x9a8   : > { %v3555_v42 = vpop.permute.xlu1 %3554  ;;  %v3415_v2 = vsel %vm412_vm4, %v3405_v56, %v8191_v35 }
 0x9a9   : > { %3786 = vrot.lane.b32.xlu2 %v3555_v42, %s5885_s27  ;;  %v3566_v57 = vsel %vm768_vm15, %v3555_v42, %v8196_v8 }
 0x9ad   : > { %3740 = vrot.lane.b32.xlu0 %v3415_v2, %s5885_s27 }
 0x9af   : > { %v3597_v16 = vpop.permute.xlu0 %3596  ;;  %v3411_v52 = vpop.permute.xlu2 %3410 }
 0x9b0   : > { %v3608_v13 = vsel %vm811_vm13, %v3597_v16, %v8181_v54  ;;  %v8208_v41 = vpop.permute.xlu1 %3448 }
 0x9b1   : > { %3800 = vrot.lane.b32.xlu1 %v3608_v13, %s5885_s27  ;;  %v3416_v13 = vsel %vm412_vm4, %v8116_v34, %v3411_v52 }
 0x9b5   : > { %3798 = vrot.lane.b32.xlu0 %v3597_v16, %s5885_s27 }
 0x9b7   : > { %v8203_v49 = vpop.permute.xlu0 %3490  ;;  %v3605_v39 = vpop.permute.xlu2 %3604 }
 0x9b8   : > { %v3499_v23 = vsel %vm698_vm11, %v3489_v7, %v8203_v49  ;;  %v8220_v4 = vpop.permute.xlu1 %3682 }
 0x9b9   : > { %3764 = vrot.lane.b32.xlu2 %v3499_v23, %s5885_s27  ;;  %3762 = vrot.lane.b32.xlu1 %v3498_v62, %s5885_s27 }
 0x9bd   : > { %3788 = vrot.lane.b32.xlu0 %v3566_v57, %s5885_s27 }
 0x9bf   : > { %v3447_v9 = vpop.permute.xlu0 %3446  ;;  %v3493_v44 = vpop.permute.xlu2 %3492 }
 0x9c0   : > { %v3457_v12 = vsel %vm655_vm12, %v3447_v9, %v8208_v41  ;;  %v3456_v19 = vsel %vm655_vm12, %v3445_v58, %v3447_v9  ;;  %v3647_v24 = vpop.permute.xlu1 %3646 }
 0x9c1   : > { %3752 = vrot.lane.b32.xlu2 %v3457_v12, %s5885_s27  ;;  %3750 = vrot.lane.b32.xlu1 %v3456_v19, %s5885_s27 }
 0x9c7   : > { %v3681_v56 = vpop.permute.xlu0 %3680  ;;  %v3561_v42 = vpop.permute.xlu2 %3560 }
 0x9c8   : > { %v8225_v18 = vpop.permute.xlu1 %3524 }
 0x9cf   : > { %v3645_v15 = vpop.permute.xlu0 %3644  ;;  %v3455_v9 = vpop.permute.xlu2 %3454 }
 0x9d0   : > { %3816 = vrot.lane.b32.xlu1 %v3645_v15, %s5885_s27  ;;  %v3652_v30 = vsel %vm854_vm10, %v3645_v15, %v3647_v24  ;;  %v3603_v58 = vpop.permute.xlu1 %3602 }
 0x9d1   : > { %3818 = vrot.lane.b32.xlu2 %v3652_v30, %s5885_s27  ;;  %v3610_v23 = vsel %vm811_vm13, %v3603_v58, %v3605_v39 }
 0x9d7   : > { %v3523_v32 = vpop.permute.xlu0 %3522  ;;  %v3687_v30 = vpop.permute.xlu2 %3686 }
 0x9d8   : > { %3780 = vrot.lane.b32.xlu1 %v3523_v32, %s5885_s27  ;;  %v3527_v7 = vsel %vm350_vm9, %v3523_v32, %v8225_v18  ;;  %v3497_v57 = vpop.permute.xlu1 %3496 }
 0x9d9   : > { %3782 = vrot.lane.b32.xlu2 %v3527_v7, %s5885_s27 }
 0x9df   : > { %v3413_v2 = vpop.permute.xlu0 %3412 }
 0x9e0   : > { %3792 = vrot.lane.b32.xlu1 %v3561_v42, %s5885_s27  ;;  %v3417_v16 = vsel %vm412_vm4, %v3411_v52, %v3413_v2  ;;  %v3453_v15 = vpop.permute.xlu1 %3452 }
 0x9e1   : > { %3746 = vrot.lane.b32.xlu0 %v3417_v16, %s5885_s27  ;;  %3744 = vrot.lane.b32.xlu2 %v3416_v13, %s5885_s27  ;;  %v3459_v7 = vsel %vm655_vm12, %v3453_v15, %v3455_v9  ;;  %v8260_v16 = vpop.permute.xlu2 %3732  ;;  %v3611_v13 = vsel %vm811_vm13, %v3605_v39, %v8147_v20 }
 0x9e7   : > { %v3495_v62 = vpop.permute.xlu0 %3494 }
 0x9e8   : > { %3806 = vrot.lane.b32.xlu1 %v3610_v23, %s5885_s27  ;;  %v3501_v34 = vsel %vm698_vm11, %v3495_v62, %v3497_v57  ;;  %v3500_v19 = vsel %vm698_vm11, %v3493_v44, %v3495_v62  ;;  %v3651_v44 = vsel %vm854_vm10, %v8177_v53, %v8124_v43 }
 0x9e9   : > { %3804 = vrot.lane.b32.xlu0 %v3603_v58, %s5885_s27  ;;  %3728 = vrot.lane.b32.xlu2 %v8088_v6, %s5885_s27  ;;  %v3567_v58 = vsel %vm768_vm15, %v8196_v8, %v8170_v50 }
 0x9ef   : > { %v3563_v12 = vpop.permute.xlu0 %3562 }
 0x9f0   : > { %3770 = vrot.lane.b32.xlu1 %v3501_v34, %s5885_s27  ;;  %v3568_v52 = vsel %vm768_vm15, %v3561_v42, %v3563_v12  ;;  %v3653_v42 = vsel %vm854_vm10, %v3647_v24, %v8103_v0  ;;  %v3609_v0 = vsel %vm811_vm13, %v8181_v54, %v8163_v11  ;;  %v3692_v24 = vsel %vm897_vm14, %v3681_v56, %v8220_v4 }
 0x9f1   : > { %3768 = vrot.lane.b32.xlu0 %v3500_v19, %s5885_s27  ;;  %3794 = vrot.lane.b32.xlu2 %v3568_v52, %s5885_s27  ;;  %v3569_v20 = vsel %vm768_vm15, %v3563_v12, %v8157_v55 }
 0x9f7   : > { %v3451_v32 = vpop.permute.xlu0 %3450 }
 0x9f8   : > { %v3458_v6 = vsel %vm655_vm12, %v3451_v32, %v3453_v15  ;;  %3726 = vrot.lane.b32.xlu1 %v8090_v28, %s5885_s27  ;;  %v8266_v28 = vpop.permute.xlu2 %3738 }
 0x9f9   : > { %3756 = vrot.lane.b32.xlu2 %v3458_v6, %s5885_s27  ;;  %3758 = vrot.lane.b32.xlu0 %v3459_v7, %s5885_s27 }
 0x9ff   : > { %v3689_v43 = vpop.permute.xlu0 %3688 }
 0xa00   : > { %3814 = vrot.lane.b32.xlu1 %v3651_v44, %s5885_s27  ;;  %v3695_v50 = vsel %vm897_vm14, %v3689_v43, %v8167_v17 }
 0xa01   : > { %3772 = vrot.lane.b32.xlu2 %v3497_v57, %s5885_s27  ;;  %3820 = vrot.lane.b32.xlu0 %v3653_v42, %s5885_s27 }
 0xa03   : > { %v8274_v53 = vpop.permute.xlu2 %3786 }
 0xa07   : > { %v8286_v11 = vpop.permute.xlu0 %3734 }
 0xa08   : > { %3766 = vrot.lane.b32.xlu1 %v8203_v49, %s5885_s27 }
 0xa09   : > { %3822 = vrot.lane.b32.xlu0 %v3681_v56, %s5885_s27  ;;  %3828 = vrot.lane.b32.xlu2 %v3687_v30, %s5885_s27  ;;  %v3694_v56 = vsel %vm897_vm14, %v3687_v30, %v3689_v43 }
 0xa0b   : > { %v8279_v49 = vpop.permute.xlu1 %3812 }
 0xa0f   : > { %v3811_v39 = vpop.permute.xlu0 %3810 }
 0xa10   : > { %3802 = vrot.lane.b32.xlu1 %v3609_v0, %s5885_s27 }
 0xa11   : > { %3754 = vrot.lane.b32.xlu0 %v8208_v41, %s5885_s27  ;;  %3760 = vrot.lane.b32.xlu2 %v3455_v9, %s5885_s27 }
 0xa13   : > { %v8288_v54 = vpop.permute.xlu2 %3764  ;;  %v8292_v41 = vpop.permute.xlu1 %3776 }
 0xa17   : > { %v3775_v8 = vpop.permute.xlu0 %3774 }
 0xa18   : > { %3824 = vrot.lane.b32.xlu1 %v3692_v24, %s5885_s27 }
 0xa19   : > { %3808 = vrot.lane.b32.xlu0 %v3611_v13, %s5885_s27  ;;  %3748 = vrot.lane.b32.xlu2 %v3413_v2, %s5885_s27 }
 0xa1b   : > { %v8303_v62 = vpop.permute.xlu2 %3752 }
 0xa20   : > { %3790 = vrot.lane.b32.xlu1 %v3567_v58, %s5885_s27 }
 0xa21   : > { %3830 = vrot.lane.b32.xlu0 %v3694_v56, %s5885_s27  ;;  %3796 = vrot.lane.b32.xlu2 %v3569_v20, %s5885_s27 }
 0xa23   : > { %v8305_v2 = vpop.permute.xlu1 %3800 }
 0xa28   : > { %3742 = vrot.lane.b32.xlu1 %v8191_v35, %s5885_s27  ;;  %v3693_v35 = vsel %vm897_vm14, %v8220_v4, %v8172_v21 }
 0xa29   : > { %3784 = vrot.lane.b32.xlu0 %v8225_v18, %s5885_s27  ;;  %3832 = vrot.lane.b32.xlu2 %v3695_v50, %s5885_s27  ;;  %v8328_v18 = vpop.permute.xlu0 %3740  ;;  %v5723_v50 = vld [vmem:[%s9082_s2 + $0x34] sm:$0xf] }
 0xa2b   : > { %v8314_v55 = vpop.permute.xlu2 %3818  ;;  %v3763_v23 = vpop.permute.xlu1 %3762 }
 0xa2c   : > { %v3846_v24 = vsel %vm9182_vm1, %v3763_v23, %v8288_v54  ;;  %v5523_v23 = vld [vmem:[%s9082_s2 + $0x3c] sm:$0xf0]  ;;  %vm9189_vm1 = vmmov %vm9144_vm0 }
 0xa30   : > { %3736 = vrot.lane.b32.xlu1 %v3375_v61, %s5885_s27 }
 0xa31   : > { %3778 = vrot.lane.b32.xlu0 %v8185_v3, %s5885_s27  ;;  %3826 = vrot.lane.b32.xlu2 %v3693_v35, %s5885_s27  ;;  %v3799_v61 = vpop.permute.xlu0 %3798  ;;  %v3862_v3 = vsel %vm9177_vm5, %v3811_v39, %v8279_v49  ;;  %vm9184_vm5 = vmmov %vm9144_vm0  ;;  %v3850_v35 = vsel %vm9144_vm0, %v3775_v8, %v8292_v41 }
 0xa32   : > { %v3858_v32 = vsel %vm9179_vm2, %v3799_v61, %v8305_v2  ;;  %vm9186_vm2 = vmmov %vm9144_vm0  ;;  %v8376_v61 = vor.u32 %v5723_v50, %v5523_v23 }
 0xa33   : > { %v8326_v17 = vpop.permute.xlu2 %3782  ;;  %v3751_v1 = vpop.permute.xlu1 %3750 }
 0xa39   : > { %3730 = vrot.lane.b32.xlu0 %v3372_v40, %s5885_s27  ;;  %v8340_v12 = vpop.permute.xlu0 %3788 }
 0xa3b   : > { %v3745_v25 = vpop.permute.xlu2 %3744 }
 0xa42   : > { %v3817_v57 = vpop.permute.xlu1 %3816 }
 0xa43   : > { %v3864_v21 = vsel %vm9176_vm3, %v3817_v57, %v8314_v55  ;;  %v8336_v4 = vpop.permute.xlu2 %3728  ;;  %vm9183_vm3 = vmmov %vm9144_vm0 }
 0xa44   : > { %3931 = vmatpush.bf16.msra.mxu2 %v3864_v21  ;;  %v3854_v13 = vsel %vm9183_vm3, %v8274_v53, %v8340_v12  ;;  %v3842_v53 = vsel %vm9186_vm2, %v3751_v1, %v8303_v62  ;;  %vm9190_vm3 = vmmov %vm9144_vm0 }
 0xa45   : > { %vm9193_vm2 = vmmov %vm9144_vm0 }
 0xa48   : > { %3932 = vmatpush.bf16.msra.mxu2 %v3862_v3 }
 0xa4a   : > { %v3781_v9 = vpop.permute.xlu1 %3780 }
 0xa4b   : > { %v8342_v34 = vpop.permute.xlu2 %3794 }
 0xa52   : > { %v3793_v29 = vpop.permute.xlu1 %3792 }
 0xa53   : > { %v8344_v51 = vpop.permute.xlu0 %3746  ;;  %v3757_v40 = vpop.permute.xlu2 %3756  ;;  %v3856_v43 = vsel %vm9181_vm8, %v3793_v29, %v8342_v34  ;;  %vm9188_vm8 = vmmov %vm9144_vm0 }
 0xa54   : > { %v3838_v1 = vsel %vm9188_vm8, %v8266_v28, %v8328_v18  ;;  %v5724_v28 = vld [vmem:[%s9082_s2 + $0x38] sm:$0xf0]  ;;  %vm9195_vm8 = vmmov %vm9144_vm0 }
 0xa5a   : > { %v8346_v19 = vpop.permute.xlu1 %3806 }
 0xa5b   : > { %v3805_v52 = vpop.permute.xlu0 %3804  ;;  %v3773_v30 = vpop.permute.xlu2 %3772 }
 0xa5c   : > { %v3860_v15 = vsel %vm9178_vm7, %v3805_v52, %v8346_v19  ;;  %vm9185_vm7 = vmmov %vm9144_vm0 }
 0xa5d   : > { %3933 = vmatpush.bf16.msra.mxu2 %v3860_v15  ;;  %v3852_v39 = vsel %vm9185_vm7, %v3781_v9, %v8326_v17  ;;  %v3836_v15 = vsel %vm9190_vm3, %v8260_v16, %v8286_v11  ;;  %vm9192_vm7 = vmmov %vm9144_vm0 }
 0xa5e   : > { %vm9197_vm3 = vmmov %vm9144_vm0 }
 0xa61   : > { %3934 = vmatpush.bf16.msra.mxu2 %v3858_v32 }
 0xa62   : > { %v3771_v6 = vpop.permute.xlu1 %3770 }
 0xa63   : > { %v3849_v7 = vsel %vm9144_vm0, %v3771_v6, %v3773_v30  ;;  %v3769_v44 = vpop.permute.xlu0 %3768  ;;  %v8356_v0 = vpop.permute.xlu2 %3828  ;;  %v5726_v30 = vld [vmem:[%s9082_s2 + $0x4c] sm:$0xf] }
 0xa64   : > { %v3848_v42 = vsel %vm9180_vm6, %v3769_v44, %v3771_v6  ;;  %3969 = vmatpush.bf16.msrb.mxu1 %v3849_v7  ;;  %vm9187_vm6 = vmmov %vm9144_vm0 }
 0xa65   : > { %3912 = vmatpush.bf16.msra.mxu3 %v3848_v42  ;;  %3935 = vmatpush.bf16.msra.mxu2 %v3856_v43  ;;  %v3840_v9 = vsel %vm9187_vm6, %v3745_v25, %v8344_v51  ;;  %v5521_v25 = vld [vmem:[%s9082_s2 + $0x30] sm:$0xf]  ;;  %vm9194_vm6 = vmmov %vm9144_vm0 }
 0xa66   : > { %v8404_v6 = vor.u32 %v5724_v28, %v5521_v25 }
 0xa69   : > { %3913 = vmatpush.bf16.msra.mxu3 %v3846_v24  ;;  %3936 = vmatpush.bf16.msra.mxu2 %v3854_v13 }
 0xa6a   : > { %v3727_v58 = vpop.permute.xlu1 %3726 }
 0xa6b   : > { %v3759_v56 = vpop.permute.xlu0 %3758  ;;  %v3761_v57 = vpop.permute.xlu2 %3760  ;;  %v3834_v16 = vsel %vm9192_vm7, %v3727_v58, %v8336_v4  ;;  %vm9199_vm7 = vmmov %vm9144_vm0 }
 0xa6c   : > { %v3844_v20 = vsel %vm9184_vm5, %v3757_v40, %v3759_v56  ;;  %vm9191_vm5 = vmmov %vm9144_vm0 }
 0xa6d   : > { %3914 = vmatpush.bf16.msra.mxu3 %v3844_v20  ;;  %3937 = vmatpush.bf16.msra.mxu2 %v3852_v39  ;;  %v3845_v32 = vsel %vm9191_vm5, %v3759_v56, %v3761_v57  ;;  %vm9198_vm5 = vmmov %vm9144_vm0  ;;  %v5529_v57 = vld [vmem:[%s9082_s2 + $0x38] sm:$0xf] }
 0xa71   : > { %3915 = vmatpush.bf16.msra.mxu3 %v3842_v53  ;;  %3938 = vmatpush.bf16.msra.mxu2 %v3850_v35 }
 0xa72   : > { %v3815_v21 = vpop.permute.xlu1 %3814 }
 0xa73   : > { %v3821_v3 = vpop.permute.xlu0 %3820  ;;  %v3749_v52 = vpop.permute.xlu2 %3748  ;;  %v3863_v13 = vsel %vm9194_vm6, %v8279_v49, %v3815_v21  ;;  %v5727_v49 = vld [vmem:[%s9082_s2 + $0x50] sm:$0xf0]  ;;  %vm9201_vm6 = vmmov %vm9144_vm0 }
 0xa74   : > { %3939 = vmatmul.bf16.vlgmr.msra.gmra.mxu2 %v8376_v61  ;;  %v3865_v44 = vsel %vm9193_vm2, %v8314_v55, %v3821_v3  ;;  %v3841_v55 = vsel %vm9195_vm8, %v8344_v51, %v3749_v52  ;;  %v5541_v3 = vld [vmem:[%s9082_s2 + $0x50] sm:$0xf]  ;;  %vm9200_vm2 = vmmov %vm9144_vm0 }
 0xa75   : > { %3916 = vmatpush.bf16.msra.mxu3 %v3840_v9  ;;  %vm9202_vm8 = vmmov %vm9144_vm0 }
 0xa79   : > { %3917 = vmatpush.bf16.msra.mxu3 %v3838_v1 }
 0xa7a   : > { %v3767_v29 = vpop.permute.xlu1 %3766 }
 0xa7b   : > { %v3823_v8 = vpop.permute.xlu0 %3822  ;;  %v3847_v40 = vsel %vm9189_vm1, %v8288_v54, %v3767_v29  ;;  %v5535_v54 = vld [vmem:[%s9082_s2 + $0x54] sm:$0xf0]  ;;  %v3797_v58 = vpop.permute.xlu2 %3796  ;;  %vm9196_vm1 = vmmov %vm9144_vm0 }
 0xa7c   : > { %3970 = vmatpush.bf16.msrb.mxu1 %v3847_v40  ;;  %v8406_v7 = vor.u32 %v5726_v30, %v5535_v54  ;;  %v3857_v21 = vsel %vm9199_vm7, %v8342_v34, %v3797_v58  ;;  %vm9206_vm7 = vmmov %vm9144_vm0 }
 0xa7d   : > { %3918 = vmatpush.bf16.msra.mxu3 %v3836_v15 }
 0xa80   : > { %3971 = vmatpush.bf16.msrb.mxu1 %v3845_v32 }
 0xa81   : > { %3919 = vmatpush.bf16.msra.mxu3 %v3834_v16 }
 0xa82   : > { %v3803_v42 = vpop.permute.xlu1 %3802 }
 0xa83   : > { %v3755_v43 = vpop.permute.xlu0 %3754  ;;  %v3833_v50 = vpop.permute.xlu2 %3832  ;;  %v3859_v23 = vsel %vm9197_vm3, %v8305_v2, %v3803_v42  ;;  %v5725_v2 = vld [vmem:[%s9082_s2 + $0x40] sm:$0xf0] }
 0xa84   : > { %3920 = vmatmul.bf16.vlgmr.msra.gmra.mxu3 %v8404_v6  ;;  %3944 = vmatmul.bf16.gmra.mxu2 %v8406_v7  ;;  %v3843_v24 = vsel %vm9144_vm0, %v8303_v62, %v3755_v43  ;;  %v5533_v62 = vld [vmem:[%s9082_s2 + $0x48] sm:$0xf]  ;;  %v5530_v1 = vor.u32 %v5725_v2, %v5529_v57 }
 0xa85   : > { %3988 = vmatpush.bf16.msrb.mxu3 %v3865_v44  ;;  %3972 = vmatpush.bf16.msrb.mxu1 %v3843_v24  ;;  %v5534_v51 = vor.u32 %v5727_v49, %v5533_v62 }
 0xa89   : > { %3989 = vmatpush.bf16.msrb.mxu3 %v3863_v13  ;;  %3973 = vmatpush.bf16.msrb.mxu1 %v3841_v55 }
 0xa8a   : > { %v3825_v56 = vpop.permute.xlu1 %3824 }
 0xa8b   : > { %v3809_v20 = vpop.permute.xlu0 %3808  ;;  %v3866_v9 = vsel %vm9200_vm2, %v3823_v8, %v3825_v56  ;;  %v3827_v52 = vpop.permute.xlu2 %3826  ;;  %vm9207_vm2 = vmmov %vm9144_vm0 }
 0xa8c   : > { %v3861_v39 = vsel %vm9196_vm1, %v8346_v19, %v3809_v20  ;;  %vm9203_vm1 = vcmask 261120   ;;  %v3867_v30 = vsel %vm9206_vm7, %v3825_v56, %v3827_v52  ;;  %v4327_v52 = vld [vmem:[#allocation2 + $0xc] sm:$0xf] }
 0xa8d   : > { %3990 = vmatpush.bf16.msrb.mxu3 %v3861_v39  ;;  %vm9204_vm3 = vmmov %vm9203_vm1 }
 0xa91   : > { %3991 = vmatpush.bf16.msrb.mxu3 %v3859_v23 }
 0xa92   : > { %v3791_v53 = vpop.permute.xlu1 %3790 }
 0xa93   : > { %v3831_v35 = vpop.permute.xlu0 %3830  ;;  %v3855_v34 = vsel %vm9201_vm6, %v8340_v12, %v3791_v53  ;;  %vm9208_vm6 = vmmov %vm9203_vm1 }
 0xa94   : > { %v3868_v19 = vsel %vm9198_vm5, %v8356_v0, %v3831_v35  ;;  %3925 = vmatmul.bf16.gmra.mxu3 %v5534_v51  ;;  %v5728_v0 = vld [vmem:[%s9082_s2 + $0x58] sm:$0xf0]  ;;  %v3869_v40 = vsel %vm9144_vm0, %v3831_v35, %v3833_v50  ;;  %vm9205_vm5 = vmmov %vm9144_vm0 }
 0xa95   : > { %3956 = vmatpush.bf16.msrb.mxu0 %v3868_v19  ;;  %5767 = vmatpush.bf16.msrb.mxu2 %v3868_v19  ;;  %v5542_v29 = vor.u32 %v5728_v0, %v5541_v3 }
 0xa96   : > { %3992 = vmatpush.bf16.msrb.mxu3 %v3857_v21 }
 0xa99   : > { %3957 = vmatpush.bf16.msrb.mxu0 %v3866_v9  ;;  %5768 = vmatpush.bf16.msrb.mxu2 %v3866_v9 }
 0xa9a   : > { %3993 = vmatpush.bf16.msrb.mxu3 %v3855_v34  ;;  %v3743_v15 = vpop.permute.xlu1 %3742 }
 0xa9b   : > { %v3785_v25 = vpop.permute.xlu0 %3784  ;;  %v3839_v28 = vsel %vm9202_vm8, %v8328_v18, %v3743_v15  ;;  %vm9209_vm8 = vmmov %vm9144_vm0  ;;  %v4329_v15 = vld [vmem:[#allocation2 + $0x1c] sm:$0xf] }
 0xa9c   : > { %5543 = vmatmul.msk.bf16.vlgmr.msrb.gmra.mxu0 %vm9203_vm1, %v5530_v1  ;;  %5544 = vmatmul.msk.bf16.vlgmr.msrb.gmra.mxu2 %vm9204_vm3, %v5542_v29  ;;  %v3853_v8 = vsel %vm9205_vm5, %v8326_v17, %v3785_v25  ;;  %vm9211_vm3 = vmmov %vm9203_vm1  ;;  %vm9212_vm5 = vcmask 64512  }
 0xa9d   : > { %4013 = vmatpush.bf16.msra.mxu2 %v3869_v40  ;;  %3974 = vmatpush.bf16.msrb.mxu1 %v3839_v28  ;;  %vm9213_vm7 = vmmov %vm9212_vm5 }
 0xa9e   : > { %3994 = vmatpush.bf16.msrb.mxu3 %v3853_v8 }
 0xaa1   : > { %4014 = vmatpush.bf16.msra.mxu2 %v3867_v30 }
 0xaa2   : > { %v3737_v12 = vpop.permute.xlu1 %3736 }
 0xaa3   : > { %v3779_v54 = vpop.permute.xlu0 %3778  ;;  %v3837_v32 = vsel %vm9207_vm2, %v8286_v11, %v3737_v12  ;;  %vm9214_vm2 = vmmov %vm9212_vm5 }
 0xaa4   : > { %3975 = vmatpush.bf16.msrb.mxu1 %v3837_v32  ;;  %v3851_v18 = vsel %vm9144_vm0, %v8292_v41, %v3779_v54  ;;  %v4336_v54 = vunpack.c.l.bf16 %v4327_v52  ;;  %v4339_v32 = vunpack.c.l.bf16 %v4329_v15  ;;  %vm9215_vm0 = vmmov %vm9214_vm2 }
 0xaa5   : > { %3995 = vmatpush.bf16.msrb.mxu3 %v3851_v18  ;;  %v5623_v18 = vld [vmem:[#allocation2 + $0x2c] sm:$0xf] }
 0xaa8   : > { %3996 = vmatmul.bf16.vlgmr.msrb.gmra.mxu3 %v8376_v61 }
 0xaab   : > { %v3731_v16 = vpop.permute.xlu0 %3730 }
 0xaac   : > { %5545 = vmatmul.msk.bf16.vlgmr.msra.gmra.mxu2 %vm9208_vm6, %v5530_v1  ;;  %v3835_v17 = vsel %vm9209_vm8, %v8336_v4, %v3731_v16  ;;  %v5766_v16 = vld [vmem:[#allocation2 + $0x38] sm:$0xf0] }
 0xaad   : > { %3976 = vmatpush.bf16.msrb.mxu1 %v3835_v17 }
 0xab0   : > { %3977 = vmatmul.bf16.vlgmr.msrb.gmra.mxu1 %v8404_v6 }
 0xab8   : > { %4001 = vmatmul.bf16.gmra.mxu3 %v8406_v7 }
 0xabc   : > { %5546 = vmatmul.msk.bf16.gmra.mxu2 %vm9203_vm1, %v5542_v29 }
 0xac0   : > { %3982 = vmatmul.bf16.gmra.mxu1 %v5534_v51 }
 0xaf7   : > { %v3940_v11 = vpop.f32.mrf.mxu2 }
 0xaff   : > { %v3942_v44 = vpop.f32.mrf.mxu2 }
 0xb07   : > { %v3921_v41 = vpop.f32.mrf.mxu3  ;;  %v3945_v43 = vpop.f32.mrf.mxu2 }
 0xb08   : > { %v3941_v42 = vadd.f32 %v3940_v11, %v3921_v41  ;;  %v4371_v41 = vmul.f32 %v6077_v10, %v4339_v32 }
 0xb0f   : > { %v3923_v61 = vpop.f32.mrf.mxu3  ;;  %v3947_v24 = vpop.f32.mrf.mxu2 }
 0xb10   : > { %v3943_v50 = vadd.f32 %v3942_v44, %v3923_v61  ;;  %v4368_v44 = vmul.f32 %v6077_v10, %v4336_v54  ;;  %v4333_v61 = vld [vmem:[#allocation2 + $0x3c] sm:$0xf] }
 0xb17   : > { %v3926_v13 = vpop.f32.mrf.mxu3 }
 0xb18   : > { %v3946_v2 = vadd.f32 %v3945_v43, %v3926_v13  ;;  %v4331_v43 = vld [vmem:[#allocation2 + $0x2c] sm:$0xf] }
 0xb19   : > { %v3959_v4 = vpop.f32.mrf.mxu0  ;;  %v4342_v13 = vunpack.c.l.bf16 %v4331_v43 }
 0xb1f   : > { %v3964_v58 = vpop.f32.mrf.mxu2  ;;  %v3928_v55 = vpop.f32.mrf.mxu3 }
 0xb20   : > { %v8472_v9 = vadd.f32 %v3964_v58, %v3946_v2  ;;  %v3948_v25 = vadd.f32 %v3947_v24, %v3928_v55  ;;  %v5624_v24 = vor.u32 %v5766_v16, %v5623_v18  ;;  %v4379_v55 = vpack.c.bf16 %v4368_v44, %v4368_v44 }
 0xb21   : > { %v3961_v7 = vpop.f32.mrf.mxu0 }
 0xb22   : > { %v8466_v53 = vadd.f32 %v3961_v7, %v3943_v50  ;;  %v8488_v7 = vadd.f32 %v3959_v4, %v3941_v42  ;;  %v4388_v4 = vmul.f32 %v9139_v14, %v4336_v54 }
 0xb27   : > { %v3966_v56 = vpop.f32.mrf.mxu2 }
 0xb28   : > { %v8478_v30 = vadd.f32 %v3966_v56, %v3948_v25  ;;  %v4381_v56 = vpack.c.bf16 %v4371_v41, %v4371_v41  ;;  %v4374_v25 = vmul.f32 %v6077_v10, %v4342_v13 }
 0xb2a   : > { %v4639_v50 = vunpack.c.l.b16 %v4381_v56 }
 0xb2b   : > { %v3997_v20 = vpop.f32.mrf.mxu3 }
 0xb2d   : > { %v3978_v39 = vpop.f32.mrf.mxu1 }
 0xb2e   : > { %v3998_v17 = vadd.f32 %v3997_v20, %v3978_v39  ;;  %v4394_v20 = vmul.f32 %v9139_v14, %v4342_v13 }
 0xb2f   : > { %v4016_v6 = vpop.f32.mrf.mxu2 }
 0xb30   : > { %v8486_v58 = vadd.f32 %v4016_v6, %v3998_v17  ;;  %v5755_v6 = vld [vmem:[#allocation2 + $0x2c] sm:$0xf0]  ;;  %v4383_v17 = vpack.c.bf16 %v4374_v25, %v4374_v25  ;;  %v5550_v25 = vld [vmem:[%s9084_s4 + $0x28] sm:$0xff] }
 0xb32   : > { %v4026_v39 = vadd.f32 %v8486_v58, %v8488_v7  ;;  %v4642_v41 = vunpack.c.l.b16 %v4383_v17 }
 0xb33   : > { %v3999_v62 = vpop.f32.mrf.mxu3 }
 0xb35   : > { %v3980_v49 = vpop.f32.mrf.mxu1 }
 0xb36   : > { %v4000_v23 = vadd.f32 %v3999_v62, %v3980_v49  ;;  %v4345_v62 = vunpack.c.l.bf16 %v4333_v61  ;;  %v4636_v49 = vunpack.c.l.b16 %v4379_v55  ;;  %v5611_v61 = vld [vmem:[#allocation2 + $0xc] sm:$0xf]  ;;  %v4351_v55 = vmul.f32 %v9138_v63, %v4339_v32 }
 0xb37   : > { %v4018_v51 = vpop.f32.mrf.mxu2 }
 0xb38   : > { %v8468_v35 = vadd.f32 %v4018_v51, %v4000_v23  ;;  %v4397_v23 = vmul.f32 %v9139_v14, %v4345_v62  ;;  %v5575_v51 = vld [vmem:[#allocation2 + $0x20] sm:$0xf]  ;;  %v4357_v56 = vmul.f32 %v9138_v63, %v4345_v62 }
 0xb39   : > { %v5576_v42 = vor.u32 %v5755_v6, %v5575_v51 }
 0xb3a   : > { %v4029_v19 = vadd.f32 %v8468_v35, %v8466_v53  ;;  %v4365_v51 = vpack.c.bf16 %v4357_v56, %v4357_v56 }
 0xb3b   : > { %v4002_v57 = vpop.f32.mrf.mxu3 }
 0xb3c   : > { %4030 = vadd.xlane.f32.xlu0 %v4029_v19  ;;  %v4648_v19 = vpack.c.b16 %v4639_v50, %v4636_v49  ;;  %v4361_v50 = vpack.c.bf16 %v4351_v55, %v4351_v55 }
 0xb3d   : > { %v3983_v21 = vpop.f32.mrf.mxu1 }
 0xb3e   : > { %v4003_v3 = vadd.f32 %v4002_v57, %v3983_v21  ;;  %v4403_v57 = vpack.c.bf16 %v4394_v20, %v4394_v20  ;;  %v4405_v21 = vpack.c.bf16 %v4397_v23, %v4397_v23  ;;  %v4597_v6 = vunpack.c.l.b16 %v4361_v50 }
 0xb3f   : > { %v4021_v0 = vpop.f32.mrf.mxu2 }
 0xb40   : > { %v8474_v1 = vadd.f32 %v4021_v0, %v4003_v3  ;;  %v4726_v2 = vunpack.c.l.b16 %v4403_v57  ;;  %v4729_v3 = vunpack.c.l.b16 %v4405_v21  ;;  %v4391_v0 = vmul.f32 %v9139_v14, %v4339_v32  ;;  %v9210_v21 = vld [vmem:[#allocation4_spill] sm:$0xff] }
 0xb41   : > { %v4348_v14 = vmul.f32 %v9138_v63, %v4336_v54  ;;  %v4603_v32 = vunpack.c.l.b16 %v4365_v51 }
 0xb42   : > { %v4032_v29 = vadd.f32 %v8474_v1, %v8472_v9  ;;  %v4735_v52 = vpack.c.b16 %v4729_v3, %v4726_v2  ;;  %v4401_v15 = vpack.c.bf16 %v4391_v0, %v4391_v0 }
 0xb43   : > { %v4004_v40 = vpop.f32.mrf.mxu3  ;;  %v4359_v49 = vpack.c.bf16 %v4348_v14, %v4348_v14 }
 0xb44   : > { %4033 = vadd.xlane.f32.xlu2 %v4032_v29  ;;  %v5563_v29 = vld [vmem:[#allocation2] sm:$0xf]  ;;  %v4723_v16 = vunpack.c.l.b16 %v4401_v15 }
 0xb45   : > { %v3985_v34 = vpop.f32.mrf.mxu1  ;;  %v4594_v54 = vunpack.c.l.b16 %v4359_v49  ;;  %v5549_v15 = vld [vmem:[%s9084_s4 + $0x20] sm:$0xff] }
 0xb46   : > { %v4005_v28 = vadd.f32 %v4004_v40, %v3985_v34  ;;  %v5752_v40 = vld [vmem:[#allocation2 + $0xc] sm:$0xf0]  ;;  %v4399_v34 = vpack.c.bf16 %v4388_v4, %v4388_v4 }
 0xb47   : > { %v4023_v8 = vpop.f32.mrf.mxu2  ;;  %v4606_v57 = vpack.c.b16 %v4597_v6, %v4594_v54 }
 0xb48   : > { %v8480_v12 = vadd.f32 %v4023_v8, %v4005_v28  ;;  %v4377_v28 = vmul.f32 %v6077_v10, %v4345_v62  ;;  %v5564_v8 = vor.u32 %v5752_v40, %v5563_v29  ;;  %v4720_v18 = vunpack.c.l.b16 %v4399_v34  ;;  %v5547_v40 = vld [vmem:[%s9083_s3 + $0x8] sm:$0xff] }
 0xb49   : > { %v4354_v10 = vmul.f32 %v9138_v63, %v4342_v13 }
 0xb4a   : > { %v4035_v11 = vadd.f32 %v8480_v12, %v8478_v30  ;;  %v4732_v44 = vpack.c.b16 %v4723_v16, %v4720_v18 }
 0xb4b   : > { %v4363_v23 = vpack.c.bf16 %v4354_v10, %v4354_v10 }
 0xb4c   : > { %4036 = vadd.xlane.f32.xlu1 %v4035_v11  ;;  %v4385_v11 = vpack.c.bf16 %v4377_v28, %v4377_v28  ;;  %v5551_v28 = vld [vmem:[%s9084_s4 + $0x30] sm:$0xff] }
 0xb4e   : > { %v4645_v43 = vunpack.c.l.b16 %v4385_v11 }
 0xb50   : > { %4704 = vrot.lane.b32.xlu0 %v5624_v24, %s5891_s9  ;;  %v5763_v24 = vld [vmem:[#allocation2 + $0x18] sm:$0xf0] }
 0xb51   : > { %v5612_v20 = vor.u32 %v5763_v24, %v5611_v61 }
 0xb54   : > { %4027 = vadd.xlane.f32.xlu1 %v4026_v39  ;;  %v4651_v39 = vpack.c.b16 %v4645_v43, %v4642_v41 }
 0xb58   : > { %4656 = vrot.lane.b32.xlu0 %v4648_v19, %s5894_s12  ;;  %v4600_v19 = vunpack.c.l.b16 %v4363_v23 }
 0xb5a   : > { %v4609_v13 = vpack.c.b16 %v4603_v32, %v4600_v19 }
 0xb5c   : > { %4464 = vrot.lane.b32.xlu2 %v5576_v42, %s5886_s28 }
 0xb60   : > { %4746 = vrot.lane.b32.xlu0 %v4735_v52, %s5896_s14 }
 0xb64   : > { %4458 = vrot.lane.b32.xlu2 %v5564_v8, %s5886_s28  ;;  %v5552_v8 = vld [vmem:[%s9084_s4 + $0x38] sm:$0xff] }
 0xb68   : > { %4740 = vrot.lane.b32.xlu0 %v4732_v44, %s5896_s14 }
 0xb6c   : > { %4662 = vrot.lane.b32.xlu2 %v4651_v39, %s5894_s12 }
 0xb6d   : > { %4698 = vrot.lane.b32.xlu1 %v5612_v20, %s5891_s9 }
 0xb74   : > { %4614 = vrot.lane.b32.xlu2 %v4606_v57, %s5892_s10 }
 0xb75   : > { %4620 = vrot.lane.b32.xlu1 %v4609_v13, %s5892_s10 }
 0xbaf   : > { %v4031_v4 = vpop.xlane.xlu0 %4030 }
 0xbb0   : > { %v4039_v3 = vmul.f32 %v4031_v4, %v9210_v21 }
 0xbb7   : > { %v4034_v63 = vpop.xlane.xlu2 %4033 }
 0xbb8   : > { %v4040_v2 = vmul.f32 %v4034_v63, %v9210_v21 }
 0xbbf   : > { %v4037_v62 = vpop.xlane.xlu1 %4036 }
 0xbc0   : > { %v4041_v42 = vmul.f32 %v4037_v62, %v9210_v21 }
 0xbc2   : > { %4059 = vmatpush.msra.mxu0 %v4041_v42 }
 0xbc4   : > { %4060 = vmatpush.msra.mxu0 %v4040_v2 }
 0xbc6   : > { %4061 = vmatpush.msra.mxu0 %v4039_v3 }
 0xbc7   : > { %v4028_v0 = vpop.xlane.xlu1 %4027 }
 0xbc8   : > { %v4038_v29 = vmul.f32 %v4028_v0, %v9210_v21 }
 0xbca   : > { %4062 = vmatpush.msra.mxu0 %v4038_v29 }
 0xbcb   : > { %5548 = vmatmul.msk.f32.vlgmr.msra.gmra.mxu0 %vm9211_vm3, %v5547_v40 }
 0xc48   : > { %v4064_v34 = vpop.f32.mrf.mxu0 }
 0xc49   : > { %v4067_v52 = vmax.f32 %v4064_v34, 0.0 }
 0xc4b   : > { %4100 = vmatpush.msra.mxu1 %v4067_v52 }
 0xc4c   : > { %5553 = vmatmul.msk.f32.vlgmr.msra.gmra.mxu1 %vm9212_vm5, %v5549_v15 }
 0xc54   : > { %5554 = vmatmul.msk.f32.gmra.mxu1 %vm9213_vm7, %v5550_v25 }
 0xc5c   : > { %5555 = vmatmul.msk.f32.gmra.mxu1 %vm9214_vm2, %v5551_v28 }
 0xc64   : > { %5556 = vmatmul.msk.f32.gmra.mxu1 %vm9215_vm0, %v5552_v8 }
 0xcc9   : > { %v4102_v18 = vpop.f32.mrf.mxu1 }
 0xcca   : > { %v5557_v16 = vmul.f32 -1.442695, %v4102_v18 }
 0xccc   : > { %5843 = vpow2.f32 %v5557_v16 }
 0xcd1   : > { %v4105_v17 = vpop.f32.mrf.mxu1 }
 0xcd2   : > { %v5844_v11 = vpop.eup %5843  ;;  %v5558_v14 = vmul.f32 -1.442695, %v4105_v17 }
 0xcd3   : > { %v4126_v44 = vadd.f32 1.0, %v5844_v11 }
 0xcd4   : > { %5845 = vpow2.f32 %v5558_v14 }
 0xcd5   : > { %5847 = vrcp.f32 %v4126_v44  ;;  %v4141_v20 = vand.u32 2147483648, %v4126_v44  ;;  %v4139_v49 = vand.u32 2147483647, %v4126_v44  ;;  %vm4135_vm8 = vweird.f32 %v4126_v44 }
 0xcd7   : > { %v4142_v32 = vor.u32 1.1754944e-38, %v4141_v20  ;;  %vm4140_vm3 = vcmp.eq.f32.partialorder %v4139_v49, 8.507059e+37  ;;  %v8536_v49 = vpop.permute.xlu2 %4464 }
 0xcd9   : > { %v4108_v41 = vpop.f32.mrf.mxu1 }
 0xcda   : > { %v5846_v43 = vpop.eup %5845  ;;  %v5559_v61 = vmul.f32 -1.442695, %v4108_v41 }
 0xcdb   : > { %v5848_v24 = vpop.eup %5847  ;;  %v4127_v55 = vadd.f32 1.0, %v5846_v43 }
 0xcdc   : > { %5849 = vpow2.f32 %v5559_v61  ;;  %v4131_v10 = vmul.f32 %v5848_v24, %v4126_v44  ;;  %vm4136_vm6 = vweird.f32 %v5848_v24 }
 0xcdd   : > { %5851 = vrcp.f32 %v4127_v55  ;;  %vm4137_vm1 = vmor %vm4135_vm8, %vm4136_vm6  ;;  %v4156_v21 = vand.u32 2147483648, %v4127_v55  ;;  %v4154_v4 = vand.u32 2147483647, %v4127_v55  ;;  %vm4150_vm7 = vweird.f32 %v4127_v55 }
 0xcde   : > { %v4132_v56 = vsub.f32 1.0, %v4131_v10 }
 0xcdf   : > { %v4157_v40 = vor.u32 1.1754944e-38, %v4156_v21  ;;  %vm4155_vm0 = vcmp.eq.f32.partialorder %v4154_v4, 8.507059e+37  ;;  %v9216_v21 = vld [vmem:[#allocation9_spill] sm:$0xff]  ;;  %v9217_v4 = vld [vmem:[#allocation10_spill] sm:$0xff] }
 0xce0   : > { %v4133_v39 = vmul.f32 %v5848_v24, %v4132_v56 }
 0xce1   : > { %v4111_v50 = vpop.f32.mrf.mxu1 }
 0xce2   : > { %v5850_v23 = vpop.eup %5849  ;;  %v5560_v51 = vmul.f32 -1.442695, %v4111_v50  ;;  %v4134_v54 = vadd.f32 %v5848_v24, %v4133_v39  ;;  %v8538_v50 = vpop.permute.xlu2 %4458 }
 0xce3   : > { %v5852_v6 = vpop.eup %5851  ;;  %v4128_v19 = vadd.f32 1.0, %v5850_v23  ;;  %v8540_v23 = vpop.permute.xlu0 %4704 }
 0xce4   : > { %5853 = vpow2.f32 %v5560_v51  ;;  %v4138_v57 = vsel %vm4137_vm1, %v5848_v24, %v4134_v54  ;;  %v4146_v13 = vmul.f32 %v5852_v6, %v4127_v55  ;;  %vm4151_vm5 = vweird.f32 %v5852_v6 }
 0xce5   : > { %5855 = vrcp.f32 %v4128_v19  ;;  %v4143_v63 = vsel %vm4140_vm3, %v4142_v32, %v4138_v57  ;;  %vm4152_vm2 = vmor %vm4150_vm7, %vm4151_vm5  ;;  %v4171_v25 = vand.u32 2147483648, %v4128_v19  ;;  %vm4165_vm6 = vweird.f32 %v4128_v19 }
 0xce6   : > { %4192 = vperm.xlu1 %5822, %v4143_v63   ;;  %v4147_v62 = vsub.f32 1.0, %v4146_v13  ;;  %v4169_v8 = vand.u32 2147483647, %v4128_v19 }
 0xce7   : > { %v4172_v16 = vor.u32 1.1754944e-38, %v4171_v25 }
 0xce8   : > { %v4148_v42 = vmul.f32 %v5852_v6, %v4147_v62  ;;  %vm4170_vm3 = vcmp.eq.f32.partialorder %v4169_v8, 8.507059e+37 }
 0xcea   : > { %v5854_v2 = vpop.eup %5853  ;;  %v4149_v3 = vadd.f32 %v5852_v6, %v4148_v42  ;;  %v8542_v51 = vpop.permute.xlu2 %4662 }
 0xceb   : > { %v5856_v0 = vpop.eup %5855  ;;  %v4129_v29 = vadd.f32 1.0, %v5854_v2  ;;  %v8544_v54 = vpop.permute.xlu0 %4656 }
 0xcec   : > { %v4153_v34 = vsel %vm4152_vm2, %v5852_v6, %v4149_v3  ;;  %v4161_v52 = vmul.f32 %v5856_v0, %v4128_v19  ;;  %vm4166_vm8 = vweird.f32 %v5856_v0  ;;  %v8546_v6 = vpop.permute.xlu1 %4698 }
 0xced   : > { %5857 = vrcp.f32 %v4129_v29  ;;  %v4158_v15 = vsel %vm4155_vm0, %v4157_v40, %v4153_v34  ;;  %vm4167_vm1 = vmor %vm4165_vm6, %vm4166_vm8  ;;  %v4186_v43 = vand.u32 2147483648, %v4129_v29  ;;  %vm4180_vm5 = vweird.f32 %v4129_v29 }
 0xcee   : > { %4197 = vperm.xlu0 %5824, %v4158_v15   ;;  %v4162_v28 = vsub.f32 1.0, %v4161_v52  ;;  %v4184_v24 = vand.u32 2147483647, %v4129_v29  ;;  %v9218_v52 = vld [vmem:[#allocation11_spill] sm:$0xff] }
 0xcef   : > { %v4187_v10 = vor.u32 1.1754944e-38, %v4186_v43 }
 0xcf0   : > { %v4163_v18 = vmul.f32 %v5856_v0, %v4162_v28  ;;  %vm4185_vm0 = vcmp.eq.f32.partialorder %v4184_v24, 8.507059e+37 }
 0xcf2   : > { %v4164_v17 = vadd.f32 %v5856_v0, %v4163_v18  ;;  %v8548_v19 = vpop.permute.xlu2 %4614 }
 0xcf3   : > { %v5858_v11 = vpop.eup %5857  ;;  %v8550_v32 = vpop.permute.xlu0 %4746 }
 0xcf4   : > { %v4168_v14 = vsel %vm4167_vm1, %v5856_v0, %v4164_v17  ;;  %v4176_v44 = vmul.f32 %v5858_v11, %v4129_v29  ;;  %vm4181_vm7 = vweird.f32 %v5858_v11  ;;  %v8552_v57 = vpop.permute.xlu1 %4620 }
 0xcf5   : > { %v4173_v41 = vsel %vm4170_vm3, %v4172_v16, %v4168_v14  ;;  %vm4182_vm2 = vmor %vm4180_vm5, %vm4181_vm7  ;;  %v9220_v16 = vld [vmem:[#allocation5_spill] sm:$0xff] }
 0xcf6   : > { %4202 = vperm.xlu2 %5823, %v4173_v41   ;;  %v4177_v61 = vsub.f32 1.0, %v4176_v44 }
 0xcf8   : > { %v4178_v55 = vmul.f32 %v5858_v11, %v4177_v61 }
 0xcfa   : > { %v4179_v56 = vadd.f32 %v5858_v11, %v4178_v55 }
 0xcfb   : > { %v8561_v0 = vpop.permute.xlu0 %4740 }
 0xcfc   : > { %v4183_v20 = vsel %vm4182_vm2, %v5858_v11, %v4179_v56  ;;  %v9221_v11 = vld [vmem:[#allocation6_spill] sm:$0xff] }
 0xcfd   : > { %v4188_v39 = vsel %vm4185_vm0, %v4187_v10, %v4183_v20 }
 0xcfe   : > { %4207 = vperm.xlu0 %5824, %v4188_v39  }
 0xd50   : > { %v4203_v13 = vpop.permute.xlu2 %4202 }
 0xd51   : > { %v4214_v63 = vmul.f32 %v4203_v13, %v8472_v9  ;;  %v4215_v62 = vmul.f32 %v4203_v13, %v8474_v1  ;;  %v9219_v9 = vld [vmem:[#allocation12_spill] sm:$0xff] }
 0xd53   : > { %v4222_v42 = vadd.f32 %v4214_v63, %v9216_v21  ;;  %v4223_v2 = vadd.f32 %v4215_v62, %v9217_v4 }
 0xd55   : > { %v8558_v3 = vpack.c.bf16 %v4223_v2, %v4222_v42 }
 0xd57   : > { %4240 = vst [vmem:[#allocation2 + $0x24] sm:$0xff] %v8558_v3 }
 0xd58   : > { %v4193_v29 = vpop.permute.xlu1 %4192 }
 0xd59   : > { %v4210_v40 = vmul.f32 %v4193_v29, %v8488_v7  ;;  %v4211_v34 = vmul.f32 %v4193_v29, %v8486_v58 }
 0xd5b   : > { %v4218_v15 = vadd.f32 %v4210_v40, %v9218_v52  ;;  %v4219_v25 = vadd.f32 %v4211_v34, %v9219_v9  ;;  %v9222_v52 = vld [vmem:[#allocation13_spill] sm:$0xff]  ;;  %v9223_v9 = vld [vmem:[#allocation14_spill] sm:$0xff] }
 0xd5d   : > { %v8567_v1 = vpack.c.bf16 %v4219_v25, %v4218_v15 }
 0xd5f   : > { %4238 = vst [vmem:[#allocation2 + $0x4] sm:$0xff] %v8567_v1 }
 0xd60   : > { %v4198_v28 = vpop.permute.xlu0 %4197 }
 0xd61   : > { %v4212_v8 = vmul.f32 %v4198_v28, %v8466_v53  ;;  %v4213_v18 = vmul.f32 %v4198_v28, %v8468_v35 }
 0xd63   : > { %v4220_v17 = vadd.f32 %v4212_v8, %v9220_v16  ;;  %v4221_v14 = vadd.f32 %v4213_v18, %v9221_v11 }
 0xd65   : > { %v4235_v7 = vpack.c.bf16 %v4221_v14, %v4220_v17 }
 0xd66   : > { %v4242_v58 = vld [vmem:[#allocation2] sm:$0xff]  ;;  %v5761_v43 = vld [vmem:[#allocation2 + $0x8] sm:$0xf] }
 0xd67   : > { %4239 = vst [vmem:[#allocation2 + $0x14] sm:$0xff] %v4235_v7  ;;  %v8574_v44 = vunpack.c.l.bf16 %v4242_v58  ;;  %v8576_v41 = vunpack.c.h.bf16 %v4242_v58  ;;  %v5571_v61 = vld [vmem:[#allocation2 + $0x8] sm:$0xf]  ;;  %v5751_v24 = vld [vmem:[#allocation2 + $0x4] sm:$0xf] }
 0xd68   : > { %v5603_v11 = vld [vmem:[#allocation2 + $0x4] sm:$0xf] }
 0xd69   : > { %v4302_v53 = vmul.f32 %v6024_v38, %v8574_v44  ;;  %v4303_v35 = vmul.f32 %v8576_v41, %v6046_v47 }
 0xd6b   : > { %v4314_v34 = vpack.c.bf16 %v4303_v35, %v4302_v53  ;;  %v4337_v53 = vunpack.c.l.bf16 %v4235_v7 }
 0xd6d   : > { %v4524_v14 = vunpack.c.l.b16 %v4314_v34 }
 0xd6e   : > { %v5605_v55 = vld [vmem:[#allocation2 + $0x14] sm:$0xf0]  ;;  %v5565_v56 = vld [vmem:[#allocation2 + $0x10] sm:$0xf0] }
 0xd6f   : > { %v5753_v10 = vld [vmem:[#allocation2 + $0x14] sm:$0xf0]  ;;  %v5608_v20 = vor.u32 %v5761_v43, %v5605_v55  ;;  %v5568_v13 = vor.u32 %v5751_v24, %v5565_v56  ;;  %v4244_v63 = vld [vmem:[#allocation2 + $0x10] sm:$0xff]  ;;  %v4282_v43 = vmul.f32 %v9122_v5, %v8574_v44  ;;  %v4243_v24 = vld [vmem:[#allocation2 + $0x8] sm:$0xf] }
 0xd70   : > { %v5572_v39 = vor.u32 %v5753_v10, %v5571_v61  ;;  %v4208_v62 = vpop.permute.xlu0 %4207  ;;  %v8582_v21 = vunpack.c.l.bf16 %v4244_v63  ;;  %v8584_v42 = vunpack.c.h.bf16 %v4244_v63  ;;  %v4245_v18 = vld [vmem:[#allocation2 + $0x18] sm:$0xf]  ;;  %v5758_v17 = vld [vmem:[#allocation2 + $0x10] sm:$0xf0]  ;;  %v4283_v61 = vmul.f32 %v8576_v41, %v9123_v36  ;;  %v5587_v10 = vld [vmem:[#allocation2 + $0x4] sm:$0xf] }
 0xd71   : > { %v4216_v4 = vmul.f32 %v4208_v62, %v8478_v30  ;;  %v4217_v2 = vmul.f32 %v4208_v62, %v8480_v12  ;;  %4696 = vrot.lane.b32.xlu2 %v5608_v20, %s5891_s9  ;;  %4460 = vrot.lane.b32.xlu1 %v5568_v13, %s5886_s28  ;;  %v5762_v30 = vld [vmem:[#allocation2 + $0x10] sm:$0xf0]  ;;  %v8608_v56 = vunpack.c.l.bf16 %v4245_v18  ;;  %v5588_v35 = vor.u32 %v5758_v17, %v5587_v10 }
 0xd72   : > { %4462 = vrot.lane.b32.xlu0 %v5572_v39, %s5886_s28  ;;  %v4305_v29 = vmul.f32 %v6024_v38, %v8582_v21  ;;  %v4306_v40 = vmul.f32 %v8584_v42, %v6046_v47  ;;  %v4285_v12 = vmul.f32 %v9122_v5, %v8582_v21  ;;  %v4286_v8 = vmul.f32 %v8584_v42, %v9123_v36 }
 0xd73   : > { %v4224_v15 = vadd.f32 %v4216_v4, %v9222_v52  ;;  %v4225_v25 = vadd.f32 %v4217_v2, %v9223_v9  ;;  %v5604_v55 = vor.u32 %v5762_v30, %v5603_v11  ;;  %v4338_v13 = vunpack.c.h.bf16 %v4235_v7  ;;  %v5757_v30 = vld [vmem:[#allocation2 + $0x8] sm:$0xf] }
 0xd74   : > { %v4316_v28 = vpack.c.bf16 %v4306_v40, %v4305_v29  ;;  %v4296_v39 = vpack.c.bf16 %v4286_v8, %v4285_v12  ;;  %v8611_v63 = vunpack.c.l.bf16 %v4243_v24  ;;  %v4294_v62 = vpack.c.bf16 %v4283_v61, %v4282_v43  ;;  %v5589_v40 = vld [vmem:[#allocation2 + $0x14] sm:$0xf0] }
 0xd75   : > { %v8601_v16 = vpack.c.bf16 %v4225_v25, %v4224_v15  ;;  %v4334_v4 = vunpack.c.l.bf16 %v8567_v1  ;;  %v4335_v2 = vunpack.c.h.bf16 %v8567_v1  ;;  %v4307_v29 = vmul.f32 %v6022_v37, %v8608_v56 }
 0xd76   : > { %v4527_v58 = vunpack.c.l.b16 %v4316_v28  ;;  %v4528_v52 = vunpack.c.h.b16 %v4316_v28  ;;  %v4485_v15 = vunpack.c.l.b16 %v4296_v39  ;;  %v4389_v7 = vmul.f32 %v9124_v27, %v4337_v53 }
 0xd77   : > { %4241 = vst [vmem:[#allocation2 + $0x34] sm:$0xff] %v8601_v16  ;;  %v4390_v9 = vmul.f32 %v4338_v13, %v9125_v45  ;;  %v4304_v25 = vmul.f32 %v6022_v37, %v8611_v63  ;;  %v4525_v12 = vunpack.c.h.b16 %v4314_v34  ;;  %v4482_v8 = vunpack.c.l.b16 %v4294_v62 }
 0xd78   : > { %v4536_v20 = vpack.c.b16 %v4527_v58, %v4524_v14  ;;  %v4386_v18 = vmul.f32 %v9124_v27, %v4334_v4  ;;  %v4387_v1 = vmul.f32 %v4335_v2, %v9125_v45  ;;  %v5592_v17 = vor.u32 %v5757_v30, %v5589_v40 }
 0xd79   : > { %4574 = vrot.lane.b32.xlu1 %v5588_v35, %s5890_s8  ;;  %v4317_v11 = vpack.c.bf16 %v4307_v29, %v4307_v29  ;;  %v4537_v14 = vpack.c.b16 %v4528_v52, %v4525_v12  ;;  %v4494_v58 = vpack.c.b16 %v4485_v15, %v4482_v8  ;;  %v4400_v28 = vpack.c.bf16 %v4390_v9, %v4389_v7 }
 0xd7a   : > { %4694 = vrot.lane.b32.xlu0 %v5604_v55, %s5891_s9  ;;  %4542 = vrot.lane.b32.xlu2 %v4536_v20, %s5893_s11  ;;  %v4315_v43 = vpack.c.bf16 %v4304_v25, %v4304_v25  ;;  %v4398_v61 = vpack.c.bf16 %v4387_v1, %v4386_v18  ;;  %v4287_v34 = vmul.f32 %v9121_v48, %v8608_v56  ;;  %v4486_v55 = vunpack.c.h.b16 %v4296_v39 }
 0xd7b   : > { %v4529_v24 = vunpack.c.l.b16 %v4317_v11  ;;  %v4722_v10 = vunpack.c.h.b16 %v4400_v28  ;;  %v4369_v35 = vmul.f32 %v6191_v59, %v4337_v53  ;;  %v4370_v20 = vmul.f32 %v4338_v13, %v6213_v46 }
 0xd7c   : > { %v4526_v29 = vunpack.c.l.b16 %v4315_v43  ;;  %v4284_v40 = vmul.f32 %v9121_v48, %v8611_v63  ;;  %v4483_v52 = vunpack.c.h.b16 %v4294_v62  ;;  %v4719_v15 = vunpack.c.h.b16 %v4398_v61 }
 0xd7d   : > { %v4366_v7 = vmul.f32 %v6191_v59, %v4334_v4  ;;  %v4367_v9 = vmul.f32 %v4335_v2, %v6213_v46  ;;  %v4297_v30 = vpack.c.bf16 %v4287_v34, %v4287_v34  ;;  %v4380_v39 = vpack.c.bf16 %v4370_v20, %v4369_v35 }
 0xd7e   : > { %v4538_v25 = vpack.c.b16 %v4529_v24, %v4526_v29  ;;  %v4495_v12 = vpack.c.b16 %v4486_v55, %v4483_v52  ;;  %v4731_v8 = vpack.c.b16 %v4722_v10, %v4719_v15  ;;  %v4295_v18 = vpack.c.bf16 %v4284_v40, %v4284_v40 }
 0xd7f   : > { %v4378_v1 = vpack.c.bf16 %v4367_v9, %v4366_v7  ;;  %v4349_v62 = vmul.f32 %v6254_v26, %v4337_v53  ;;  %v4350_v11 = vmul.f32 %v4338_v13, %v6262_v22  ;;  %v4265_v43 = vmul.f32 %v6280_v31, %v8582_v21 }
 0xd80   : > { %v4266_v24 = vmul.f32 %v8584_v42, %v6297_v60  ;;  %v4484_v34 = vunpack.c.l.b16 %v4295_v18  ;;  %v4346_v55 = vmul.f32 %v6254_v26, %v4334_v4  ;;  %v4347_v10 = vmul.f32 %v4335_v2, %v6262_v22 }
 0xd81   : > { %4544 = vrot.lane.b32.xlu1 %v4537_v14, %s5893_s11  ;;  %v4638_v14 = vunpack.c.h.b16 %v4380_v39  ;;  %v4635_v35 = vunpack.c.h.b16 %v4378_v1  ;;  %v4634_v20 = vunpack.c.l.b16 %v4378_v1  ;;  %v4262_v53 = vmul.f32 %v6280_v31, %v8574_v44  ;;  %v4249_v1 = vld [vmem:[#allocation2 + $0x38] sm:$0xf] }
 0xd82   : > { %4576 = vrot.lane.b32.xlu0 %v5592_v17, %s5890_s8  ;;  %4500 = vrot.lane.b32.xlu2 %v4494_v58, %s5895_s13  ;;  %v4487_v17 = vunpack.c.l.b16 %v4297_v30  ;;  %v4637_v58 = vunpack.c.l.b16 %v4380_v39  ;;  %v4263_v13 = vmul.f32 %v8576_v41, %v6297_v60  ;;  %v4360_v21 = vpack.c.bf16 %v4350_v11, %v4349_v62 }
 0xd83   : > { %v4647_v40 = vpack.c.b16 %v4638_v14, %v4635_v35  ;;  %v4276_v15 = vpack.c.bf16 %v4266_v24, %v4265_v43  ;;  %v4358_v42 = vpack.c.bf16 %v4347_v10, %v4346_v55  ;;  %v4721_v2 = vunpack.c.l.b16 %v4400_v28  ;;  %v5615_v35 = vld [vmem:[#allocation2 + $0x24] sm:$0xf] }
 0xd84   : > { %v4496_v29 = vpack.c.b16 %v4487_v17, %v4484_v34  ;;  %v4646_v52 = vpack.c.b16 %v4637_v58, %v4634_v20  ;;  %v4274_v4 = vpack.c.bf16 %v4263_v13, %v4262_v53  ;;  %v4595_v7 = vunpack.c.l.b16 %v4360_v21  ;;  %v4248_v17 = vld [vmem:[#allocation2 + $0x30] sm:$0xff]  ;;  %v4247_v20 = vld [vmem:[#allocation2 + $0x28] sm:$0xf]  ;;  %v4246_v53 = vld [vmem:[#allocation2 + $0x20] sm:$0xff] }
 0xd85   : > { %v4417_v9 = vunpack.c.l.b16 %v4276_v15  ;;  %v4718_v44 = vunpack.c.l.b16 %v4398_v61  ;;  %v4592_v41 = vunpack.c.l.b16 %v4358_v42  ;;  %v4596_v61 = vunpack.c.h.b16 %v4360_v21  ;;  %v5765_v58 = vld [vmem:[#allocation2 + $0x30] sm:$0xf0] }
 0xd86   : > { %v4414_v30 = vunpack.c.l.b16 %v4274_v4  ;;  %v4418_v11 = vunpack.c.h.b16 %v4276_v15  ;;  %v4343_v14 = vunpack.c.l.bf16 %v8601_v16  ;;  %v4344_v43 = vunpack.c.h.bf16 %v8601_v16 }
 0xd87   : > { %v4604_v39 = vpack.c.b16 %v4595_v7, %v4592_v41  ;;  %v4415_v24 = vunpack.c.h.b16 %v4274_v4  ;;  %v8663_v34 = vunpack.c.l.bf16 %v4249_v1  ;;  %v8665_v55 = vunpack.c.l.bf16 %v4248_v17  ;;  %v5756_v1 = vld [vmem:[#allocation2 + $0x34] sm:$0xf0] }
 0xd88   : > { %v4426_v18 = vpack.c.b16 %v4417_v9, %v4414_v30  ;;  %v4375_v10 = vmul.f32 %v6191_v59, %v4343_v14  ;;  %v4376_v13 = vmul.f32 %v4344_v43, %v6213_v46  ;;  %v5616_v15 = vor.u32 %v5765_v58, %v5615_v35  ;;  %v5577_v58 = vld [vmem:[#allocation2 + $0x30] sm:$0xf0] }
 0xd89   : > { %4502 = vrot.lane.b32.xlu1 %v4495_v12, %s5895_s13  ;;  %v4341_v12 = vunpack.c.h.bf16 %v8558_v3  ;;  %v4427_v16 = vpack.c.b16 %v4418_v11, %v4415_v24  ;;  %v8679_v7 = vunpack.c.l.bf16 %v4247_v20  ;;  %v8683_v9 = vunpack.c.l.bf16 %v4246_v53  ;;  %v5760_v24 = vld [vmem:[#allocation2 + $0x30] sm:$0xf0] }
 0xd8a   : > { %4546 = vrot.lane.b32.xlu0 %v4538_v25, %s5893_s11  ;;  %4738 = vrot.lane.b32.xlu2 %v4731_v8, %s5896_s14  ;;  %v4340_v25 = vunpack.c.l.bf16 %v8558_v3  ;;  %v4730_v8 = vpack.c.b16 %v4721_v2, %v4718_v44  ;;  %v4593_v3 = vunpack.c.h.b16 %v4358_v42  ;;  %v8673_v42 = vunpack.c.h.bf16 %v4248_v17 }
 0xd8b   : > { %v4373_v28 = vmul.f32 %v4341_v12, %v6213_v46  ;;  %v8675_v4 = vpack.c.bf16 %v4376_v13, %v4375_v10  ;;  %v4353_v2 = vmul.f32 %v4341_v12, %v6262_v22  ;;  %v4313_v46 = vmul.f32 %v6022_v37, %v8663_v34 }
 0xd8c   : > { %v4372_v62 = vmul.f32 %v6191_v59, %v4340_v25  ;;  %v4605_v21 = vpack.c.b16 %v4596_v61, %v4593_v3  ;;  %v4352_v59 = vmul.f32 %v6254_v26, %v4340_v25  ;;  %v8685_v44 = vunpack.c.h.bf16 %v4246_v53  ;;  %v5583_v3 = vld [vmem:[#allocation2 + $0x28] sm:$0xf]  ;;  %v5754_v53 = vld [vmem:[#allocation2 + $0x24] sm:$0xf] }
 0xd8d   : > { %v4311_v41 = vmul.f32 %v6024_v38, %v8665_v55  ;;  %v4312_v17 = vmul.f32 %v8673_v42, %v6046_v47  ;;  %v5584_v10 = vor.u32 %v5756_v1, %v5583_v3 }
 0xd8e   : > { %v4362_v61 = vpack.c.bf16 %v4353_v2, %v4352_v59 }
 0xd8f   : > { %v8708_v13 = vpack.c.bf16 %v4312_v17, %v4311_v41 }
 0xd90   : > { %v4599_v59 = vunpack.c.h.b16 %v4362_v61 }
 0xd91   : > { %4654 = vrot.lane.b32.xlu1 %v4647_v40, %s5894_s12  ;;  %v4392_v40 = vmul.f32 %v9124_v27, %v4340_v25  ;;  %v4644_v25 = vunpack.c.h.b16 %v8675_v4 }
 0xd92   : > { %4504 = vrot.lane.b32.xlu0 %v4496_v29, %s5895_s13  ;;  %4652 = vrot.lane.b32.xlu2 %v4646_v52, %s5894_s12  ;;  %v8669_v29 = vpack.c.bf16 %v4373_v28, %v4372_v62  ;;  %v4393_v52 = vmul.f32 %v4341_v12, %v9125_v45  ;;  %v4395_v12 = vmul.f32 %v9124_v27, %v4343_v14 }
 0xd93   : > { %v4356_v28 = vmul.f32 %v4344_v43, %v6262_v22  ;;  %v4310_v27 = vmul.f32 %v6022_v37, %v8679_v7  ;;  %v5595_v22 = vld [vmem:[#allocation2 + $0x24] sm:$0xf] }
 0xd94   : > { %v4641_v30 = vunpack.c.h.b16 %v8669_v29 }
 0xd96   : > { %v8699_v62 = vpack.c.b16 %v4644_v25, %v4641_v30  ;;  %v4533_v30 = vunpack.c.l.b16 %v8708_v13  ;;  %v4293_v25 = vmul.f32 %v9121_v48, %v8663_v34 }
 0xd99   : > { %4610 = vrot.lane.b32.xlu1 %v4604_v39, %s5892_s10  ;;  %v4396_v39 = vmul.f32 %v4344_v43, %v9125_v45  ;;  %v4308_v45 = vmul.f32 %v6024_v38, %v8683_v9  ;;  %v4321_v43 = vpack.c.bf16 %v4313_v46, %v4313_v46  ;;  %v4319_v38 = vpack.c.bf16 %v4310_v27, %v4310_v27 }
 0xd9a   : > { %4736 = vrot.lane.b32.xlu0 %v4730_v8, %s5896_s14  ;;  %4782 = vrot.lane.b32.xlu2 %v4426_v18, %s5885_s27  ;;  %v4402_v8 = vpack.c.bf16 %v4393_v52, %v4392_v40  ;;  %v4355_v18 = vmul.f32 %v6254_v26, %v4343_v14  ;;  %v4309_v26 = vmul.f32 %v8685_v44, %v6046_v47  ;;  %v4598_v40 = vunpack.c.l.b16 %v4362_v61  ;;  %v5617_v61 = vld [vmem:[#allocation2 + $0x34] sm:$0xf0] }
 0xd9b   : > { %v4404_v11 = vpack.c.bf16 %v4396_v39, %v4395_v12  ;;  %v4264_v46 = vmul.f32 %v6283_v33, %v8611_v63  ;;  %v4535_v41 = vunpack.c.l.b16 %v4321_v43  ;;  %v4291_v12 = vmul.f32 %v9122_v5, %v8665_v55 }
 0xd9c   : > { %v4364_v14 = vpack.c.bf16 %v4356_v28, %v4355_v18  ;;  %v4724_v35 = vunpack.c.l.b16 %v4402_v8  ;;  %v4292_v39 = vmul.f32 %v8673_v42, %v9123_v36  ;;  %v4725_v1 = vunpack.c.h.b16 %v4402_v8  ;;  %v5764_v8 = vld [vmem:[#allocation2 + $0x28] sm:$0xf] }
 0xd9d   : > { %v4727_v20 = vunpack.c.l.b16 %v4404_v11  ;;  %v4728_v17 = vunpack.c.h.b16 %v4404_v11  ;;  %v4532_v28 = vunpack.c.l.b16 %v4319_v38  ;;  %v4290_v63 = vmul.f32 %v9121_v48, %v8679_v7  ;;  %v5597_v38 = vld [vmem:[#allocation2 + $0x34] sm:$0xf0] }
 0xd9e   : > { %v4601_v52 = vunpack.c.l.b16 %v4364_v14  ;;  %v4602_v2 = vunpack.c.h.b16 %v4364_v14  ;;  %v4301_v11 = vpack.c.bf16 %v4293_v25, %v4293_v25 }
 0xd9f   : > { %v8710_v37 = vpack.c.b16 %v4727_v20, %v4724_v35  ;;  %v4734_v27 = vpack.c.b16 %v4728_v17, %v4725_v1  ;;  %v4541_v14 = vpack.c.b16 %v4535_v41, %v4532_v28  ;;  %v4300_v20 = vpack.c.bf16 %v4292_v39, %v4291_v12  ;;  %v5759_v41 = vld [vmem:[#allocation2 + $0x28] sm:$0xf] }
 0xda0   : > { %v8713_v47 = vpack.c.b16 %v4601_v52, %v4598_v40  ;;  %v8726_v18 = vpack.c.b16 %v4602_v2, %v4599_v59  ;;  %v4299_v48 = vpack.c.bf16 %v4290_v63, %v4290_v63  ;;  %v4640_v40 = vunpack.c.l.b16 %v8669_v29 }
 0xda1   : > { %4784 = vrot.lane.b32.xlu1 %v4427_v16, %s5885_s27  ;;  %v5596_v16 = vor.u32 %v5760_v24, %v5595_v22  ;;  %v4289_v24 = vmul.f32 %v8685_v44, %v9123_v36  ;;  %v4491_v43 = vunpack.c.l.b16 %v4300_v20  ;;  %v4643_v52 = vunpack.c.l.b16 %v8675_v4 }
 0xda2   : > { %4612 = vrot.lane.b32.xlu0 %v4605_v21, %s5892_s10  ;;  %4700 = vrot.lane.b32.xlu2 %v5616_v15, %s5891_s9  ;;  %v5580_v21 = vor.u32 %v5754_v53, %v5577_v58  ;;  %v4318_v15 = vpack.c.bf16 %v4309_v26, %v4308_v45  ;;  %v4288_v58 = vmul.f32 %v9122_v5, %v8683_v9  ;;  %v4534_v4 = vunpack.c.h.b16 %v8708_v13 }
 0xda3   : > { %v4267_v45 = vmul.f32 %v6283_v33, %v8608_v56  ;;  %v4275_v26 = vpack.c.bf16 %v4264_v46, %v4264_v46  ;;  %v4493_v56 = vunpack.c.l.b16 %v4301_v11  ;;  %v4649_v2 = vpack.c.b16 %v4643_v52, %v4640_v40 }
 0xda4   : > { %v4530_v3 = vunpack.c.l.b16 %v4318_v15  ;;  %v4298_v5 = vpack.c.bf16 %v4289_v24, %v4288_v58  ;;  %v4270_v29 = vmul.f32 %v6283_v33, %v8679_v7  ;;  %v4531_v12 = vunpack.c.h.b16 %v4318_v15 }
 0xda5   : > { %v4277_v53 = vpack.c.bf16 %v4267_v45, %v4267_v45  ;;  %v8739_v36 = vunpack.c.l.b16 %v4275_v26  ;;  %v4273_v39 = vmul.f32 %v6283_v33, %v8663_v34  ;;  %v4492_v13 = vunpack.c.h.b16 %v4300_v20 }
 0xda6   : > { %v4539_v35 = vpack.c.b16 %v4533_v30, %v4530_v3  ;;  %v4488_v59 = vunpack.c.l.b16 %v4298_v5  ;;  %v5600_v30 = vor.u32 %v5759_v41, %v5597_v38  ;;  %v4279_v1 = vpack.c.bf16 %v4270_v29, %v4270_v29 }
 0xda7   : > { %v8741_v22 = vunpack.c.l.b16 %v4277_v53  ;;  %v4540_v17 = vpack.c.b16 %v4534_v4, %v4531_v12  ;;  %v4281_v28 = vpack.c.bf16 %v4273_v39, %v4273_v39  ;;  %v4271_v15 = vmul.f32 %v6280_v31, %v8665_v55 }
 0xda8   : > { %v4497_v25 = vpack.c.b16 %v4491_v43, %v4488_v59  ;;  %v4272_v33 = vmul.f32 %v8673_v42, %v6297_v60  ;;  %v4268_v3 = vmul.f32 %v6280_v31, %v8683_v9 }
 0xda9   : > { %4466 = vrot.lane.b32.xlu1 %v5580_v21, %s5886_s28  ;;  %v4428_v21 = vpack.c.b16 %v8741_v22, %v8739_v36  ;;  %v8762_v7 = vunpack.c.l.b16 %v4281_v28 }
 0xdaa   : > { %4468 = vrot.lane.b32.xlu0 %v5584_v10, %s5886_s28  ;;  %4578 = vrot.lane.b32.xlu2 %v5596_v16, %s5890_s8  ;;  %v5620_v10 = vor.u32 %v5764_v8, %v5617_v61  ;;  %v4490_v16 = vunpack.c.l.b16 %v4299_v48  ;;  %v8760_v61 = vunpack.c.l.b16 %v4279_v1  ;;  %v4280_v58 = vpack.c.bf16 %v4272_v33, %v4271_v15 }
 0xdac   : > { %v4499_v46 = vpack.c.b16 %v4493_v56, %v4490_v16  ;;  %v4431_v34 = vpack.c.b16 %v8762_v7, %v8760_v61  ;;  %v4423_v24 = vunpack.c.l.b16 %v4280_v58  ;;  %v4424_v9 = vunpack.c.h.b16 %v4280_v58 }
 0xdb1   : > { %4702 = vrot.lane.b32.xlu1 %v5620_v10, %s5891_s9 }
 0xdb2   : > { %4552 = vrot.lane.b32.xlu0 %v4541_v14, %s5893_s11  ;;  %4548 = vrot.lane.b32.xlu2 %v4539_v35, %s5893_s11 }
 0xdb9   : > { %4580 = vrot.lane.b32.xlu1 %v5600_v30, %s5890_s8 }
 0xdba   : > { %4510 = vrot.lane.b32.xlu0 %v4499_v46, %s5895_s13  ;;  %4506 = vrot.lane.b32.xlu2 %v4497_v25, %s5895_s13 }
 0xdc1   : > { %4550 = vrot.lane.b32.xlu1 %v4540_v17, %s5893_s11 }
 0xdc2   : > { %4660 = vrot.lane.b32.xlu0 %v8699_v62, %s5894_s12  ;;  %4742 = vrot.lane.b32.xlu2 %v8710_v37, %s5896_s14  ;;  %v4489_v62 = vunpack.c.h.b16 %v4298_v5  ;;  %v4269_v37 = vmul.f32 %v8685_v44, %v6297_v60 }
 0xdc4   : > { %v4498_v63 = vpack.c.b16 %v4492_v13, %v4489_v62  ;;  %v4278_v55 = vpack.c.bf16 %v4269_v37, %v4268_v3 }
 0xdc6   : > { %v4420_v45 = vunpack.c.l.b16 %v4278_v55  ;;  %v4421_v44 = vunpack.c.h.b16 %v4278_v55 }
 0xdc8   : > { %v4429_v26 = vpack.c.b16 %v4423_v24, %v4420_v45 }
 0xdc9   : > { %4508 = vrot.lane.b32.xlu1 %v4498_v63, %s5895_s13 }
 0xdca   : > { %4616 = vrot.lane.b32.xlu0 %v8713_v47, %s5892_s10  ;;  %4618 = vrot.lane.b32.xlu2 %v8726_v18, %s5892_s10  ;;  %v4430_v47 = vpack.c.b16 %v4424_v9, %v4421_v44 }
 0xdcb   : > { %v4697_v42 = vpop.permute.xlu2 %4696 }
 0xdd1   : > { %4744 = vrot.lane.b32.xlu1 %v4734_v27, %s5896_s14 }
 0xdd2   : > { %4788 = vrot.lane.b32.xlu2 %v4429_v26, %s5885_s27 }
 0xdd4   : > { %v4543_v31 = vpop.permute.xlu2 %4542 }
 0xdd9   : > { %4658 = vrot.lane.b32.xlu1 %v4649_v2, %s5894_s12  ;;  %s9061_s12 = scalar_lea.vmem %s9086_s6, %s5655_s23 }
 0xddc   : > { %v4501_v60 = vpop.permute.xlu2 %4500 }
 0xde1   : > { %4790 = vrot.lane.b32.xlu1 %v4430_v47, %s5885_s27 }
 0xde3   : > { %v4461_v18 = vpop.permute.xlu1 %4460 }
 0xde4   : > { %v8783_v14 = vpop.permute.xlu0 %4462  ;;  %v4470_v8 = vsel %vm412_vm4, %v8538_v50, %v4461_v18  ;;  %v8787_v11 = vpop.permute.xlu2 %4738  ;;  %v4707_v50 = vsel %vm854_vm10, %v4697_v42, %v8546_v6 }
 0xde5   : > { %4794 = vrot.lane.b32.xlu2 %v4470_v8, %s5885_s27  ;;  %v4471_v27 = vsel %vm412_vm4, %v4461_v18, %v8783_v14  ;;  %v4749_v61 = vsel %vm897_vm14, %v8787_v11, %v8561_v0 }
 0xde9   : > { %4796 = vrot.lane.b32.xlu1 %v4471_v27, %s5885_s27 }
 0xdeb   : > { %v8794_v20 = vpop.permute.xlu1 %4574 }
 0xdec   : > { %v4695_v10 = vpop.permute.xlu0 %4694  ;;  %v4653_v53 = vpop.permute.xlu2 %4652 }
 0xded   : > { %v4706_v35 = vsel %vm854_vm10, %v4695_v10, %v4697_v42  ;;  %4866 = vrot.lane.b32.xlu0 %v4695_v10, %s5885_s27 }
 0xdee   : > { %4868 = vrot.lane.b32.xlu2 %v4706_v35, %s5885_s27 }
 0xdf1   : > { %4870 = vrot.lane.b32.xlu1 %v4707_v50, %s5885_s27 }
 0xdf3   : > { %v4545_v5 = vpop.permute.xlu1 %4544 }
 0xdf4   : > { %v8801_v48 = vpop.permute.xlu0 %4576  ;;  %v8804_v56 = vpop.permute.xlu2 %4782  ;;  %v4554_v52 = vsel %vm698_vm11, %v4543_v31, %v4545_v5 }
 0xdf6   : > { %4854 = vrot.lane.b32.xlu2 %v4653_v53, %s5885_s27 }
 0xdfb   : > { %v4503_v40 = vpop.permute.xlu1 %4502 }
 0xdfc   : > { %v4547_v43 = vpop.permute.xlu0 %4546  ;;  %v4701_v6 = vpop.permute.xlu2 %4700  ;;  %v4512_v2 = vsel %vm655_vm12, %v4501_v60, %v4503_v40 }
 0xdfd   : > { %4822 = vrot.lane.b32.xlu1 %v4547_v43, %s5885_s27  ;;  %v4555_v16 = vsel %vm698_vm11, %v4545_v5, %v4547_v43 }
 0xdfe   : > { %4818 = vrot.lane.b32.xlu2 %v4554_v52, %s5885_s27 }
 0xe03   : > { %v8810_v59 = vpop.permute.xlu1 %4654 }
 0xe04   : > { %v4505_v38 = vpop.permute.xlu0 %4504  ;;  %v8820_v25 = vpop.permute.xlu2 %4578  ;;  %v4664_v60 = vsel %vm811_vm13, %v4653_v53, %v8810_v59 }
 0xe05   : > { %4820 = vrot.lane.b32.xlu1 %v4555_v16, %s5885_s27  ;;  %v4513_v29 = vsel %vm655_vm12, %v4503_v40, %v4505_v38 }
 0xe0b   : > { %v8816_v30 = vpop.permute.xlu1 %4610 }
 0xe0c   : > { %v4737_v46 = vpop.permute.xlu0 %4736  ;;  %v4549_v39 = vpop.permute.xlu2 %4548 }
 0xe0d   : > { %v4748_v41 = vsel %vm897_vm14, %v4737_v46, %v8787_v11  ;;  %4878 = vrot.lane.b32.xlu0 %v4737_v46, %s5885_s27  ;;  %4806 = vrot.lane.b32.xlu1 %v4512_v2, %s5885_s27 }
 0xe0e   : > { %4880 = vrot.lane.b32.xlu2 %v4748_v41, %s5885_s27 }
 0xe13   : > { %v8824_v12 = vpop.permute.xlu1 %4784 }
 0xe14   : > { %v4613_v4 = vpop.permute.xlu0 %4612  ;;  %v4507_v13 = vpop.permute.xlu2 %4506 }
 0xe15   : > { %4808 = vrot.lane.b32.xlu0 %v4513_v29, %s5885_s27  ;;  %v4622_v47 = vsel %vm768_vm15, %v8816_v30, %v4613_v4  ;;  %v4623_v10 = vsel %vm768_vm15, %v4613_v4, %v8548_v19 }
 0xe1b   : > { %v4467_v17 = vpop.permute.xlu1 %4466 }
 0xe1c   : > { %v4469_v1 = vpop.permute.xlu0 %4468  ;;  %v4472_v15 = vsel %vm412_vm4, %v8536_v49, %v4467_v17  ;;  %v4743_v63 = vpop.permute.xlu2 %4742 }
 0xe1d   : > { %4872 = vrot.lane.b32.xlu0 %v4701_v6, %s5885_s27  ;;  %v4473_v28 = vsel %vm412_vm4, %v4467_v17, %v4469_v1  ;;  %vm9224_vm4 = vcmask 138240  }
 0xe1e   : > { %4802 = vrot.lane.b32.xlu2 %v4473_v28, %s5885_s27  ;;  %vm9232_vm6 = vmmov %vm9224_vm4 }
 0xe1f   : > { %vm9233_vm8 = vmmov %vm9224_vm4 }
 0xe20   : > { %vm9234_vm1 = vmmov %vm9224_vm4 }
 0xe21   : > { %vm9235_vm3 = vmmov %vm9234_vm1 }
 0xe22   : > { %vm9236_vm5 = vmmov %vm9234_vm1 }
 0xe23   : > { %v4703_v62 = vpop.permute.xlu1 %4702  ;;  %vm9237_vm7 = vmmov %vm9234_vm1 }
 0xe24   : > { %v4553_v33 = vpop.permute.xlu0 %4552  ;;  %v4708_v3 = vsel %vm854_vm10, %v4701_v6, %v4703_v62  ;;  %v4709_v37 = vsel %vm854_vm10, %v4703_v62, %v8540_v23  ;;  %v4619_v23 = vpop.permute.xlu2 %4618  ;;  %vm9225_vm10 = vmmov %vm9224_vm4 }
 0xe25   : > { %4800 = vrot.lane.b32.xlu0 %v4472_v15, %s5885_s27  ;;  %4876 = vrot.lane.b32.xlu1 %v4709_v37, %s5885_s27  ;;  %v4625_v16 = vsel %vm768_vm15, %v4619_v23, %v8552_v57  ;;  %vm9238_vm2 = vmmov %vm9234_vm1 }
 0xe26   : > { %4874 = vrot.lane.b32.xlu2 %v4708_v3, %s5885_s27  ;;  %vm9239_vm0 = vmmov %vm9234_vm1 }
 0xe2b   : > { %v8838_v55 = vpop.permute.xlu1 %4580 }
 0xe2c   : > { %v4511_v58 = vpop.permute.xlu0 %4510  ;;  %v8855_v18 = vpop.permute.xlu2 %4788 }
 0xe2d   : > { %4884 = vrot.lane.b32.xlu0 %v4743_v63, %s5885_s27  ;;  %4828 = vrot.lane.b32.xlu1 %v4553_v33, %s5885_s27 }
 0xe2e   : > { %4810 = vrot.lane.b32.xlu2 %v4505_v38, %s5885_s27  ;;  %v4665_v38 = vsel %vm811_vm13, %v8810_v59, %v8544_v54 }
 0xe33   : > { %v4551_v42 = vpop.permute.xlu1 %4550 }
 0xe34   : > { %v4661_v49 = vpop.permute.xlu0 %4660  ;;  %v4556_v24 = vsel %vm698_vm11, %v4549_v39, %v4551_v42  ;;  %v4557_v50 = vsel %vm698_vm11, %v4551_v42, %v4553_v33  ;;  %vm9226_vm11 = vmmov %vm9224_vm4 }
 0xe35   : > { %4824 = vrot.lane.b32.xlu1 %v4556_v24, %s5885_s27  ;;  %v4667_v5 = vsel %vm811_vm13, %v4661_v49, %v8542_v51  ;;  %v4583_v51 = vsel %vm350_vm9, %v8820_v25, %v8838_v55 }
 0xe3b   : > { %v4509_v31 = vpop.permute.xlu1 %4508 }
 0xe3c   : > { %v4617_v45 = vpop.permute.xlu0 %4616  ;;  %v4515_v9 = vsel %vm655_vm12, %v4509_v31, %v4511_v58  ;;  %v4514_v52 = vsel %vm655_vm12, %v4507_v13, %v4509_v31  ;;  %vm9228_vm12 = vmmov %vm9224_vm4 }
 0xe3d   : > { %v4624_v26 = vsel %vm768_vm15, %v4617_v45, %v4619_v23  ;;  %4814 = vrot.lane.b32.xlu2 %v4515_v9, %s5885_s27  ;;  %4856 = vrot.lane.b32.xlu1 %v4664_v60, %s5885_s27  ;;  %vm9231_vm15 = vmmov %vm9224_vm4 }
 0xe3f   : > { %v8860_v27 = vpop.permute.xlu2 %4794 }
 0xe43   : > { %v8851_v44 = vpop.permute.xlu1 %4744 }
 0xe44   : > { %v4750_v35 = vsel %vm897_vm14, %v4743_v63, %v8851_v44 }
 0xe45   : > { %4844 = vrot.lane.b32.xlu2 %v4622_v47, %s5885_s27  ;;  %4848 = vrot.lane.b32.xlu1 %v4617_v45, %s5885_s27 }
 0xe48   : > { %v8872_v53 = vpop.permute.xlu2 %4868 }
 0xe4b   : > { %v4659_v8 = vpop.permute.xlu1 %4658 }
 0xe4c   : > { %4860 = vrot.lane.b32.xlu0 %v4659_v8, %s5885_s27  ;;  %v4666_v43 = vsel %vm811_vm13, %v4659_v8, %v4661_v49  ;;  %vm9229_vm13 = vmmov %vm9224_vm4 }
 0xe4d   : > { %4836 = vrot.lane.b32.xlu2 %v8820_v25, %s5885_s27  ;;  %4804 = vrot.lane.b32.xlu1 %v4469_v1, %s5885_s27  ;;  %v4751_v1 = vsel %vm897_vm14, %v8851_v44, %v8550_v32  ;;  %vm9230_vm14 = vmmov %vm9224_vm4 }
 0xe50   : > { %v8883_v40 = vpop.permute.xlu2 %4854 }
 0xe53   : > { %v8881_v19 = vpop.permute.xlu1 %4790 }
 0xe54   : > { %4816 = vrot.lane.b32.xlu0 %v4511_v58, %s5885_s27 }
 0xe55   : > { %4846 = vrot.lane.b32.xlu1 %v4623_v10, %s5885_s27  ;;  %4886 = vrot.lane.b32.xlu2 %v4750_v35, %s5885_s27 }
 0xe58   : > { %v8899_v2 = vpop.permute.xlu2 %4818 }
 0xe5b   : > { %v8894_v6 = vpop.permute.xlu1 %4796 }
 0xe5c   : > { %4826 = vrot.lane.b32.xlu0 %v4557_v50, %s5885_s27 }
 0xe5d   : > { %4864 = vrot.lane.b32.xlu1 %v4667_v5, %s5885_s27  ;;  %4862 = vrot.lane.b32.xlu2 %v4666_v43, %s5885_s27 }
 0xe5f   : > { %v4867_v54 = vpop.permute.xlu0 %4866 }
 0xe60   : > { %v4918_v0 = vsel %vm9225_vm10, %v4867_v54, %v8872_v53  ;;  %vm9241_vm10 = vmmov %vm9239_vm0  ;;  %v5627_v54 = vld [vmem:[%s9085_s5] sm:$0xf] }
 0xe63   : > { %v8908_v57 = vpop.permute.xlu1 %4870 }
 0xe64   : > { %4812 = vrot.lane.b32.xlu0 %v4514_v52, %s5885_s27 }
 0xe65   : > { %4838 = vrot.lane.b32.xlu1 %v4583_v51, %s5885_s27  ;;  %4852 = vrot.lane.b32.xlu2 %v4625_v16, %s5885_s27  ;;  %v4894_v16 = vsel %vm9241_vm10, %v8860_v27, %v8894_v6  ;;  %vm9256_vm10 = vmmov %vm9239_vm0 }
 0xe68   : > { %v8910_v46 = vpop.permute.xlu2 %4880 }
 0xe6c   : > { %4858 = vrot.lane.b32.xlu0 %v4665_v38, %s5885_s27 }
 0xe6d   : > { %4830 = vrot.lane.b32.xlu1 %v8794_v20, %s5885_s27  ;;  %4792 = vrot.lane.b32.xlu2 %v4431_v34, %s5885_s27 }
 0xe6f   : > { %v4823_v59 = vpop.permute.xlu1 %4822 }
 0xe74   : > { %4842 = vrot.lane.b32.xlu0 %v8816_v30, %s5885_s27 }
 0xe75   : > { %4786 = vrot.lane.b32.xlu1 %v4428_v21, %s5885_s27  ;;  %4834 = vrot.lane.b32.xlu2 %v8801_v48, %s5885_s27 }
 0xe77   : > { %v4821_v34 = vpop.permute.xlu1 %4820 }
 0xe78   : > { %v8920_v41 = vpop.permute.xlu2 %4802  ;;  %v4902_v9 = vsel %vm9234_vm1, %v8899_v2, %v4821_v34  ;;  %v4903_v44 = vsel %vm9235_vm3, %v4821_v34, %v4823_v59  ;;  %v5746_v59 = vld [vmem:[%s9085_s5 + $0x8] sm:$0xf0]  ;;  %v5635_v34 = vld [vmem:[%s9085_s5 + $0x8] sm:$0xf]  ;;  %vm9250_vm1 = vmmov %vm9239_vm0 }
 0xe79   : > { %vm9251_vm3 = vmmov %vm9239_vm0 }
 0xe7c   : > { %4798 = vrot.lane.b32.xlu0 %v8783_v14, %s5885_s27  ;;  %v4582_v14 = vsel %vm350_vm9, %v8794_v20, %v8801_v48  ;;  %vm9227_vm9 = vmmov %vm9224_vm4 }
 0xe7d   : > { %4882 = vrot.lane.b32.xlu2 %v4749_v61, %s5885_s27  ;;  %v5628_v61 = vor.u32 %v5746_v59, %v5627_v54 }
 0xe7f   : > { %v4879_v7 = vpop.permute.xlu0 %4878  ;;  %v4807_v25 = vpop.permute.xlu1 %4806 }
 0xe80   : > { %v4875_v36 = vpop.permute.xlu2 %4874  ;;  %v4922_v32 = vsel %vm9228_vm12, %v4879_v7, %v8910_v46  ;;  %vm9244_vm12 = vmmov %vm9239_vm0 }
 0xe84   : > { %4840 = vrot.lane.b32.xlu0 %v8838_v55, %s5885_s27 }
 0xe87   : > { %v4809_v22 = vpop.permute.xlu0 %4808 }
 0xe88   : > { %v4811_v29 = vpop.permute.xlu2 %4810  ;;  %v4898_v50 = vsel %vm9238_vm2, %v4807_v25, %v4809_v22  ;;  %vm9254_vm2 = vmmov %vm9239_vm0 }
 0xe89   : > { %v4899_v63 = vsel %vm9229_vm13, %v4809_v22, %v4811_v29  ;;  %vm9245_vm13 = vmmov %vm9239_vm0 }
 0xe8c   : > { %4850 = vrot.lane.b32.xlu0 %v4624_v26, %s5885_s27 }
 0xe8f   : > { %v4873_v21 = vpop.permute.xlu0 %4872 }
 0xe90   : > { %v4920_v30 = vsel %vm9224_vm4, %v4873_v21, %v4875_v36  ;;  %vm9240_vm4 = vmmov %vm9239_vm0 }
 0xe91   : > { %4987 = vmatpush.bf16.msrb.mxu2 %v4920_v30 }
 0xe94   : > { %4832 = vrot.lane.b32.xlu0 %v4582_v14, %s5885_s27 }
 0xe95   : > { %4988 = vmatpush.bf16.msrb.mxu2 %v4918_v0 }
 0xe97   : > { %v4877_v11 = vpop.permute.xlu1 %4876  ;;  %v4815_v4 = vpop.permute.xlu2 %4814 }
 0xe98   : > { %v4921_v39 = vsel %vm9226_vm11, %v4875_v36, %v4877_v11  ;;  %v4801_v13 = vpop.permute.xlu0 %4800  ;;  %vm9242_vm11 = vmmov %vm9239_vm0  ;;  %v5747_v36 = vld [vmem:[%s9085_s5 + $0x10] sm:$0xf0]  ;;  %v5647_v11 = vld [vmem:[%s9085_s5 + $0x20] sm:$0xf] }
 0xe99   : > { %v4896_v43 = vsel %vm9239_vm0, %v4801_v13, %v8920_v41  ;;  %v4892_v2 = vsel %vm9242_vm11, %v8855_v18, %v8881_v19  ;;  %v5636_v21 = vor.u32 %v5747_v36, %v5635_v34  ;;  %vm9257_vm11 = vmmov %vm9239_vm0 }
 0xe9c   : > { %4888 = vrot.lane.b32.xlu0 %v4751_v1, %s5885_s27 }
 0xe9f   : > { %v4829_v17 = vpop.permute.xlu1 %4828  ;;  %v8943_v28 = vpop.permute.xlu2 %4844 }
 0xea0   : > { %v4885_v20 = vpop.permute.xlu0 %4884 }
 0xea7   : > { %v4825_v15 = vpop.permute.xlu1 %4824  ;;  %v8945_v33 = vpop.permute.xlu2 %4836 }
 0xeaf   : > { %v8947_v48 = vpop.permute.xlu1 %4856  ;;  %v8949_v62 = vpop.permute.xlu2 %4886 }
 0xeb0   : > { %v4924_v3 = vsel %vm9227_vm9, %v4885_v20, %v8949_v62  ;;  %v4914_v24 = vsel %vm9231_vm15, %v8883_v40, %v8947_v48  ;;  %vm9243_vm9 = vmmov %vm9239_vm0 }
 0xeb1   : > { %5012 = vmatpush.bf16.msrb.mxu0 %v4924_v3  ;;  %v4890_v27 = vsel %vm9243_vm9, %v8804_v56, %v8824_v12  ;;  %v4919_v56 = vsel %vm9245_vm13, %v8872_v53, %v8908_v57  ;;  %vm9247_vm15 = vmmov %vm9239_vm0  ;;  %v5639_v57 = vld [vmem:[%s9085_s5 + $0x18] sm:$0xf] }
 0xeb2   : > { %vm9258_vm9 = vmmov %vm9239_vm0 }
 0xeb3   : > { %vm9260_vm13 = vmmov %vm9239_vm0 }
 0xeb5   : > { %5013 = vmatpush.bf16.msrb.mxu0 %v4922_v32 }
 0xeb7   : > { %v8955_v37 = vpop.permute.xlu1 %4848  ;;  %v4863_v58 = vpop.permute.xlu2 %4862 }
 0xebe   : > { %v4861_v55 = vpop.permute.xlu0 %4860 }
 0xebf   : > { %v4916_v49 = vsel %vm9230_vm14, %v4861_v55, %v4863_v58  ;;  %v4805_v42 = vpop.permute.xlu1 %4804  ;;  %v4853_v51 = vpop.permute.xlu2 %4852  ;;  %vm9246_vm14 = vcmask 261120  }
 0xec0   : > { %4989 = vmatpush.bf16.msrb.mxu2 %v4916_v49  ;;  %v4897_v40 = vsel %vm9240_vm4, %v8920_v41, %v4805_v42  ;;  %5649 = vmatmul.msk.bf16.vlgmr.msrb.gmra.mxu0 %vm9246_vm14, %v5636_v21  ;;  %vm9255_vm4 = vmmov %vm9239_vm0 }
 0xec4   : > { %4990 = vmatpush.bf16.msrb.mxu2 %v4914_v24 }
 0xec6   : > { %v4817_v23 = vpop.permute.xlu0 %4816 }
 0xec7   : > { %v8962_v45 = vpop.permute.xlu1 %4846  ;;  %v4901_v35 = vsel %vm9237_vm7, %v4815_v4, %v4817_v23  ;;  %v4793_v22 = vpop.permute.xlu2 %4792  ;;  %vm9253_vm7 = vmmov %vm9246_vm14  ;;  %v5748_v23 = vld [vmem:[%s9085_s5 + $0x1c] sm:$0xf] }
 0xec8   : > { %vm9261_vm14 = vmmov %vm9253_vm7 }
 0xece   : > { %v4827_v26 = vpop.permute.xlu0 %4826 }
 0xecf   : > { %v4904_v31 = vsel %vm9232_vm6, %v4825_v15, %v4827_v26  ;;  %v4905_v60 = vsel %vm9233_vm8, %v4827_v26, %v4829_v17  ;;  %v4865_v47 = vpop.permute.xlu1 %4864  ;;  %vm9248_vm6 = vmmov %vm9239_vm0  ;;  %v4911_v15 = vsel %vm9239_vm0, %v8943_v28, %v8962_v45  ;;  %v4835_v20 = vpop.permute.xlu2 %4834  ;;  %v5641_v45 = vld [vmem:[%s9085_s5 + $0x24] sm:$0xf0] }
 0xed0   : > { %4968 = vmatpush.bf16.msra.mxu3 %v4904_v31  ;;  %5025 = vmatpush.bf16.msrb.mxu1 %v4905_v60  ;;  %v4917_v25 = vsel %vm9248_vm6, %v4863_v58, %v4865_v47  ;;  %vm9249_vm8 = vmmov %vm9239_vm0 }
 0xed4   : > { %4969 = vmatpush.bf16.msra.mxu3 %v4902_v9  ;;  %5026 = vmatpush.bf16.msrb.mxu1 %v4903_v44 }
 0xed6   : > { %v4813_v8 = vpop.permute.xlu0 %4812 }
 0xed7   : > { %v4900_v10 = vsel %vm9236_vm5, %v4813_v8, %v4815_v4  ;;  %v4839_v52 = vpop.permute.xlu1 %4838  ;;  %vm9252_vm5 = vmmov %vm9239_vm0  ;;  %v4883_v42 = vpop.permute.xlu2 %4882 }
 0xed8   : > { %4970 = vmatpush.bf16.msra.mxu3 %v4900_v10  ;;  %5027 = vmatpush.bf16.msrb.mxu1 %v4901_v35  ;;  %v4908_v3 = vsel %vm9255_vm4, %v8945_v33, %v4839_v52  ;;  %v4923_v24 = vsel %vm9260_vm13, %v8910_v46, %v4883_v42  ;;  %v5867_v35 = vld [vmem:[%s5949_s26 + $0x8] sm:$0xff] }
 0xedc   : > { %4971 = vmatpush.bf16.msra.mxu3 %v4898_v50  ;;  %5028 = vmatpush.bf16.msrb.mxu1 %v4899_v63  ;;  %v5629_v63 = vld [vmem:[%s9085_s5 + $0xc] sm:$0xf0] }
 0xede   : > { %v4859_v5 = vpop.permute.xlu0 %4858 }
 0xedf   : > { %v4831_v41 = vpop.permute.xlu1 %4830  ;;  %v4915_v53 = vsel %vm9250_vm1, %v8947_v48, %v4859_v5  ;;  %v5868_v5 = vld [vmem:[%s5949_s26] sm:$0xff] }
 0xee0   : > { %4972 = vmatpush.bf16.msra.mxu3 %v4896_v43  ;;  %5029 = vmatpush.bf16.msrb.mxu1 %v4897_v40 }
 0xee4   : > { %4973 = vmatpush.bf16.msra.mxu3 %v4894_v16 }
 0xee6   : > { %v4843_v38 = vpop.permute.xlu0 %4842 }
 0xee7   : > { %v4787_v30 = vpop.permute.xlu1 %4786  ;;  %v4910_v13 = vsel %vm9254_vm2, %v4843_v38, %v8943_v28 }
 0xee8   : > { %4974 = vmatpush.bf16.msra.mxu3 %v4892_v2  ;;  %v4891_v0 = vsel %vm9249_vm8, %v8824_v12, %v4787_v30  ;;  %v5750_v12 = vld [vmem:[%s9085_s5 + $0x28] sm:$0xf0] }
 0xeec   : > { %4975 = vmatpush.bf16.msra.mxu3 %v4890_v27 }
 0xeee   : > { %v4799_v7 = vpop.permute.xlu0 %4798 }
 0xeef   : > { %v4895_v18 = vsel %vm9244_vm12, %v8894_v6, %v4799_v7  ;;  %4976 = vmatmul.bf16.vlgmr.msra.gmra.mxu3 %v5628_v61  ;;  %v4893_v6 = vsel %vm9247_vm15, %v8881_v19, %v4793_v22  ;;  %v5749_v19 = vld [vmem:[%s9085_s5 + $0x20] sm:$0xf0]  ;;  %vm9259_vm12 = vmmov %vm9239_vm0 }
 0xef0   : > { %5044 = vmatpush.bf16.msrb.mxu3 %v4921_v39  ;;  %5030 = vmatpush.bf16.msrb.mxu1 %v4895_v18  ;;  %v5640_v14 = vor.u32 %v5749_v19, %v5639_v57  ;;  %v5648_v39 = vor.u32 %v5750_v12, %v5647_v11  ;;  %vm9262_vm15 = vmmov %vm9253_vm7 }
 0xef2   : > { %5650 = vmatmul.msk.bf16.gmra.mxu0 %vm9253_vm7, %v5648_v39 }
 0xef4   : > { %5045 = vmatpush.bf16.msrb.mxu3 %v4919_v56  ;;  %5031 = vmatpush.bf16.msrb.mxu1 %v4893_v6 }
 0xef6   : > { %v4841_v29 = vpop.permute.xlu0 %4840 }
 0xef7   : > { %v4909_v32 = vsel %vm9256_vm10, %v4839_v52, %v4841_v29 }
 0xef8   : > { %5046 = vmatpush.bf16.msrb.mxu3 %v4917_v25  ;;  %5032 = vmatpush.bf16.msrb.mxu1 %v4891_v0  ;;  %v5871_v25 = vld [vmem:[%s5949_s26 + $0x28] sm:$0xff]  ;;  %v5872_v0 = vld [vmem:[%s5949_s26 + $0x20] sm:$0xff] }
 0xefb   : > { %5033 = vmatmul.bf16.vlgmr.msrb.gmra.mxu1 %v5628_v61  ;;  %v5870_v61 = vld [vmem:[%s5949_s26 + $0x18] sm:$0xff] }
 0xefc   : > { %5047 = vmatpush.bf16.msrb.mxu3 %v4915_v53 }
 0xefe   : > { %v4851_v4 = vpop.permute.xlu0 %4850 }
 0xeff   : > { %v4912_v1 = vsel %vm9251_vm3, %v8955_v37, %v4851_v4  ;;  %v4913_v17 = vsel %vm9252_vm5, %v4851_v4, %v4853_v51  ;;  %4981 = vmatmul.bf16.gmra.mxu3 %v5640_v14  ;;  %v5745_v37 = vld [vmem:[%s9085_s5 + $0x4] sm:$0xf] }
 0xf00   : > { %4991 = vmatpush.bf16.msrb.mxu2 %v4912_v1  ;;  %5048 = vmatpush.bf16.msrb.mxu3 %v4913_v17  ;;  %v5632_v55 = vor.u32 %v5745_v37, %v5629_v63  ;;  %v5873_v17 = vld [vmem:[%s5949_s26 + $0x30] sm:$0xff] }
 0xf04   : > { %4992 = vmatpush.bf16.msrb.mxu2 %v4910_v13  ;;  %5049 = vmatpush.bf16.msrb.mxu3 %v4911_v15  ;;  %v5874_v15 = vld [vmem:[%s5949_s26 + $0x38] sm:$0xff] }
 0xf06   : > { %v4833_v48 = vpop.permute.xlu0 %4832 }
 0xf07   : > { %v4906_v28 = vsel %vm9257_vm11, %v4831_v41, %v4833_v48  ;;  %v4907_v58 = vsel %vm9258_vm9, %v4833_v48, %v4835_v20  ;;  %v5869_v41 = vld [vmem:[%s5949_s26 + $0x10] sm:$0xff] }
 0xf08   : > { %4993 = vmatpush.bf16.msrb.mxu2 %v4908_v3  ;;  %5050 = vmatpush.bf16.msrb.mxu3 %v4909_v32 }
 0xf0b   : > { %5038 = vmatmul.bf16.gmra.mxu1 %v5640_v14 }
 0xf0c   : > { %4994 = vmatpush.bf16.msrb.mxu2 %v4906_v28  ;;  %5051 = vmatpush.bf16.msrb.mxu3 %v4907_v58 }
 0xf0e   : > { %v4889_v33 = vpop.permute.xlu0 %4888 }
 0xf0f   : > { %v4925_v49 = vsel %vm9259_vm12, %v8949_v62, %v4889_v33  ;;  %4995 = vmatmul.bf16.vlgmr.msrb.gmra.mxu2 %v5632_v55  ;;  %5052 = vmatmul.bf16.vlgmr.msrb.gmra.mxu3 %v5632_v55  ;;  %v5644_v62 = vor.u32 %v5748_v23, %v5641_v45 }
 0xf10   : > { %5069 = vmatpush.bf16.msra.mxu0 %v4925_v49 }
 0xf14   : > { %5070 = vmatpush.bf16.msra.mxu0 %v4923_v24 }
 0xf17   : > { %5651 = vmatmul.msk.bf16.vlgmr.msra.gmra.mxu0 %vm9261_vm14, %v5636_v21 }
 0xf1f   : > { %5000 = vmatmul.bf16.gmra.mxu2 %v5644_v62  ;;  %5057 = vmatmul.bf16.gmra.mxu3 %v5644_v62 }
 0xf27   : > { %5652 = vmatmul.msk.bf16.gmra.mxu0 %vm9262_vm15, %v5648_v39 }
 0xf3d   : > { %v5015_v26 = vpop.f32.mrf.mxu0 }
 0xf45   : > { %v5017_v31 = vpop.f32.mrf.mxu0 }
 0xf6f   : > { %v5020_v44 = vpop.f32.mrf.mxu0 }
 0xf72   : > { %v4977_v46 = vpop.f32.mrf.mxu3 }
 0xf73   : > { %v4978_v43 = vadd.f32 %v5868_v5, %v4977_v46 }
 0xf77   : > { %v5022_v10 = vpop.f32.mrf.mxu0 }
 0xf78   : > { %v5034_v47 = vpop.f32.mrf.mxu1 }
 0xf79   : > { %v5035_v50 = vadd.f32 %v5867_v35, %v5034_v47 }
 0xf7a   : > { %v4979_v60 = vpop.f32.mrf.mxu3 }
 0xf7b   : > { %v4980_v27 = vadd.f32 %v5869_v41, %v4979_v60 }
 0xf80   : > { %v5036_v40 = vpop.f32.mrf.mxu1 }
 0xf81   : > { %v5037_v7 = vadd.f32 %v5870_v61, %v5036_v40 }
 0xf82   : > { %v4982_v9 = vpop.f32.mrf.mxu3 }
 0xf83   : > { %v4983_v53 = vadd.f32 %v5872_v0, %v4982_v9 }
 0xf88   : > { %v5039_v21 = vpop.f32.mrf.mxu1 }
 0xf89   : > { %v5040_v29 = vadd.f32 %v5871_v25, %v5039_v21 }
 0xf8a   : > { %v4984_v8 = vpop.f32.mrf.mxu3 }
 0xf8b   : > { %v4985_v13 = vadd.f32 %v5873_v17, %v4984_v8 }
 0xf90   : > { %v5041_v1 = vpop.f32.mrf.mxu1 }
 0xf91   : > { %v5042_v20 = vadd.f32 %v5874_v15, %v5041_v1 }
 0xf92   : > { %v4996_v52 = vpop.f32.mrf.mxu2  ;;  %v5053_v16 = vpop.f32.mrf.mxu3 }
 0xf93   : > { %v4997_v51 = vadd.f32 %v4996_v52, %v4978_v43  ;;  %v5054_v38 = vadd.f32 %v5053_v16, %v5035_v50 }
 0xf94   : > { %v5072_v2 = vpop.f32.mrf.mxu0 }
 0xf95   : > { %v5016_v54 = vadd.f32 %v5015_v26, %v4997_v51  ;;  %v5073_v59 = vadd.f32 %v5072_v2, %v5054_v38 }
 0xf97   : > { %5082 = vst [vmem:[%s9061_s12] sm:$0xff] %v5016_v54 }
 0xf98   : > { %5083 = vst [vmem:[%s9061_s12 + $0x8] sm:$0xff] %v5073_v59 }
 0xf9a   : > { %v4998_v18 = vpop.f32.mrf.mxu2  ;;  %v5055_v34 = vpop.f32.mrf.mxu3 }
 0xf9b   : > { %v4999_v36 = vadd.f32 %v4998_v18, %v4980_v27  ;;  %v5056_v22 = vadd.f32 %v5055_v34, %v5037_v7 }
 0xf9c   : > { %v5074_v56 = vpop.f32.mrf.mxu0 }
 0xf9d   : > { %v5018_v6 = vadd.f32 %v5017_v31, %v4999_v36  ;;  %v5075_v30 = vadd.f32 %v5074_v56, %v5056_v22 }
 0xf9f   : > { %5084 = vst [vmem:[%s9061_s12 + $0x10] sm:$0xff] %v5018_v6 }
 0xfa0   : > { %5085 = vst [vmem:[%s9061_s12 + $0x18] sm:$0xff] %v5075_v30 }
 0xfa2   : > { %v5001_v57 = vpop.f32.mrf.mxu2  ;;  %v5058_v19 = vpop.f32.mrf.mxu3 }
 0xfa3   : > { %v5002_v14 = vadd.f32 %v5001_v57, %v4983_v53  ;;  %v5059_v11 = vadd.f32 %v5058_v19, %v5040_v29 }
 0xfa4   : > { %v5077_v12 = vpop.f32.mrf.mxu0 }
 0xfa5   : > { %v5021_v4 = vadd.f32 %v5020_v44, %v5002_v14  ;;  %v5078_v39 = vadd.f32 %v5077_v12, %v5059_v11 }
 0xfa7   : > { %5086 = vst [vmem:[%s9061_s12 + $0x20] sm:$0xff] %v5021_v4 }
 0xfa8   : > { %5087 = vst [vmem:[%s9061_s12 + $0x28] sm:$0xff] %v5078_v39 }
 0xfaa   : > { %v5003_v48 = vpop.f32.mrf.mxu2  ;;  %v5060_v3 = vpop.f32.mrf.mxu3 }
 0xfab   : > { %v5004_v32 = vadd.f32 %v5003_v48, %v4985_v13  ;;  %v5061_v37 = vadd.f32 %v5060_v3, %v5042_v20 }
 0xfac   : > { %v5079_v63 = vpop.f32.mrf.mxu0 }
 0xfad   : > { %v5023_v28 = vadd.f32 %v5022_v10, %v5004_v32  ;;  %v5080_v58 = vadd.f32 %v5079_v63, %v5061_v37 }
 0xfaf   : > { %5088 = vst [vmem:[%s9061_s12 + $0x30] sm:$0xff] %v5023_v28 }
 0xfb0   : > { %5089 = vst [vmem:[%s9061_s12 + $0x38] sm:$0xff] %v5080_v58 }
 0xfb1 PF: > { %s16_s21 = sadd.s32 1, %s5881_s21  }
 0xfb2   : > { %p13_p4 = scmp.ge.s32.totalorder %s16_s21, 4  }
 0xfb4   :  { %15 = sbr.rel (!%p13_p4) target bundleno = 1 (0x1), region = 78 }

</bundles_post_ra>
